<compile_context>
chip_gen: v6e
topology: v6e:2x2x1
jax: 0.10.0
libtpu: 0.0.40
codegen_flags: <defaults>
</compile_context>

<pallas_src>
import jax
import jax.numpy as jnp
from jax import lax
from jax.experimental import pallas as pl
from jax.experimental.pallas import tpu as pltpu

LANE = 128
SUBLANE = 8
_NEG = -1e30
MATMUL_DTYPE = jnp.float32   # set to jnp.bfloat16 on v6e/v7x at real sizes


def _ceil_to(x, m):
    return ((x + m - 1) // m) * m


# --------------------------------------------------------------------------
# Kernel 1: bidirectional LSTM encoder (length-masked) + fused state reduction
# --------------------------------------------------------------------------
def encoder_kernel(lens_ref,                         # [BB, 1] int32
                   x_ref,                            # [T, BB, E] f32 (time-major)
                   wih_f_ref, whh_f_ref, b_f_ref,    # [E,4Hp], [Hp,4Hp], [1,4Hp]
                   wih_b_ref, whh_b_ref, b_b_ref,
                   w_rh_ref, b_rh_ref,               # [2Hp,Hp], [1,Hp]
                   w_rc_ref, b_rc_ref,
                   out_ref,                          # [T, BB, 2Hp]  fused fwd|bwd
                   nh_ref, nc_ref):                  # [BB, Hp]
    T, BB, _E = x_ref.shape
    Hp = whh_f_ref.shape[0]
    lens = lens_ref[...]                             # [BB, 1] int32

    wih_f = wih_f_ref[...]; whh_f = whh_f_ref[...]; b_f = b_f_ref[...]
    wih_b = wih_b_ref[...]; whh_b = whh_b_ref[...]; b_b = b_b_ref[...]
    w_rh = w_rh_ref[...]; w_rc = w_rc_ref[...]
    wdt = w_rh.dtype

    h0 = jnp.zeros((BB, Hp), jnp.float32)
    c0 = jnp.zeros((BB, Hp), jnp.float32)

    def lstm_step(x_t, h, c, wih, whh, b):
        gates = (jnp.dot(x_t.astype(wih.dtype), wih, preferred_element_type=jnp.float32)
                 + jnp.dot(h.astype(whh.dtype), whh, preferred_element_type=jnp.float32)
                 + b)                                              # [BB, 4Hp]
        i = jax.nn.sigmoid(gates[:, 0 * Hp:1 * Hp])
        f = jax.nn.sigmoid(gates[:, 1 * Hp:2 * Hp])
        g = jnp.tanh(gates[:, 2 * Hp:3 * Hp])
        o = jax.nn.sigmoid(gates[:, 3 * Hp:4 * Hp])
        c_new = f * c + i * g
        h_new = o * jnp.tanh(c_new)
        return h_new, c_new

    # ---- forward direction (writes left half of the fused output) ----
    def fwd_body(t, carry):
        h, c = carry
        h_new, c_new = lstm_step(x_ref[t], h, c, wih_f, whh_f, b_f)
        mask = t < lens                                            # [BB, 1] bool
        out_ref[t, :, pl.ds(0, Hp)] = jnp.where(mask, h_new, 0.0)
        return (jnp.where(mask, h_new, h), jnp.where(mask, c_new, c))

    h_f, c_f = lax.fori_loop(0, T, fwd_body, (h0, c0), unroll=True)

    # ---- backward direction (writes right half of the fused output) ----
    def bwd_body(step, carry):
        h, c = carry
        t = T - 1 - step
        h_new, c_new = lstm_step(x_ref[t], h, c, wih_b, whh_b, b_b)
        mask = t < lens
        out_ref[t, :, pl.ds(Hp, Hp)] = jnp.where(mask, h_new, 0.0)
        return (jnp.where(mask, h_new, h), jnp.where(mask, c_new, c))

    h_b, c_b = lax.fori_loop(0, T, bwd_body, (h0, c0), unroll=True)

    # ---- fused reduce_h_W / reduce_c_W epilogue (split-K dots: no concat) ----
    nh_ref[...] = (jnp.dot(h_f.astype(wdt), w_rh[:Hp, :], preferred_element_type=jnp.float32)
                   + jnp.dot(h_b.astype(wdt), w_rh[Hp:, :], preferred_element_type=jnp.float32)
                   + b_rh_ref[...])
    nc_ref[...] = (jnp.dot(c_f.astype(wdt), w_rc[:Hp, :], preferred_element_type=jnp.float32)
                   + jnp.dot(c_b.astype(wdt), w_rc[Hp:, :], preferred_element_type=jnp.float32)
                   + b_rc_ref[...])


# --------------------------------------------------------------------------
# Kernel 2: batch-vectorized GRU decoder + Linear + LogSoftmax + NLL
# --------------------------------------------------------------------------
def decoder_kernel(yoh_ref,                          # [Lout, BB, Vp] f32 one-hot targets
                   h0_ref,                           # [BB, Hp]
                   x_sos_ref,                        # [1, Hp] embed of SOS token (id=1)
                   wih_ref, whh_ref,                 # [Hp, 3Hp]
                   bih_ref, bhh_ref,                 # [1, 3Hp]
                   wout_ref, bout_ref,               # [Hp, Vp], [1, Vp] (pad cols = -1e30)
                   rowloss_ref):                     # [BB, 1] f32 per-example loss
    Lout, BB, _Vp = yoh_ref.shape
    Hp = h0_ref.shape[1]

    x = jnp.maximum(x_sos_ref[...], 0.0)             # F.relu(embedding(SOS))
    wih = wih_ref[...]; whh = whh_ref[...]
    bih = bih_ref[...]; bhh = bhh_ref[...]
    wout = wout_ref[...]; bout = bout_ref[...]

    # constant SOS input-side gates: compute + broadcast to batch ONCE (hoisted)
    gi = jnp.dot(x.astype(wih.dtype), wih, preferred_element_type=jnp.float32) + bih
    gi = jnp.broadcast_to(gi, (BB, 3 * Hp))
    gi_r = gi[:, 0 * Hp:1 * Hp]
    gi_z = gi[:, 1 * Hp:2 * Hp]
    gi_n = gi[:, 2 * Hp:3 * Hp]

    # TODO(synk): at real vocab sizes (V*H f32 > VMEM on v7x) tile wout over V
    #             with an online logsumexp; unnecessary at demo shapes.
    def step(s, carry):
        h, acc = carry                                             # [BB,Hp], [BB,1]
        gh = (jnp.dot(h.astype(whh.dtype), whh, preferred_element_type=jnp.float32)
              + bhh)                                               # [BB, 3Hp]
        r = jax.nn.sigmoid(gi_r + gh[:, 0 * Hp:1 * Hp])
        z = jax.nn.sigmoid(gi_z + gh[:, 1 * Hp:2 * Hp])
        n = jnp.tanh(gi_n + r * gh[:, 2 * Hp:3 * Hp])
        h_new = (1.0 - z) * n + z * h
        logits = (jnp.dot(h_new.astype(wout.dtype), wout,
                          preferred_element_type=jnp.float32) + bout)   # [BB, Vp]
        m = jnp.max(logits, axis=1, keepdims=True)
        logp = logits - (m + jnp.log(jnp.sum(jnp.exp(logits - m), axis=1, keepdims=True)))
        oh = yoh_ref[s]                                            # [BB, Vp]
        nll = -jnp.sum(oh * logp, axis=1, keepdims=True)           # [BB, 1]
        return (h_new, acc + nll)

    h_init = h0_ref[...]
    acc0 = jnp.zeros((BB, 1), jnp.float32)
    _, acc = lax.fori_loop(0, Lout, step, (h_init, acc0), unroll=True)
    rowloss_ref[...] = acc


# --------------------------------------------------------------------------
# Glue: weight padding (lane-aligned, gate-blocked), pallas_call wiring
# --------------------------------------------------------------------------
def _pad_gated_weight(w, h, hp, n_gates, in_pad_to=None):
    """torch [n_gates*h, in_dim] -> transposed, gate-block padded [in_dim(+pad), n_gates*hp]."""
    wt = w.T                                            # [in_dim, n_gates*h]
    in_dim = wt.shape[0]
    blocks = [jnp.pad(wt[:, g * h:(g + 1) * h], ((0, 0), (0, hp - h)))
              for g in range(n_gates)]
    out = jnp.concatenate(blocks, axis=1)               # [in_dim, n_gates*hp]
    if in_pad_to is not None and in_pad_to > in_dim:
        out = jnp.pad(out, ((0, in_pad_to - in_dim), (0, 0)))
    return out


def _pad_gated_bias(b, h, hp, n_gates):
    blocks = [jnp.pad(b[g * h:(g + 1) * h], (0, hp - h)) for g in range(n_gates)]
    return jnp.concatenate(blocks).reshape(1, n_gates * hp)


def _pad_reduce_weight(w, h, hp):
    """torch [h, 2h] (out,in) -> [2hp, hp] with the fwd/bwd input halves block-padded."""
    wt = w.T                                            # [2h, h]
    top = jnp.pad(wt[:h], ((0, hp - h), (0, hp - h)))
    bot = jnp.pad(wt[h:], ((0, hp - h), (0, hp - h)))
    return jnp.concatenate([top, bot], axis=0)


def _full_spec(shape):
    zeros = (0,) * len(shape)
    return pl.BlockSpec(shape, lambda i, _z=zeros: _z)


def xavier(key, shape):
    fan_in, fan_out = shape[-1], shape[-2]
    limit = (6.0 / (fan_in + fan_out)) ** 0.5
    return jax.random.uniform(key, shape, jnp.float32, -limit, limit)


def make_params(key, in_vocab, out_vocab, emb_dim, hidden, out_size):
    ks = jax.random.split(key, 12)
    H, E, V = hidden, emb_dim, out_size
    z = lambda n: jnp.zeros((n,), jnp.float32)
    return {
        "in_emb": jax.random.normal(ks[0], (in_vocab, E), jnp.float32) * 0.1,
        # encoder LSTM (fwd / bwd), torch layout [4H, E] / [4H, H]; biases init 0
        "wih_f": xavier(ks[1], (4 * H, E)), "whh_f": xavier(ks[2], (4 * H, H)),
        "b_ih_f": z(4 * H), "b_hh_f": z(4 * H),
        "wih_b": xavier(ks[3], (4 * H, E)), "whh_b": xavier(ks[4], (4 * H, H)),
        "b_ih_b": z(4 * H), "b_hh_b": z(4 * H),
        # state reduction linears [H, 2H] + bias [H]
        "w_rh": xavier(ks[5], (H, 2 * H)), "b_rh": z(H),
        "w_rc": xavier(ks[6], (H, 2 * H)), "b_rc": z(H),
        # decoder: embedding [V, H], GRU [3H, H] x2 + biases, out linear [V, H]
        "dec_emb": jax.random.normal(ks[7], (out_vocab, H), jnp.float32) * 0.1,
        "w_ih_d": xavier(ks[8], (3 * H, H)), "w_hh_d": xavier(ks[9], (3 * H, H)),
        "b_ih_d": z(3 * H), "b_hh_d": z(3 * H),
        "w_out": xavier(ks[10], (V, H)), "b_out": z(V),
    }


@jax.jit
def seq2seq_forward(params, x_tensor, inp_lens, y_tensor, out_lens):
    # NOTE: out_lens is accepted but unused, exactly like the reference forward,
    #       which loops over all output_length steps with an unmasked NLLLoss.
    del out_lens
    B, T = x_tensor.shape
    _, Lout = y_tensor.shape
    E = params["in_emb"].shape[1]
    H = params["whh_f"].shape[1]
    V = params["w_out"].shape[0]
    f32 = jnp.float32

    Hp = _ceil_to(H, LANE)
    Vp = _ceil_to(V, LANE)
    if B <= LANE:
        BB = _ceil_to(B, SUBLANE)      # one batch block (demo path)
        Bp = BB
    else:
        BB = LANE                      # 128-row batch chunks at real sizes
        Bp = _ceil_to(B, LANE)
    nblk = Bp // BB

    # ---- input embedding lookup (glue); dropout omitted ----
    x_emb = jnp.take(params["in_emb"], x_tensor, axis=0)            # [B, T, E]
    x_emb_p = jnp.zeros((Bp, T, E), f32).at[:B].set(x_emb)
    x_tbe = jnp.transpose(x_emb_p, (1, 0, 2))                       # [T, Bp, E] time-major
    lens_p = jnp.zeros((Bp, 1), jnp.int32).at[:B, 0].set(inp_lens.astype(jnp.int32))

    # ---- pad / pre-transpose encoder weights (lane-aligned gate blocks) ----
    wih_f = _pad_gated_weight(params["wih_f"], H, Hp, 4).astype(MATMUL_DTYPE)
    whh_f = _pad_gated_weight(params["whh_f"], H, Hp, 4, in_pad_to=Hp).astype(MATMUL_DTYPE)
    b_f = _pad_gated_bias(params["b_ih_f"] + params["b_hh_f"], H, Hp, 4)
    wih_b = _pad_gated_weight(params["wih_b"], H, Hp, 4).astype(MATMUL_DTYPE)
    whh_b = _pad_gated_weight(params["whh_b"], H, Hp, 4, in_pad_to=Hp).astype(MATMUL_DTYPE)
    b_b = _pad_gated_bias(params["b_ih_b"] + params["b_hh_b"], H, Hp, 4)
    w_rh = _pad_reduce_weight(params["w_rh"], H, Hp).astype(MATMUL_DTYPE)
    w_rc = _pad_reduce_weight(params["w_rc"], H, Hp).astype(MATMUL_DTYPE)
    b_rh = jnp.zeros((1, Hp), f32).at[0, :H].set(params["b_rh"])
    b_rc = jnp.zeros((1, Hp), f32).at[0, :H].set(params["b_rc"])

    # TODO(synk): for very long T at real sizes, stream the encoder over T-chunks
    #             (arbitrary grid axis, h/c carried in scratch) to fit v7x 64MiB VMEM.
    enc_out_p, nh_p, nc_p = pl.pallas_call(
        encoder_kernel,
        out_shape=(jax.ShapeDtypeStruct((T, Bp, 2 * Hp), f32),      # fused fwd|bwd outputs
                   jax.ShapeDtypeStruct((Bp, Hp), f32),             # new_h
                   jax.ShapeDtypeStruct((Bp, Hp), f32)),            # new_c
        grid=(nblk,),
        in_specs=[
            pl.BlockSpec((BB, 1), lambda i: (i, 0)),                # lens
            pl.BlockSpec((T, BB, E), lambda i: (0, i, 0)),          # x (time-major)
            _full_spec(wih_f.shape), _full_spec(whh_f.shape), _full_spec(b_f.shape),
            _full_spec(wih_b.shape), _full_spec(whh_b.shape), _full_spec(b_b.shape),
            _full_spec(w_rh.shape), _full_spec(b_rh.shape),
            _full_spec(w_rc.shape), _full_spec(b_rc.shape),
        ],
        out_specs=(
            pl.BlockSpec((T, BB, 2 * Hp), lambda i: (0, i, 0)),
            pl.BlockSpec((BB, Hp), lambda i: (i, 0)),
            pl.BlockSpec((BB, Hp), lambda i: (i, 0)),
        ),
        compiler_params=pltpu.CompilerParams(dimension_semantics=("parallel",)),
    )(lens_p, x_tbe, wih_f, whh_f, b_f, wih_b, whh_b, b_b, w_rh, b_rh, w_rc, b_rc)

    # decoder init reproduces the reference bug: decoder_hidden_all holds the
    # reduced CELL state (enc_final_states_reshaped[1]), not new_h.
    dec_h0 = nc_p                                                   # [Bp, Hp]

    # ---- pad / pre-transpose decoder weights ----
    x_sos = jnp.zeros((1, Hp), f32).at[0, :H].set(params["dec_emb"][1])
    w_ih_d = _pad_gated_weight(params["w_ih_d"], H, Hp, 3, in_pad_to=Hp).astype(MATMUL_DTYPE)
    w_hh_d = _pad_gated_weight(params["w_hh_d"], H, Hp, 3, in_pad_to=Hp).astype(MATMUL_DTYPE)
    b_ih_d = _pad_gated_bias(params["b_ih_d"], H, Hp, 3)
    b_hh_d = _pad_gated_bias(params["b_hh_d"], H, Hp, 3)
    w_out = jnp.zeros((Hp, Vp), f32).at[:H, :V].set(params["w_out"].T).astype(MATMUL_DTYPE)
    b_out = jnp.full((1, Vp), _NEG, f32).at[0, :V].set(params["b_out"])  # pad cols -> -inf-ish

    # one-hot targets (vector NLL select, no scalar SMEM chain)
    y_pad = jnp.zeros((Bp, Lout), jnp.int32).at[:B].set(y_tensor.astype(jnp.int32))
    y_oh = jnp.transpose(jax.nn.one_hot(y_pad, Vp, dtype=f32), (1, 0, 2))  # [Lout, Bp, Vp]

    row_loss = pl.pallas_call(
        decoder_kernel,
        out_shape=jax.ShapeDtypeStruct((Bp, 1), f32),
        grid=(nblk,),
        in_specs=[
            pl.BlockSpec((Lout, BB, Vp), lambda i: (0, i, 0)),      # one-hot targets
            pl.BlockSpec((BB, Hp), lambda i: (i, 0)),               # h0
            _full_spec(x_sos.shape),
            _full_spec(w_ih_d.shape), _full_spec(w_hh_d.shape),
            _full_spec(b_ih_d.shape), _full_spec(b_hh_d.shape),
            _full_spec(w_out.shape), _full_spec(b_out.shape),
        ],
        out_specs=pl.BlockSpec((BB, 1), lambda i: (i, 0)),
        compiler_params=pltpu.CompilerParams(dimension_semantics=("parallel",)),
    )(y_oh, dec_h0, x_sos, w_ih_d, w_hh_d, b_ih_d, b_hh_d, w_out, b_out)

    # mask padded batch rows, average over the real batch (reference semantics)
    row_mask = (jnp.arange(Bp) < B).astype(f32).reshape(Bp, 1)
    loss = jnp.sum(row_loss * row_mask) / jnp.float32(B)

    # encoder interface extras (unpadded views)
    enc_context_mask = (jnp.arange(T)[None, :] < inp_lens[:, None]).astype(jnp.int32)
    if Hp == H:
        enc_output_each_word = enc_out_p[:, :B, :]
    else:
        enc_output_each_word = jnp.concatenate(
            [enc_out_p[:, :B, :H], enc_out_p[:, :B, Hp:Hp + H]], axis=-1)
    new_h = nh_p[:B, :H]
    new_c = nc_p[:B, :H]
    return loss, enc_output_each_word, enc_context_mask, (new_h, new_c)


if __name__ == "__main__":
    # small shapes: batch=2, input seq len=8, output seq len=6,
    # emb_dim=32, hidden=32, input vocab=20, output vocab=16
    B, T, Lout = 2, 8, 6
    E, H = 32, 32
    IN_VOCAB, OUT_VOCAB = 20, 16

    key = jax.random.PRNGKey(0)
    k_p, k_x, k_y = jax.random.split(key, 3)
    params = make_params(k_p, IN_VOCAB, OUT_VOCAB, E, H, OUT_VOCAB)

    x_tensor = jax.random.randint(k_x, (B, T), 2, IN_VOCAB, dtype=jnp.int32)
    y_tensor = jax.random.randint(k_y, (B, Lout), 2, OUT_VOCAB, dtype=jnp.int32)
    inp_lens = jnp.array([T, T - 3], dtype=jnp.int32)
    out_lens = jnp.array([Lout, Lout - 2], dtype=jnp.int32)

    loss, enc_out, ctx_mask, (h_t, c_t) = seq2seq_forward(
        params, x_tensor, inp_lens, y_tensor, out_lens)
    jax.block_until_ready(loss)

    assert loss.shape == () and bool(jnp.isfinite(loss))
    assert enc_out.shape == (T, B, 2 * H)
    assert ctx_mask.shape == (B, T)
    assert h_t.shape == (B, H) and c_t.shape == (B, H)
    print("KERNEL_OK")
</pallas_src>

<mosaic_0001>
module attributes {stable_mosaic.version = 11 : i64} {
  func.func @encoder_kernel(%arg0: i32, %arg1: memref<8x1xi32, #tpu.memory_space<vmem>>, %arg2: memref<8x8x32xf32, #tpu.memory_space<vmem>>, %arg3: memref<32x512xf32, #tpu.memory_space<vmem>>, %arg4: memref<128x512xf32, #tpu.memory_space<vmem>>, %arg5: memref<1x512xf32, #tpu.memory_space<vmem>>, %arg6: memref<32x512xf32, #tpu.memory_space<vmem>>, %arg7: memref<128x512xf32, #tpu.memory_space<vmem>>, %arg8: memref<1x512xf32, #tpu.memory_space<vmem>>, %arg9: memref<256x128xf32, #tpu.memory_space<vmem>>, %arg10: memref<1x128xf32, #tpu.memory_space<vmem>>, %arg11: memref<256x128xf32, #tpu.memory_space<vmem>>, %arg12: memref<1x128xf32, #tpu.memory_space<vmem>>, %arg13: memref<8x8x256xf32, #tpu.memory_space<vmem>>, %arg14: memref<8x128xf32, #tpu.memory_space<vmem>>, %arg15: memref<8x128xf32, #tpu.memory_space<vmem>>) attributes {dimension_semantics = [#tpu.dimension_semantics<parallel>], iteration_bounds = array<i64: 1>, scalar_prefetch = 0 : i64, scratch_operands = 0 : i64, tpu.core_type = #tpu.core_type<tc>, window_params = [{transform_indices = @transform_0, window_bounds = array<i64: 8, 1>}, {transform_indices = @transform_1, window_bounds = array<i64: 8, 8, 32>}, {pipeline_mode = #tpu.pipeline_mode<synchronous>, transform_indices = @transform_2, window_bounds = array<i64: 32, 512>}, {pipeline_mode = #tpu.pipeline_mode<synchronous>, transform_indices = @transform_3, window_bounds = array<i64: 128, 512>}, {pipeline_mode = #tpu.pipeline_mode<synchronous>, transform_indices = @transform_4, window_bounds = array<i64: 1, 512>}, {pipeline_mode = #tpu.pipeline_mode<synchronous>, transform_indices = @transform_5, window_bounds = array<i64: 32, 512>}, {pipeline_mode = #tpu.pipeline_mode<synchronous>, transform_indices = @transform_6, window_bounds = array<i64: 128, 512>}, {pipeline_mode = #tpu.pipeline_mode<synchronous>, transform_indices = @transform_7, window_bounds = array<i64: 1, 512>}, {pipeline_mode = #tpu.pipeline_mode<synchronous>, transform_indices = @transform_8, window_bounds = array<i64: 256, 128>}, {pipeline_mode = #tpu.pipeline_mode<synchronous>, transform_indices = @transform_9, window_bounds = array<i64: 1, 128>}, {pipeline_mode = #tpu.pipeline_mode<synchronous>, transform_indices = @transform_10, window_bounds = array<i64: 256, 128>}, {pipeline_mode = #tpu.pipeline_mode<synchronous>, transform_indices = @transform_11, window_bounds = array<i64: 1, 128>}, {transform_indices = @transform_12, window_bounds = array<i64: 8, 8, 256>}, {transform_indices = @transform_13, window_bounds = array<i64: 8, 128>}, {transform_indices = @transform_14, window_bounds = array<i64: 8, 128>}]} {
    %c0 = arith.constant 0 : index
    %c0_0 = arith.constant 0 : index
    %0 = vector.load %arg1[%c0, %c0_0] : memref<8x1xi32, #tpu.memory_space<vmem>>, vector<8x1xi32>
    %c0_1 = arith.constant 0 : index
    %c0_2 = arith.constant 0 : index
    %1 = vector.load %arg3[%c0_1, %c0_2] : memref<32x512xf32, #tpu.memory_space<vmem>>, vector<32x512xf32>
    %c0_3 = arith.constant 0 : index
    %c0_4 = arith.constant 0 : index
    %2 = vector.load %arg4[%c0_3, %c0_4] : memref<128x512xf32, #tpu.memory_space<vmem>>, vector<128x512xf32>
    %c0_5 = arith.constant 0 : index
    %c0_6 = arith.constant 0 : index
    %3 = vector.load %arg5[%c0_5, %c0_6] : memref<1x512xf32, #tpu.memory_space<vmem>>, vector<1x512xf32>
    %c0_7 = arith.constant 0 : index
    %c0_8 = arith.constant 0 : index
    %4 = vector.load %arg6[%c0_7, %c0_8] : memref<32x512xf32, #tpu.memory_space<vmem>>, vector<32x512xf32>
    %c0_9 = arith.constant 0 : index
    %c0_10 = arith.constant 0 : index
    %5 = vector.load %arg7[%c0_9, %c0_10] : memref<128x512xf32, #tpu.memory_space<vmem>>, vector<128x512xf32>
    %c0_11 = arith.constant 0 : index
    %c0_12 = arith.constant 0 : index
    %6 = vector.load %arg8[%c0_11, %c0_12] : memref<1x512xf32, #tpu.memory_space<vmem>>, vector<1x512xf32>
    %c0_13 = arith.constant 0 : index
    %c0_14 = arith.constant 0 : index
    %7 = vector.load %arg9[%c0_13, %c0_14] : memref<256x128xf32, #tpu.memory_space<vmem>>, vector<256x128xf32>
    %c0_15 = arith.constant 0 : index
    %c0_16 = arith.constant 0 : index
    %8 = vector.load %arg11[%c0_15, %c0_16] : memref<256x128xf32, #tpu.memory_space<vmem>>, vector<256x128xf32>
    %cst = arith.constant 0.000000e+00 : f32
    %9 = vector.broadcast %cst : f32 to vector<8x128xf32>
    %cst_17 = arith.constant 0.000000e+00 : f32
    %10 = vector.broadcast %cst_17 : f32 to vector<8x128xf32>
    %c0_i32 = arith.constant 0 : i32
    %11 = arith.index_cast %c0_i32 : i32 to index
    %c0_18 = arith.constant 0 : index
    %c0_19 = arith.constant 0 : index
    %12 = vector.load %arg2[%11, %c0_18, %c0_19] : memref<8x8x32xf32, #tpu.memory_space<vmem>>, vector<1x8x32xf32>
    %13 = vector.shape_cast %12 : vector<1x8x32xf32> to vector<8x32xf32>
    %cst_20 = arith.constant dense<0.000000e+00> : vector<8x512xf32>
    %14 = tpu.matmul %13, %1, %cst_20 {dimension_numbers = #tpu.dot_dimension_numbers<[1], [0], [0], [1], [0, 0, 1, 1], [], []>} : vector<8x32xf32>, vector<32x512xf32>, vector<8x512xf32> -> vector<8x512xf32>
    %cst_21 = arith.constant dense<0.000000e+00> : vector<8x512xf32>
    %15 = tpu.matmul %9, %2, %cst_21 {dimension_numbers = #tpu.dot_dimension_numbers<[1], [0], [0], [1], [0, 0, 1, 1], [], []>} : vector<8x128xf32>, vector<128x512xf32>, vector<8x512xf32> -> vector<8x512xf32>
    %16 = arith.addf %14, %15 : vector<8x512xf32>
    %17 = vector.broadcast %3 : vector<1x512xf32> to vector<8x512xf32>
    %18 = arith.addf %16, %17 : vector<8x512xf32>
    %19 = vector.extract_strided_slice %18 {offsets = [0, 0], sizes = [8, 128], strides = [1, 1]} : vector<8x512xf32> to vector<8x128xf32>
    %20 = arith.negf %19 : vector<8x128xf32>
    %21 = math.exp %20 : vector<8x128xf32>
    %cst_22 = arith.constant 1.000000e+00 : f32
    %22 = vector.broadcast %cst_22 : f32 to vector<8x128xf32>
    %23 = arith.addf %22, %21 : vector<8x128xf32>
    %24 = arith.divf %22, %23 : vector<8x128xf32>
    %25 = vector.extract_strided_slice %18 {offsets = [0, 128], sizes = [8, 128], strides = [1, 1]} : vector<8x512xf32> to vector<8x128xf32>
    %26 = arith.negf %25 : vector<8x128xf32>
    %27 = math.exp %26 : vector<8x128xf32>
    %cst_23 = arith.constant 1.000000e+00 : f32
    %28 = vector.broadcast %cst_23 : f32 to vector<8x128xf32>
    %29 = arith.addf %28, %27 : vector<8x128xf32>
    %30 = arith.divf %28, %29 : vector<8x128xf32>
    %31 = vector.extract_strided_slice %18 {offsets = [0, 256], sizes = [8, 128], strides = [1, 1]} : vector<8x512xf32> to vector<8x128xf32>
    %32 = math.tanh %31 : vector<8x128xf32>
    %33 = vector.extract_strided_slice %18 {offsets = [0, 384], sizes = [8, 128], strides = [1, 1]} : vector<8x512xf32> to vector<8x128xf32>
    %34 = arith.negf %33 : vector<8x128xf32>
    %35 = math.exp %34 : vector<8x128xf32>
    %cst_24 = arith.constant 1.000000e+00 : f32
    %36 = vector.broadcast %cst_24 : f32 to vector<8x128xf32>
    %37 = arith.addf %36, %35 : vector<8x128xf32>
    %38 = arith.divf %36, %37 : vector<8x128xf32>
    %39 = arith.mulf %30, %10 : vector<8x128xf32>
    %40 = arith.mulf %24, %32 : vector<8x128xf32>
    %41 = arith.addf %39, %40 : vector<8x128xf32>
    %42 = math.tanh %41 : vector<8x128xf32>
    %43 = arith.mulf %38, %42 : vector<8x128xf32>
    %44 = vector.broadcast %c0_i32 : i32 to vector<8x1xi32>
    %45 = arith.cmpi slt, %44, %0 : vector<8x1xi32>
    %cst_25 = arith.constant 0.000000e+00 : f32
    %46 = vector.shape_cast %45 : vector<8x1xi1> to vector<8x1xi1>
    %47 = vector.broadcast %46 : vector<8x1xi1> to vector<8x128xi1>
    %48 = vector.broadcast %cst_25 : f32 to vector<8x128xf32>
    %49 = arith.select %47, %43, %48 : vector<8x128xi1>, vector<8x128xf32>
    %50 = arith.index_cast %c0_i32 : i32 to index
    %c0_26 = arith.constant 0 : index
    %c0_27 = arith.constant 0 : index
    %51 = vector.load %arg13[%50, %c0_26, %c0_27] : memref<8x8x256xf32, #tpu.memory_space<vmem>>, vector<1x8x128xf32>
    %52 = vector.shape_cast %51 : vector<1x8x128xf32> to vector<8x128xf32>
    %53 = vector.shape_cast %49 : vector<8x128xf32> to vector<1x8x128xf32>
    tpu.vector_store %arg13[%50, %c0_26, %c0_27], %53 {strides = array<i32>} : memref<8x8x256xf32, #tpu.memory_space<vmem>>, vector<1x8x128xf32>,
    %54 = vector.shape_cast %45 : vector<8x1xi1> to vector<8x1xi1>
    %55 = vector.broadcast %54 : vector<8x1xi1> to vector<8x128xi1>
    %56 = arith.select %55, %43, %9 : vector<8x128xi1>, vector<8x128xf32>
    %57 = vector.shape_cast %45 : vector<8x1xi1> to vector<8x1xi1>
    %58 = vector.broadcast %57 : vector<8x1xi1> to vector<8x128xi1>
    %59 = arith.select %58, %41, %10 : vector<8x128xi1>, vector<8x128xf32>
    %c1_i32 = arith.constant 1 : i32
    %60 = arith.index_cast %c1_i32 : i32 to index
    %c0_28 = arith.constant 0 : index
    %c0_29 = arith.constant 0 : index
    %61 = vector.load %arg2[%60, %c0_28, %c0_29] : memref<8x8x32xf32, #tpu.memory_space<vmem>>, vector<1x8x32xf32>
    %62 = vector.shape_cast %61 : vector<1x8x32xf32> to vector<8x32xf32>
    %cst_30 = arith.constant dense<0.000000e+00> : vector<8x512xf32>
    %63 = tpu.matmul %62, %1, %cst_30 {dimension_numbers = #tpu.dot_dimension_numbers<[1], [0], [0], [1], [0, 0, 1, 1], [], []>} : vector<8x32xf32>, vector<32x512xf32>, vector<8x512xf32> -> vector<8x512xf32>
    %cst_31 = arith.constant dense<0.000000e+00> : vector<8x512xf32>
    %64 = tpu.matmul %56, %2, %cst_31 {dimension_numbers = #tpu.dot_dimension_numbers<[1], [0], [0], [1], [0, 0, 1, 1], [], []>} : vector<8x128xf32>, vector<128x512xf32>, vector<8x512xf32> -> vector<8x512xf32>
    %65 = arith.addf %63, %64 : vector<8x512xf32>
    %66 = vector.broadcast %3 : vector<1x512xf32> to vector<8x512xf32>
    %67 = arith.addf %65, %66 : vector<8x512xf32>
    %68 = vector.extract_strided_slice %67 {offsets = [0, 0], sizes = [8, 128], strides = [1, 1]} : vector<8x512xf32> to vector<8x128xf32>
    %69 = arith.negf %68 : vector<8x128xf32>
    %70 = math.exp %69 : vector<8x128xf32>
    %cst_32 = arith.constant 1.000000e+00 : f32
    %71 = vector.broadcast %cst_32 : f32 to vector<8x128xf32>
    %72 = arith.addf %71, %70 : vector<8x128xf32>
    %73 = arith.divf %71, %72 : vector<8x128xf32>
    %74 = vector.extract_strided_slice %67 {offsets = [0, 128], sizes = [8, 128], strides = [1, 1]} : vector<8x512xf32> to vector<8x128xf32>
    %75 = arith.negf %74 : vector<8x128xf32>
    %76 = math.exp %75 : vector<8x128xf32>
    %cst_33 = arith.constant 1.000000e+00 : f32
    %77 = vector.broadcast %cst_33 : f32 to vector<8x128xf32>
    %78 = arith.addf %77, %76 : vector<8x128xf32>
    %79 = arith.divf %77, %78 : vector<8x128xf32>
    %80 = vector.extract_strided_slice %67 {offsets = [0, 256], sizes = [8, 128], strides = [1, 1]} : vector<8x512xf32> to vector<8x128xf32>
    %81 = math.tanh %80 : vector<8x128xf32>
    %82 = vector.extract_strided_slice %67 {offsets = [0, 384], sizes = [8, 128], strides = [1, 1]} : vector<8x512xf32> to vector<8x128xf32>
    %83 = arith.negf %82 : vector<8x128xf32>
    %84 = math.exp %83 : vector<8x128xf32>
    %cst_34 = arith.constant 1.000000e+00 : f32
    %85 = vector.broadcast %cst_34 : f32 to vector<8x128xf32>
    %86 = arith.addf %85, %84 : vector<8x128xf32>
    %87 = arith.divf %85, %86 : vector<8x128xf32>
    %88 = arith.mulf %79, %59 : vector<8x128xf32>
    %89 = arith.mulf %73, %81 : vector<8x128xf32>
    %90 = arith.addf %88, %89 : vector<8x128xf32>
    %91 = math.tanh %90 : vector<8x128xf32>
    %92 = arith.mulf %87, %91 : vector<8x128xf32>
    %93 = vector.broadcast %c1_i32 : i32 to vector<8x1xi32>
    %94 = arith.cmpi slt, %93, %0 : vector<8x1xi32>
    %cst_35 = arith.constant 0.000000e+00 : f32
    %95 = vector.shape_cast %94 : vector<8x1xi1> to vector<8x1xi1>
    %96 = vector.broadcast %95 : vector<8x1xi1> to vector<8x128xi1>
    %97 = vector.broadcast %cst_35 : f32 to vector<8x128xf32>
    %98 = arith.select %96, %92, %97 : vector<8x128xi1>, vector<8x128xf32>
    %99 = arith.index_cast %c1_i32 : i32 to index
    %c0_36 = arith.constant 0 : index
    %c0_37 = arith.constant 0 : index
    %100 = vector.load %arg13[%99, %c0_36, %c0_37] : memref<8x8x256xf32, #tpu.memory_space<vmem>>, vector<1x8x128xf32>
    %101 = vector.shape_cast %100 : vector<1x8x128xf32> to vector<8x128xf32>
    %102 = vector.shape_cast %98 : vector<8x128xf32> to vector<1x8x128xf32>
    tpu.vector_store %arg13[%99, %c0_36, %c0_37], %102 {strides = array<i32>} : memref<8x8x256xf32, #tpu.memory_space<vmem>>, vector<1x8x128xf32>,
    %103 = vector.shape_cast %94 : vector<8x1xi1> to vector<8x1xi1>
    %104 = vector.broadcast %103 : vector<8x1xi1> to vector<8x128xi1>
    %105 = arith.select %104, %92, %56 : vector<8x128xi1>, vector<8x128xf32>
    %106 = vector.shape_cast %94 : vector<8x1xi1> to vector<8x1xi1>
    %107 = vector.broadcast %106 : vector<8x1xi1> to vector<8x128xi1>
    %108 = arith.select %107, %90, %59 : vector<8x128xi1>, vector<8x128xf32>
    %c2_i32 = arith.constant 2 : i32
    %109 = arith.index_cast %c2_i32 : i32 to index
    %c0_38 = arith.constant 0 : index
    %c0_39 = arith.constant 0 : index
    %110 = vector.load %arg2[%109, %c0_38, %c0_39] : memref<8x8x32xf32, #tpu.memory_space<vmem>>, vector<1x8x32xf32>
    %111 = vector.shape_cast %110 : vector<1x8x32xf32> to vector<8x32xf32>
    %cst_40 = arith.constant dense<0.000000e+00> : vector<8x512xf32>
    %112 = tpu.matmul %111, %1, %cst_40 {dimension_numbers = #tpu.dot_dimension_numbers<[1], [0], [0], [1], [0, 0, 1, 1], [], []>} : vector<8x32xf32>, vector<32x512xf32>, vector<8x512xf32> -> vector<8x512xf32>
    %cst_41 = arith.constant dense<0.000000e+00> : vector<8x512xf32>
    %113 = tpu.matmul %105, %2, %cst_41 {dimension_numbers = #tpu.dot_dimension_numbers<[1], [0], [0], [1], [0, 0, 1, 1], [], []>} : vector<8x128xf32>, vector<128x512xf32>, vector<8x512xf32> -> vector<8x512xf32>
    %114 = arith.addf %112, %113 : vector<8x512xf32>
    %115 = vector.broadcast %3 : vector<1x512xf32> to vector<8x512xf32>
    %116 = arith.addf %114, %115 : vector<8x512xf32>
    %117 = vector.extract_strided_slice %116 {offsets = [0, 0], sizes = [8, 128], strides = [1, 1]} : vector<8x512xf32> to vector<8x128xf32>
    %118 = arith.negf %117 : vector<8x128xf32>
    %119 = math.exp %118 : vector<8x128xf32>
    %cst_42 = arith.constant 1.000000e+00 : f32
    %120 = vector.broadcast %cst_42 : f32 to vector<8x128xf32>
    %121 = arith.addf %120, %119 : vector<8x128xf32>
    %122 = arith.divf %120, %121 : vector<8x128xf32>
    %123 = vector.extract_strided_slice %116 {offsets = [0, 128], sizes = [8, 128], strides = [1, 1]} : vector<8x512xf32> to vector<8x128xf32>
    %124 = arith.negf %123 : vector<8x128xf32>
    %125 = math.exp %124 : vector<8x128xf32>
    %cst_43 = arith.constant 1.000000e+00 : f32
    %126 = vector.broadcast %cst_43 : f32 to vector<8x128xf32>
    %127 = arith.addf %126, %125 : vector<8x128xf32>
    %128 = arith.divf %126, %127 : vector<8x128xf32>
    %129 = vector.extract_strided_slice %116 {offsets = [0, 256], sizes = [8, 128], strides = [1, 1]} : vector<8x512xf32> to vector<8x128xf32>
    %130 = math.tanh %129 : vector<8x128xf32>
    %131 = vector.extract_strided_slice %116 {offsets = [0, 384], sizes = [8, 128], strides = [1, 1]} : vector<8x512xf32> to vector<8x128xf32>
    %132 = arith.negf %131 : vector<8x128xf32>
    %133 = math.exp %132 : vector<8x128xf32>
    %cst_44 = arith.constant 1.000000e+00 : f32
    %134 = vector.broadcast %cst_44 : f32 to vector<8x128xf32>
    %135 = arith.addf %134, %133 : vector<8x128xf32>
    %136 = arith.divf %134, %135 : vector<8x128xf32>
    %137 = arith.mulf %128, %108 : vector<8x128xf32>
    %138 = arith.mulf %122, %130 : vector<8x128xf32>
    %139 = arith.addf %137, %138 : vector<8x128xf32>
    %140 = math.tanh %139 : vector<8x128xf32>
    %141 = arith.mulf %136, %140 : vector<8x128xf32>
    %142 = vector.broadcast %c2_i32 : i32 to vector<8x1xi32>
    %143 = arith.cmpi slt, %142, %0 : vector<8x1xi32>
    %cst_45 = arith.constant 0.000000e+00 : f32
    %144 = vector.shape_cast %143 : vector<8x1xi1> to vector<8x1xi1>
    %145 = vector.broadcast %144 : vector<8x1xi1> to vector<8x128xi1>
    %146 = vector.broadcast %cst_45 : f32 to vector<8x128xf32>
    %147 = arith.select %145, %141, %146 : vector<8x128xi1>, vector<8x128xf32>
    %148 = arith.index_cast %c2_i32 : i32 to index
    %c0_46 = arith.constant 0 : index
    %c0_47 = arith.constant 0 : index
    %149 = vector.load %arg13[%148, %c0_46, %c0_47] : memref<8x8x256xf32, #tpu.memory_space<vmem>>, vector<1x8x128xf32>
    %150 = vector.shape_cast %149 : vector<1x8x128xf32> to vector<8x128xf32>
    %151 = vector.shape_cast %147 : vector<8x128xf32> to vector<1x8x128xf32>
    tpu.vector_store %arg13[%148, %c0_46, %c0_47], %151 {strides = array<i32>} : memref<8x8x256xf32, #tpu.memory_space<vmem>>, vector<1x8x128xf32>,
    %152 = vector.shape_cast %143 : vector<8x1xi1> to vector<8x1xi1>
    %153 = vector.broadcast %152 : vector<8x1xi1> to vector<8x128xi1>
    %154 = arith.select %153, %141, %105 : vector<8x128xi1>, vector<8x128xf32>
    %155 = vector.shape_cast %143 : vector<8x1xi1> to vector<8x1xi1>
    %156 = vector.broadcast %155 : vector<8x1xi1> to vector<8x128xi1>
    %157 = arith.select %156, %139, %108 : vector<8x128xi1>, vector<8x128xf32>
    %c3_i32 = arith.constant 3 : i32
    %158 = arith.index_cast %c3_i32 : i32 to index
    %c0_48 = arith.constant 0 : index
    %c0_49 = arith.constant 0 : index
    %159 = vector.load %arg2[%158, %c0_48, %c0_49] : memref<8x8x32xf32, #tpu.memory_space<vmem>>, vector<1x8x32xf32>
    %160 = vector.shape_cast %159 : vector<1x8x32xf32> to vector<8x32xf32>
    %cst_50 = arith.constant dense<0.000000e+00> : vector<8x512xf32>
    %161 = tpu.matmul %160, %1, %cst_50 {dimension_numbers = #tpu.dot_dimension_numbers<[1], [0], [0], [1], [0, 0, 1, 1], [], []>} : vector<8x32xf32>, vector<32x512xf32>, vector<8x512xf32> -> vector<8x512xf32>
    %cst_51 = arith.constant dense<0.000000e+00> : vector<8x512xf32>
    %162 = tpu.matmul %154, %2, %cst_51 {dimension_numbers = #tpu.dot_dimension_numbers<[1], [0], [0], [1], [0, 0, 1, 1], [], []>} : vector<8x128xf32>, vector<128x512xf32>, vector<8x512xf32> -> vector<8x512xf32>
    %163 = arith.addf %161, %162 : vector<8x512xf32>
    %164 = vector.broadcast %3 : vector<1x512xf32> to vector<8x512xf32>
    %165 = arith.addf %163, %164 : vector<8x512xf32>
    %166 = vector.extract_strided_slice %165 {offsets = [0, 0], sizes = [8, 128], strides = [1, 1]} : vector<8x512xf32> to vector<8x128xf32>
    %167 = arith.negf %166 : vector<8x128xf32>
    %168 = math.exp %167 : vector<8x128xf32>
    %cst_52 = arith.constant 1.000000e+00 : f32
    %169 = vector.broadcast %cst_52 : f32 to vector<8x128xf32>
    %170 = arith.addf %169, %168 : vector<8x128xf32>
    %171 = arith.divf %169, %170 : vector<8x128xf32>
    %172 = vector.extract_strided_slice %165 {offsets = [0, 128], sizes = [8, 128], strides = [1, 1]} : vector<8x512xf32> to vector<8x128xf32>
    %173 = arith.negf %172 : vector<8x128xf32>
    %174 = math.exp %173 : vector<8x128xf32>
    %cst_53 = arith.constant 1.000000e+00 : f32
    %175 = vector.broadcast %cst_53 : f32 to vector<8x128xf32>
    %176 = arith.addf %175, %174 : vector<8x128xf32>
    %177 = arith.divf %175, %176 : vector<8x128xf32>
    %178 = vector.extract_strided_slice %165 {offsets = [0, 256], sizes = [8, 128], strides = [1, 1]} : vector<8x512xf32> to vector<8x128xf32>
    %179 = math.tanh %178 : vector<8x128xf32>
    %180 = vector.extract_strided_slice %165 {offsets = [0, 384], sizes = [8, 128], strides = [1, 1]} : vector<8x512xf32> to vector<8x128xf32>
    %181 = arith.negf %180 : vector<8x128xf32>
    %182 = math.exp %181 : vector<8x128xf32>
    %cst_54 = arith.constant 1.000000e+00 : f32
    %183 = vector.broadcast %cst_54 : f32 to vector<8x128xf32>
    %184 = arith.addf %183, %182 : vector<8x128xf32>
    %185 = arith.divf %183, %184 : vector<8x128xf32>
    %186 = arith.mulf %177, %157 : vector<8x128xf32>
    %187 = arith.mulf %171, %179 : vector<8x128xf32>
    %188 = arith.addf %186, %187 : vector<8x128xf32>
    %189 = math.tanh %188 : vector<8x128xf32>
    %190 = arith.mulf %185, %189 : vector<8x128xf32>
    %191 = vector.broadcast %c3_i32 : i32 to vector<8x1xi32>
    %192 = arith.cmpi slt, %191, %0 : vector<8x1xi32>
    %cst_55 = arith.constant 0.000000e+00 : f32
    %193 = vector.shape_cast %192 : vector<8x1xi1> to vector<8x1xi1>
    %194 = vector.broadcast %193 : vector<8x1xi1> to vector<8x128xi1>
    %195 = vector.broadcast %cst_55 : f32 to vector<8x128xf32>
    %196 = arith.select %194, %190, %195 : vector<8x128xi1>, vector<8x128xf32>
    %197 = arith.index_cast %c3_i32 : i32 to index
    %c0_56 = arith.constant 0 : index
    %c0_57 = arith.constant 0 : index
    %198 = vector.load %arg13[%197, %c0_56, %c0_57] : memref<8x8x256xf32, #tpu.memory_space<vmem>>, vector<1x8x128xf32>
    %199 = vector.shape_cast %198 : vector<1x8x128xf32> to vector<8x128xf32>
    %200 = vector.shape_cast %196 : vector<8x128xf32> to vector<1x8x128xf32>
    tpu.vector_store %arg13[%197, %c0_56, %c0_57], %200 {strides = array<i32>} : memref<8x8x256xf32, #tpu.memory_space<vmem>>, vector<1x8x128xf32>,
    %201 = vector.shape_cast %192 : vector<8x1xi1> to vector<8x1xi1>
    %202 = vector.broadcast %201 : vector<8x1xi1> to vector<8x128xi1>
    %203 = arith.select %202, %190, %154 : vector<8x128xi1>, vector<8x128xf32>
    %204 = vector.shape_cast %192 : vector<8x1xi1> to vector<8x1xi1>
    %205 = vector.broadcast %204 : vector<8x1xi1> to vector<8x128xi1>
    %206 = arith.select %205, %188, %157 : vector<8x128xi1>, vector<8x128xf32>
    %c4_i32 = arith.constant 4 : i32
    %207 = arith.index_cast %c4_i32 : i32 to index
    %c0_58 = arith.constant 0 : index
    %c0_59 = arith.constant 0 : index
    %208 = vector.load %arg2[%207, %c0_58, %c0_59] : memref<8x8x32xf32, #tpu.memory_space<vmem>>, vector<1x8x32xf32>
    %209 = vector.shape_cast %208 : vector<1x8x32xf32> to vector<8x32xf32>
    %cst_60 = arith.constant dense<0.000000e+00> : vector<8x512xf32>
    %210 = tpu.matmul %209, %1, %cst_60 {dimension_numbers = #tpu.dot_dimension_numbers<[1], [0], [0], [1], [0, 0, 1, 1], [], []>} : vector<8x32xf32>, vector<32x512xf32>, vector<8x512xf32> -> vector<8x512xf32>
    %cst_61 = arith.constant dense<0.000000e+00> : vector<8x512xf32>
    %211 = tpu.matmul %203, %2, %cst_61 {dimension_numbers = #tpu.dot_dimension_numbers<[1], [0], [0], [1], [0, 0, 1, 1], [], []>} : vector<8x128xf32>, vector<128x512xf32>, vector<8x512xf32> -> vector<8x512xf32>
    %212 = arith.addf %210, %211 : vector<8x512xf32>
    %213 = vector.broadcast %3 : vector<1x512xf32> to vector<8x512xf32>
    %214 = arith.addf %212, %213 : vector<8x512xf32>
    %215 = vector.extract_strided_slice %214 {offsets = [0, 0], sizes = [8, 128], strides = [1, 1]} : vector<8x512xf32> to vector<8x128xf32>
    %216 = arith.negf %215 : vector<8x128xf32>
    %217 = math.exp %216 : vector<8x128xf32>
    %cst_62 = arith.constant 1.000000e+00 : f32
    %218 = vector.broadcast %cst_62 : f32 to vector<8x128xf32>
    %219 = arith.addf %218, %217 : vector<8x128xf32>
    %220 = arith.divf %218, %219 : vector<8x128xf32>
    %221 = vector.extract_strided_slice %214 {offsets = [0, 128], sizes = [8, 128], strides = [1, 1]} : vector<8x512xf32> to vector<8x128xf32>
    %222 = arith.negf %221 : vector<8x128xf32>
    %223 = math.exp %222 : vector<8x128xf32>
    %cst_63 = arith.constant 1.000000e+00 : f32
    %224 = vector.broadcast %cst_63 : f32 to vector<8x128xf32>
    %225 = arith.addf %224, %223 : vector<8x128xf32>
    %226 = arith.divf %224, %225 : vector<8x128xf32>
    %227 = vector.extract_strided_slice %214 {offsets = [0, 256], sizes = [8, 128], strides = [1, 1]} : vector<8x512xf32> to vector<8x128xf32>
    %228 = math.tanh %227 : vector<8x128xf32>
    %229 = vector.extract_strided_slice %214 {offsets = [0, 384], sizes = [8, 128], strides = [1, 1]} : vector<8x512xf32> to vector<8x128xf32>
    %230 = arith.negf %229 : vector<8x128xf32>
    %231 = math.exp %230 : vector<8x128xf32>
    %cst_64 = arith.constant 1.000000e+00 : f32
    %232 = vector.broadcast %cst_64 : f32 to vector<8x128xf32>
    %233 = arith.addf %232, %231 : vector<8x128xf32>
    %234 = arith.divf %232, %233 : vector<8x128xf32>
    %235 = arith.mulf %226, %206 : vector<8x128xf32>
    %236 = arith.mulf %220, %228 : vector<8x128xf32>
    %237 = arith.addf %235, %236 : vector<8x128xf32>
    %238 = math.tanh %237 : vector<8x128xf32>
    %239 = arith.mulf %234, %238 : vector<8x128xf32>
    %240 = vector.broadcast %c4_i32 : i32 to vector<8x1xi32>
    %241 = arith.cmpi slt, %240, %0 : vector<8x1xi32>
    %cst_65 = arith.constant 0.000000e+00 : f32
    %242 = vector.shape_cast %241 : vector<8x1xi1> to vector<8x1xi1>
    %243 = vector.broadcast %242 : vector<8x1xi1> to vector<8x128xi1>
    %244 = vector.broadcast %cst_65 : f32 to vector<8x128xf32>
    %245 = arith.select %243, %239, %244 : vector<8x128xi1>, vector<8x128xf32>
    %246 = arith.index_cast %c4_i32 : i32 to index
    %c0_66 = arith.constant 0 : index
    %c0_67 = arith.constant 0 : index
    %247 = vector.load %arg13[%246, %c0_66, %c0_67] : memref<8x8x256xf32, #tpu.memory_space<vmem>>, vector<1x8x128xf32>
    %248 = vector.shape_cast %247 : vector<1x8x128xf32> to vector<8x128xf32>
    %249 = vector.shape_cast %245 : vector<8x128xf32> to vector<1x8x128xf32>
    tpu.vector_store %arg13[%246, %c0_66, %c0_67], %249 {strides = array<i32>} : memref<8x8x256xf32, #tpu.memory_space<vmem>>, vector<1x8x128xf32>,
    %250 = vector.shape_cast %241 : vector<8x1xi1> to vector<8x1xi1>
    %251 = vector.broadcast %250 : vector<8x1xi1> to vector<8x128xi1>
    %252 = arith.select %251, %239, %203 : vector<8x128xi1>, vector<8x128xf32>
    %253 = vector.shape_cast %241 : vector<8x1xi1> to vector<8x1xi1>
    %254 = vector.broadcast %253 : vector<8x1xi1> to vector<8x128xi1>
    %255 = arith.select %254, %237, %206 : vector<8x128xi1>, vector<8x128xf32>
    %c5_i32 = arith.constant 5 : i32
    %256 = arith.index_cast %c5_i32 : i32 to index
    %c0_68 = arith.constant 0 : index
    %c0_69 = arith.constant 0 : index
    %257 = vector.load %arg2[%256, %c0_68, %c0_69] : memref<8x8x32xf32, #tpu.memory_space<vmem>>, vector<1x8x32xf32>
    %258 = vector.shape_cast %257 : vector<1x8x32xf32> to vector<8x32xf32>
    %cst_70 = arith.constant dense<0.000000e+00> : vector<8x512xf32>
    %259 = tpu.matmul %258, %1, %cst_70 {dimension_numbers = #tpu.dot_dimension_numbers<[1], [0], [0], [1], [0, 0, 1, 1], [], []>} : vector<8x32xf32>, vector<32x512xf32>, vector<8x512xf32> -> vector<8x512xf32>
    %cst_71 = arith.constant dense<0.000000e+00> : vector<8x512xf32>
    %260 = tpu.matmul %252, %2, %cst_71 {dimension_numbers = #tpu.dot_dimension_numbers<[1], [0], [0], [1], [0, 0, 1, 1], [], []>} : vector<8x128xf32>, vector<128x512xf32>, vector<8x512xf32> -> vector<8x512xf32>
    %261 = arith.addf %259, %260 : vector<8x512xf32>
    %262 = vector.broadcast %3 : vector<1x512xf32> to vector<8x512xf32>
    %263 = arith.addf %261, %262 : vector<8x512xf32>
    %264 = vector.extract_strided_slice %263 {offsets = [0, 0], sizes = [8, 128], strides = [1, 1]} : vector<8x512xf32> to vector<8x128xf32>
    %265 = arith.negf %264 : vector<8x128xf32>
    %266 = math.exp %265 : vector<8x128xf32>
    %cst_72 = arith.constant 1.000000e+00 : f32
    %267 = vector.broadcast %cst_72 : f32 to vector<8x128xf32>
    %268 = arith.addf %267, %266 : vector<8x128xf32>
    %269 = arith.divf %267, %268 : vector<8x128xf32>
    %270 = vector.extract_strided_slice %263 {offsets = [0, 128], sizes = [8, 128], strides = [1, 1]} : vector<8x512xf32> to vector<8x128xf32>
    %271 = arith.negf %270 : vector<8x128xf32>
    %272 = math.exp %271 : vector<8x128xf32>
    %cst_73 = arith.constant 1.000000e+00 : f32
    %273 = vector.broadcast %cst_73 : f32 to vector<8x128xf32>
    %274 = arith.addf %273, %272 : vector<8x128xf32>
    %275 = arith.divf %273, %274 : vector<8x128xf32>
    %276 = vector.extract_strided_slice %263 {offsets = [0, 256], sizes = [8, 128], strides = [1, 1]} : vector<8x512xf32> to vector<8x128xf32>
    %277 = math.tanh %276 : vector<8x128xf32>
    %278 = vector.extract_strided_slice %263 {offsets = [0, 384], sizes = [8, 128], strides = [1, 1]} : vector<8x512xf32> to vector<8x128xf32>
    %279 = arith.negf %278 : vector<8x128xf32>
    %280 = math.exp %279 : vector<8x128xf32>
    %cst_74 = arith.constant 1.000000e+00 : f32
    %281 = vector.broadcast %cst_74 : f32 to vector<8x128xf32>
    %282 = arith.addf %281, %280 : vector<8x128xf32>
    %283 = arith.divf %281, %282 : vector<8x128xf32>
    %284 = arith.mulf %275, %255 : vector<8x128xf32>
    %285 = arith.mulf %269, %277 : vector<8x128xf32>
    %286 = arith.addf %284, %285 : vector<8x128xf32>
    %287 = math.tanh %286 : vector<8x128xf32>
    %288 = arith.mulf %283, %287 : vector<8x128xf32>
    %289 = vector.broadcast %c5_i32 : i32 to vector<8x1xi32>
    %290 = arith.cmpi slt, %289, %0 : vector<8x1xi32>
    %cst_75 = arith.constant 0.000000e+00 : f32
    %291 = vector.shape_cast %290 : vector<8x1xi1> to vector<8x1xi1>
    %292 = vector.broadcast %291 : vector<8x1xi1> to vector<8x128xi1>
    %293 = vector.broadcast %cst_75 : f32 to vector<8x128xf32>
    %294 = arith.select %292, %288, %293 : vector<8x128xi1>, vector<8x128xf32>
    %295 = arith.index_cast %c5_i32 : i32 to index
    %c0_76 = arith.constant 0 : index
    %c0_77 = arith.constant 0 : index
    %296 = vector.load %arg13[%295, %c0_76, %c0_77] : memref<8x8x256xf32, #tpu.memory_space<vmem>>, vector<1x8x128xf32>
    %297 = vector.shape_cast %296 : vector<1x8x128xf32> to vector<8x128xf32>
    %298 = vector.shape_cast %294 : vector<8x128xf32> to vector<1x8x128xf32>
    tpu.vector_store %arg13[%295, %c0_76, %c0_77], %298 {strides = array<i32>} : memref<8x8x256xf32, #tpu.memory_space<vmem>>, vector<1x8x128xf32>,
    %299 = vector.shape_cast %290 : vector<8x1xi1> to vector<8x1xi1>
    %300 = vector.broadcast %299 : vector<8x1xi1> to vector<8x128xi1>
    %301 = arith.select %300, %288, %252 : vector<8x128xi1>, vector<8x128xf32>
    %302 = vector.shape_cast %290 : vector<8x1xi1> to vector<8x1xi1>
    %303 = vector.broadcast %302 : vector<8x1xi1> to vector<8x128xi1>
    %304 = arith.select %303, %286, %255 : vector<8x128xi1>, vector<8x128xf32>
    %c6_i32 = arith.constant 6 : i32
    %305 = arith.index_cast %c6_i32 : i32 to index
    %c0_78 = arith.constant 0 : index
    %c0_79 = arith.constant 0 : index
    %306 = vector.load %arg2[%305, %c0_78, %c0_79] : memref<8x8x32xf32, #tpu.memory_space<vmem>>, vector<1x8x32xf32>
    %307 = vector.shape_cast %306 : vector<1x8x32xf32> to vector<8x32xf32>
    %cst_80 = arith.constant dense<0.000000e+00> : vector<8x512xf32>
    %308 = tpu.matmul %307, %1, %cst_80 {dimension_numbers = #tpu.dot_dimension_numbers<[1], [0], [0], [1], [0, 0, 1, 1], [], []>} : vector<8x32xf32>, vector<32x512xf32>, vector<8x512xf32> -> vector<8x512xf32>
    %cst_81 = arith.constant dense<0.000000e+00> : vector<8x512xf32>
    %309 = tpu.matmul %301, %2, %cst_81 {dimension_numbers = #tpu.dot_dimension_numbers<[1], [0], [0], [1], [0, 0, 1, 1], [], []>} : vector<8x128xf32>, vector<128x512xf32>, vector<8x512xf32> -> vector<8x512xf32>
    %310 = arith.addf %308, %309 : vector<8x512xf32>
    %311 = vector.broadcast %3 : vector<1x512xf32> to vector<8x512xf32>
    %312 = arith.addf %310, %311 : vector<8x512xf32>
    %313 = vector.extract_strided_slice %312 {offsets = [0, 0], sizes = [8, 128], strides = [1, 1]} : vector<8x512xf32> to vector<8x128xf32>
    %314 = arith.negf %313 : vector<8x128xf32>
    %315 = math.exp %314 : vector<8x128xf32>
    %cst_82 = arith.constant 1.000000e+00 : f32
    %316 = vector.broadcast %cst_82 : f32 to vector<8x128xf32>
    %317 = arith.addf %316, %315 : vector<8x128xf32>
    %318 = arith.divf %316, %317 : vector<8x128xf32>
    %319 = vector.extract_strided_slice %312 {offsets = [0, 128], sizes = [8, 128], strides = [1, 1]} : vector<8x512xf32> to vector<8x128xf32>
    %320 = arith.negf %319 : vector<8x128xf32>
    %321 = math.exp %320 : vector<8x128xf32>
    %cst_83 = arith.constant 1.000000e+00 : f32
    %322 = vector.broadcast %cst_83 : f32 to vector<8x128xf32>
    %323 = arith.addf %322, %321 : vector<8x128xf32>
    %324 = arith.divf %322, %323 : vector<8x128xf32>
    %325 = vector.extract_strided_slice %312 {offsets = [0, 256], sizes = [8, 128], strides = [1, 1]} : vector<8x512xf32> to vector<8x128xf32>
    %326 = math.tanh %325 : vector<8x128xf32>
    %327 = vector.extract_strided_slice %312 {offsets = [0, 384], sizes = [8, 128], strides = [1, 1]} : vector<8x512xf32> to vector<8x128xf32>
    %328 = arith.negf %327 : vector<8x128xf32>
    %329 = math.exp %328 : vector<8x128xf32>
    %cst_84 = arith.constant 1.000000e+00 : f32
    %330 = vector.broadcast %cst_84 : f32 to vector<8x128xf32>
    %331 = arith.addf %330, %329 : vector<8x128xf32>
    %332 = arith.divf %330, %331 : vector<8x128xf32>
    %333 = arith.mulf %324, %304 : vector<8x128xf32>
    %334 = arith.mulf %318, %326 : vector<8x128xf32>
    %335 = arith.addf %333, %334 : vector<8x128xf32>
    %336 = math.tanh %335 : vector<8x128xf32>
    %337 = arith.mulf %332, %336 : vector<8x128xf32>
    %338 = vector.broadcast %c6_i32 : i32 to vector<8x1xi32>
    %339 = arith.cmpi slt, %338, %0 : vector<8x1xi32>
    %cst_85 = arith.constant 0.000000e+00 : f32
    %340 = vector.shape_cast %339 : vector<8x1xi1> to vector<8x1xi1>
    %341 = vector.broadcast %340 : vector<8x1xi1> to vector<8x128xi1>
    %342 = vector.broadcast %cst_85 : f32 to vector<8x128xf32>
    %343 = arith.select %341, %337, %342 : vector<8x128xi1>, vector<8x128xf32>
    %344 = arith.index_cast %c6_i32 : i32 to index
    %c0_86 = arith.constant 0 : index
    %c0_87 = arith.constant 0 : index
    %345 = vector.load %arg13[%344, %c0_86, %c0_87] : memref<8x8x256xf32, #tpu.memory_space<vmem>>, vector<1x8x128xf32>
    %346 = vector.shape_cast %345 : vector<1x8x128xf32> to vector<8x128xf32>
    %347 = vector.shape_cast %343 : vector<8x128xf32> to vector<1x8x128xf32>
    tpu.vector_store %arg13[%344, %c0_86, %c0_87], %347 {strides = array<i32>} : memref<8x8x256xf32, #tpu.memory_space<vmem>>, vector<1x8x128xf32>,
    %348 = vector.shape_cast %339 : vector<8x1xi1> to vector<8x1xi1>
    %349 = vector.broadcast %348 : vector<8x1xi1> to vector<8x128xi1>
    %350 = arith.select %349, %337, %301 : vector<8x128xi1>, vector<8x128xf32>
    %351 = vector.shape_cast %339 : vector<8x1xi1> to vector<8x1xi1>
    %352 = vector.broadcast %351 : vector<8x1xi1> to vector<8x128xi1>
    %353 = arith.select %352, %335, %304 : vector<8x128xi1>, vector<8x128xf32>
    %c7_i32 = arith.constant 7 : i32
    %354 = arith.index_cast %c7_i32 : i32 to index
    %c0_88 = arith.constant 0 : index
    %c0_89 = arith.constant 0 : index
    %355 = vector.load %arg2[%354, %c0_88, %c0_89] : memref<8x8x32xf32, #tpu.memory_space<vmem>>, vector<1x8x32xf32>
    %356 = vector.shape_cast %355 : vector<1x8x32xf32> to vector<8x32xf32>
    %cst_90 = arith.constant dense<0.000000e+00> : vector<8x512xf32>
    %357 = tpu.matmul %356, %1, %cst_90 {dimension_numbers = #tpu.dot_dimension_numbers<[1], [0], [0], [1], [0, 0, 1, 1], [], []>} : vector<8x32xf32>, vector<32x512xf32>, vector<8x512xf32> -> vector<8x512xf32>
    %cst_91 = arith.constant dense<0.000000e+00> : vector<8x512xf32>
    %358 = tpu.matmul %350, %2, %cst_91 {dimension_numbers = #tpu.dot_dimension_numbers<[1], [0], [0], [1], [0, 0, 1, 1], [], []>} : vector<8x128xf32>, vector<128x512xf32>, vector<8x512xf32> -> vector<8x512xf32>
    %359 = arith.addf %357, %358 : vector<8x512xf32>
    %360 = vector.broadcast %3 : vector<1x512xf32> to vector<8x512xf32>
    %361 = arith.addf %359, %360 : vector<8x512xf32>
    %362 = vector.extract_strided_slice %361 {offsets = [0, 0], sizes = [8, 128], strides = [1, 1]} : vector<8x512xf32> to vector<8x128xf32>
    %363 = arith.negf %362 : vector<8x128xf32>
    %364 = math.exp %363 : vector<8x128xf32>
    %cst_92 = arith.constant 1.000000e+00 : f32
    %365 = vector.broadcast %cst_92 : f32 to vector<8x128xf32>
    %366 = arith.addf %365, %364 : vector<8x128xf32>
    %367 = arith.divf %365, %366 : vector<8x128xf32>
    %368 = vector.extract_strided_slice %361 {offsets = [0, 128], sizes = [8, 128], strides = [1, 1]} : vector<8x512xf32> to vector<8x128xf32>
    %369 = arith.negf %368 : vector<8x128xf32>
    %370 = math.exp %369 : vector<8x128xf32>
    %cst_93 = arith.constant 1.000000e+00 : f32
    %371 = vector.broadcast %cst_93 : f32 to vector<8x128xf32>
    %372 = arith.addf %371, %370 : vector<8x128xf32>
    %373 = arith.divf %371, %372 : vector<8x128xf32>
    %374 = vector.extract_strided_slice %361 {offsets = [0, 256], sizes = [8, 128], strides = [1, 1]} : vector<8x512xf32> to vector<8x128xf32>
    %375 = math.tanh %374 : vector<8x128xf32>
    %376 = vector.extract_strided_slice %361 {offsets = [0, 384], sizes = [8, 128], strides = [1, 1]} : vector<8x512xf32> to vector<8x128xf32>
    %377 = arith.negf %376 : vector<8x128xf32>
    %378 = math.exp %377 : vector<8x128xf32>
    %cst_94 = arith.constant 1.000000e+00 : f32
    %379 = vector.broadcast %cst_94 : f32 to vector<8x128xf32>
    %380 = arith.addf %379, %378 : vector<8x128xf32>
    %381 = arith.divf %379, %380 : vector<8x128xf32>
    %382 = arith.mulf %373, %353 : vector<8x128xf32>
    %383 = arith.mulf %367, %375 : vector<8x128xf32>
    %384 = arith.addf %382, %383 : vector<8x128xf32>
    %385 = math.tanh %384 : vector<8x128xf32>
    %386 = arith.mulf %381, %385 : vector<8x128xf32>
    %387 = vector.broadcast %c7_i32 : i32 to vector<8x1xi32>
    %388 = arith.cmpi slt, %387, %0 : vector<8x1xi32>
    %cst_95 = arith.constant 0.000000e+00 : f32
    %389 = vector.shape_cast %388 : vector<8x1xi1> to vector<8x1xi1>
    %390 = vector.broadcast %389 : vector<8x1xi1> to vector<8x128xi1>
    %391 = vector.broadcast %cst_95 : f32 to vector<8x128xf32>
    %392 = arith.select %390, %386, %391 : vector<8x128xi1>, vector<8x128xf32>
    %393 = arith.index_cast %c7_i32 : i32 to index
    %c0_96 = arith.constant 0 : index
    %c0_97 = arith.constant 0 : index
    %394 = vector.load %arg13[%393, %c0_96, %c0_97] : memref<8x8x256xf32, #tpu.memory_space<vmem>>, vector<1x8x128xf32>
    %395 = vector.shape_cast %394 : vector<1x8x128xf32> to vector<8x128xf32>
    %396 = vector.shape_cast %392 : vector<8x128xf32> to vector<1x8x128xf32>
    tpu.vector_store %arg13[%393, %c0_96, %c0_97], %396 {strides = array<i32>} : memref<8x8x256xf32, #tpu.memory_space<vmem>>, vector<1x8x128xf32>,
    %397 = vector.shape_cast %388 : vector<8x1xi1> to vector<8x1xi1>
    %398 = vector.broadcast %397 : vector<8x1xi1> to vector<8x128xi1>
    %399 = arith.select %398, %386, %350 : vector<8x128xi1>, vector<8x128xf32>
    %400 = vector.shape_cast %388 : vector<8x1xi1> to vector<8x1xi1>
    %401 = vector.broadcast %400 : vector<8x1xi1> to vector<8x128xi1>
    %402 = arith.select %401, %384, %353 : vector<8x128xi1>, vector<8x128xf32>
    %c8_i32 = arith.constant 8 : i32
    %c0_i32_98 = arith.constant 0 : i32
    %c7_i32_99 = arith.constant 7 : i32
    %403 = arith.subi %c7_i32_99, %c0_i32_98 : i32
    %404 = arith.index_cast %403 : i32 to index
    %c0_100 = arith.constant 0 : index
    %c0_101 = arith.constant 0 : index
    %405 = vector.load %arg2[%404, %c0_100, %c0_101] : memref<8x8x32xf32, #tpu.memory_space<vmem>>, vector<1x8x32xf32>
    %406 = vector.shape_cast %405 : vector<1x8x32xf32> to vector<8x32xf32>
    %cst_102 = arith.constant dense<0.000000e+00> : vector<8x512xf32>
    %407 = tpu.matmul %406, %4, %cst_102 {dimension_numbers = #tpu.dot_dimension_numbers<[1], [0], [0], [1], [0, 0, 1, 1], [], []>} : vector<8x32xf32>, vector<32x512xf32>, vector<8x512xf32> -> vector<8x512xf32>
    %cst_103 = arith.constant dense<0.000000e+00> : vector<8x512xf32>
    %408 = tpu.matmul %9, %5, %cst_103 {dimension_numbers = #tpu.dot_dimension_numbers<[1], [0], [0], [1], [0, 0, 1, 1], [], []>} : vector<8x128xf32>, vector<128x512xf32>, vector<8x512xf32> -> vector<8x512xf32>
    %409 = arith.addf %407, %408 : vector<8x512xf32>
    %410 = vector.broadcast %6 : vector<1x512xf32> to vector<8x512xf32>
    %411 = arith.addf %409, %410 : vector<8x512xf32>
    %412 = vector.extract_strided_slice %411 {offsets = [0, 0], sizes = [8, 128], strides = [1, 1]} : vector<8x512xf32> to vector<8x128xf32>
    %413 = arith.negf %412 : vector<8x128xf32>
    %414 = math.exp %413 : vector<8x128xf32>
    %cst_104 = arith.constant 1.000000e+00 : f32
    %415 = vector.broadcast %cst_104 : f32 to vector<8x128xf32>
    %416 = arith.addf %415, %414 : vector<8x128xf32>
    %417 = arith.divf %415, %416 : vector<8x128xf32>
    %418 = vector.extract_strided_slice %411 {offsets = [0, 128], sizes = [8, 128], strides = [1, 1]} : vector<8x512xf32> to vector<8x128xf32>
    %419 = arith.negf %418 : vector<8x128xf32>
    %420 = math.exp %419 : vector<8x128xf32>
    %cst_105 = arith.constant 1.000000e+00 : f32
    %421 = vector.broadcast %cst_105 : f32 to vector<8x128xf32>
    %422 = arith.addf %421, %420 : vector<8x128xf32>
    %423 = arith.divf %421, %422 : vector<8x128xf32>
    %424 = vector.extract_strided_slice %411 {offsets = [0, 256], sizes = [8, 128], strides = [1, 1]} : vector<8x512xf32> to vector<8x128xf32>
    %425 = math.tanh %424 : vector<8x128xf32>
    %426 = vector.extract_strided_slice %411 {offsets = [0, 384], sizes = [8, 128], strides = [1, 1]} : vector<8x512xf32> to vector<8x128xf32>
    %427 = arith.negf %426 : vector<8x128xf32>
    %428 = math.exp %427 : vector<8x128xf32>
    %cst_106 = arith.constant 1.000000e+00 : f32
    %429 = vector.broadcast %cst_106 : f32 to vector<8x128xf32>
    %430 = arith.addf %429, %428 : vector<8x128xf32>
    %431 = arith.divf %429, %430 : vector<8x128xf32>
    %432 = arith.mulf %423, %10 : vector<8x128xf32>
    %433 = arith.mulf %417, %425 : vector<8x128xf32>
    %434 = arith.addf %432, %433 : vector<8x128xf32>
    %435 = math.tanh %434 : vector<8x128xf32>
    %436 = arith.mulf %431, %435 : vector<8x128xf32>
    %437 = vector.broadcast %403 : i32 to vector<8x1xi32>
    %438 = arith.cmpi slt, %437, %0 : vector<8x1xi32>
    %cst_107 = arith.constant 0.000000e+00 : f32
    %439 = vector.shape_cast %438 : vector<8x1xi1> to vector<8x1xi1>
    %440 = vector.broadcast %439 : vector<8x1xi1> to vector<8x128xi1>
    %441 = vector.broadcast %cst_107 : f32 to vector<8x128xf32>
    %442 = arith.select %440, %436, %441 : vector<8x128xi1>, vector<8x128xf32>
    %443 = arith.index_cast %403 : i32 to index
    %c0_108 = arith.constant 0 : index
    %c128 = arith.constant 128 : index
    %444 = vector.load %arg13[%443, %c0_108, %c128] : memref<8x8x256xf32, #tpu.memory_space<vmem>>, vector<1x8x128xf32>
    %445 = vector.shape_cast %444 : vector<1x8x128xf32> to vector<8x128xf32>
    %446 = vector.shape_cast %442 : vector<8x128xf32> to vector<1x8x128xf32>
    tpu.vector_store %arg13[%443, %c0_108, %c128], %446 {strides = array<i32>} : memref<8x8x256xf32, #tpu.memory_space<vmem>>, vector<1x8x128xf32>,
    %447 = vector.shape_cast %438 : vector<8x1xi1> to vector<8x1xi1>
    %448 = vector.broadcast %447 : vector<8x1xi1> to vector<8x128xi1>
    %449 = arith.select %448, %436, %9 : vector<8x128xi1>, vector<8x128xf32>
    %450 = vector.shape_cast %438 : vector<8x1xi1> to vector<8x1xi1>
    %451 = vector.broadcast %450 : vector<8x1xi1> to vector<8x128xi1>
    %452 = arith.select %451, %434, %10 : vector<8x128xi1>, vector<8x128xf32>
    %c1_i32_109 = arith.constant 1 : i32
    %c7_i32_110 = arith.constant 7 : i32
    %453 = arith.subi %c7_i32_110, %c1_i32_109 : i32
    %454 = arith.index_cast %453 : i32 to index
    %c0_111 = arith.constant 0 : index
    %c0_112 = arith.constant 0 : index
    %455 = vector.load %arg2[%454, %c0_111, %c0_112] : memref<8x8x32xf32, #tpu.memory_space<vmem>>, vector<1x8x32xf32>
    %456 = vector.shape_cast %455 : vector<1x8x32xf32> to vector<8x32xf32>
    %cst_113 = arith.constant dense<0.000000e+00> : vector<8x512xf32>
    %457 = tpu.matmul %456, %4, %cst_113 {dimension_numbers = #tpu.dot_dimension_numbers<[1], [0], [0], [1], [0, 0, 1, 1], [], []>} : vector<8x32xf32>, vector<32x512xf32>, vector<8x512xf32> -> vector<8x512xf32>
    %cst_114 = arith.constant dense<0.000000e+00> : vector<8x512xf32>
    %458 = tpu.matmul %449, %5, %cst_114 {dimension_numbers = #tpu.dot_dimension_numbers<[1], [0], [0], [1], [0, 0, 1, 1], [], []>} : vector<8x128xf32>, vector<128x512xf32>, vector<8x512xf32> -> vector<8x512xf32>
    %459 = arith.addf %457, %458 : vector<8x512xf32>
    %460 = vector.broadcast %6 : vector<1x512xf32> to vector<8x512xf32>
    %461 = arith.addf %459, %460 : vector<8x512xf32>
    %462 = vector.extract_strided_slice %461 {offsets = [0, 0], sizes = [8, 128], strides = [1, 1]} : vector<8x512xf32> to vector<8x128xf32>
    %463 = arith.negf %462 : vector<8x128xf32>
    %464 = math.exp %463 : vector<8x128xf32>
    %cst_115 = arith.constant 1.000000e+00 : f32
    %465 = vector.broadcast %cst_115 : f32 to vector<8x128xf32>
    %466 = arith.addf %465, %464 : vector<8x128xf32>
    %467 = arith.divf %465, %466 : vector<8x128xf32>
    %468 = vector.extract_strided_slice %461 {offsets = [0, 128], sizes = [8, 128], strides = [1, 1]} : vector<8x512xf32> to vector<8x128xf32>
    %469 = arith.negf %468 : vector<8x128xf32>
    %470 = math.exp %469 : vector<8x128xf32>
    %cst_116 = arith.constant 1.000000e+00 : f32
    %471 = vector.broadcast %cst_116 : f32 to vector<8x128xf32>
    %472 = arith.addf %471, %470 : vector<8x128xf32>
    %473 = arith.divf %471, %472 : vector<8x128xf32>
    %474 = vector.extract_strided_slice %461 {offsets = [0, 256], sizes = [8, 128], strides = [1, 1]} : vector<8x512xf32> to vector<8x128xf32>
    %475 = math.tanh %474 : vector<8x128xf32>
    %476 = vector.extract_strided_slice %461 {offsets = [0, 384], sizes = [8, 128], strides = [1, 1]} : vector<8x512xf32> to vector<8x128xf32>
    %477 = arith.negf %476 : vector<8x128xf32>
    %478 = math.exp %477 : vector<8x128xf32>
    %cst_117 = arith.constant 1.000000e+00 : f32
    %479 = vector.broadcast %cst_117 : f32 to vector<8x128xf32>
    %480 = arith.addf %479, %478 : vector<8x128xf32>
    %481 = arith.divf %479, %480 : vector<8x128xf32>
    %482 = arith.mulf %473, %452 : vector<8x128xf32>
    %483 = arith.mulf %467, %475 : vector<8x128xf32>
    %484 = arith.addf %482, %483 : vector<8x128xf32>
    %485 = math.tanh %484 : vector<8x128xf32>
    %486 = arith.mulf %481, %485 : vector<8x128xf32>
    %487 = vector.broadcast %453 : i32 to vector<8x1xi32>
    %488 = arith.cmpi slt, %487, %0 : vector<8x1xi32>
    %cst_118 = arith.constant 0.000000e+00 : f32
    %489 = vector.shape_cast %488 : vector<8x1xi1> to vector<8x1xi1>
    %490 = vector.broadcast %489 : vector<8x1xi1> to vector<8x128xi1>
    %491 = vector.broadcast %cst_118 : f32 to vector<8x128xf32>
    %492 = arith.select %490, %486, %491 : vector<8x128xi1>, vector<8x128xf32>
    %493 = arith.index_cast %453 : i32 to index
    %c0_119 = arith.constant 0 : index
    %c128_120 = arith.constant 128 : index
    %494 = vector.load %arg13[%493, %c0_119, %c128_120] : memref<8x8x256xf32, #tpu.memory_space<vmem>>, vector<1x8x128xf32>
    %495 = vector.shape_cast %494 : vector<1x8x128xf32> to vector<8x128xf32>
    %496 = vector.shape_cast %492 : vector<8x128xf32> to vector<1x8x128xf32>
    tpu.vector_store %arg13[%493, %c0_119, %c128_120], %496 {strides = array<i32>} : memref<8x8x256xf32, #tpu.memory_space<vmem>>, vector<1x8x128xf32>,
    %497 = vector.shape_cast %488 : vector<8x1xi1> to vector<8x1xi1>
    %498 = vector.broadcast %497 : vector<8x1xi1> to vector<8x128xi1>
    %499 = arith.select %498, %486, %449 : vector<8x128xi1>, vector<8x128xf32>
    %500 = vector.shape_cast %488 : vector<8x1xi1> to vector<8x1xi1>
    %501 = vector.broadcast %500 : vector<8x1xi1> to vector<8x128xi1>
    %502 = arith.select %501, %484, %452 : vector<8x128xi1>, vector<8x128xf32>
    %c2_i32_121 = arith.constant 2 : i32
    %c7_i32_122 = arith.constant 7 : i32
    %503 = arith.subi %c7_i32_122, %c2_i32_121 : i32
    %504 = arith.index_cast %503 : i32 to index
    %c0_123 = arith.constant 0 : index
    %c0_124 = arith.constant 0 : index
    %505 = vector.load %arg2[%504, %c0_123, %c0_124] : memref<8x8x32xf32, #tpu.memory_space<vmem>>, vector<1x8x32xf32>
    %506 = vector.shape_cast %505 : vector<1x8x32xf32> to vector<8x32xf32>
    %cst_125 = arith.constant dense<0.000000e+00> : vector<8x512xf32>
    %507 = tpu.matmul %506, %4, %cst_125 {dimension_numbers = #tpu.dot_dimension_numbers<[1], [0], [0], [1], [0, 0, 1, 1], [], []>} : vector<8x32xf32>, vector<32x512xf32>, vector<8x512xf32> -> vector<8x512xf32>
    %cst_126 = arith.constant dense<0.000000e+00> : vector<8x512xf32>
    %508 = tpu.matmul %499, %5, %cst_126 {dimension_numbers = #tpu.dot_dimension_numbers<[1], [0], [0], [1], [0, 0, 1, 1], [], []>} : vector<8x128xf32>, vector<128x512xf32>, vector<8x512xf32> -> vector<8x512xf32>
    %509 = arith.addf %507, %508 : vector<8x512xf32>
    %510 = vector.broadcast %6 : vector<1x512xf32> to vector<8x512xf32>
    %511 = arith.addf %509, %510 : vector<8x512xf32>
    %512 = vector.extract_strided_slice %511 {offsets = [0, 0], sizes = [8, 128], strides = [1, 1]} : vector<8x512xf32> to vector<8x128xf32>
    %513 = arith.negf %512 : vector<8x128xf32>
    %514 = math.exp %513 : vector<8x128xf32>
    %cst_127 = arith.constant 1.000000e+00 : f32
    %515 = vector.broadcast %cst_127 : f32 to vector<8x128xf32>
    %516 = arith.addf %515, %514 : vector<8x128xf32>
    %517 = arith.divf %515, %516 : vector<8x128xf32>
    %518 = vector.extract_strided_slice %511 {offsets = [0, 128], sizes = [8, 128], strides = [1, 1]} : vector<8x512xf32> to vector<8x128xf32>
    %519 = arith.negf %518 : vector<8x128xf32>
    %520 = math.exp %519 : vector<8x128xf32>
    %cst_128 = arith.constant 1.000000e+00 : f32
    %521 = vector.broadcast %cst_128 : f32 to vector<8x128xf32>
    %522 = arith.addf %521, %520 : vector<8x128xf32>
    %523 = arith.divf %521, %522 : vector<8x128xf32>
    %524 = vector.extract_strided_slice %511 {offsets = [0, 256], sizes = [8, 128], strides = [1, 1]} : vector<8x512xf32> to vector<8x128xf32>
    %525 = math.tanh %524 : vector<8x128xf32>
    %526 = vector.extract_strided_slice %511 {offsets = [0, 384], sizes = [8, 128], strides = [1, 1]} : vector<8x512xf32> to vector<8x128xf32>
    %527 = arith.negf %526 : vector<8x128xf32>
    %528 = math.exp %527 : vector<8x128xf32>
    %cst_129 = arith.constant 1.000000e+00 : f32
    %529 = vector.broadcast %cst_129 : f32 to vector<8x128xf32>
    %530 = arith.addf %529, %528 : vector<8x128xf32>
    %531 = arith.divf %529, %530 : vector<8x128xf32>
    %532 = arith.mulf %523, %502 : vector<8x128xf32>
    %533 = arith.mulf %517, %525 : vector<8x128xf32>
    %534 = arith.addf %532, %533 : vector<8x128xf32>
    %535 = math.tanh %534 : vector<8x128xf32>
    %536 = arith.mulf %531, %535 : vector<8x128xf32>
    %537 = vector.broadcast %503 : i32 to vector<8x1xi32>
    %538 = arith.cmpi slt, %537, %0 : vector<8x1xi32>
    %cst_130 = arith.constant 0.000000e+00 : f32
    %539 = vector.shape_cast %538 : vector<8x1xi1> to vector<8x1xi1>
    %540 = vector.broadcast %539 : vector<8x1xi1> to vector<8x128xi1>
    %541 = vector.broadcast %cst_130 : f32 to vector<8x128xf32>
    %542 = arith.select %540, %536, %541 : vector<8x128xi1>, vector<8x128xf32>
    %543 = arith.index_cast %503 : i32 to index
    %c0_131 = arith.constant 0 : index
    %c128_132 = arith.constant 128 : index
    %544 = vector.load %arg13[%543, %c0_131, %c128_132] : memref<8x8x256xf32, #tpu.memory_space<vmem>>, vector<1x8x128xf32>
    %545 = vector.shape_cast %544 : vector<1x8x128xf32> to vector<8x128xf32>
    %546 = vector.shape_cast %542 : vector<8x128xf32> to vector<1x8x128xf32>
    tpu.vector_store %arg13[%543, %c0_131, %c128_132], %546 {strides = array<i32>} : memref<8x8x256xf32, #tpu.memory_space<vmem>>, vector<1x8x128xf32>,
    %547 = vector.shape_cast %538 : vector<8x1xi1> to vector<8x1xi1>
    %548 = vector.broadcast %547 : vector<8x1xi1> to vector<8x128xi1>
    %549 = arith.select %548, %536, %499 : vector<8x128xi1>, vector<8x128xf32>
    %550 = vector.shape_cast %538 : vector<8x1xi1> to vector<8x1xi1>
    %551 = vector.broadcast %550 : vector<8x1xi1> to vector<8x128xi1>
    %552 = arith.select %551, %534, %502 : vector<8x128xi1>, vector<8x128xf32>
    %c3_i32_133 = arith.constant 3 : i32
    %c7_i32_134 = arith.constant 7 : i32
    %553 = arith.subi %c7_i32_134, %c3_i32_133 : i32
    %554 = arith.index_cast %553 : i32 to index
    %c0_135 = arith.constant 0 : index
    %c0_136 = arith.constant 0 : index
    %555 = vector.load %arg2[%554, %c0_135, %c0_136] : memref<8x8x32xf32, #tpu.memory_space<vmem>>, vector<1x8x32xf32>
    %556 = vector.shape_cast %555 : vector<1x8x32xf32> to vector<8x32xf32>
    %cst_137 = arith.constant dense<0.000000e+00> : vector<8x512xf32>
    %557 = tpu.matmul %556, %4, %cst_137 {dimension_numbers = #tpu.dot_dimension_numbers<[1], [0], [0], [1], [0, 0, 1, 1], [], []>} : vector<8x32xf32>, vector<32x512xf32>, vector<8x512xf32> -> vector<8x512xf32>
    %cst_138 = arith.constant dense<0.000000e+00> : vector<8x512xf32>
    %558 = tpu.matmul %549, %5, %cst_138 {dimension_numbers = #tpu.dot_dimension_numbers<[1], [0], [0], [1], [0, 0, 1, 1], [], []>} : vector<8x128xf32>, vector<128x512xf32>, vector<8x512xf32> -> vector<8x512xf32>
    %559 = arith.addf %557, %558 : vector<8x512xf32>
    %560 = vector.broadcast %6 : vector<1x512xf32> to vector<8x512xf32>
    %561 = arith.addf %559, %560 : vector<8x512xf32>
    %562 = vector.extract_strided_slice %561 {offsets = [0, 0], sizes = [8, 128], strides = [1, 1]} : vector<8x512xf32> to vector<8x128xf32>
    %563 = arith.negf %562 : vector<8x128xf32>
    %564 = math.exp %563 : vector<8x128xf32>
    %cst_139 = arith.constant 1.000000e+00 : f32
    %565 = vector.broadcast %cst_139 : f32 to vector<8x128xf32>
    %566 = arith.addf %565, %564 : vector<8x128xf32>
    %567 = arith.divf %565, %566 : vector<8x128xf32>
    %568 = vector.extract_strided_slice %561 {offsets = [0, 128], sizes = [8, 128], strides = [1, 1]} : vector<8x512xf32> to vector<8x128xf32>
    %569 = arith.negf %568 : vector<8x128xf32>
    %570 = math.exp %569 : vector<8x128xf32>
    %cst_140 = arith.constant 1.000000e+00 : f32
    %571 = vector.broadcast %cst_140 : f32 to vector<8x128xf32>
    %572 = arith.addf %571, %570 : vector<8x128xf32>
    %573 = arith.divf %571, %572 : vector<8x128xf32>
    %574 = vector.extract_strided_slice %561 {offsets = [0, 256], sizes = [8, 128], strides = [1, 1]} : vector<8x512xf32> to vector<8x128xf32>
    %575 = math.tanh %574 : vector<8x128xf32>
    %576 = vector.extract_strided_slice %561 {offsets = [0, 384], sizes = [8, 128], strides = [1, 1]} : vector<8x512xf32> to vector<8x128xf32>
    %577 = arith.negf %576 : vector<8x128xf32>
    %578 = math.exp %577 : vector<8x128xf32>
    %cst_141 = arith.constant 1.000000e+00 : f32
    %579 = vector.broadcast %cst_141 : f32 to vector<8x128xf32>
    %580 = arith.addf %579, %578 : vector<8x128xf32>
    %581 = arith.divf %579, %580 : vector<8x128xf32>
    %582 = arith.mulf %573, %552 : vector<8x128xf32>
    %583 = arith.mulf %567, %575 : vector<8x128xf32>
    %584 = arith.addf %582, %583 : vector<8x128xf32>
    %585 = math.tanh %584 : vector<8x128xf32>
    %586 = arith.mulf %581, %585 : vector<8x128xf32>
    %587 = vector.broadcast %553 : i32 to vector<8x1xi32>
    %588 = arith.cmpi slt, %587, %0 : vector<8x1xi32>
    %cst_142 = arith.constant 0.000000e+00 : f32
    %589 = vector.shape_cast %588 : vector<8x1xi1> to vector<8x1xi1>
    %590 = vector.broadcast %589 : vector<8x1xi1> to vector<8x128xi1>
    %591 = vector.broadcast %cst_142 : f32 to vector<8x128xf32>
    %592 = arith.select %590, %586, %591 : vector<8x128xi1>, vector<8x128xf32>
    %593 = arith.index_cast %553 : i32 to index
    %c0_143 = arith.constant 0 : index
    %c128_144 = arith.constant 128 : index
    %594 = vector.load %arg13[%593, %c0_143, %c128_144] : memref<8x8x256xf32, #tpu.memory_space<vmem>>, vector<1x8x128xf32>
    %595 = vector.shape_cast %594 : vector<1x8x128xf32> to vector<8x128xf32>
    %596 = vector.shape_cast %592 : vector<8x128xf32> to vector<1x8x128xf32>
    tpu.vector_store %arg13[%593, %c0_143, %c128_144], %596 {strides = array<i32>} : memref<8x8x256xf32, #tpu.memory_space<vmem>>, vector<1x8x128xf32>,
    %597 = vector.shape_cast %588 : vector<8x1xi1> to vector<8x1xi1>
    %598 = vector.broadcast %597 : vector<8x1xi1> to vector<8x128xi1>
    %599 = arith.select %598, %586, %549 : vector<8x128xi1>, vector<8x128xf32>
    %600 = vector.shape_cast %588 : vector<8x1xi1> to vector<8x1xi1>
    %601 = vector.broadcast %600 : vector<8x1xi1> to vector<8x128xi1>
    %602 = arith.select %601, %584, %552 : vector<8x128xi1>, vector<8x128xf32>
    %c4_i32_145 = arith.constant 4 : i32
    %c7_i32_146 = arith.constant 7 : i32
    %603 = arith.subi %c7_i32_146, %c4_i32_145 : i32
    %604 = arith.index_cast %603 : i32 to index
    %c0_147 = arith.constant 0 : index
    %c0_148 = arith.constant 0 : index
    %605 = vector.load %arg2[%604, %c0_147, %c0_148] : memref<8x8x32xf32, #tpu.memory_space<vmem>>, vector<1x8x32xf32>
    %606 = vector.shape_cast %605 : vector<1x8x32xf32> to vector<8x32xf32>
    %cst_149 = arith.constant dense<0.000000e+00> : vector<8x512xf32>
    %607 = tpu.matmul %606, %4, %cst_149 {dimension_numbers = #tpu.dot_dimension_numbers<[1], [0], [0], [1], [0, 0, 1, 1], [], []>} : vector<8x32xf32>, vector<32x512xf32>, vector<8x512xf32> -> vector<8x512xf32>
    %cst_150 = arith.constant dense<0.000000e+00> : vector<8x512xf32>
    %608 = tpu.matmul %599, %5, %cst_150 {dimension_numbers = #tpu.dot_dimension_numbers<[1], [0], [0], [1], [0, 0, 1, 1], [], []>} : vector<8x128xf32>, vector<128x512xf32>, vector<8x512xf32> -> vector<8x512xf32>
    %609 = arith.addf %607, %608 : vector<8x512xf32>
    %610 = vector.broadcast %6 : vector<1x512xf32> to vector<8x512xf32>
    %611 = arith.addf %609, %610 : vector<8x512xf32>
    %612 = vector.extract_strided_slice %611 {offsets = [0, 0], sizes = [8, 128], strides = [1, 1]} : vector<8x512xf32> to vector<8x128xf32>
    %613 = arith.negf %612 : vector<8x128xf32>
    %614 = math.exp %613 : vector<8x128xf32>
    %cst_151 = arith.constant 1.000000e+00 : f32
    %615 = vector.broadcast %cst_151 : f32 to vector<8x128xf32>
    %616 = arith.addf %615, %614 : vector<8x128xf32>
    %617 = arith.divf %615, %616 : vector<8x128xf32>
    %618 = vector.extract_strided_slice %611 {offsets = [0, 128], sizes = [8, 128], strides = [1, 1]} : vector<8x512xf32> to vector<8x128xf32>
    %619 = arith.negf %618 : vector<8x128xf32>
    %620 = math.exp %619 : vector<8x128xf32>
    %cst_152 = arith.constant 1.000000e+00 : f32
    %621 = vector.broadcast %cst_152 : f32 to vector<8x128xf32>
    %622 = arith.addf %621, %620 : vector<8x128xf32>
    %623 = arith.divf %621, %622 : vector<8x128xf32>
    %624 = vector.extract_strided_slice %611 {offsets = [0, 256], sizes = [8, 128], strides = [1, 1]} : vector<8x512xf32> to vector<8x128xf32>
    %625 = math.tanh %624 : vector<8x128xf32>
    %626 = vector.extract_strided_slice %611 {offsets = [0, 384], sizes = [8, 128], strides = [1, 1]} : vector<8x512xf32> to vector<8x128xf32>
    %627 = arith.negf %626 : vector<8x128xf32>
    %628 = math.exp %627 : vector<8x128xf32>
    %cst_153 = arith.constant 1.000000e+00 : f32
    %629 = vector.broadcast %cst_153 : f32 to vector<8x128xf32>
    %630 = arith.addf %629, %628 : vector<8x128xf32>
    %631 = arith.divf %629, %630 : vector<8x128xf32>
    %632 = arith.mulf %623, %602 : vector<8x128xf32>
    %633 = arith.mulf %617, %625 : vector<8x128xf32>
    %634 = arith.addf %632, %633 : vector<8x128xf32>
    %635 = math.tanh %634 : vector<8x128xf32>
    %636 = arith.mulf %631, %635 : vector<8x128xf32>
    %637 = vector.broadcast %603 : i32 to vector<8x1xi32>
    %638 = arith.cmpi slt, %637, %0 : vector<8x1xi32>
    %cst_154 = arith.constant 0.000000e+00 : f32
    %639 = vector.shape_cast %638 : vector<8x1xi1> to vector<8x1xi1>
    %640 = vector.broadcast %639 : vector<8x1xi1> to vector<8x128xi1>
    %641 = vector.broadcast %cst_154 : f32 to vector<8x128xf32>
    %642 = arith.select %640, %636, %641 : vector<8x128xi1>, vector<8x128xf32>
    %643 = arith.index_cast %603 : i32 to index
    %c0_155 = arith.constant 0 : index
    %c128_156 = arith.constant 128 : index
    %644 = vector.load %arg13[%643, %c0_155, %c128_156] : memref<8x8x256xf32, #tpu.memory_space<vmem>>, vector<1x8x128xf32>
    %645 = vector.shape_cast %644 : vector<1x8x128xf32> to vector<8x128xf32>
    %646 = vector.shape_cast %642 : vector<8x128xf32> to vector<1x8x128xf32>
    tpu.vector_store %arg13[%643, %c0_155, %c128_156], %646 {strides = array<i32>} : memref<8x8x256xf32, #tpu.memory_space<vmem>>, vector<1x8x128xf32>,
    %647 = vector.shape_cast %638 : vector<8x1xi1> to vector<8x1xi1>
    %648 = vector.broadcast %647 : vector<8x1xi1> to vector<8x128xi1>
    %649 = arith.select %648, %636, %599 : vector<8x128xi1>, vector<8x128xf32>
    %650 = vector.shape_cast %638 : vector<8x1xi1> to vector<8x1xi1>
    %651 = vector.broadcast %650 : vector<8x1xi1> to vector<8x128xi1>
    %652 = arith.select %651, %634, %602 : vector<8x128xi1>, vector<8x128xf32>
    %c5_i32_157 = arith.constant 5 : i32
    %c7_i32_158 = arith.constant 7 : i32
    %653 = arith.subi %c7_i32_158, %c5_i32_157 : i32
    %654 = arith.index_cast %653 : i32 to index
    %c0_159 = arith.constant 0 : index
    %c0_160 = arith.constant 0 : index
    %655 = vector.load %arg2[%654, %c0_159, %c0_160] : memref<8x8x32xf32, #tpu.memory_space<vmem>>, vector<1x8x32xf32>
    %656 = vector.shape_cast %655 : vector<1x8x32xf32> to vector<8x32xf32>
    %cst_161 = arith.constant dense<0.000000e+00> : vector<8x512xf32>
    %657 = tpu.matmul %656, %4, %cst_161 {dimension_numbers = #tpu.dot_dimension_numbers<[1], [0], [0], [1], [0, 0, 1, 1], [], []>} : vector<8x32xf32>, vector<32x512xf32>, vector<8x512xf32> -> vector<8x512xf32>
    %cst_162 = arith.constant dense<0.000000e+00> : vector<8x512xf32>
    %658 = tpu.matmul %649, %5, %cst_162 {dimension_numbers = #tpu.dot_dimension_numbers<[1], [0], [0], [1], [0, 0, 1, 1], [], []>} : vector<8x128xf32>, vector<128x512xf32>, vector<8x512xf32> -> vector<8x512xf32>
    %659 = arith.addf %657, %658 : vector<8x512xf32>
    %660 = vector.broadcast %6 : vector<1x512xf32> to vector<8x512xf32>
    %661 = arith.addf %659, %660 : vector<8x512xf32>
    %662 = vector.extract_strided_slice %661 {offsets = [0, 0], sizes = [8, 128], strides = [1, 1]} : vector<8x512xf32> to vector<8x128xf32>
    %663 = arith.negf %662 : vector<8x128xf32>
    %664 = math.exp %663 : vector<8x128xf32>
    %cst_163 = arith.constant 1.000000e+00 : f32
    %665 = vector.broadcast %cst_163 : f32 to vector<8x128xf32>
    %666 = arith.addf %665, %664 : vector<8x128xf32>
    %667 = arith.divf %665, %666 : vector<8x128xf32>
    %668 = vector.extract_strided_slice %661 {offsets = [0, 128], sizes = [8, 128], strides = [1, 1]} : vector<8x512xf32> to vector<8x128xf32>
    %669 = arith.negf %668 : vector<8x128xf32>
    %670 = math.exp %669 : vector<8x128xf32>
    %cst_164 = arith.constant 1.000000e+00 : f32
    %671 = vector.broadcast %cst_164 : f32 to vector<8x128xf32>
    %672 = arith.addf %671, %670 : vector<8x128xf32>
    %673 = arith.divf %671, %672 : vector<8x128xf32>
    %674 = vector.extract_strided_slice %661 {offsets = [0, 256], sizes = [8, 128], strides = [1, 1]} : vector<8x512xf32> to vector<8x128xf32>
    %675 = math.tanh %674 : vector<8x128xf32>
    %676 = vector.extract_strided_slice %661 {offsets = [0, 384], sizes = [8, 128], strides = [1, 1]} : vector<8x512xf32> to vector<8x128xf32>
    %677 = arith.negf %676 : vector<8x128xf32>
    %678 = math.exp %677 : vector<8x128xf32>
    %cst_165 = arith.constant 1.000000e+00 : f32
    %679 = vector.broadcast %cst_165 : f32 to vector<8x128xf32>
    %680 = arith.addf %679, %678 : vector<8x128xf32>
    %681 = arith.divf %679, %680 : vector<8x128xf32>
    %682 = arith.mulf %673, %652 : vector<8x128xf32>
    %683 = arith.mulf %667, %675 : vector<8x128xf32>
    %684 = arith.addf %682, %683 : vector<8x128xf32>
    %685 = math.tanh %684 : vector<8x128xf32>
    %686 = arith.mulf %681, %685 : vector<8x128xf32>
    %687 = vector.broadcast %653 : i32 to vector<8x1xi32>
    %688 = arith.cmpi slt, %687, %0 : vector<8x1xi32>
    %cst_166 = arith.constant 0.000000e+00 : f32
    %689 = vector.shape_cast %688 : vector<8x1xi1> to vector<8x1xi1>
    %690 = vector.broadcast %689 : vector<8x1xi1> to vector<8x128xi1>
    %691 = vector.broadcast %cst_166 : f32 to vector<8x128xf32>
    %692 = arith.select %690, %686, %691 : vector<8x128xi1>, vector<8x128xf32>
    %693 = arith.index_cast %653 : i32 to index
    %c0_167 = arith.constant 0 : index
    %c128_168 = arith.constant 128 : index
    %694 = vector.load %arg13[%693, %c0_167, %c128_168] : memref<8x8x256xf32, #tpu.memory_space<vmem>>, vector<1x8x128xf32>
    %695 = vector.shape_cast %694 : vector<1x8x128xf32> to vector<8x128xf32>
    %696 = vector.shape_cast %692 : vector<8x128xf32> to vector<1x8x128xf32>
    tpu.vector_store %arg13[%693, %c0_167, %c128_168], %696 {strides = array<i32>} : memref<8x8x256xf32, #tpu.memory_space<vmem>>, vector<1x8x128xf32>,
    %697 = vector.shape_cast %688 : vector<8x1xi1> to vector<8x1xi1>
    %698 = vector.broadcast %697 : vector<8x1xi1> to vector<8x128xi1>
    %699 = arith.select %698, %686, %649 : vector<8x128xi1>, vector<8x128xf32>
    %700 = vector.shape_cast %688 : vector<8x1xi1> to vector<8x1xi1>
    %701 = vector.broadcast %700 : vector<8x1xi1> to vector<8x128xi1>
    %702 = arith.select %701, %684, %652 : vector<8x128xi1>, vector<8x128xf32>
    %c6_i32_169 = arith.constant 6 : i32
    %c7_i32_170 = arith.constant 7 : i32
    %703 = arith.subi %c7_i32_170, %c6_i32_169 : i32
    %704 = arith.index_cast %703 : i32 to index
    %c0_171 = arith.constant 0 : index
    %c0_172 = arith.constant 0 : index
    %705 = vector.load %arg2[%704, %c0_171, %c0_172] : memref<8x8x32xf32, #tpu.memory_space<vmem>>, vector<1x8x32xf32>
    %706 = vector.shape_cast %705 : vector<1x8x32xf32> to vector<8x32xf32>
    %cst_173 = arith.constant dense<0.000000e+00> : vector<8x512xf32>
    %707 = tpu.matmul %706, %4, %cst_173 {dimension_numbers = #tpu.dot_dimension_numbers<[1], [0], [0], [1], [0, 0, 1, 1], [], []>} : vector<8x32xf32>, vector<32x512xf32>, vector<8x512xf32> -> vector<8x512xf32>
    %cst_174 = arith.constant dense<0.000000e+00> : vector<8x512xf32>
    %708 = tpu.matmul %699, %5, %cst_174 {dimension_numbers = #tpu.dot_dimension_numbers<[1], [0], [0], [1], [0, 0, 1, 1], [], []>} : vector<8x128xf32>, vector<128x512xf32>, vector<8x512xf32> -> vector<8x512xf32>
    %709 = arith.addf %707, %708 : vector<8x512xf32>
    %710 = vector.broadcast %6 : vector<1x512xf32> to vector<8x512xf32>
    %711 = arith.addf %709, %710 : vector<8x512xf32>
    %712 = vector.extract_strided_slice %711 {offsets = [0, 0], sizes = [8, 128], strides = [1, 1]} : vector<8x512xf32> to vector<8x128xf32>
    %713 = arith.negf %712 : vector<8x128xf32>
    %714 = math.exp %713 : vector<8x128xf32>
    %cst_175 = arith.constant 1.000000e+00 : f32
    %715 = vector.broadcast %cst_175 : f32 to vector<8x128xf32>
    %716 = arith.addf %715, %714 : vector<8x128xf32>
    %717 = arith.divf %715, %716 : vector<8x128xf32>
    %718 = vector.extract_strided_slice %711 {offsets = [0, 128], sizes = [8, 128], strides = [1, 1]} : vector<8x512xf32> to vector<8x128xf32>
    %719 = arith.negf %718 : vector<8x128xf32>
    %720 = math.exp %719 : vector<8x128xf32>
    %cst_176 = arith.constant 1.000000e+00 : f32
    %721 = vector.broadcast %cst_176 : f32 to vector<8x128xf32>
    %722 = arith.addf %721, %720 : vector<8x128xf32>
    %723 = arith.divf %721, %722 : vector<8x128xf32>
    %724 = vector.extract_strided_slice %711 {offsets = [0, 256], sizes = [8, 128], strides = [1, 1]} : vector<8x512xf32> to vector<8x128xf32>
    %725 = math.tanh %724 : vector<8x128xf32>
    %726 = vector.extract_strided_slice %711 {offsets = [0, 384], sizes = [8, 128], strides = [1, 1]} : vector<8x512xf32> to vector<8x128xf32>
    %727 = arith.negf %726 : vector<8x128xf32>
    %728 = math.exp %727 : vector<8x128xf32>
    %cst_177 = arith.constant 1.000000e+00 : f32
    %729 = vector.broadcast %cst_177 : f32 to vector<8x128xf32>
    %730 = arith.addf %729, %728 : vector<8x128xf32>
    %731 = arith.divf %729, %730 : vector<8x128xf32>
    %732 = arith.mulf %723, %702 : vector<8x128xf32>
    %733 = arith.mulf %717, %725 : vector<8x128xf32>
    %734 = arith.addf %732, %733 : vector<8x128xf32>
    %735 = math.tanh %734 : vector<8x128xf32>
    %736 = arith.mulf %731, %735 : vector<8x128xf32>
    %737 = vector.broadcast %703 : i32 to vector<8x1xi32>
    %738 = arith.cmpi slt, %737, %0 : vector<8x1xi32>
    %cst_178 = arith.constant 0.000000e+00 : f32
    %739 = vector.shape_cast %738 : vector<8x1xi1> to vector<8x1xi1>
    %740 = vector.broadcast %739 : vector<8x1xi1> to vector<8x128xi1>
    %741 = vector.broadcast %cst_178 : f32 to vector<8x128xf32>
    %742 = arith.select %740, %736, %741 : vector<8x128xi1>, vector<8x128xf32>
    %743 = arith.index_cast %703 : i32 to index
    %c0_179 = arith.constant 0 : index
    %c128_180 = arith.constant 128 : index
    %744 = vector.load %arg13[%743, %c0_179, %c128_180] : memref<8x8x256xf32, #tpu.memory_space<vmem>>, vector<1x8x128xf32>
    %745 = vector.shape_cast %744 : vector<1x8x128xf32> to vector<8x128xf32>
    %746 = vector.shape_cast %742 : vector<8x128xf32> to vector<1x8x128xf32>
    tpu.vector_store %arg13[%743, %c0_179, %c128_180], %746 {strides = array<i32>} : memref<8x8x256xf32, #tpu.memory_space<vmem>>, vector<1x8x128xf32>,
    %747 = vector.shape_cast %738 : vector<8x1xi1> to vector<8x1xi1>
    %748 = vector.broadcast %747 : vector<8x1xi1> to vector<8x128xi1>
    %749 = arith.select %748, %736, %699 : vector<8x128xi1>, vector<8x128xf32>
    %750 = vector.shape_cast %738 : vector<8x1xi1> to vector<8x1xi1>
    %751 = vector.broadcast %750 : vector<8x1xi1> to vector<8x128xi1>
    %752 = arith.select %751, %734, %702 : vector<8x128xi1>, vector<8x128xf32>
    %c7_i32_181 = arith.constant 7 : i32
    %c7_i32_182 = arith.constant 7 : i32
    %753 = arith.subi %c7_i32_182, %c7_i32_181 : i32
    %754 = arith.index_cast %753 : i32 to index
    %c0_183 = arith.constant 0 : index
    %c0_184 = arith.constant 0 : index
    %755 = vector.load %arg2[%754, %c0_183, %c0_184] : memref<8x8x32xf32, #tpu.memory_space<vmem>>, vector<1x8x32xf32>
    %756 = vector.shape_cast %755 : vector<1x8x32xf32> to vector<8x32xf32>
    %cst_185 = arith.constant dense<0.000000e+00> : vector<8x512xf32>
    %757 = tpu.matmul %756, %4, %cst_185 {dimension_numbers = #tpu.dot_dimension_numbers<[1], [0], [0], [1], [0, 0, 1, 1], [], []>} : vector<8x32xf32>, vector<32x512xf32>, vector<8x512xf32> -> vector<8x512xf32>
    %cst_186 = arith.constant dense<0.000000e+00> : vector<8x512xf32>
    %758 = tpu.matmul %749, %5, %cst_186 {dimension_numbers = #tpu.dot_dimension_numbers<[1], [0], [0], [1], [0, 0, 1, 1], [], []>} : vector<8x128xf32>, vector<128x512xf32>, vector<8x512xf32> -> vector<8x512xf32>
    %759 = arith.addf %757, %758 : vector<8x512xf32>
    %760 = vector.broadcast %6 : vector<1x512xf32> to vector<8x512xf32>
    %761 = arith.addf %759, %760 : vector<8x512xf32>
    %762 = vector.extract_strided_slice %761 {offsets = [0, 0], sizes = [8, 128], strides = [1, 1]} : vector<8x512xf32> to vector<8x128xf32>
    %763 = arith.negf %762 : vector<8x128xf32>
    %764 = math.exp %763 : vector<8x128xf32>
    %cst_187 = arith.constant 1.000000e+00 : f32
    %765 = vector.broadcast %cst_187 : f32 to vector<8x128xf32>
    %766 = arith.addf %765, %764 : vector<8x128xf32>
    %767 = arith.divf %765, %766 : vector<8x128xf32>
    %768 = vector.extract_strided_slice %761 {offsets = [0, 128], sizes = [8, 128], strides = [1, 1]} : vector<8x512xf32> to vector<8x128xf32>
    %769 = arith.negf %768 : vector<8x128xf32>
    %770 = math.exp %769 : vector<8x128xf32>
    %cst_188 = arith.constant 1.000000e+00 : f32
    %771 = vector.broadcast %cst_188 : f32 to vector<8x128xf32>
    %772 = arith.addf %771, %770 : vector<8x128xf32>
    %773 = arith.divf %771, %772 : vector<8x128xf32>
    %774 = vector.extract_strided_slice %761 {offsets = [0, 256], sizes = [8, 128], strides = [1, 1]} : vector<8x512xf32> to vector<8x128xf32>
    %775 = math.tanh %774 : vector<8x128xf32>
    %776 = vector.extract_strided_slice %761 {offsets = [0, 384], sizes = [8, 128], strides = [1, 1]} : vector<8x512xf32> to vector<8x128xf32>
    %777 = arith.negf %776 : vector<8x128xf32>
    %778 = math.exp %777 : vector<8x128xf32>
    %cst_189 = arith.constant 1.000000e+00 : f32
    %779 = vector.broadcast %cst_189 : f32 to vector<8x128xf32>
    %780 = arith.addf %779, %778 : vector<8x128xf32>
    %781 = arith.divf %779, %780 : vector<8x128xf32>
    %782 = arith.mulf %773, %752 : vector<8x128xf32>
    %783 = arith.mulf %767, %775 : vector<8x128xf32>
    %784 = arith.addf %782, %783 : vector<8x128xf32>
    %785 = math.tanh %784 : vector<8x128xf32>
    %786 = arith.mulf %781, %785 : vector<8x128xf32>
    %787 = vector.broadcast %753 : i32 to vector<8x1xi32>
    %788 = arith.cmpi slt, %787, %0 : vector<8x1xi32>
    %cst_190 = arith.constant 0.000000e+00 : f32
    %789 = vector.shape_cast %788 : vector<8x1xi1> to vector<8x1xi1>
    %790 = vector.broadcast %789 : vector<8x1xi1> to vector<8x128xi1>
    %791 = vector.broadcast %cst_190 : f32 to vector<8x128xf32>
    %792 = arith.select %790, %786, %791 : vector<8x128xi1>, vector<8x128xf32>
    %793 = arith.index_cast %753 : i32 to index
    %c0_191 = arith.constant 0 : index
    %c128_192 = arith.constant 128 : index
    %794 = vector.load %arg13[%793, %c0_191, %c128_192] : memref<8x8x256xf32, #tpu.memory_space<vmem>>, vector<1x8x128xf32>
    %795 = vector.shape_cast %794 : vector<1x8x128xf32> to vector<8x128xf32>
    %796 = vector.shape_cast %792 : vector<8x128xf32> to vector<1x8x128xf32>
    tpu.vector_store %arg13[%793, %c0_191, %c128_192], %796 {strides = array<i32>} : memref<8x8x256xf32, #tpu.memory_space<vmem>>, vector<1x8x128xf32>,
    %797 = vector.shape_cast %788 : vector<8x1xi1> to vector<8x1xi1>
    %798 = vector.broadcast %797 : vector<8x1xi1> to vector<8x128xi1>
    %799 = arith.select %798, %786, %749 : vector<8x128xi1>, vector<8x128xf32>
    %800 = vector.shape_cast %788 : vector<8x1xi1> to vector<8x1xi1>
    %801 = vector.broadcast %800 : vector<8x1xi1> to vector<8x128xi1>
    %802 = arith.select %801, %784, %752 : vector<8x128xi1>, vector<8x128xf32>
    %c8_i32_193 = arith.constant 8 : i32
    %803 = vector.extract_strided_slice %7 {offsets = [0, 0], sizes = [128, 128], strides = [1, 1]} : vector<256x128xf32> to vector<128x128xf32>
    %cst_194 = arith.constant dense<0.000000e+00> : vector<8x128xf32>
    %804 = tpu.matmul %399, %803, %cst_194 {dimension_numbers = #tpu.dot_dimension_numbers<[1], [0], [0], [1], [0, 0, 1, 1], [], []>} : vector<8x128xf32>, vector<128x128xf32>, vector<8x128xf32> -> vector<8x128xf32>
    %805 = vector.extract_strided_slice %7 {offsets = [128, 0], sizes = [128, 128], strides = [1, 1]} : vector<256x128xf32> to vector<128x128xf32>
    %cst_195 = arith.constant dense<0.000000e+00> : vector<8x128xf32>
    %806 = tpu.matmul %799, %805, %cst_195 {dimension_numbers = #tpu.dot_dimension_numbers<[1], [0], [0], [1], [0, 0, 1, 1], [], []>} : vector<8x128xf32>, vector<128x128xf32>, vector<8x128xf32> -> vector<8x128xf32>
    %807 = arith.addf %804, %806 : vector<8x128xf32>
    %c0_196 = arith.constant 0 : index
    %c0_197 = arith.constant 0 : index
    %808 = vector.load %arg10[%c0_196, %c0_197] : memref<1x128xf32, #tpu.memory_space<vmem>>, vector<1x128xf32>
    %809 = vector.broadcast %808 : vector<1x128xf32> to vector<8x128xf32>
    %810 = arith.addf %807, %809 : vector<8x128xf32>
    %c0_198 = arith.constant 0 : index
    %c0_199 = arith.constant 0 : index
    %811 = vector.load %arg14[%c0_198, %c0_199] : memref<8x128xf32, #tpu.memory_space<vmem>>, vector<8x128xf32>
    tpu.vector_store %arg14[%c0_198, %c0_199], %810 {strides = array<i32>} : memref<8x128xf32, #tpu.memory_space<vmem>>, vector<8x128xf32>,
    %812 = vector.extract_strided_slice %8 {offsets = [0, 0], sizes = [128, 128], strides = [1, 1]} : vector<256x128xf32> to vector<128x128xf32>
    %cst_200 = arith.constant dense<0.000000e+00> : vector<8x128xf32>
    %813 = tpu.matmul %402, %812, %cst_200 {dimension_numbers = #tpu.dot_dimension_numbers<[1], [0], [0], [1], [0, 0, 1, 1], [], []>} : vector<8x128xf32>, vector<128x128xf32>, vector<8x128xf32> -> vector<8x128xf32>
    %814 = vector.extract_strided_slice %8 {offsets = [128, 0], sizes = [128, 128], strides = [1, 1]} : vector<256x128xf32> to vector<128x128xf32>
    %cst_201 = arith.constant dense<0.000000e+00> : vector<8x128xf32>
    %815 = tpu.matmul %802, %814, %cst_201 {dimension_numbers = #tpu.dot_dimension_numbers<[1], [0], [0], [1], [0, 0, 1, 1], [], []>} : vector<8x128xf32>, vector<128x128xf32>, vector<8x128xf32> -> vector<8x128xf32>
    %816 = arith.addf %813, %815 : vector<8x128xf32>
    %c0_202 = arith.constant 0 : index
    %c0_203 = arith.constant 0 : index
    %817 = vector.load %arg12[%c0_202, %c0_203] : memref<1x128xf32, #tpu.memory_space<vmem>>, vector<1x128xf32>
    %818 = vector.broadcast %817 : vector<1x128xf32> to vector<8x128xf32>
    %819 = arith.addf %816, %818 : vector<8x128xf32>
    %c0_204 = arith.constant 0 : index
    %c0_205 = arith.constant 0 : index
    %820 = vector.load %arg15[%c0_204, %c0_205] : memref<8x128xf32, #tpu.memory_space<vmem>>, vector<8x128xf32>
    tpu.vector_store %arg15[%c0_204, %c0_205], %819 {strides = array<i32>} : memref<8x128xf32, #tpu.memory_space<vmem>>, vector<8x128xf32>,
    return
  }
  func.func @transform_0(%arg0: i32) -> (i32, i32) {
    %c0_i32 = arith.constant 0 : i32
    %c0_i32_0 = arith.constant 0 : i32
    return %arg0, %c0_i32 : i32, i32
  }
  func.func @transform_1(%arg0: i32) -> (i32, i32, i32) {
    %c0_i32 = arith.constant 0 : i32
    %c0_i32_0 = arith.constant 0 : i32
    %c0_i32_1 = arith.constant 0 : i32
    return %c0_i32, %arg0, %c0_i32_0 : i32, i32, i32
  }
  func.func @transform_2(%arg0: i32) -> (i32, i32) {
    %c0_i32 = arith.constant 0 : i32
    %c0_i32_0 = arith.constant 0 : i32
    %c0_i32_1 = arith.constant 0 : i32
    return %c0_i32, %c0_i32_0 : i32, i32
  }
  func.func @transform_3(%arg0: i32) -> (i32, i32) {
    %c0_i32 = arith.constant 0 : i32
    %c0_i32_0 = arith.constant 0 : i32
    %c0_i32_1 = arith.constant 0 : i32
    return %c0_i32, %c0_i32_0 : i32, i32
  }
  func.func @transform_4(%arg0: i32) -> (i32, i32) {
    %c0_i32 = arith.constant 0 : i32
    %c0_i32_0 = arith.constant 0 : i32
    %c0_i32_1 = arith.constant 0 : i32
    return %c0_i32, %c0_i32_0 : i32, i32
  }
  func.func @transform_5(%arg0: i32) -> (i32, i32) {
    %c0_i32 = arith.constant 0 : i32
    %c0_i32_0 = arith.constant 0 : i32
    %c0_i32_1 = arith.constant 0 : i32
    return %c0_i32, %c0_i32_0 : i32, i32
  }
  func.func @transform_6(%arg0: i32) -> (i32, i32) {
    %c0_i32 = arith.constant 0 : i32
    %c0_i32_0 = arith.constant 0 : i32
    %c0_i32_1 = arith.constant 0 : i32
    return %c0_i32, %c0_i32_0 : i32, i32
  }
  func.func @transform_7(%arg0: i32) -> (i32, i32) {
    %c0_i32 = arith.constant 0 : i32
    %c0_i32_0 = arith.constant 0 : i32
    %c0_i32_1 = arith.constant 0 : i32
    return %c0_i32, %c0_i32_0 : i32, i32
  }
  func.func @transform_8(%arg0: i32) -> (i32, i32) {
    %c0_i32 = arith.constant 0 : i32
    %c0_i32_0 = arith.constant 0 : i32
    %c0_i32_1 = arith.constant 0 : i32
    return %c0_i32, %c0_i32_0 : i32, i32
  }
  func.func @transform_9(%arg0: i32) -> (i32, i32) {
    %c0_i32 = arith.constant 0 : i32
    %c0_i32_0 = arith.constant 0 : i32
    %c0_i32_1 = arith.constant 0 : i32
    return %c0_i32, %c0_i32_0 : i32, i32
  }
  func.func @transform_10(%arg0: i32) -> (i32, i32) {
    %c0_i32 = arith.constant 0 : i32
    %c0_i32_0 = arith.constant 0 : i32
    %c0_i32_1 = arith.constant 0 : i32
    return %c0_i32, %c0_i32_0 : i32, i32
  }
  func.func @transform_11(%arg0: i32) -> (i32, i32) {
    %c0_i32 = arith.constant 0 : i32
    %c0_i32_0 = arith.constant 0 : i32
    %c0_i32_1 = arith.constant 0 : i32
    return %c0_i32, %c0_i32_0 : i32, i32
  }
  func.func @transform_12(%arg0: i32) -> (i32, i32, i32) {
    %c0_i32 = arith.constant 0 : i32
    %c0_i32_0 = arith.constant 0 : i32
    %c0_i32_1 = arith.constant 0 : i32
    return %c0_i32, %arg0, %c0_i32_0 : i32, i32, i32
  }
  func.func @transform_13(%arg0: i32) -> (i32, i32) {
    %c0_i32 = arith.constant 0 : i32
    %c0_i32_0 = arith.constant 0 : i32
    return %arg0, %c0_i32 : i32, i32
  }
  func.func @transform_14(%arg0: i32) -> (i32, i32) {
    %c0_i32 = arith.constant 0 : i32
    %c0_i32_0 = arith.constant 0 : i32
    return %arg0, %c0_i32 : i32, i32
  }
}

module attributes {stable_mosaic.version = 11 : i64} {
  func.func @decoder_kernel(%arg0: i32, %arg1: memref<6x8x128xf32, #tpu.memory_space<vmem>>, %arg2: memref<8x128xf32, #tpu.memory_space<vmem>>, %arg3: memref<1x128xf32, #tpu.memory_space<vmem>>, %arg4: memref<128x384xf32, #tpu.memory_space<vmem>>, %arg5: memref<128x384xf32, #tpu.memory_space<vmem>>, %arg6: memref<1x384xf32, #tpu.memory_space<vmem>>, %arg7: memref<1x384xf32, #tpu.memory_space<vmem>>, %arg8: memref<128x128xf32, #tpu.memory_space<vmem>>, %arg9: memref<1x128xf32, #tpu.memory_space<vmem>>, %arg10: memref<8x1xf32, #tpu.memory_space<vmem>>) attributes {dimension_semantics = [#tpu.dimension_semantics<parallel>], iteration_bounds = array<i64: 1>, scalar_prefetch = 0 : i64, scratch_operands = 0 : i64, tpu.core_type = #tpu.core_type<tc>, window_params = [{transform_indices = @transform_0, window_bounds = array<i64: 6, 8, 128>}, {transform_indices = @transform_1, window_bounds = array<i64: 8, 128>}, {pipeline_mode = #tpu.pipeline_mode<synchronous>, transform_indices = @transform_2, window_bounds = array<i64: 1, 128>}, {pipeline_mode = #tpu.pipeline_mode<synchronous>, transform_indices = @transform_3, window_bounds = array<i64: 128, 384>}, {pipeline_mode = #tpu.pipeline_mode<synchronous>, transform_indices = @transform_4, window_bounds = array<i64: 128, 384>}, {pipeline_mode = #tpu.pipeline_mode<synchronous>, transform_indices = @transform_5, window_bounds = array<i64: 1, 384>}, {pipeline_mode = #tpu.pipeline_mode<synchronous>, transform_indices = @transform_6, window_bounds = array<i64: 1, 384>}, {pipeline_mode = #tpu.pipeline_mode<synchronous>, transform_indices = @transform_7, window_bounds = array<i64: 128, 128>}, {pipeline_mode = #tpu.pipeline_mode<synchronous>, transform_indices = @transform_8, window_bounds = array<i64: 1, 128>}, {transform_indices = @transform_9, window_bounds = array<i64: 8, 1>}]} {
    %c0 = arith.constant 0 : index
    %c0_0 = arith.constant 0 : index
    %0 = vector.load %arg3[%c0, %c0_0] : memref<1x128xf32, #tpu.memory_space<vmem>>, vector<1x128xf32>
    %cst = arith.constant 0.000000e+00 : f32
    %1 = vector.broadcast %cst : f32 to vector<1x128xf32>
    %2 = arith.maximumf %0, %1 : vector<1x128xf32>
    %c0_1 = arith.constant 0 : index
    %c0_2 = arith.constant 0 : index
    %3 = vector.load %arg4[%c0_1, %c0_2] : memref<128x384xf32, #tpu.memory_space<vmem>>, vector<128x384xf32>
    %c0_3 = arith.constant 0 : index
    %c0_4 = arith.constant 0 : index
    %4 = vector.load %arg5[%c0_3, %c0_4] : memref<128x384xf32, #tpu.memory_space<vmem>>, vector<128x384xf32>
    %c0_5 = arith.constant 0 : index
    %c0_6 = arith.constant 0 : index
    %5 = vector.load %arg6[%c0_5, %c0_6] : memref<1x384xf32, #tpu.memory_space<vmem>>, vector<1x384xf32>
    %c0_7 = arith.constant 0 : index
    %c0_8 = arith.constant 0 : index
    %6 = vector.load %arg7[%c0_7, %c0_8] : memref<1x384xf32, #tpu.memory_space<vmem>>, vector<1x384xf32>
    %c0_9 = arith.constant 0 : index
    %c0_10 = arith.constant 0 : index
    %7 = vector.load %arg8[%c0_9, %c0_10] : memref<128x128xf32, #tpu.memory_space<vmem>>, vector<128x128xf32>
    %c0_11 = arith.constant 0 : index
    %c0_12 = arith.constant 0 : index
    %8 = vector.load %arg9[%c0_11, %c0_12] : memref<1x128xf32, #tpu.memory_space<vmem>>, vector<1x128xf32>
    %cst_13 = arith.constant dense<0.000000e+00> : vector<1x384xf32>
    %9 = tpu.matmul %2, %3, %cst_13 {dimension_numbers = #tpu.dot_dimension_numbers<[1], [0], [0], [1], [0, 0, 1, 1], [], []>} : vector<1x128xf32>, vector<128x384xf32>, vector<1x384xf32> -> vector<1x384xf32>
    %10 = arith.addf %9, %5 : vector<1x384xf32>
    %11 = vector.shape_cast %10 : vector<1x384xf32> to vector<1x384xf32>
    %12 = vector.broadcast %11 : vector<1x384xf32> to vector<8x384xf32>
    %13 = vector.extract_strided_slice %12 {offsets = [0, 0], sizes = [8, 128], strides = [1, 1]} : vector<8x384xf32> to vector<8x128xf32>
    %14 = vector.extract_strided_slice %12 {offsets = [0, 128], sizes = [8, 128], strides = [1, 1]} : vector<8x384xf32> to vector<8x128xf32>
    %15 = vector.extract_strided_slice %12 {offsets = [0, 256], sizes = [8, 128], strides = [1, 1]} : vector<8x384xf32> to vector<8x128xf32>
    %c0_14 = arith.constant 0 : index
    %c0_15 = arith.constant 0 : index
    %16 = vector.load %arg2[%c0_14, %c0_15] : memref<8x128xf32, #tpu.memory_space<vmem>>, vector<8x128xf32>
    %cst_16 = arith.constant 0.000000e+00 : f32
    %17 = vector.broadcast %cst_16 : f32 to vector<8x1xf32>
    %c0_i32 = arith.constant 0 : i32
    %cst_17 = arith.constant dense<0.000000e+00> : vector<8x384xf32>
    %18 = tpu.matmul %16, %4, %cst_17 {dimension_numbers = #tpu.dot_dimension_numbers<[1], [0], [0], [1], [0, 0, 1, 1], [], []>} : vector<8x128xf32>, vector<128x384xf32>, vector<8x384xf32> -> vector<8x384xf32>
    %19 = vector.broadcast %6 : vector<1x384xf32> to vector<8x384xf32>
    %20 = arith.addf %18, %19 : vector<8x384xf32>
    %21 = vector.extract_strided_slice %20 {offsets = [0, 0], sizes = [8, 128], strides = [1, 1]} : vector<8x384xf32> to vector<8x128xf32>
    %22 = arith.addf %13, %21 : vector<8x128xf32>
    %23 = arith.negf %22 : vector<8x128xf32>
    %24 = math.exp %23 : vector<8x128xf32>
    %cst_18 = arith.constant 1.000000e+00 : f32
    %25 = vector.broadcast %cst_18 : f32 to vector<8x128xf32>
    %26 = arith.addf %25, %24 : vector<8x128xf32>
    %27 = arith.divf %25, %26 : vector<8x128xf32>
    %28 = vector.extract_strided_slice %20 {offsets = [0, 128], sizes = [8, 128], strides = [1, 1]} : vector<8x384xf32> to vector<8x128xf32>
    %29 = arith.addf %14, %28 : vector<8x128xf32>
    %30 = arith.negf %29 : vector<8x128xf32>
    %31 = math.exp %30 : vector<8x128xf32>
    %cst_19 = arith.constant 1.000000e+00 : f32
    %32 = vector.broadcast %cst_19 : f32 to vector<8x128xf32>
    %33 = arith.addf %32, %31 : vector<8x128xf32>
    %34 = arith.divf %32, %33 : vector<8x128xf32>
    %35 = vector.extract_strided_slice %20 {offsets = [0, 256], sizes = [8, 128], strides = [1, 1]} : vector<8x384xf32> to vector<8x128xf32>
    %36 = arith.mulf %27, %35 : vector<8x128xf32>
    %37 = arith.addf %15, %36 : vector<8x128xf32>
    %38 = math.tanh %37 : vector<8x128xf32>
    %cst_20 = arith.constant 1.000000e+00 : f32
    %39 = vector.broadcast %cst_20 : f32 to vector<8x128xf32>
    %40 = arith.subf %39, %34 : vector<8x128xf32>
    %41 = arith.mulf %40, %38 : vector<8x128xf32>
    %42 = arith.mulf %34, %16 : vector<8x128xf32>
    %43 = arith.addf %41, %42 : vector<8x128xf32>
    %cst_21 = arith.constant dense<0.000000e+00> : vector<8x128xf32>
    %44 = tpu.matmul %43, %7, %cst_21 {dimension_numbers = #tpu.dot_dimension_numbers<[1], [0], [0], [1], [0, 0, 1, 1], [], []>} : vector<8x128xf32>, vector<128x128xf32>, vector<8x128xf32> -> vector<8x128xf32>
    %45 = vector.broadcast %8 : vector<1x128xf32> to vector<8x128xf32>
    %46 = arith.addf %44, %45 : vector<8x128xf32>
    %cst_22 = arith.constant dense<0xFF800000> : vector<8xf32>
    %47 = vector.multi_reduction <maximumf>, %46, %cst_22 [1] : vector<8x128xf32> to vector<8xf32>
    %48 = vector.shape_cast %47 : vector<8xf32> to vector<8x1xf32>
    %49 = vector.broadcast %48 : vector<8x1xf32> to vector<8x128xf32>
    %50 = arith.subf %46, %49 : vector<8x128xf32>
    %51 = math.exp %50 : vector<8x128xf32>
    %cst_23 = arith.constant dense<0.000000e+00> : vector<8xf32>
    %52 = vector.multi_reduction <add>, %51, %cst_23 [1] : vector<8x128xf32> to vector<8xf32>
    %53 = vector.shape_cast %52 : vector<8xf32> to vector<8x1xf32>
    %54 = math.log %53 : vector<8x1xf32>
    %55 = arith.addf %48, %54 : vector<8x1xf32>
    %56 = vector.broadcast %55 : vector<8x1xf32> to vector<8x128xf32>
    %57 = arith.subf %46, %56 : vector<8x128xf32>
    %58 = arith.index_cast %c0_i32 : i32 to index
    %c0_24 = arith.constant 0 : index
    %c0_25 = arith.constant 0 : index
    %59 = vector.load %arg1[%58, %c0_24, %c0_25] : memref<6x8x128xf32, #tpu.memory_space<vmem>>, vector<1x8x128xf32>
    %60 = vector.shape_cast %59 : vector<1x8x128xf32> to vector<8x128xf32>
    %61 = arith.mulf %60, %57 : vector<8x128xf32>
    %cst_26 = arith.constant dense<0.000000e+00> : vector<8xf32>
    %62 = vector.multi_reduction <add>, %61, %cst_26 [1] : vector<8x128xf32> to vector<8xf32>
    %63 = vector.shape_cast %62 : vector<8xf32> to vector<8x1xf32>
    %cst_27 = arith.constant 0.000000e+00 : f32
    %64 = vector.broadcast %cst_27 : f32 to vector<8x1xf32>
    %65 = arith.subf %64, %63 : vector<8x1xf32>
    %66 = arith.addf %17, %65 : vector<8x1xf32>
    %c1_i32 = arith.constant 1 : i32
    %cst_28 = arith.constant dense<0.000000e+00> : vector<8x384xf32>
    %67 = tpu.matmul %43, %4, %cst_28 {dimension_numbers = #tpu.dot_dimension_numbers<[1], [0], [0], [1], [0, 0, 1, 1], [], []>} : vector<8x128xf32>, vector<128x384xf32>, vector<8x384xf32> -> vector<8x384xf32>
    %68 = vector.broadcast %6 : vector<1x384xf32> to vector<8x384xf32>
    %69 = arith.addf %67, %68 : vector<8x384xf32>
    %70 = vector.extract_strided_slice %69 {offsets = [0, 0], sizes = [8, 128], strides = [1, 1]} : vector<8x384xf32> to vector<8x128xf32>
    %71 = arith.addf %13, %70 : vector<8x128xf32>
    %72 = arith.negf %71 : vector<8x128xf32>
    %73 = math.exp %72 : vector<8x128xf32>
    %cst_29 = arith.constant 1.000000e+00 : f32
    %74 = vector.broadcast %cst_29 : f32 to vector<8x128xf32>
    %75 = arith.addf %74, %73 : vector<8x128xf32>
    %76 = arith.divf %74, %75 : vector<8x128xf32>
    %77 = vector.extract_strided_slice %69 {offsets = [0, 128], sizes = [8, 128], strides = [1, 1]} : vector<8x384xf32> to vector<8x128xf32>
    %78 = arith.addf %14, %77 : vector<8x128xf32>
    %79 = arith.negf %78 : vector<8x128xf32>
    %80 = math.exp %79 : vector<8x128xf32>
    %cst_30 = arith.constant 1.000000e+00 : f32
    %81 = vector.broadcast %cst_30 : f32 to vector<8x128xf32>
    %82 = arith.addf %81, %80 : vector<8x128xf32>
    %83 = arith.divf %81, %82 : vector<8x128xf32>
    %84 = vector.extract_strided_slice %69 {offsets = [0, 256], sizes = [8, 128], strides = [1, 1]} : vector<8x384xf32> to vector<8x128xf32>
    %85 = arith.mulf %76, %84 : vector<8x128xf32>
    %86 = arith.addf %15, %85 : vector<8x128xf32>
    %87 = math.tanh %86 : vector<8x128xf32>
    %cst_31 = arith.constant 1.000000e+00 : f32
    %88 = vector.broadcast %cst_31 : f32 to vector<8x128xf32>
    %89 = arith.subf %88, %83 : vector<8x128xf32>
    %90 = arith.mulf %89, %87 : vector<8x128xf32>
    %91 = arith.mulf %83, %43 : vector<8x128xf32>
    %92 = arith.addf %90, %91 : vector<8x128xf32>
    %cst_32 = arith.constant dense<0.000000e+00> : vector<8x128xf32>
    %93 = tpu.matmul %92, %7, %cst_32 {dimension_numbers = #tpu.dot_dimension_numbers<[1], [0], [0], [1], [0, 0, 1, 1], [], []>} : vector<8x128xf32>, vector<128x128xf32>, vector<8x128xf32> -> vector<8x128xf32>
    %94 = vector.broadcast %8 : vector<1x128xf32> to vector<8x128xf32>
    %95 = arith.addf %93, %94 : vector<8x128xf32>
    %cst_33 = arith.constant dense<0xFF800000> : vector<8xf32>
    %96 = vector.multi_reduction <maximumf>, %95, %cst_33 [1] : vector<8x128xf32> to vector<8xf32>
    %97 = vector.shape_cast %96 : vector<8xf32> to vector<8x1xf32>
    %98 = vector.broadcast %97 : vector<8x1xf32> to vector<8x128xf32>
    %99 = arith.subf %95, %98 : vector<8x128xf32>
    %100 = math.exp %99 : vector<8x128xf32>
    %cst_34 = arith.constant dense<0.000000e+00> : vector<8xf32>
    %101 = vector.multi_reduction <add>, %100, %cst_34 [1] : vector<8x128xf32> to vector<8xf32>
    %102 = vector.shape_cast %101 : vector<8xf32> to vector<8x1xf32>
    %103 = math.log %102 : vector<8x1xf32>
    %104 = arith.addf %97, %103 : vector<8x1xf32>
    %105 = vector.broadcast %104 : vector<8x1xf32> to vector<8x128xf32>
    %106 = arith.subf %95, %105 : vector<8x128xf32>
    %107 = arith.index_cast %c1_i32 : i32 to index
    %c0_35 = arith.constant 0 : index
    %c0_36 = arith.constant 0 : index
    %108 = vector.load %arg1[%107, %c0_35, %c0_36] : memref<6x8x128xf32, #tpu.memory_space<vmem>>, vector<1x8x128xf32>
    %109 = vector.shape_cast %108 : vector<1x8x128xf32> to vector<8x128xf32>
    %110 = arith.mulf %109, %106 : vector<8x128xf32>
    %cst_37 = arith.constant dense<0.000000e+00> : vector<8xf32>
    %111 = vector.multi_reduction <add>, %110, %cst_37 [1] : vector<8x128xf32> to vector<8xf32>
    %112 = vector.shape_cast %111 : vector<8xf32> to vector<8x1xf32>
    %cst_38 = arith.constant 0.000000e+00 : f32
    %113 = vector.broadcast %cst_38 : f32 to vector<8x1xf32>
    %114 = arith.subf %113, %112 : vector<8x1xf32>
    %115 = arith.addf %66, %114 : vector<8x1xf32>
    %c2_i32 = arith.constant 2 : i32
    %cst_39 = arith.constant dense<0.000000e+00> : vector<8x384xf32>
    %116 = tpu.matmul %92, %4, %cst_39 {dimension_numbers = #tpu.dot_dimension_numbers<[1], [0], [0], [1], [0, 0, 1, 1], [], []>} : vector<8x128xf32>, vector<128x384xf32>, vector<8x384xf32> -> vector<8x384xf32>
    %117 = vector.broadcast %6 : vector<1x384xf32> to vector<8x384xf32>
    %118 = arith.addf %116, %117 : vector<8x384xf32>
    %119 = vector.extract_strided_slice %118 {offsets = [0, 0], sizes = [8, 128], strides = [1, 1]} : vector<8x384xf32> to vector<8x128xf32>
    %120 = arith.addf %13, %119 : vector<8x128xf32>
    %121 = arith.negf %120 : vector<8x128xf32>
    %122 = math.exp %121 : vector<8x128xf32>
    %cst_40 = arith.constant 1.000000e+00 : f32
    %123 = vector.broadcast %cst_40 : f32 to vector<8x128xf32>
    %124 = arith.addf %123, %122 : vector<8x128xf32>
    %125 = arith.divf %123, %124 : vector<8x128xf32>
    %126 = vector.extract_strided_slice %118 {offsets = [0, 128], sizes = [8, 128], strides = [1, 1]} : vector<8x384xf32> to vector<8x128xf32>
    %127 = arith.addf %14, %126 : vector<8x128xf32>
    %128 = arith.negf %127 : vector<8x128xf32>
    %129 = math.exp %128 : vector<8x128xf32>
    %cst_41 = arith.constant 1.000000e+00 : f32
    %130 = vector.broadcast %cst_41 : f32 to vector<8x128xf32>
    %131 = arith.addf %130, %129 : vector<8x128xf32>
    %132 = arith.divf %130, %131 : vector<8x128xf32>
    %133 = vector.extract_strided_slice %118 {offsets = [0, 256], sizes = [8, 128], strides = [1, 1]} : vector<8x384xf32> to vector<8x128xf32>
    %134 = arith.mulf %125, %133 : vector<8x128xf32>
    %135 = arith.addf %15, %134 : vector<8x128xf32>
    %136 = math.tanh %135 : vector<8x128xf32>
    %cst_42 = arith.constant 1.000000e+00 : f32
    %137 = vector.broadcast %cst_42 : f32 to vector<8x128xf32>
    %138 = arith.subf %137, %132 : vector<8x128xf32>
    %139 = arith.mulf %138, %136 : vector<8x128xf32>
    %140 = arith.mulf %132, %92 : vector<8x128xf32>
    %141 = arith.addf %139, %140 : vector<8x128xf32>
    %cst_43 = arith.constant dense<0.000000e+00> : vector<8x128xf32>
    %142 = tpu.matmul %141, %7, %cst_43 {dimension_numbers = #tpu.dot_dimension_numbers<[1], [0], [0], [1], [0, 0, 1, 1], [], []>} : vector<8x128xf32>, vector<128x128xf32>, vector<8x128xf32> -> vector<8x128xf32>
    %143 = vector.broadcast %8 : vector<1x128xf32> to vector<8x128xf32>
    %144 = arith.addf %142, %143 : vector<8x128xf32>
    %cst_44 = arith.constant dense<0xFF800000> : vector<8xf32>
    %145 = vector.multi_reduction <maximumf>, %144, %cst_44 [1] : vector<8x128xf32> to vector<8xf32>
    %146 = vector.shape_cast %145 : vector<8xf32> to vector<8x1xf32>
    %147 = vector.broadcast %146 : vector<8x1xf32> to vector<8x128xf32>
    %148 = arith.subf %144, %147 : vector<8x128xf32>
    %149 = math.exp %148 : vector<8x128xf32>
    %cst_45 = arith.constant dense<0.000000e+00> : vector<8xf32>
    %150 = vector.multi_reduction <add>, %149, %cst_45 [1] : vector<8x128xf32> to vector<8xf32>
    %151 = vector.shape_cast %150 : vector<8xf32> to vector<8x1xf32>
    %152 = math.log %151 : vector<8x1xf32>
    %153 = arith.addf %146, %152 : vector<8x1xf32>
    %154 = vector.broadcast %153 : vector<8x1xf32> to vector<8x128xf32>
    %155 = arith.subf %144, %154 : vector<8x128xf32>
    %156 = arith.index_cast %c2_i32 : i32 to index
    %c0_46 = arith.constant 0 : index
    %c0_47 = arith.constant 0 : index
    %157 = vector.load %arg1[%156, %c0_46, %c0_47] : memref<6x8x128xf32, #tpu.memory_space<vmem>>, vector<1x8x128xf32>
    %158 = vector.shape_cast %157 : vector<1x8x128xf32> to vector<8x128xf32>
    %159 = arith.mulf %158, %155 : vector<8x128xf32>
    %cst_48 = arith.constant dense<0.000000e+00> : vector<8xf32>
    %160 = vector.multi_reduction <add>, %159, %cst_48 [1] : vector<8x128xf32> to vector<8xf32>
    %161 = vector.shape_cast %160 : vector<8xf32> to vector<8x1xf32>
    %cst_49 = arith.constant 0.000000e+00 : f32
    %162 = vector.broadcast %cst_49 : f32 to vector<8x1xf32>
    %163 = arith.subf %162, %161 : vector<8x1xf32>
    %164 = arith.addf %115, %163 : vector<8x1xf32>
    %c3_i32 = arith.constant 3 : i32
    %cst_50 = arith.constant dense<0.000000e+00> : vector<8x384xf32>
    %165 = tpu.matmul %141, %4, %cst_50 {dimension_numbers = #tpu.dot_dimension_numbers<[1], [0], [0], [1], [0, 0, 1, 1], [], []>} : vector<8x128xf32>, vector<128x384xf32>, vector<8x384xf32> -> vector<8x384xf32>
    %166 = vector.broadcast %6 : vector<1x384xf32> to vector<8x384xf32>
    %167 = arith.addf %165, %166 : vector<8x384xf32>
    %168 = vector.extract_strided_slice %167 {offsets = [0, 0], sizes = [8, 128], strides = [1, 1]} : vector<8x384xf32> to vector<8x128xf32>
    %169 = arith.addf %13, %168 : vector<8x128xf32>
    %170 = arith.negf %169 : vector<8x128xf32>
    %171 = math.exp %170 : vector<8x128xf32>
    %cst_51 = arith.constant 1.000000e+00 : f32
    %172 = vector.broadcast %cst_51 : f32 to vector<8x128xf32>
    %173 = arith.addf %172, %171 : vector<8x128xf32>
    %174 = arith.divf %172, %173 : vector<8x128xf32>
    %175 = vector.extract_strided_slice %167 {offsets = [0, 128], sizes = [8, 128], strides = [1, 1]} : vector<8x384xf32> to vector<8x128xf32>
    %176 = arith.addf %14, %175 : vector<8x128xf32>
    %177 = arith.negf %176 : vector<8x128xf32>
    %178 = math.exp %177 : vector<8x128xf32>
    %cst_52 = arith.constant 1.000000e+00 : f32
    %179 = vector.broadcast %cst_52 : f32 to vector<8x128xf32>
    %180 = arith.addf %179, %178 : vector<8x128xf32>
    %181 = arith.divf %179, %180 : vector<8x128xf32>
    %182 = vector.extract_strided_slice %167 {offsets = [0, 256], sizes = [8, 128], strides = [1, 1]} : vector<8x384xf32> to vector<8x128xf32>
    %183 = arith.mulf %174, %182 : vector<8x128xf32>
    %184 = arith.addf %15, %183 : vector<8x128xf32>
    %185 = math.tanh %184 : vector<8x128xf32>
    %cst_53 = arith.constant 1.000000e+00 : f32
    %186 = vector.broadcast %cst_53 : f32 to vector<8x128xf32>
    %187 = arith.subf %186, %181 : vector<8x128xf32>
    %188 = arith.mulf %187, %185 : vector<8x128xf32>
    %189 = arith.mulf %181, %141 : vector<8x128xf32>
    %190 = arith.addf %188, %189 : vector<8x128xf32>
    %cst_54 = arith.constant dense<0.000000e+00> : vector<8x128xf32>
    %191 = tpu.matmul %190, %7, %cst_54 {dimension_numbers = #tpu.dot_dimension_numbers<[1], [0], [0], [1], [0, 0, 1, 1], [], []>} : vector<8x128xf32>, vector<128x128xf32>, vector<8x128xf32> -> vector<8x128xf32>
    %192 = vector.broadcast %8 : vector<1x128xf32> to vector<8x128xf32>
    %193 = arith.addf %191, %192 : vector<8x128xf32>
    %cst_55 = arith.constant dense<0xFF800000> : vector<8xf32>
    %194 = vector.multi_reduction <maximumf>, %193, %cst_55 [1] : vector<8x128xf32> to vector<8xf32>
    %195 = vector.shape_cast %194 : vector<8xf32> to vector<8x1xf32>
    %196 = vector.broadcast %195 : vector<8x1xf32> to vector<8x128xf32>
    %197 = arith.subf %193, %196 : vector<8x128xf32>
    %198 = math.exp %197 : vector<8x128xf32>
    %cst_56 = arith.constant dense<0.000000e+00> : vector<8xf32>
    %199 = vector.multi_reduction <add>, %198, %cst_56 [1] : vector<8x128xf32> to vector<8xf32>
    %200 = vector.shape_cast %199 : vector<8xf32> to vector<8x1xf32>
    %201 = math.log %200 : vector<8x1xf32>
    %202 = arith.addf %195, %201 : vector<8x1xf32>
    %203 = vector.broadcast %202 : vector<8x1xf32> to vector<8x128xf32>
    %204 = arith.subf %193, %203 : vector<8x128xf32>
    %205 = arith.index_cast %c3_i32 : i32 to index
    %c0_57 = arith.constant 0 : index
    %c0_58 = arith.constant 0 : index
    %206 = vector.load %arg1[%205, %c0_57, %c0_58] : memref<6x8x128xf32, #tpu.memory_space<vmem>>, vector<1x8x128xf32>
    %207 = vector.shape_cast %206 : vector<1x8x128xf32> to vector<8x128xf32>
    %208 = arith.mulf %207, %204 : vector<8x128xf32>
    %cst_59 = arith.constant dense<0.000000e+00> : vector<8xf32>
    %209 = vector.multi_reduction <add>, %208, %cst_59 [1] : vector<8x128xf32> to vector<8xf32>
    %210 = vector.shape_cast %209 : vector<8xf32> to vector<8x1xf32>
    %cst_60 = arith.constant 0.000000e+00 : f32
    %211 = vector.broadcast %cst_60 : f32 to vector<8x1xf32>
    %212 = arith.subf %211, %210 : vector<8x1xf32>
    %213 = arith.addf %164, %212 : vector<8x1xf32>
    %c4_i32 = arith.constant 4 : i32
    %cst_61 = arith.constant dense<0.000000e+00> : vector<8x384xf32>
    %214 = tpu.matmul %190, %4, %cst_61 {dimension_numbers = #tpu.dot_dimension_numbers<[1], [0], [0], [1], [0, 0, 1, 1], [], []>} : vector<8x128xf32>, vector<128x384xf32>, vector<8x384xf32> -> vector<8x384xf32>
    %215 = vector.broadcast %6 : vector<1x384xf32> to vector<8x384xf32>
    %216 = arith.addf %214, %215 : vector<8x384xf32>
    %217 = vector.extract_strided_slice %216 {offsets = [0, 0], sizes = [8, 128], strides = [1, 1]} : vector<8x384xf32> to vector<8x128xf32>
    %218 = arith.addf %13, %217 : vector<8x128xf32>
    %219 = arith.negf %218 : vector<8x128xf32>
    %220 = math.exp %219 : vector<8x128xf32>
    %cst_62 = arith.constant 1.000000e+00 : f32
    %221 = vector.broadcast %cst_62 : f32 to vector<8x128xf32>
    %222 = arith.addf %221, %220 : vector<8x128xf32>
    %223 = arith.divf %221, %222 : vector<8x128xf32>
    %224 = vector.extract_strided_slice %216 {offsets = [0, 128], sizes = [8, 128], strides = [1, 1]} : vector<8x384xf32> to vector<8x128xf32>
    %225 = arith.addf %14, %224 : vector<8x128xf32>
    %226 = arith.negf %225 : vector<8x128xf32>
    %227 = math.exp %226 : vector<8x128xf32>
    %cst_63 = arith.constant 1.000000e+00 : f32
    %228 = vector.broadcast %cst_63 : f32 to vector<8x128xf32>
    %229 = arith.addf %228, %227 : vector<8x128xf32>
    %230 = arith.divf %228, %229 : vector<8x128xf32>
    %231 = vector.extract_strided_slice %216 {offsets = [0, 256], sizes = [8, 128], strides = [1, 1]} : vector<8x384xf32> to vector<8x128xf32>
    %232 = arith.mulf %223, %231 : vector<8x128xf32>
    %233 = arith.addf %15, %232 : vector<8x128xf32>
    %234 = math.tanh %233 : vector<8x128xf32>
    %cst_64 = arith.constant 1.000000e+00 : f32
    %235 = vector.broadcast %cst_64 : f32 to vector<8x128xf32>
    %236 = arith.subf %235, %230 : vector<8x128xf32>
    %237 = arith.mulf %236, %234 : vector<8x128xf32>
    %238 = arith.mulf %230, %190 : vector<8x128xf32>
    %239 = arith.addf %237, %238 : vector<8x128xf32>
    %cst_65 = arith.constant dense<0.000000e+00> : vector<8x128xf32>
    %240 = tpu.matmul %239, %7, %cst_65 {dimension_numbers = #tpu.dot_dimension_numbers<[1], [0], [0], [1], [0, 0, 1, 1], [], []>} : vector<8x128xf32>, vector<128x128xf32>, vector<8x128xf32> -> vector<8x128xf32>
    %241 = vector.broadcast %8 : vector<1x128xf32> to vector<8x128xf32>
    %242 = arith.addf %240, %241 : vector<8x128xf32>
    %cst_66 = arith.constant dense<0xFF800000> : vector<8xf32>
    %243 = vector.multi_reduction <maximumf>, %242, %cst_66 [1] : vector<8x128xf32> to vector<8xf32>
    %244 = vector.shape_cast %243 : vector<8xf32> to vector<8x1xf32>
    %245 = vector.broadcast %244 : vector<8x1xf32> to vector<8x128xf32>
    %246 = arith.subf %242, %245 : vector<8x128xf32>
    %247 = math.exp %246 : vector<8x128xf32>
    %cst_67 = arith.constant dense<0.000000e+00> : vector<8xf32>
    %248 = vector.multi_reduction <add>, %247, %cst_67 [1] : vector<8x128xf32> to vector<8xf32>
    %249 = vector.shape_cast %248 : vector<8xf32> to vector<8x1xf32>
    %250 = math.log %249 : vector<8x1xf32>
    %251 = arith.addf %244, %250 : vector<8x1xf32>
    %252 = vector.broadcast %251 : vector<8x1xf32> to vector<8x128xf32>
    %253 = arith.subf %242, %252 : vector<8x128xf32>
    %254 = arith.index_cast %c4_i32 : i32 to index
    %c0_68 = arith.constant 0 : index
    %c0_69 = arith.constant 0 : index
    %255 = vector.load %arg1[%254, %c0_68, %c0_69] : memref<6x8x128xf32, #tpu.memory_space<vmem>>, vector<1x8x128xf32>
    %256 = vector.shape_cast %255 : vector<1x8x128xf32> to vector<8x128xf32>
    %257 = arith.mulf %256, %253 : vector<8x128xf32>
    %cst_70 = arith.constant dense<0.000000e+00> : vector<8xf32>
    %258 = vector.multi_reduction <add>, %257, %cst_70 [1] : vector<8x128xf32> to vector<8xf32>
    %259 = vector.shape_cast %258 : vector<8xf32> to vector<8x1xf32>
    %cst_71 = arith.constant 0.000000e+00 : f32
    %260 = vector.broadcast %cst_71 : f32 to vector<8x1xf32>
    %261 = arith.subf %260, %259 : vector<8x1xf32>
    %262 = arith.addf %213, %261 : vector<8x1xf32>
    %c5_i32 = arith.constant 5 : i32
    %cst_72 = arith.constant dense<0.000000e+00> : vector<8x384xf32>
    %263 = tpu.matmul %239, %4, %cst_72 {dimension_numbers = #tpu.dot_dimension_numbers<[1], [0], [0], [1], [0, 0, 1, 1], [], []>} : vector<8x128xf32>, vector<128x384xf32>, vector<8x384xf32> -> vector<8x384xf32>
    %264 = vector.broadcast %6 : vector<1x384xf32> to vector<8x384xf32>
    %265 = arith.addf %263, %264 : vector<8x384xf32>
    %266 = vector.extract_strided_slice %265 {offsets = [0, 0], sizes = [8, 128], strides = [1, 1]} : vector<8x384xf32> to vector<8x128xf32>
    %267 = arith.addf %13, %266 : vector<8x128xf32>
    %268 = arith.negf %267 : vector<8x128xf32>
    %269 = math.exp %268 : vector<8x128xf32>
    %cst_73 = arith.constant 1.000000e+00 : f32
    %270 = vector.broadcast %cst_73 : f32 to vector<8x128xf32>
    %271 = arith.addf %270, %269 : vector<8x128xf32>
    %272 = arith.divf %270, %271 : vector<8x128xf32>
    %273 = vector.extract_strided_slice %265 {offsets = [0, 128], sizes = [8, 128], strides = [1, 1]} : vector<8x384xf32> to vector<8x128xf32>
    %274 = arith.addf %14, %273 : vector<8x128xf32>
    %275 = arith.negf %274 : vector<8x128xf32>
    %276 = math.exp %275 : vector<8x128xf32>
    %cst_74 = arith.constant 1.000000e+00 : f32
    %277 = vector.broadcast %cst_74 : f32 to vector<8x128xf32>
    %278 = arith.addf %277, %276 : vector<8x128xf32>
    %279 = arith.divf %277, %278 : vector<8x128xf32>
    %280 = vector.extract_strided_slice %265 {offsets = [0, 256], sizes = [8, 128], strides = [1, 1]} : vector<8x384xf32> to vector<8x128xf32>
    %281 = arith.mulf %272, %280 : vector<8x128xf32>
    %282 = arith.addf %15, %281 : vector<8x128xf32>
    %283 = math.tanh %282 : vector<8x128xf32>
    %cst_75 = arith.constant 1.000000e+00 : f32
    %284 = vector.broadcast %cst_75 : f32 to vector<8x128xf32>
    %285 = arith.subf %284, %279 : vector<8x128xf32>
    %286 = arith.mulf %285, %283 : vector<8x128xf32>
    %287 = arith.mulf %279, %239 : vector<8x128xf32>
    %288 = arith.addf %286, %287 : vector<8x128xf32>
    %cst_76 = arith.constant dense<0.000000e+00> : vector<8x128xf32>
    %289 = tpu.matmul %288, %7, %cst_76 {dimension_numbers = #tpu.dot_dimension_numbers<[1], [0], [0], [1], [0, 0, 1, 1], [], []>} : vector<8x128xf32>, vector<128x128xf32>, vector<8x128xf32> -> vector<8x128xf32>
    %290 = vector.broadcast %8 : vector<1x128xf32> to vector<8x128xf32>
    %291 = arith.addf %289, %290 : vector<8x128xf32>
    %cst_77 = arith.constant dense<0xFF800000> : vector<8xf32>
    %292 = vector.multi_reduction <maximumf>, %291, %cst_77 [1] : vector<8x128xf32> to vector<8xf32>
    %293 = vector.shape_cast %292 : vector<8xf32> to vector<8x1xf32>
    %294 = vector.broadcast %293 : vector<8x1xf32> to vector<8x128xf32>
    %295 = arith.subf %291, %294 : vector<8x128xf32>
    %296 = math.exp %295 : vector<8x128xf32>
    %cst_78 = arith.constant dense<0.000000e+00> : vector<8xf32>
    %297 = vector.multi_reduction <add>, %296, %cst_78 [1] : vector<8x128xf32> to vector<8xf32>
    %298 = vector.shape_cast %297 : vector<8xf32> to vector<8x1xf32>
    %299 = math.log %298 : vector<8x1xf32>
    %300 = arith.addf %293, %299 : vector<8x1xf32>
    %301 = vector.broadcast %300 : vector<8x1xf32> to vector<8x128xf32>
    %302 = arith.subf %291, %301 : vector<8x128xf32>
    %303 = arith.index_cast %c5_i32 : i32 to index
    %c0_79 = arith.constant 0 : index
    %c0_80 = arith.constant 0 : index
    %304 = vector.load %arg1[%303, %c0_79, %c0_80] : memref<6x8x128xf32, #tpu.memory_space<vmem>>, vector<1x8x128xf32>
    %305 = vector.shape_cast %304 : vector<1x8x128xf32> to vector<8x128xf32>
    %306 = arith.mulf %305, %302 : vector<8x128xf32>
    %cst_81 = arith.constant dense<0.000000e+00> : vector<8xf32>
    %307 = vector.multi_reduction <add>, %306, %cst_81 [1] : vector<8x128xf32> to vector<8xf32>
    %308 = vector.shape_cast %307 : vector<8xf32> to vector<8x1xf32>
    %cst_82 = arith.constant 0.000000e+00 : f32
    %309 = vector.broadcast %cst_82 : f32 to vector<8x1xf32>
    %310 = arith.subf %309, %308 : vector<8x1xf32>
    %311 = arith.addf %262, %310 : vector<8x1xf32>
    %c6_i32 = arith.constant 6 : i32
    %c0_83 = arith.constant 0 : index
    %c0_84 = arith.constant 0 : index
    %312 = vector.load %arg10[%c0_83, %c0_84] : memref<8x1xf32, #tpu.memory_space<vmem>>, vector<8x1xf32>
    tpu.vector_store %arg10[%c0_83, %c0_84], %311 {strides = array<i32>} : memref<8x1xf32, #tpu.memory_space<vmem>>, vector<8x1xf32>,
    return
  }
  func.func @transform_0(%arg0: i32) -> (i32, i32, i32) {
    %c0_i32 = arith.constant 0 : i32
    %c0_i32_0 = arith.constant 0 : i32
    %c0_i32_1 = arith.constant 0 : i32
    return %c0_i32, %arg0, %c0_i32_0 : i32, i32, i32
  }
  func.func @transform_1(%arg0: i32) -> (i32, i32) {
    %c0_i32 = arith.constant 0 : i32
    %c0_i32_0 = arith.constant 0 : i32
    return %arg0, %c0_i32 : i32, i32
  }
  func.func @transform_2(%arg0: i32) -> (i32, i32) {
    %c0_i32 = arith.constant 0 : i32
    %c0_i32_0 = arith.constant 0 : i32
    %c0_i32_1 = arith.constant 0 : i32
    return %c0_i32, %c0_i32_0 : i32, i32
  }
  func.func @transform_3(%arg0: i32) -> (i32, i32) {
    %c0_i32 = arith.constant 0 : i32
    %c0_i32_0 = arith.constant 0 : i32
    %c0_i32_1 = arith.constant 0 : i32
    return %c0_i32, %c0_i32_0 : i32, i32
  }
  func.func @transform_4(%arg0: i32) -> (i32, i32) {
    %c0_i32 = arith.constant 0 : i32
    %c0_i32_0 = arith.constant 0 : i32
    %c0_i32_1 = arith.constant 0 : i32
    return %c0_i32, %c0_i32_0 : i32, i32
  }
  func.func @transform_5(%arg0: i32) -> (i32, i32) {
    %c0_i32 = arith.constant 0 : i32
    %c0_i32_0 = arith.constant 0 : i32
    %c0_i32_1 = arith.constant 0 : i32
    return %c0_i32, %c0_i32_0 : i32, i32
  }
  func.func @transform_6(%arg0: i32) -> (i32, i32) {
    %c0_i32 = arith.constant 0 : i32
    %c0_i32_0 = arith.constant 0 : i32
    %c0_i32_1 = arith.constant 0 : i32
    return %c0_i32, %c0_i32_0 : i32, i32
  }
  func.func @transform_7(%arg0: i32) -> (i32, i32) {
    %c0_i32 = arith.constant 0 : i32
    %c0_i32_0 = arith.constant 0 : i32
    %c0_i32_1 = arith.constant 0 : i32
    return %c0_i32, %c0_i32_0 : i32, i32
  }
  func.func @transform_8(%arg0: i32) -> (i32, i32) {
    %c0_i32 = arith.constant 0 : i32
    %c0_i32_0 = arith.constant 0 : i32
    %c0_i32_1 = arith.constant 0 : i32
    return %c0_i32, %c0_i32_0 : i32, i32
  }
  func.func @transform_9(%arg0: i32) -> (i32, i32) {
    %c0_i32 = arith.constant 0 : i32
    %c0_i32_0 = arith.constant 0 : i32
    return %arg0, %c0_i32 : i32, i32
  }
}

</mosaic_0001>

<bundles_post_ra>
// kernel: seq2seq_forward.3
= control target key start
LH: loop header
LB: loop body
LE: loop exit
PB: predicated region body
PF: predicated region fallthrough
CT: control target
= control target key end

     0   :  { %v4358_v3 = vmov 0.0   ;;  %vm2692_vm0 = vmmov 0   ;;  %vm1840_vm1 = vcmask 7168   ;;  %s4320_s3 = inlined_call_operand.vmem [shape: f32[128,384], index: 3, kind: input, shape index: {}]   ;;  %s4321_s2 = inlined_call_operand.vmem [shape: f32[1,128], index: 2, kind: input, shape index: {}]   ;;  %s4322_s4 = inlined_call_operand.vmem [shape: f32[128,384], index: 4, kind: input, shape index: {}]   ;;  %s4323_s1 = inlined_call_operand.vmem [shape: f32[8,128], index: 1, kind: input, shape index: {}]   ;;  %s4324_s7 = inlined_call_operand.vmem [shape: f32[128,128], index: 7, kind: input, shape index: {}]   ;;  %s4325_s5 = inlined_call_operand.vmem [shape: f32[1,384], index: 5, kind: input, shape index: {}]   ;;  %s4326_s6 = inlined_call_operand.vmem [shape: f32[1,384], index: 6, kind: input, shape index: {}]   ;;  %s4327_s8 = inlined_call_operand.vmem [shape: f32[1,128], index: 8, kind: input, shape index: {}]   ;;  %s4328_s0 = inlined_call_operand.vmem [shape: f32[6,8,128], index: 0, kind: input, shape index: {}]   ;;  %s4329_s9 = inlined_call_operand.vmem [shape: f32[8,1], index: 9, kind: output, shape index: {}]  }
   0x1   :  { %v80_v0 = vld [vmem:[%s4320_s3 + $0x170] sm:$0xff]  ;;  %v79_v1 = vld [vmem:[%s4320_s3 + $0x168] sm:$0xff]  ;;  %v77_v2 = vld [vmem:[%s4320_s3 + $0x158] sm:$0xff]  ;;  %229 = vmatprep.mubr.f32.mxu0 %v4358_v3  ;;  %2085 = vmatprep.subr.mxu1 %v4358_v3 }
   0x2   :  { %165 = vmatprep.subr.mxu0 %v80_v0  ;;  %v76_v4 = vld [vmem:[%s4320_s3 + $0x150] sm:$0xff]  ;;  %2117 = vmatprep.mubr.msk.f32.mxu1 %vm2692_vm0, %v4358_v3  ;;  %v74_v5 = vld [vmem:[%s4320_s3 + $0x140] sm:$0xff]  ;;  %v73_v6 = vld [vmem:[%s4320_s3 + $0x138] sm:$0xff] }
   0x3   :  { %166 = vmatpush1.msra.mxu0 %v79_v1  ;;  %v71_v7 = vld [vmem:[%s4320_s3 + $0x128] sm:$0xff]  ;;  %v70_v8 = vld [vmem:[%s4320_s3 + $0x120] sm:$0xff]  ;;  %v68_v9 = vld [vmem:[%s4320_s3 + $0x110] sm:$0xff] }
   0x4   :  { %167 = vmatprep.subr.mxu0 %v77_v2  ;;  %v67_v10 = vld [vmem:[%s4320_s3 + $0x108] sm:$0xff]  ;;  %v65_v11 = vld [vmem:[%s4320_s3 + $0xf8] sm:$0xff]  ;;  %v64_v12 = vld [vmem:[%s4320_s3 + $0xf0] sm:$0xff] }
   0x5   :  { %168 = vmatpush1.msra.mxu0 %v76_v4  ;;  %v62_v13 = vld [vmem:[%s4320_s3 + $0xe0] sm:$0xff]  ;;  %v61_v14 = vld [vmem:[%s4320_s3 + $0xd8] sm:$0xff]  ;;  %v59_v16 = vld [vmem:[%s4320_s3 + $0xc8] sm:$0xff] }
   0x6   :  { %169 = vmatprep.subr.mxu0 %v74_v5  ;;  %v81_v15 = vld [vmem:[%s4320_s3 + $0x178] sm:$0xff]  ;;  %v78_v17 = vld [vmem:[%s4320_s3 + $0x160] sm:$0xff]  ;;  %v75_v19 = vld [vmem:[%s4320_s3 + $0x148] sm:$0xff] }
   0x7   :  { %170 = vmatpush1.msra.mxu0 %v73_v6  ;;  %2086 = vmatpush3.msra.mxu1 %v81_v15  ;;  %v58_v18 = vld [vmem:[%s4320_s3 + $0xc0] sm:$0xff]  ;;  %v56_v20 = vld [vmem:[%s4320_s3 + $0xb0] sm:$0xff]  ;;  %v55_v21 = vld [vmem:[%s4320_s3 + $0xa8] sm:$0xff] }
   0x8   :  { %171 = vmatprep.subr.mxu0 %v71_v7  ;;  %2087 = vmatprep.subr.mxu1 %v4358_v3  ;;  %v72_v22 = vld [vmem:[%s4320_s3 + $0x130] sm:$0xff]  ;;  %v53_v23 = vld [vmem:[%s4320_s3 + $0x98] sm:$0xff]  ;;  %v50_v26 = vld [vmem:[%s4320_s3 + $0x80] sm:$0xff] }
   0x9   :  { %172 = vmatpush1.msra.mxu0 %v70_v8  ;;  %2088 = vmatpush3.msra.mxu1 %v78_v17  ;;  %v52_v24 = vld [vmem:[%s4320_s3 + $0x90] sm:$0xff]  ;;  %v69_v25 = vld [vmem:[%s4320_s3 + $0x118] sm:$0xff]  ;;  %v66_v28 = vld [vmem:[%s4320_s3 + $0x100] sm:$0xff] }
   0xa   :  { %173 = vmatprep.subr.mxu0 %v68_v9  ;;  %2089 = vmatprep.subr.mxu1 %v4358_v3  ;;  %v49_v27 = vld [vmem:[%s4320_s3 + $0x78] sm:$0xff]  ;;  %v47_v29 = vld [vmem:[%s4320_s3 + $0x68] sm:$0xff]  ;;  %v46_v30 = vld [vmem:[%s4320_s3 + $0x60] sm:$0xff] }
   0xb   :  { %174 = vmatpush1.msra.mxu0 %v67_v10  ;;  %2090 = vmatpush3.msra.mxu1 %v75_v19  ;;  %v63_v31 = vld [vmem:[%s4320_s3 + $0xe8] sm:$0xff]  ;;  %v44_v32 = vld [vmem:[%s4320_s3 + $0x50] sm:$0xff]  ;;  %v41_v35 = vld [vmem:[%s4320_s3 + $0x38] sm:$0xff] }
   0xc   :  { %175 = vmatprep.subr.mxu0 %v65_v11  ;;  %2091 = vmatprep.subr.mxu1 %v4358_v3  ;;  %v43_v33 = vld [vmem:[%s4320_s3 + $0x48] sm:$0xff]  ;;  %v60_v34 = vld [vmem:[%s4320_s3 + $0xd0] sm:$0xff]  ;;  %v57_v37 = vld [vmem:[%s4320_s3 + $0xb8] sm:$0xff] }
   0xd   :  { %176 = vmatpush1.msra.mxu0 %v64_v12  ;;  %2092 = vmatpush3.msra.mxu1 %v72_v22  ;;  %v40_v36 = vld [vmem:[%s4320_s3 + $0x30] sm:$0xff]  ;;  %v38_v38 = vld [vmem:[%s4320_s3 + $0x20] sm:$0xff]  ;;  %v37_v40 = vld [vmem:[%s4320_s3 + $0x18] sm:$0xff] }
   0xe   :  { %177 = vmatprep.subr.mxu0 %v62_v13  ;;  %2093 = vmatprep.subr.mxu1 %v4358_v3  ;;  %v2871_v39 = vld [vmem:[%s4321_s2] sm:$0x1]  ;;  %v35_v42 = vld [vmem:[%s4320_s3 + $0x8] sm:$0xff]  ;;  %v2894_v46 = vld [vmem:[%s4322_s4 + $0x170] sm:$0xff] }
   0xf   :  { %178 = vmatpush1.msra.mxu0 %v61_v14  ;;  %2094 = vmatpush3.msra.mxu1 %v69_v25  ;;  %v54_v41 = vld [vmem:[%s4320_s3 + $0xa0] sm:$0xff]  ;;  %v33_v44 = vmax.f32 %v2871_v39, 0.0  ;;  %v51_v45 = vld [vmem:[%s4320_s3 + $0x88] sm:$0xff]  ;;  %v2905_v48 = vld [vmem:[%s4322_s4 + $0x158] sm:$0xff] }
  0x10   :  { %179 = vmatprep.subr.mxu0 %v59_v16  ;;  %2095 = vmatprep.subr.mxu1 %v4358_v3  ;;  %v34_v43 = vld [vmem:[%s4320_s3] sm:$0xff]  ;;  %v2899_v47 = vld [vmem:[%s4322_s4 + $0x168] sm:$0xff]  ;;  %v48_v49 = vld [vmem:[%s4320_s3 + $0x70] sm:$0xff] }
  0x11   :  { %180 = vmatpush1.msra.mxu0 %v58_v18  ;;  %2096 = vmatpush3.msra.mxu1 %v66_v28  ;;  %v2914_v50 = vld [vmem:[%s4322_s4 + $0x150] sm:$0xff]  ;;  %v2920_v51 = vld [vmem:[%s4322_s4 + $0x140] sm:$0xff]  ;;  %v45_v52 = vld [vmem:[%s4320_s3 + $0x58] sm:$0xff] }
  0x12   :  { %181 = vmatprep.subr.mxu0 %v56_v20  ;;  %2097 = vmatprep.subr.mxu1 %v4358_v3  ;;  %v2930_v53 = vld [vmem:[%s4322_s4 + $0x138] sm:$0xff]  ;;  %v2936_v54 = vld [vmem:[%s4322_s4 + $0x128] sm:$0xff]  ;;  %v42_v55 = vld [vmem:[%s4320_s3 + $0x40] sm:$0xff] }
  0x13   :  { %182 = vmatpush1.msra.mxu0 %v55_v21  ;;  %2098 = vmatpush3.msra.mxu1 %v63_v31  ;;  %v2946_v56 = vld [vmem:[%s4322_s4 + $0x120] sm:$0xff]  ;;  %v2952_v57 = vld [vmem:[%s4322_s4 + $0x110] sm:$0xff]  ;;  %v39_v58 = vld [vmem:[%s4320_s3 + $0x28] sm:$0xff] }
  0x14   :  { %183 = vmatprep.subr.mxu0 %v53_v23  ;;  %2099 = vmatprep.subr.mxu1 %v4358_v3  ;;  %4401 = vst [vmem:[#allocation2_spill] sm:$0xff] %v2946_v56  ;;  %4402 = vst [vmem:[#allocation3_spill] sm:$0xff] %v2952_v57  ;;  %v2962_v59 = vld [vmem:[%s4322_s4 + $0x108] sm:$0xff]  ;;  %v2968_v60 = vld [vmem:[%s4322_s4 + $0xf8] sm:$0xff] }
  0x15   :  { %184 = vmatpush1.msra.mxu0 %v52_v24  ;;  %2100 = vmatpush3.msra.mxu1 %v60_v34  ;;  %4403 = vst [vmem:[#allocation4_spill] sm:$0xff] %v2962_v59  ;;  %4404 = vst [vmem:[#allocation5_spill] sm:$0xff] %v2968_v60  ;;  %v36_v61 = vld [vmem:[%s4320_s3 + $0x10] sm:$0xff]  ;;  %v2984_v63 = vld [vmem:[%s4322_s4 + $0xe0] sm:$0xff] }
  0x16   :  { %185 = vmatprep.subr.mxu0 %v50_v26  ;;  %2101 = vmatprep.subr.mxu1 %v4358_v3  ;;  %v2978_v62 = vld [vmem:[%s4322_s4 + $0xf0] sm:$0xff]  ;;  %4406 = vst [vmem:[#allocation7_spill] sm:$0xff] %v2984_v63  ;;  %v2991_v0 = vld [vmem:[%s4322_s4 + $0xd8] sm:$0xff]  ;;  %v2997_v1 = vld [vmem:[%s4322_s4 + $0xc8] sm:$0xff] }
  0x17   :  { %186 = vmatpush1.msra.mxu0 %v49_v27  ;;  %2102 = vmatpush3.msra.mxu1 %v57_v37  ;;  %4405 = vst [vmem:[#allocation6_spill] sm:$0xff] %v2978_v62  ;;  %4407 = vst [vmem:[#allocation8_spill] sm:$0xff] %v2991_v0  ;;  %v3003_v2 = vld [vmem:[%s4322_s4 + $0x178] sm:$0xff]  ;;  %v3009_v4 = vld [vmem:[%s4322_s4 + $0xc0] sm:$0xff] }
  0x18   :  { %187 = vmatprep.subr.mxu0 %v47_v29  ;;  %2103 = vmatprep.subr.mxu1 %v4358_v3  ;;  %4408 = vst [vmem:[#allocation9_spill] sm:$0xff] %v2997_v1  ;;  %4409 = vst [vmem:[#allocation10_spill] sm:$0xff] %v3009_v4  ;;  %v3016_v5 = vld [vmem:[%s4322_s4 + $0xb0] sm:$0xff]  ;;  %v3021_v6 = vld [vmem:[%s4322_s4 + $0x160] sm:$0xff] }
  0x19   :  { %188 = vmatpush1.msra.mxu0 %v46_v30  ;;  %2104 = vmatpush3.msra.mxu1 %v54_v41  ;;  %4410 = vst [vmem:[#allocation11_spill] sm:$0xff] %v3016_v5  ;;  %v3027_v7 = vld [vmem:[%s4322_s4 + $0xa8] sm:$0xff]  ;;  %v3034_v8 = vld [vmem:[%s4322_s4 + $0x98] sm:$0xff]  ;;  %v3046_v10 = vld [vmem:[%s4322_s4 + $0x90] sm:$0xff] }
  0x1a   :  { %189 = vmatprep.subr.mxu0 %v44_v32  ;;  %2105 = vmatprep.subr.mxu1 %v4358_v3  ;;  %4411 = vst [vmem:[#allocation12_spill] sm:$0xff] %v3027_v7  ;;  %4412 = vst [vmem:[#allocation13_spill] sm:$0xff] %v3034_v8  ;;  %v3040_v9 = vld [vmem:[%s4322_s4 + $0x148] sm:$0xff]  ;;  %v3053_v11 = vld [vmem:[%s4322_s4 + $0x80] sm:$0xff] }
  0x1b   :  { %190 = vmatpush1.msra.mxu0 %v43_v33  ;;  %2106 = vmatpush3.msra.mxu1 %v51_v45  ;;  %4413 = vst [vmem:[#allocation14_spill] sm:$0xff] %v3046_v10  ;;  %4414 = vst [vmem:[#allocation15_spill] sm:$0xff] %v3053_v11  ;;  %v3059_v12 = vld [vmem:[%s4322_s4 + $0x130] sm:$0xff]  ;;  %v3065_v13 = vld [vmem:[%s4322_s4 + $0x78] sm:$0xff] }
  0x1c   :  { %191 = vmatprep.subr.mxu0 %v41_v35  ;;  %2107 = vmatprep.subr.mxu1 %v4358_v3  ;;  %4415 = vst [vmem:[#allocation16_spill] sm:$0xff] %v3065_v13  ;;  %v3072_v14 = vld [vmem:[%s4322_s4 + $0x68] sm:$0xff]  ;;  %v3078_v15 = vld [vmem:[%s4322_s4 + $0x118] sm:$0xff]  ;;  %v3084_v16 = vld [vmem:[%s4322_s4 + $0x60] sm:$0xff] }
  0x1d   :  { %192 = vmatpush1.msra.mxu0 %v40_v36  ;;  %2108 = vmatpush3.msra.mxu1 %v48_v49  ;;  %4416 = vst [vmem:[#allocation17_spill] sm:$0xff] %v3072_v14  ;;  %4417 = vst [vmem:[#allocation18_spill] sm:$0xff] %v3084_v16  ;;  %v3091_v17 = vld [vmem:[%s4322_s4 + $0x50] sm:$0xff]  ;;  %v3097_v18 = vld [vmem:[%s4322_s4 + $0x100] sm:$0xff] }
  0x1e   :  { %193 = vmatprep.subr.mxu0 %v38_v38  ;;  %2109 = vmatprep.subr.mxu1 %v4358_v3  ;;  %4418 = vst [vmem:[#allocation19_spill] sm:$0xff] %v3091_v17  ;;  %v3103_v19 = vld [vmem:[%s4322_s4 + $0x48] sm:$0xff]  ;;  %v3110_v20 = vld [vmem:[%s4322_s4 + $0x38] sm:$0xff]  ;;  %v3122_v22 = vld [vmem:[%s4322_s4 + $0x30] sm:$0xff] }
  0x1f   :  { %194 = vmatpush1.msra.mxu0 %v37_v40  ;;  %2110 = vmatpush3.msra.mxu1 %v45_v52  ;;  %4419 = vst [vmem:[#allocation20_spill] sm:$0xff] %v3103_v19  ;;  %4420 = vst [vmem:[#allocation21_spill] sm:$0xff] %v3110_v20  ;;  %v3116_v21 = vld [vmem:[%s4322_s4 + $0xe8] sm:$0xff]  ;;  %v3129_v23 = vld [vmem:[%s4322_s4 + $0x20] sm:$0xff] }
  0x20   :  { %195 = vmatprep.subr.mxu0 %v35_v42  ;;  %2111 = vmatprep.subr.mxu1 %v4358_v3  ;;  %4421 = vst [vmem:[#allocation22_spill] sm:$0xff] %v3122_v22  ;;  %4422 = vst [vmem:[#allocation23_spill] sm:$0xff] %v3129_v23  ;;  %v3135_v24 = vld [vmem:[%s4322_s4 + $0xd0] sm:$0xff]  ;;  %v3141_v25 = vld [vmem:[%s4322_s4 + $0x18] sm:$0xff] }
  0x21   :  { %196 = vmatpush1.msra.mxu0 %v34_v43  ;;  %2112 = vmatpush3.msra.mxu1 %v42_v55  ;;  %4423 = vst [vmem:[#allocation24_spill] sm:$0xff] %v3141_v25  ;;  %v3148_v26 = vld [vmem:[%s4322_s4 + $0x8] sm:$0xff]  ;;  %v3154_v27 = vld [vmem:[%s4322_s4 + $0xb8] sm:$0xff]  ;;  %v3160_v28 = vld [vmem:[%s4322_s4] sm:$0xff] }
  0x22   :  { %230 = vmatmul.mubr.f32.vlgmr.msra.gmra.mxu0 %v33_v44  ;;  %335 = vmatprep.subr.mxu0 %v2894_v46  ;;  %4424 = vst [vmem:[#allocation25_spill] sm:$0xff] %v3148_v26  ;;  %4425 = vst [vmem:[#allocation26_spill] sm:$0xff] %v3160_v28  ;;  %v3167_v29 = vld [vmem:[%s4323_s1] sm:$0xff]  ;;  %v3182_v31 = vld [vmem:[%s4322_s4 + $0x88] sm:$0xff] }
  0x23   :  { %336 = vmatpush1.msra.mxu0 %v2899_v47  ;;  %2113 = vmatprep.subr.mxu1 %v4358_v3  ;;  %v3173_v30 = vld [vmem:[%s4322_s4 + $0xa0] sm:$0xff]  ;;  %v3190_v32 = vld [vmem:[%s4322_s4 + $0x70] sm:$0xff]  ;;  %v3200_v33 = vld [vmem:[%s4322_s4 + $0x58] sm:$0xff] }
  0x24   :  { %337 = vmatprep.subr.mxu0 %v2905_v48  ;;  %2114 = vmatpush3.msra.mxu1 %v39_v58  ;;  %v3209_v34 = vld [vmem:[%s4322_s4 + $0x40] sm:$0xff]  ;;  %v3216_v35 = vld [vmem:[%s4322_s4 + $0x28] sm:$0xff]  ;;  %v3223_v36 = vld [vmem:[%s4322_s4 + $0x10] sm:$0xff] }
  0x25   :  { %338 = vmatpush1.msra.mxu0 %v2914_v50  ;;  %2115 = vmatprep.subr.mxu1 %v4358_v3  ;;  %v3266_v37 = vld [vmem:[%s4324_s7 + $0x78] sm:$0xff]  ;;  %v3271_v38 = vld [vmem:[%s4324_s7 + $0x70] sm:$0xff]  ;;  %v3278_v39 = vld [vmem:[%s4324_s7 + $0x68] sm:$0xff] }
  0x26   :  { %339 = vmatprep.subr.mxu0 %v2920_v51  ;;  %2116 = vmatpush3.msra.mxu1 %v36_v61  ;;  %v3287_v40 = vld [vmem:[%s4324_s7 + $0x60] sm:$0xff]  ;;  %v3294_v41 = vld [vmem:[%s4324_s7 + $0x58] sm:$0xff]  ;;  %v3301_v42 = vld [vmem:[%s4324_s7 + $0x50] sm:$0xff] }
  0x27   :  { %340 = vmatpush1.msra.mxu0 %v2930_v53  ;;  %399 = vmatprep.mubr.f32.mxu0 %v4358_v3  ;;  %v3308_v43 = vld [vmem:[%s4324_s7 + $0x48] sm:$0xff]  ;;  %v3321_v45 = vld [vmem:[%s4324_s7 + $0x38] sm:$0xff]  ;;  %v3327_v49 = vld [vmem:[%s4324_s7 + $0x30] sm:$0xff] }
  0x28   :  { %341 = vmatprep.subr.mxu0 %v2936_v54  ;;  %2120 = vmatprep.subr.mxu1 %v4358_v3  ;;  %v3334_v52 = vld [vmem:[%s4324_s7 + $0x28] sm:$0xff]  ;;  %v3341_v55 = vld [vmem:[%s4324_s7 + $0x20] sm:$0xff]  ;;  %v3348_v58 = vld [vmem:[%s4324_s7 + $0x18] sm:$0xff] }
  0x29   :  { %342 = vmatpush1.msra.mxu0 %v2946_v56  ;;  %2118 = vmatmul.mubr.f32.vlgmr.msra.gmra.mxu1 %v33_v44  ;;  %v3315_v44 = vld [vmem:[%s4324_s7 + $0x40] sm:$0xff]  ;;  %v3355_v61 = vld [vmem:[%s4324_s7 + $0x10] sm:$0xff] }
  0x2a   :  { %343 = vmatprep.subr.mxu0 %v2952_v57  ;;  %2121 = vmatpush3.msra.mxu1 %v3003_v2 }
  0x2b   :  { %344 = vmatpush1.msra.mxu0 %v2962_v59  ;;  %2122 = vmatprep.subr.mxu1 %v4358_v3 }
  0x2c   :  { %345 = vmatprep.subr.mxu0 %v2968_v60  ;;  %2123 = vmatpush3.msra.mxu1 %v3021_v6 }
  0x2d   :  { %346 = vmatpush1.msra.mxu0 %v2978_v62  ;;  %2124 = vmatprep.subr.mxu1 %v4358_v3 }
  0x2e   :  { %347 = vmatprep.subr.mxu0 %v2984_v63  ;;  %2125 = vmatpush3.msra.mxu1 %v3040_v9 }
  0x2f   :  { %348 = vmatpush1.msra.mxu0 %v2991_v0  ;;  %2126 = vmatprep.subr.mxu1 %v4358_v3 }
  0x30   :  { %349 = vmatprep.subr.mxu0 %v2997_v1  ;;  %2127 = vmatpush3.msra.mxu1 %v3059_v12 }
  0x31   :  { %350 = vmatpush1.msra.mxu0 %v3009_v4  ;;  %2128 = vmatprep.subr.mxu1 %v4358_v3 }
  0x32   :  { %351 = vmatprep.subr.mxu0 %v3016_v5  ;;  %2129 = vmatpush3.msra.mxu1 %v3078_v15 }
  0x33   :  { %352 = vmatpush1.msra.mxu0 %v3027_v7  ;;  %2130 = vmatprep.subr.mxu1 %v4358_v3 }
  0x34   :  { %353 = vmatprep.subr.mxu0 %v3034_v8  ;;  %2131 = vmatpush3.msra.mxu1 %v3097_v18 }
  0x35   :  { %354 = vmatpush1.msra.mxu0 %v3046_v10  ;;  %2132 = vmatprep.subr.mxu1 %v4358_v3 }
  0x36   :  { %355 = vmatprep.subr.mxu0 %v3053_v11  ;;  %2133 = vmatpush3.msra.mxu1 %v3116_v21 }
  0x37   :  { %356 = vmatpush1.msra.mxu0 %v3065_v13  ;;  %2134 = vmatprep.subr.mxu1 %v4358_v3 }
  0x38   :  { %357 = vmatprep.subr.mxu0 %v3072_v14  ;;  %2135 = vmatpush3.msra.mxu1 %v3135_v24 }
  0x39   :  { %358 = vmatpush1.msra.mxu0 %v3084_v16  ;;  %2136 = vmatprep.subr.mxu1 %v4358_v3 }
  0x3a   :  { %359 = vmatprep.subr.mxu0 %v3091_v17  ;;  %2137 = vmatpush3.msra.mxu1 %v3154_v27 }
  0x3b   :  { %360 = vmatpush1.msra.mxu0 %v3103_v19  ;;  %2138 = vmatprep.subr.mxu1 %v4358_v3 }
  0x3c   :  { %361 = vmatprep.subr.mxu0 %v3110_v20  ;;  %2139 = vmatpush3.msra.mxu1 %v3173_v30 }
  0x3d   :  { %362 = vmatpush1.msra.mxu0 %v3122_v22  ;;  %2140 = vmatprep.subr.mxu1 %v4358_v3 }
  0x3e   :  { %363 = vmatprep.subr.mxu0 %v3129_v23  ;;  %2152 = vmatprep.mubr.msk.f32.mxu1 %vm2692_vm0, %v4358_v3 }
  0x3f   :  { %364 = vmatpush1.msra.mxu0 %v3141_v25  ;;  %2141 = vmatpush3.msra.mxu1 %v3182_v31 }
  0x40   :  { %365 = vmatprep.subr.mxu0 %v3148_v26  ;;  %2142 = vmatprep.subr.mxu1 %v4358_v3 }
  0x41   :  { %366 = vmatpush1.msra.mxu0 %v3160_v28  ;;  %2143 = vmatpush3.msra.mxu1 %v3190_v32 }
  0x42   :  { %400 = vmatmul.mubr.f32.vlgmr.msra.gmra.mxu0 %v3167_v29  ;;  %2155 = vmatprep.subr.mxu0 %v4358_v3 }
  0x43   :  { %2187 = vmatprep.mubr.msk.f32.mxu0 %vm2692_vm0, %v4358_v3  ;;  %2144 = vmatprep.subr.mxu1 %v4358_v3 }
  0x44   :  { %2145 = vmatpush3.msra.mxu1 %v3200_v33  ;;  %2156 = vmatpush3.msra.mxu0 %v3266_v37 }
  0x45   :  { %2146 = vmatprep.subr.mxu1 %v4358_v3  ;;  %2157 = vmatprep.subr.mxu0 %v4358_v3 }
  0x46   :  { %2147 = vmatpush3.msra.mxu1 %v3209_v34  ;;  %2158 = vmatpush3.msra.mxu0 %v3271_v38 }
  0x47   :  { %2148 = vmatprep.subr.mxu1 %v4358_v3  ;;  %2159 = vmatprep.subr.mxu0 %v4358_v3 }
  0x48   :  { %2149 = vmatpush3.msra.mxu1 %v3216_v35  ;;  %2160 = vmatpush3.msra.mxu0 %v3278_v39 }
  0x49   :  { %2150 = vmatprep.subr.mxu1 %v4358_v3  ;;  %2161 = vmatprep.subr.mxu0 %v4358_v3 }
  0x4a   :  { %2151 = vmatpush3.msra.mxu1 %v3223_v36  ;;  %2162 = vmatpush3.msra.mxu0 %v3287_v40 }
  0x4b   :  { %2153 = vmatmul.mubr.f32.vlgmr.msra.gmra.mxu1 %v3167_v29  ;;  %590 = vmatprep.subr.mxu1 %v2894_v46 }
  0x4c   :  { %591 = vmatpush1.msra.mxu1 %v2899_v47  ;;  %654 = vmatprep.mubr.f32.mxu1 %v4358_v3 }
  0x4d   :  { %592 = vmatprep.subr.mxu1 %v2905_v48  ;;  %2163 = vmatprep.subr.mxu0 %v4358_v3 }
  0x4e   :  { %593 = vmatpush1.msra.mxu1 %v2914_v50  ;;  %2164 = vmatpush3.msra.mxu0 %v3294_v41 }
  0x4f   :  { %594 = vmatprep.subr.mxu1 %v2920_v51  ;;  %2165 = vmatprep.subr.mxu0 %v4358_v3 }
  0x50   :  { %595 = vmatpush1.msra.mxu1 %v2930_v53  ;;  %2166 = vmatpush3.msra.mxu0 %v3301_v42 }
  0x51   :  { %596 = vmatprep.subr.mxu1 %v2936_v54  ;;  %2167 = vmatprep.subr.mxu0 %v4358_v3 }
  0x52   :  { %597 = vmatpush1.msra.mxu1 %v2946_v56  ;;  %2168 = vmatpush3.msra.mxu0 %v3308_v43 }
  0x53   :  { %598 = vmatprep.subr.mxu1 %v2952_v57  ;;  %2169 = vmatprep.subr.mxu0 %v4358_v3 }
  0x54   :  { %599 = vmatpush1.msra.mxu1 %v2962_v59  ;;  %2170 = vmatpush3.msra.mxu0 %v3315_v44 }
  0x55   :  { %600 = vmatprep.subr.mxu1 %v2968_v60  ;;  %2171 = vmatprep.subr.mxu0 %v4358_v3 }
  0x56   :  { %601 = vmatpush1.msra.mxu1 %v2978_v62  ;;  %2172 = vmatpush3.msra.mxu0 %v3321_v45 }
  0x57   :  { %602 = vmatprep.subr.mxu1 %v2984_v63  ;;  %2173 = vmatprep.subr.mxu0 %v4358_v3 }
  0x58   :  { %603 = vmatpush1.msra.mxu1 %v2991_v0  ;;  %2174 = vmatpush3.msra.mxu0 %v3327_v49 }
  0x59   :  { %604 = vmatprep.subr.mxu1 %v2997_v1  ;;  %2175 = vmatprep.subr.mxu0 %v4358_v3 }
  0x5a   :  { %605 = vmatpush1.msra.mxu1 %v3009_v4  ;;  %2176 = vmatpush3.msra.mxu0 %v3334_v52 }
  0x5b   :  { %606 = vmatprep.subr.mxu1 %v3016_v5  ;;  %2177 = vmatprep.subr.mxu0 %v4358_v3 }
  0x5c   :  { %607 = vmatpush1.msra.mxu1 %v3027_v7  ;;  %2178 = vmatpush3.msra.mxu0 %v3341_v55 }
  0x5d   :  { %608 = vmatprep.subr.mxu1 %v3034_v8  ;;  %2179 = vmatprep.subr.mxu0 %v4358_v3 }
  0x5e   :  { %609 = vmatpush1.msra.mxu1 %v3046_v10  ;;  %2180 = vmatpush3.msra.mxu0 %v3348_v58 }
  0x5f   :  { %610 = vmatprep.subr.mxu1 %v3053_v11  ;;  %2181 = vmatprep.subr.mxu0 %v4358_v3 }
  0x60   :  { %611 = vmatpush1.msra.mxu1 %v3065_v13  ;;  %2182 = vmatpush3.msra.mxu0 %v3355_v61  ;;  %v131_v13 = vld [vmem:[%s4326_s6] sm:$0x7] }
  0x61   :  { %612 = vmatprep.subr.mxu1 %v3072_v14  ;;  %2183 = vmatprep.subr.mxu0 %v4358_v3 }
  0x62   :  { %613 = vmatpush1.msra.mxu1 %v3084_v16 }
  0x63   :  { %614 = vmatprep.subr.mxu1 %v3091_v17  ;;  %v130_v17 = vld [vmem:[%s4325_s5] sm:$0x7] }
  0x64   :  { %615 = vmatpush1.msra.mxu1 %v3103_v19 }
  0x65   :  { %616 = vmatprep.subr.mxu1 %v3110_v20 }
  0x66   :  { %617 = vmatpush1.msra.mxu1 %v3122_v22 }
  0x67   :  { %618 = vmatprep.subr.mxu1 %v3129_v23 }
  0x68   :  { %619 = vmatpush1.msra.mxu1 %v3141_v25  ;;  %v150_v25 = vlaneseq }
  0x69   :  { %620 = vmatprep.subr.mxu1 %v3148_v26  ;;  %v3369_v26 = vld [vmem:[%s4324_s7] sm:$0xff] }
  0x6a   :  { %621 = vmatpush1.msra.mxu1 %v3160_v28  ;;  %v3362_v28 = vld [vmem:[%s4324_s7 + $0x8] sm:$0xff]  ;;  %v151_v20 = vshrl.u32 %v150_v25, 7 }
  0x6b   :  { %2225 = vmatprep.subr.mxu1 %v4358_v3  ;;  %2184 = vmatpush3.msra.mxu0 %v3362_v28 }
  0x6c   :  { %2185 = vmatprep.subr.mxu0 %v4358_v3  ;;  %v152_v19 = vsub.s32 0, %v151_v20  ;;  %v156_v11 = vsub.s32 1, %v151_v20 }
  0x6d   :  { %2186 = vmatpush3.msra.mxu0 %v3369_v26 }
  0x6e   :  { %2190 = vmatprep.subr.mxu0 %v4358_v3  ;;  %v153_v16 = vrot.slane %v130_v17, %v152_v19  ;;  %v3381_v8 = vrot.slane %v131_v13, %v152_v19  ;;  %v157_v7 = vrot.slane %v130_v17, %v156_v11  ;;  %v3385_v25 = vrot.slane %v131_v13, %v156_v11 }
  0x70   :  { %4426 = vst [vmem:[#allocation27_spill] sm:$0xff] %v3381_v8 }
  0xe2   :  { %v231_v14 = vpop.f32.mrf.mxu0 }
  0xe3   :  { %v232_v10 = vadd.f32 %v231_v14, %v153_v16 }
  0xe4   :  { %v233_v3 = vpop.f32.mrf.mxu0 }
  0xe5   :  { %v234_v0 = vadd.f32 %v233_v3, %v157_v7 }
  0xe7   :  { %v3390_v59 = vrot.slane %v234_v0, %v152_v19 }
  0xe9   :  { %v302_v23 = vpop.f32.mrf.mxu1 }
  0xeb   :  { %v2119_v22 = vpop.f32.mrf.mxu1 }
  0xec   :  { %v3383_v22 = vrot.slane %v232_v10, %v152_v19 }
 0x102   :  { %v401_v5 = vpop.f32.mrf.mxu0 }
 0x103   :  { %v402_v4 = vadd.f32 %v401_v5, %v3381_v8  ;;  %v160_v5 = vsub.s32 2, %v151_v20 }
 0x104   :  { %v403_v1 = vpop.f32.mrf.mxu0 }
 0x105   :  { %v476_v63 = vadd.f32 %v402_v4, %v3383_v22  ;;  %v404_v60 = vadd.f32 %v403_v1, %v3385_v25  ;;  %v161_v8 = vrot.slane %v130_v17, %v160_v5  ;;  %v3393_v3 = vrot.slane %v131_v13, %v160_v5  ;;  %v4433_v5 = vld [vmem:[#allocation7_spill] sm:$0xff] }
 0x107   :  { %v1846_v62 = vmul.f32 -1.442695, %v476_v63  ;;  %v483_v14 = vadd.f32 %v404_v60, %v3390_v59  ;;  %v303_v63 = vadd.f32 %v302_v23, %v161_v8  ;;  %v4428_v8 = vld [vmem:[#allocation2_spill] sm:$0xff]  ;;  %v4430_v23 = vld [vmem:[#allocation4_spill] sm:$0xff] }
 0x109   :  { %2542 = vpow2.f32 %v1846_v62  ;;  %v1847_v16 = vmul.f32 -1.442695, %v483_v14  ;;  %v3396_v62 = vrot.slane %v303_v63, %v152_v19  ;;  %v4429_v19 = vld [vmem:[#allocation3_spill] sm:$0xff]  ;;  %v4435_v63 = vld [vmem:[#allocation9_spill] sm:$0xff] }
 0x10b   :  { %v472_v57 = vpop.f32.mrf.mxu1  ;;  %2544 = vpow2.f32 %v1847_v16 }
 0x10c   :  { %v473_v0 = vadd.f32 %v472_v57, %v3393_v3  ;;  %v4427_v57 = vmov 0.0  }
 0x10d   :  { %v2154_v10 = vpop.f32.mrf.mxu1 }
 0x116   :  { %v2543_v11 = vpop.eup %2542 }
 0x117   :  { %v480_v56 = vadd.f32 1.0, %v2543_v11  ;;  %v4432_v11 = vld [vmem:[#allocation6_spill] sm:$0xff] }
 0x118   :  { %v2545_v4 = vpop.eup %2544 }
 0x119   :  { %2546 = vrcp.f32 %v480_v56  ;;  %v487_v7 = vadd.f32 1.0, %v2545_v4  ;;  %v4434_v4 = vld [vmem:[#allocation8_spill] sm:$0xff] }
 0x11b   :  { %2548 = vrcp.f32 %v487_v7  ;;  %v4436_v7 = vld [vmem:[#allocation10_spill] sm:$0xff] }
 0x126   :  { %v2547_v1 = vpop.eup %2546 }
 0x127   :  { %v490_v60 = vmul.f32 %v2547_v1, %v473_v0  ;;  %v4437_v0 = vld [vmem:[#allocation11_spill] sm:$0xff]  ;;  %v4438_v1 = vld [vmem:[#allocation12_spill] sm:$0xff] }
 0x128   :  { %v2549_v16 = vpop.eup %2548 }
 0x129   :  { %v491_v14 = vadd.f32 %v490_v60, %v3396_v62  ;;  %v493_v10 = vsub.f32 1.0, %v2549_v16  ;;  %v495_v13 = vmul.f32 %v2549_v16, %v3167_v29  ;;  %v4431_v29 = vld [vmem:[#allocation5_spill] sm:$0xff]  ;;  %v4441_v16 = vld [vmem:[#allocation15_spill] sm:$0xff] }
 0x12a   :  { %v4439_v60 = vld [vmem:[#allocation13_spill] sm:$0xff] }
 0x12b   :  { %2550 = vtanh.f32 %v491_v14  ;;  %v4440_v14 = vld [vmem:[#allocation14_spill] sm:$0xff] }
 0x138   :  { %v2551_v56 = vpop.eup %2550 }
 0x139   :  { %v494_v20 = vmul.f32 %v2551_v56, %v493_v10  ;;  %v4442_v10 = vld [vmem:[#allocation16_spill] sm:$0xff]  ;;  %v4443_v56 = vld [vmem:[#allocation17_spill] sm:$0xff] }
 0x13b   :  { %v3400_v17 = vadd.f32 %v495_v13, %v494_v20  ;;  %v4444_v20 = vld [vmem:[#allocation18_spill] sm:$0xff]  ;;  %v4445_v13 = vld [vmem:[#allocation19_spill] sm:$0xff] }
 0x13d   :  { %2188 = vmatmul.mubr.f32.vlgmr.msra.gmra.mxu0 %v3400_v17  ;;  %655 = vmatmul.mubr.f32.vlgmr.msra.gmra.mxu1 %v3400_v17 }
 0x13e   :  { %2191 = vmatpush3.msra.mxu0 %v3003_v2  ;;  %2222 = vmatprep.mubr.msk.f32.mxu0 %vm2692_vm0, %v4427_v57 }
 0x13f   :  { %2192 = vmatprep.subr.mxu0 %v4427_v57  ;;  %2226 = vmatpush3.msra.mxu1 %v3266_v37 }
 0x140   :  { %2193 = vmatpush3.msra.mxu0 %v3021_v6  ;;  %2227 = vmatprep.subr.mxu1 %v4427_v57 }
 0x141   :  { %2194 = vmatprep.subr.mxu0 %v4427_v57  ;;  %2228 = vmatpush3.msra.mxu1 %v3271_v38 }
 0x142   :  { %2195 = vmatpush3.msra.mxu0 %v3040_v9  ;;  %2229 = vmatprep.subr.mxu1 %v4427_v57 }
 0x143   :  { %2196 = vmatprep.subr.mxu0 %v4427_v57  ;;  %2230 = vmatpush3.msra.mxu1 %v3278_v39 }
 0x144   :  { %2197 = vmatpush3.msra.mxu0 %v3059_v12  ;;  %2231 = vmatprep.subr.mxu1 %v4427_v57 }
 0x145   :  { %2198 = vmatprep.subr.mxu0 %v4427_v57  ;;  %2232 = vmatpush3.msra.mxu1 %v3287_v40 }
 0x146   :  { %2199 = vmatpush3.msra.mxu0 %v3078_v15  ;;  %2233 = vmatprep.subr.mxu1 %v4427_v57 }
 0x147   :  { %2200 = vmatprep.subr.mxu0 %v4427_v57  ;;  %2234 = vmatpush3.msra.mxu1 %v3294_v41 }
 0x148   :  { %2201 = vmatpush3.msra.mxu0 %v3097_v18  ;;  %2235 = vmatprep.subr.mxu1 %v4427_v57 }
 0x149   :  { %2202 = vmatprep.subr.mxu0 %v4427_v57  ;;  %2236 = vmatpush3.msra.mxu1 %v3301_v42 }
 0x14a   :  { %2203 = vmatpush3.msra.mxu0 %v3116_v21  ;;  %2237 = vmatprep.subr.mxu1 %v4427_v57 }
 0x14b   :  { %2204 = vmatprep.subr.mxu0 %v4427_v57  ;;  %2238 = vmatpush3.msra.mxu1 %v3308_v43 }
 0x14c   :  { %2205 = vmatpush3.msra.mxu0 %v3135_v24  ;;  %2239 = vmatprep.subr.mxu1 %v4427_v57 }
 0x14d   :  { %2206 = vmatprep.subr.mxu0 %v4427_v57  ;;  %2240 = vmatpush3.msra.mxu1 %v3315_v44 }
 0x14e   :  { %2207 = vmatpush3.msra.mxu0 %v3154_v27  ;;  %2241 = vmatprep.subr.mxu1 %v4427_v57 }
 0x14f   :  { %2208 = vmatprep.subr.mxu0 %v4427_v57  ;;  %2242 = vmatpush3.msra.mxu1 %v3321_v45 }
 0x150   :  { %2209 = vmatpush3.msra.mxu0 %v3173_v30  ;;  %2243 = vmatprep.subr.mxu1 %v4427_v57 }
 0x151   :  { %2210 = vmatprep.subr.mxu0 %v4427_v57  ;;  %2244 = vmatpush3.msra.mxu1 %v3327_v49 }
 0x152   :  { %2211 = vmatpush3.msra.mxu0 %v3182_v31  ;;  %2245 = vmatprep.subr.mxu1 %v4427_v57 }
 0x153   :  { %2212 = vmatprep.subr.mxu0 %v4427_v57  ;;  %2246 = vmatpush3.msra.mxu1 %v3334_v52 }
 0x154   :  { %2213 = vmatpush3.msra.mxu0 %v3190_v32  ;;  %2247 = vmatprep.subr.mxu1 %v4427_v57 }
 0x155   :  { %2214 = vmatprep.subr.mxu0 %v4427_v57  ;;  %2248 = vmatpush3.msra.mxu1 %v3341_v55 }
 0x156   :  { %2215 = vmatpush3.msra.mxu0 %v3200_v33  ;;  %2249 = vmatprep.subr.mxu1 %v4427_v57 }
 0x157   :  { %2216 = vmatprep.subr.mxu0 %v4427_v57  ;;  %2250 = vmatpush3.msra.mxu1 %v3348_v58 }
 0x158   :  { %2217 = vmatpush3.msra.mxu0 %v3209_v34  ;;  %2251 = vmatprep.subr.mxu1 %v4427_v57 }
 0x159   :  { %2218 = vmatprep.subr.mxu0 %v4427_v57  ;;  %2252 = vmatpush3.msra.mxu1 %v3355_v61 }
 0x15a   :  { %2219 = vmatpush3.msra.mxu0 %v3216_v35  ;;  %2253 = vmatprep.subr.mxu1 %v4427_v57 }
 0x15b   :  { %2220 = vmatprep.subr.mxu0 %v4427_v57  ;;  %2254 = vmatpush3.msra.mxu1 %v3362_v28 }
 0x15c   :  { %2221 = vmatpush3.msra.mxu0 %v3223_v36  ;;  %2255 = vmatprep.subr.mxu1 %v4427_v57 }
 0x15d   :  { %2223 = vmatmul.mubr.f32.vlgmr.msra.gmra.mxu0 %v3400_v17  ;;  %840 = vmatprep.subr.mxu0 %v2894_v46 }
 0x15e   :  { %841 = vmatpush1.msra.mxu0 %v2899_v47  ;;  %2256 = vmatpush3.msra.mxu1 %v3369_v26 }
 0x15f   :  { %842 = vmatprep.subr.mxu0 %v2905_v48  ;;  %2257 = vmatprep.mubr.msk.f32.mxu1 %vm2692_vm0, %v4427_v57 }
 0x160   :  { %843 = vmatpush1.msra.mxu0 %v2914_v50  ;;  %904 = vmatprep.mubr.f32.mxu0 %v4427_v57 }
 0x161   :  { %844 = vmatprep.subr.mxu0 %v2920_v51  ;;  %2260 = vmatprep.subr.mxu1 %v4427_v57 }
 0x162   :  { %845 = vmatpush1.msra.mxu0 %v2930_v53 }
 0x163   :  { %846 = vmatprep.subr.mxu0 %v2936_v54 }
 0x164   :  { %847 = vmatpush1.msra.mxu0 %v4428_v8 }
 0x165   :  { %848 = vmatprep.subr.mxu0 %v4429_v19 }
 0x166   :  { %849 = vmatpush1.msra.mxu0 %v4430_v23 }
 0x167   :  { %850 = vmatprep.subr.mxu0 %v4431_v29 }
 0x168   :  { %851 = vmatpush1.msra.mxu0 %v4432_v11 }
 0x169   :  { %852 = vmatprep.subr.mxu0 %v4433_v5 }
 0x16a   :  { %853 = vmatpush1.msra.mxu0 %v4434_v4 }
 0x16b   :  { %854 = vmatprep.subr.mxu0 %v4435_v63  ;;  %v4446_v63 = vld [vmem:[#allocation20_spill] sm:$0xff] }
 0x16c   :  { %855 = vmatpush1.msra.mxu0 %v4436_v7  ;;  %v4447_v7 = vld [vmem:[#allocation21_spill] sm:$0xff] }
 0x16d   :  { %856 = vmatprep.subr.mxu0 %v4437_v0  ;;  %v4448_v0 = vld [vmem:[#allocation22_spill] sm:$0xff] }
 0x16e   :  { %857 = vmatpush1.msra.mxu0 %v4438_v1  ;;  %v4449_v1 = vld [vmem:[#allocation23_spill] sm:$0xff] }
 0x16f   :  { %858 = vmatprep.subr.mxu0 %v4439_v60  ;;  %v4450_v60 = vld [vmem:[#allocation24_spill] sm:$0xff] }
 0x170   :  { %859 = vmatpush1.msra.mxu0 %v4440_v14  ;;  %v4451_v14 = vld [vmem:[#allocation25_spill] sm:$0xff] }
 0x171   :  { %860 = vmatprep.subr.mxu0 %v4441_v16  ;;  %v4452_v16 = vld [vmem:[#allocation26_spill] sm:$0xff] }
 0x172   :  { %861 = vmatpush1.msra.mxu0 %v4442_v10 }
 0x173   :  { %862 = vmatprep.subr.mxu0 %v4443_v56 }
 0x174   :  { %863 = vmatpush1.msra.mxu0 %v4444_v20 }
 0x175   :  { %864 = vmatprep.subr.mxu0 %v4445_v13  ;;  %v3509_v13 = vld [vmem:[%s4327_s8] ss:$0 sm:$0xff] }
 0x176   :  { %865 = vmatpush1.msra.mxu0 %v4446_v63  ;;  %4453 = vst [vmem:[#allocation2_spill] sm:$0xff] %v3509_v13 }
 0x177   :  { %866 = vmatprep.subr.mxu0 %v4447_v7 }
 0x178   :  { %867 = vmatpush1.msra.mxu0 %v4448_v0  ;;  %v4455_v0 = vld [vmem:[#allocation27_spill] sm:$0xff] }
 0x179   :  { %868 = vmatprep.subr.mxu0 %v4449_v1 }
 0x17a   :  { %869 = vmatpush1.msra.mxu0 %v4450_v60 }
 0x17b   :  { %870 = vmatprep.subr.mxu0 %v4451_v14 }
 0x17c   :  { %871 = vmatpush1.msra.mxu0 %v4452_v16 }
 0x17d   :  { %2295 = vmatprep.subr.mxu0 %v4427_v57 }
 0x1fd   :  { %v569_v63 = vpop.f32.mrf.mxu0  ;;  %v656_v20 = vpop.f32.mrf.mxu1 }
 0x1fe   :  { %v3512_v7 = vadd.f32 %v3509_v13, %v569_v63  ;;  %v657_v1 = vadd.f32 %v656_v20, %v4455_v0 }
 0x1ff   :  { %v2189_v56 = vpop.f32.mrf.mxu0  ;;  %v658_v60 = vpop.f32.mrf.mxu1 }
 0x200   :  { %4454 = vst [vmem:[#allocation3_spill] sm:$0xff] %v3512_v7  ;;  %v731_v14 = vadd.f32 %v657_v1, %v3383_v22  ;;  %573 = vmax.xlane.f32.xlu0 %v3512_v7  ;;  %v659_v10 = vadd.f32 %v658_v60, %v3385_v25 }
 0x202   :  { %v1849_v16 = vmul.f32 -1.442695, %v731_v14  ;;  %v738_v4 = vadd.f32 %v659_v10, %v3390_v59 }
 0x204   :  { %2552 = vpow2.f32 %v1849_v16  ;;  %v1850_v5 = vmul.f32 -1.442695, %v738_v4 }
 0x206   :  { %2554 = vpow2.f32 %v1850_v5 }
 0x211   :  { %v2553_v11 = vpop.eup %2552 }
 0x212   :  { %v735_v29 = vadd.f32 1.0, %v2553_v11 }
 0x213   :  { %v2555_v63 = vpop.eup %2554 }
 0x214   :  { %2556 = vrcp.f32 %v735_v29  ;;  %v742_v20 = vadd.f32 1.0, %v2555_v63  ;;  %v4467_v29 = vld [vmem:[#allocation16_spill] sm:$0xff] }
 0x215   :  { %v4471_v63 = vld [vmem:[#allocation20_spill] sm:$0xff] }
 0x216   :  { %2558 = vrcp.f32 %v742_v20  ;;  %v4472_v20 = vld [vmem:[#allocation21_spill] sm:$0xff] }
 0x21d   :  { %v727_v13 = vpop.f32.mrf.mxu0 }
 0x21e   :  { %v728_v0 = vadd.f32 %v727_v13, %v3393_v3  ;;  %v4470_v13 = vld [vmem:[#allocation19_spill] sm:$0xff] }
 0x21f   :  { %v2224_v56 = vpop.f32.mrf.mxu0 }
 0x220   :  { %v4473_v56 = vld [vmem:[#allocation22_spill] sm:$0xff] }
 0x221   :  { %v2557_v1 = vpop.eup %2556 }
 0x222   :  { %v745_v7 = vmul.f32 %v2557_v1, %v728_v0  ;;  %v4469_v0 = vld [vmem:[#allocation18_spill] sm:$0xff]  ;;  %v4474_v1 = vld [vmem:[#allocation23_spill] sm:$0xff] }
 0x223   :  { %v2559_v60 = vpop.eup %2558 }
 0x224   :  { %v746_v14 = vadd.f32 %v745_v7, %v3396_v62  ;;  %v748_v16 = vsub.f32 1.0, %v2559_v60  ;;  %v750_v5 = vmul.f32 %v2559_v60, %v3400_v17  ;;  %v4461_v17 = vld [vmem:[#allocation10_spill] sm:$0xff]  ;;  %v4468_v7 = vld [vmem:[#allocation17_spill] sm:$0xff] }
 0x225   :  { %v4476_v60 = vld [vmem:[#allocation25_spill] sm:$0xff] }
 0x226   :  { %2560 = vtanh.f32 %v746_v14  ;;  %v4475_v14 = vld [vmem:[#allocation24_spill] sm:$0xff] }
 0x233   :  { %v2561_v10 = vpop.eup %2560 }
 0x234   :  { %v749_v4 = vmul.f32 %v2561_v10, %v748_v16  ;;  %v4477_v16 = vld [vmem:[#allocation26_spill] sm:$0xff] }
 0x236   :  { %v3522_v11 = vadd.f32 %v750_v5, %v749_v4  ;;  %v4478_v5 = vld [vmem:[#allocation2_spill] sm:$0xff] }
 0x238   :  { %2258 = vmatmul.mubr.f32.vlgmr.msra.gmra.mxu1 %v3522_v11  ;;  %905 = vmatmul.mubr.f32.vlgmr.msra.gmra.mxu0 %v3522_v11 }
 0x239   :  { %2261 = vmatpush3.msra.mxu1 %v3003_v2  ;;  %2292 = vmatprep.mubr.msk.f32.mxu1 %vm2692_vm0, %v4427_v57 }
 0x23a   :  { %2262 = vmatprep.subr.mxu1 %v4427_v57  ;;  %2296 = vmatpush3.msra.mxu0 %v3266_v37 }
 0x23b   :  { %2263 = vmatpush3.msra.mxu1 %v3021_v6  ;;  %2297 = vmatprep.subr.mxu0 %v4427_v57 }
 0x23c   :  { %2264 = vmatprep.subr.mxu1 %v4427_v57  ;;  %2298 = vmatpush3.msra.mxu0 %v3271_v38 }
 0x23d   :  { %2265 = vmatpush3.msra.mxu1 %v3040_v9  ;;  %2299 = vmatprep.subr.mxu0 %v4427_v57 }
 0x23e   :  { %2266 = vmatprep.subr.mxu1 %v4427_v57  ;;  %2300 = vmatpush3.msra.mxu0 %v3278_v39 }
 0x23f   :  { %2267 = vmatpush3.msra.mxu1 %v3059_v12  ;;  %2301 = vmatprep.subr.mxu0 %v4427_v57 }
 0x240   :  { %2268 = vmatprep.subr.mxu1 %v4427_v57  ;;  %2302 = vmatpush3.msra.mxu0 %v3287_v40 }
 0x241   :  { %2269 = vmatpush3.msra.mxu1 %v3078_v15  ;;  %2303 = vmatprep.subr.mxu0 %v4427_v57 }
 0x242   :  { %2270 = vmatprep.subr.mxu1 %v4427_v57  ;;  %2304 = vmatpush3.msra.mxu0 %v3294_v41 }
 0x243   :  { %2271 = vmatpush3.msra.mxu1 %v3097_v18  ;;  %2305 = vmatprep.subr.mxu0 %v4427_v57 }
 0x244   :  { %2272 = vmatprep.subr.mxu1 %v4427_v57  ;;  %2306 = vmatpush3.msra.mxu0 %v3301_v42 }
 0x245   :  { %2273 = vmatpush3.msra.mxu1 %v3116_v21  ;;  %2307 = vmatprep.subr.mxu0 %v4427_v57 }
 0x246   :  { %2274 = vmatprep.subr.mxu1 %v4427_v57  ;;  %2308 = vmatpush3.msra.mxu0 %v3308_v43 }
 0x247   :  { %2275 = vmatpush3.msra.mxu1 %v3135_v24  ;;  %2309 = vmatprep.subr.mxu0 %v4427_v57 }
 0x248   :  { %2276 = vmatprep.subr.mxu1 %v4427_v57  ;;  %2310 = vmatpush3.msra.mxu0 %v3315_v44 }
 0x249   :  { %2277 = vmatpush3.msra.mxu1 %v3154_v27  ;;  %2311 = vmatprep.subr.mxu0 %v4427_v57 }
 0x24a   :  { %2278 = vmatprep.subr.mxu1 %v4427_v57  ;;  %2312 = vmatpush3.msra.mxu0 %v3321_v45 }
 0x24b   :  { %2279 = vmatpush3.msra.mxu1 %v3173_v30  ;;  %2313 = vmatprep.subr.mxu0 %v4427_v57 }
 0x24c   :  { %2280 = vmatprep.subr.mxu1 %v4427_v57  ;;  %2314 = vmatpush3.msra.mxu0 %v3327_v49 }
 0x24d   :  { %2281 = vmatpush3.msra.mxu1 %v3182_v31  ;;  %2315 = vmatprep.subr.mxu0 %v4427_v57 }
 0x24e   :  { %2282 = vmatprep.subr.mxu1 %v4427_v57  ;;  %2316 = vmatpush3.msra.mxu0 %v3334_v52 }
 0x24f   :  { %2283 = vmatpush3.msra.mxu1 %v3190_v32  ;;  %2317 = vmatprep.subr.mxu0 %v4427_v57 }
 0x250   :  { %2284 = vmatprep.subr.mxu1 %v4427_v57  ;;  %2318 = vmatpush3.msra.mxu0 %v3341_v55 }
 0x251   :  { %2285 = vmatpush3.msra.mxu1 %v3200_v33  ;;  %2319 = vmatprep.subr.mxu0 %v4427_v57 }
 0x252   :  { %2286 = vmatprep.subr.mxu1 %v4427_v57  ;;  %2320 = vmatpush3.msra.mxu0 %v3348_v58 }
 0x253   :  { %2287 = vmatpush3.msra.mxu1 %v3209_v34  ;;  %2321 = vmatprep.subr.mxu0 %v4427_v57 }
 0x254   :  { %2288 = vmatprep.subr.mxu1 %v4427_v57  ;;  %2322 = vmatpush3.msra.mxu0 %v3355_v61 }
 0x255   :  { %2289 = vmatpush3.msra.mxu1 %v3216_v35  ;;  %2323 = vmatprep.subr.mxu0 %v4427_v57 }
 0x256   :  { %2290 = vmatprep.subr.mxu1 %v4427_v57  ;;  %2324 = vmatpush3.msra.mxu0 %v3362_v28 }
 0x257   :  { %2291 = vmatpush3.msra.mxu1 %v3223_v36  ;;  %2325 = vmatprep.subr.mxu0 %v4427_v57 }
 0x258   :  { %2293 = vmatmul.mubr.f32.vlgmr.msra.gmra.mxu1 %v3522_v11  ;;  %1090 = vmatprep.subr.mxu1 %v2894_v46  ;;  %v4456_v46 = vld [vmem:[#allocation5_spill] sm:$0xff] }
 0x259   :  { %1091 = vmatpush1.msra.mxu1 %v2899_v47  ;;  %2326 = vmatpush3.msra.mxu0 %v3369_v26  ;;  %v4457_v47 = vld [vmem:[#allocation6_spill] sm:$0xff] }
 0x25a   :  { %1092 = vmatprep.subr.mxu1 %v2905_v48  ;;  %2327 = vmatprep.mubr.msk.f32.mxu0 %vm2692_vm0, %v4427_v57  ;;  %v4458_v48 = vld [vmem:[#allocation7_spill] sm:$0xff] }
 0x25b   :  { %1093 = vmatpush1.msra.mxu1 %v2914_v50  ;;  %1154 = vmatprep.mubr.f32.mxu1 %v4427_v57  ;;  %v4459_v50 = vld [vmem:[#allocation8_spill] sm:$0xff] }
 0x25c   :  { %1094 = vmatprep.subr.mxu1 %v2920_v51  ;;  %2330 = vmatprep.subr.mxu0 %v4427_v57  ;;  %v4460_v51 = vld [vmem:[#allocation9_spill] sm:$0xff] }
 0x25d   :  { %1095 = vmatpush1.msra.mxu1 %v2930_v53  ;;  %v4462_v53 = vld [vmem:[#allocation11_spill] sm:$0xff] }
 0x25e   :  { %1096 = vmatprep.subr.mxu1 %v2936_v54  ;;  %v4463_v54 = vld [vmem:[#allocation12_spill] sm:$0xff] }
 0x25f   :  { %1097 = vmatpush1.msra.mxu1 %v4428_v8  ;;  %v4464_v8 = vld [vmem:[#allocation13_spill] sm:$0xff] }
 0x260   :  { %1098 = vmatprep.subr.mxu1 %v4429_v19  ;;  %v4465_v19 = vld [vmem:[#allocation14_spill] sm:$0xff] }
 0x261   :  { %1099 = vmatpush1.msra.mxu1 %v4430_v23  ;;  %v4466_v23 = vld [vmem:[#allocation15_spill] sm:$0xff] }
 0x262   :  { %1100 = vmatprep.subr.mxu1 %v4456_v46 }
 0x263   :  { %1101 = vmatpush1.msra.mxu1 %v4457_v47  ;;  %v4480_v47 = vld [vmem:[#allocation27_spill] sm:$0xff] }
 0x264   :  { %1102 = vmatprep.subr.mxu1 %v4458_v48 }
 0x265   :  { %1103 = vmatpush1.msra.mxu1 %v4459_v50 }
 0x266   :  { %1104 = vmatprep.subr.mxu1 %v4460_v51 }
 0x267   :  { %1105 = vmatpush1.msra.mxu1 %v4461_v17 }
 0x268   :  { %1106 = vmatprep.subr.mxu1 %v4462_v53 }
 0x269   :  { %1107 = vmatpush1.msra.mxu1 %v4463_v54 }
 0x26a   :  { %1108 = vmatprep.subr.mxu1 %v4464_v8 }
 0x26b   :  { %1109 = vmatpush1.msra.mxu1 %v4465_v19 }
 0x26c   :  { %1110 = vmatprep.subr.mxu1 %v4466_v23 }
 0x26d   :  { %1111 = vmatpush1.msra.mxu1 %v4467_v29 }
 0x26e   :  { %1112 = vmatprep.subr.mxu1 %v4468_v7 }
 0x26f   :  { %1113 = vmatpush1.msra.mxu1 %v4469_v0 }
 0x270   :  { %1114 = vmatprep.subr.mxu1 %v4470_v13 }
 0x271   :  { %1115 = vmatpush1.msra.mxu1 %v4471_v63 }
 0x272   :  { %1116 = vmatprep.subr.mxu1 %v4472_v20 }
 0x273   :  { %1117 = vmatpush1.msra.mxu1 %v4473_v56 }
 0x274   :  { %1118 = vmatprep.subr.mxu1 %v4474_v1 }
 0x275   :  { %1119 = vmatpush1.msra.mxu1 %v4475_v14 }
 0x276   :  { %1120 = vmatprep.subr.mxu1 %v4476_v60 }
 0x277   :  { %1121 = vmatpush1.msra.mxu1 %v4477_v16 }
 0x278   :  { %2365 = vmatprep.subr.mxu1 %v4427_v57 }
 0x2f8   :  { %v818_v10 = vpop.f32.mrf.mxu1  ;;  %v906_v4 = vpop.f32.mrf.mxu0 }
 0x2f9   :  { %v3629_v46 = vadd.f32 %v4478_v5, %v818_v10  ;;  %v907_v48 = vadd.f32 %v906_v4, %v4480_v47 }
 0x2fa   :  { %v2259_v50 = vpop.f32.mrf.mxu1  ;;  %v908_v51 = vpop.f32.mrf.mxu0 }
 0x2fb   :  { %4479 = vst [vmem:[#allocation4_spill] sm:$0xff] %v3629_v46  ;;  %v981_v17 = vadd.f32 %v907_v48, %v3383_v22  ;;  %822 = vmax.xlane.f32.xlu0 %v3629_v46  ;;  %v909_v54 = vadd.f32 %v908_v51, %v3385_v25  ;;  %v4072_v46 = vld [vmem:[%s4324_s7 + $0x28] sm:$0xff] }
 0x2fc   :  { %4483 = vst [vmem:[#allocation7_spill] sm:$0xff] %v4072_v46 }
 0x2fd   :  { %v1852_v53 = vmul.f32 -1.442695, %v981_v17  ;;  %v988_v8 = vadd.f32 %v909_v54, %v3390_v59 }
 0x2ff   :  { %2562 = vpow2.f32 %v1852_v53  ;;  %v1853_v19 = vmul.f32 -1.442695, %v988_v8 }
 0x301   :  { %2564 = vpow2.f32 %v1853_v19 }
 0x30c   :  { %v2563_v23 = vpop.eup %2562 }
 0x30d   :  { %v985_v29 = vadd.f32 1.0, %v2563_v23 }
 0x30e   :  { %v2565_v7 = vpop.eup %2564 }
 0x30f   :  { %2566 = vrcp.f32 %v985_v29  ;;  %v992_v13 = vadd.f32 1.0, %v2565_v7 }
 0x311   :  { %2568 = vrcp.f32 %v992_v13 }
 0x318   :  { %v977_v0 = vpop.f32.mrf.mxu1 }
 0x319   :  { %v978_v20 = vadd.f32 %v977_v0, %v3393_v3 }
 0x31a   :  { %v2294_v63 = vpop.f32.mrf.mxu1 }
 0x31c   :  { %v2567_v56 = vpop.eup %2566 }
 0x31d   :  { %v995_v1 = vmul.f32 %v2567_v56, %v978_v20 }
 0x31e   :  { %v2569_v60 = vpop.eup %2568 }
 0x31f   :  { %v996_v14 = vadd.f32 %v995_v1, %v3396_v62  ;;  %v998_v16 = vsub.f32 1.0, %v2569_v60  ;;  %v1000_v48 = vmul.f32 %v2569_v60, %v3522_v11 }
 0x321   :  { %2570 = vtanh.f32 %v996_v14 }
 0x32e   :  { %v2571_v10 = vpop.eup %2570 }
 0x32f   :  { %v999_v4 = vmul.f32 %v2571_v10, %v998_v16 }
 0x331   :  { %v3639_v50 = vadd.f32 %v1000_v48, %v999_v4 }
 0x333   :  { %2328 = vmatmul.mubr.f32.vlgmr.msra.gmra.mxu0 %v3639_v50  ;;  %1155 = vmatmul.mubr.f32.vlgmr.msra.gmra.mxu1 %v3639_v50 }
 0x334   :  { %2331 = vmatpush3.msra.mxu0 %v3003_v2  ;;  %2362 = vmatprep.mubr.msk.f32.mxu0 %vm2692_vm0, %v4427_v57  ;;  %v3710_v2 = vld [vmem:[%s4322_s4 + $0x170] sm:$0xff] }
 0x335   :  { %2332 = vmatprep.subr.mxu0 %v4427_v57  ;;  %2366 = vmatpush3.msra.mxu1 %v3266_v37  ;;  %v3823_v37 = vld [vmem:[%s4322_s4 + $0x98] sm:$0xff] }
 0x336   :  { %2333 = vmatpush3.msra.mxu0 %v3021_v6  ;;  %2367 = vmatprep.subr.mxu1 %v4427_v57  ;;  %v3716_v6 = vld [vmem:[%s4322_s4 + $0x168] sm:$0xff] }
 0x337   :  { %2334 = vmatprep.subr.mxu0 %v4427_v57  ;;  %2368 = vmatpush3.msra.mxu1 %v3271_v38  ;;  %v3829_v38 = vld [vmem:[%s4322_s4 + $0x90] sm:$0xff] }
 0x338   :  { %2335 = vmatpush3.msra.mxu0 %v3040_v9  ;;  %2369 = vmatprep.subr.mxu1 %v4427_v57  ;;  %v3723_v9 = vld [vmem:[%s4322_s4 + $0x158] sm:$0xff] }
 0x339   :  { %2336 = vmatprep.subr.mxu0 %v4427_v57  ;;  %2370 = vmatpush3.msra.mxu1 %v3278_v39  ;;  %v3835_v39 = vld [vmem:[%s4322_s4 + $0x80] sm:$0xff] }
 0x33a   :  { %2337 = vmatpush3.msra.mxu0 %v3059_v12  ;;  %2371 = vmatprep.subr.mxu1 %v4427_v57  ;;  %v3731_v12 = vld [vmem:[%s4322_s4 + $0x150] sm:$0xff] }
 0x33b   :  { %2338 = vmatprep.subr.mxu0 %v4427_v57  ;;  %2372 = vmatpush3.msra.mxu1 %v3287_v40  ;;  %v3841_v40 = vld [vmem:[%s4322_s4 + $0x78] sm:$0xff] }
 0x33c   :  { %2339 = vmatpush3.msra.mxu0 %v3078_v15  ;;  %2373 = vmatprep.subr.mxu1 %v4427_v57  ;;  %v3738_v15 = vld [vmem:[%s4322_s4 + $0x140] sm:$0xff] }
 0x33d   :  { %2340 = vmatprep.subr.mxu0 %v4427_v57  ;;  %2374 = vmatpush3.msra.mxu1 %v3294_v41  ;;  %v3847_v41 = vld [vmem:[%s4322_s4 + $0x68] sm:$0xff] }
 0x33e   :  { %2341 = vmatpush3.msra.mxu0 %v3097_v18  ;;  %2375 = vmatprep.subr.mxu1 %v4427_v57  ;;  %v3745_v18 = vld [vmem:[%s4322_s4 + $0x138] sm:$0xff] }
 0x33f   :  { %2342 = vmatprep.subr.mxu0 %v4427_v57  ;;  %2376 = vmatpush3.msra.mxu1 %v3301_v42  ;;  %v3853_v42 = vld [vmem:[%s4322_s4 + $0x60] sm:$0xff] }
 0x340   :  { %2343 = vmatpush3.msra.mxu0 %v3116_v21  ;;  %2377 = vmatprep.subr.mxu1 %v4427_v57  ;;  %v3751_v21 = vld [vmem:[%s4322_s4 + $0x128] sm:$0xff] }
 0x341   :  { %2344 = vmatprep.subr.mxu0 %v4427_v57  ;;  %2378 = vmatpush3.msra.mxu1 %v3308_v43  ;;  %v3859_v43 = vld [vmem:[%s4322_s4 + $0x50] sm:$0xff] }
 0x342   :  { %2345 = vmatpush3.msra.mxu0 %v3135_v24  ;;  %2379 = vmatprep.subr.mxu1 %v4427_v57  ;;  %v3757_v24 = vld [vmem:[%s4322_s4 + $0x120] sm:$0xff] }
 0x343   :  { %2346 = vmatprep.subr.mxu0 %v4427_v57  ;;  %2380 = vmatpush3.msra.mxu1 %v3315_v44  ;;  %v3865_v44 = vld [vmem:[%s4322_s4 + $0x48] sm:$0xff] }
 0x344   :  { %2347 = vmatpush3.msra.mxu0 %v3154_v27  ;;  %2381 = vmatprep.subr.mxu1 %v4427_v57  ;;  %v3769_v27 = vld [vmem:[%s4322_s4 + $0x108] sm:$0xff] }
 0x345   :  { %2348 = vmatprep.subr.mxu0 %v4427_v57  ;;  %2382 = vmatpush3.msra.mxu1 %v3321_v45  ;;  %v3871_v45 = vld [vmem:[%s4322_s4 + $0x38] sm:$0xff] }
 0x346   :  { %2349 = vmatpush3.msra.mxu0 %v3173_v30  ;;  %2383 = vmatprep.subr.mxu1 %v4427_v57  ;;  %v3781_v30 = vld [vmem:[%s4322_s4 + $0xf0] sm:$0xff] }
 0x347   :  { %2350 = vmatprep.subr.mxu0 %v4427_v57  ;;  %2384 = vmatpush3.msra.mxu1 %v3327_v49  ;;  %v3877_v49 = vld [vmem:[%s4322_s4 + $0x30] sm:$0xff] }
 0x348   :  { %2351 = vmatpush3.msra.mxu0 %v3182_v31  ;;  %2385 = vmatprep.subr.mxu1 %v4427_v57  ;;  %v3787_v31 = vld [vmem:[%s4322_s4 + $0xe0] sm:$0xff] }
 0x349   :  { %2352 = vmatprep.subr.mxu0 %v4427_v57  ;;  %2386 = vmatpush3.msra.mxu1 %v3334_v52  ;;  %v3883_v52 = vld [vmem:[%s4322_s4 + $0x20] sm:$0xff] }
 0x34a   :  { %2353 = vmatpush3.msra.mxu0 %v3190_v32  ;;  %2387 = vmatprep.subr.mxu1 %v4427_v57  ;;  %v3793_v32 = vld [vmem:[%s4322_s4 + $0xd8] sm:$0xff] }
 0x34b   :  { %2354 = vmatprep.subr.mxu0 %v4427_v57  ;;  %2388 = vmatpush3.msra.mxu1 %v3341_v55  ;;  %v3889_v55 = vld [vmem:[%s4322_s4 + $0x18] sm:$0xff] }
 0x34c   :  { %2355 = vmatpush3.msra.mxu0 %v3200_v33  ;;  %2389 = vmatprep.subr.mxu1 %v4427_v57  ;;  %v3799_v33 = vld [vmem:[%s4322_s4 + $0xc8] sm:$0xff] }
 0x34d   :  { %2356 = vmatprep.subr.mxu0 %v4427_v57  ;;  %2390 = vmatpush3.msra.mxu1 %v3348_v58  ;;  %v3895_v58 = vld [vmem:[%s4322_s4 + $0x8] sm:$0xff] }
 0x34e   :  { %2357 = vmatpush3.msra.mxu0 %v3209_v34  ;;  %2391 = vmatprep.subr.mxu1 %v4427_v57  ;;  %v3805_v34 = vld [vmem:[%s4322_s4 + $0xc0] sm:$0xff] }
 0x34f   :  { %2358 = vmatprep.subr.mxu0 %v4427_v57  ;;  %2392 = vmatpush3.msra.mxu1 %v3355_v61  ;;  %v3901_v61 = vld [vmem:[%s4322_s4] sm:$0xff] }
 0x350   :  { %2359 = vmatpush3.msra.mxu0 %v3216_v35  ;;  %2393 = vmatprep.subr.mxu1 %v4427_v57  ;;  %v3811_v35 = vld [vmem:[%s4322_s4 + $0xb0] sm:$0xff] }
 0x351   :  { %2360 = vmatprep.subr.mxu0 %v4427_v57  ;;  %2394 = vmatpush3.msra.mxu1 %v3362_v28  ;;  %v3775_v28 = vld [vmem:[%s4322_s4 + $0xf8] sm:$0xff] }
 0x352   :  { %2361 = vmatpush3.msra.mxu0 %v3223_v36  ;;  %2395 = vmatprep.subr.mxu1 %v4427_v57  ;;  %v3817_v36 = vld [vmem:[%s4322_s4 + $0xa8] sm:$0xff] }
 0x353   :  { %2363 = vmatmul.mubr.f32.vlgmr.msra.gmra.mxu0 %v3639_v50  ;;  %1340 = vmatprep.subr.mxu0 %v3710_v2 }
 0x354   :  { %1341 = vmatpush1.msra.mxu0 %v3716_v6  ;;  %2396 = vmatpush3.msra.mxu1 %v3369_v26  ;;  %v3763_v26 = vld [vmem:[%s4322_s4 + $0x110] sm:$0xff] }
 0x355   :  { %1342 = vmatprep.subr.mxu0 %v3723_v9  ;;  %2397 = vmatprep.mubr.msk.f32.mxu1 %vm2692_vm0, %v4427_v57 }
 0x356   :  { %1343 = vmatpush1.msra.mxu0 %v3731_v12  ;;  %1404 = vmatprep.mubr.f32.mxu0 %v4427_v57 }
 0x357   :  { %1344 = vmatprep.subr.mxu0 %v3738_v15  ;;  %2400 = vmatprep.subr.mxu1 %v4427_v57 }
 0x358   :  { %1345 = vmatpush1.msra.mxu0 %v3745_v18 }
 0x359   :  { %1346 = vmatprep.subr.mxu0 %v3751_v21 }
 0x35a   :  { %1347 = vmatpush1.msra.mxu0 %v3757_v24 }
 0x35b   :  { %1348 = vmatprep.subr.mxu0 %v3763_v26 }
 0x35c   :  { %1349 = vmatpush1.msra.mxu0 %v3769_v27 }
 0x35d   :  { %1350 = vmatprep.subr.mxu0 %v3775_v28 }
 0x35e   :  { %1351 = vmatpush1.msra.mxu0 %v3781_v30 }
 0x35f   :  { %1352 = vmatprep.subr.mxu0 %v3787_v31 }
 0x360   :  { %1353 = vmatpush1.msra.mxu0 %v3793_v32 }
 0x361   :  { %1354 = vmatprep.subr.mxu0 %v3799_v33 }
 0x362   :  { %1355 = vmatpush1.msra.mxu0 %v3805_v34 }
 0x363   :  { %1356 = vmatprep.subr.mxu0 %v3811_v35 }
 0x364   :  { %1357 = vmatpush1.msra.mxu0 %v3817_v36 }
 0x365   :  { %1358 = vmatprep.subr.mxu0 %v3823_v37 }
 0x366   :  { %1359 = vmatpush1.msra.mxu0 %v3829_v38 }
 0x367   :  { %1360 = vmatprep.subr.mxu0 %v3835_v39 }
 0x368   :  { %1361 = vmatpush1.msra.mxu0 %v3841_v40 }
 0x369   :  { %1362 = vmatprep.subr.mxu0 %v3847_v41 }
 0x36a   :  { %1363 = vmatpush1.msra.mxu0 %v3853_v42 }
 0x36b   :  { %1364 = vmatprep.subr.mxu0 %v3859_v43 }
 0x36c   :  { %1365 = vmatpush1.msra.mxu0 %v3865_v44 }
 0x36d   :  { %1366 = vmatprep.subr.mxu0 %v3871_v45 }
 0x36e   :  { %1367 = vmatpush1.msra.mxu0 %v3877_v49 }
 0x36f   :  { %1368 = vmatprep.subr.mxu0 %v3883_v52 }
 0x370   :  { %1369 = vmatpush1.msra.mxu0 %v3889_v55 }
 0x371   :  { %1370 = vmatprep.subr.mxu0 %v3895_v58 }
 0x372   :  { %1371 = vmatpush1.msra.mxu0 %v3901_v61 }
 0x373   :  { %2435 = vmatprep.subr.mxu0 %v4427_v57 }
 0x3f3   :  { %v1068_v11 = vpop.f32.mrf.mxu0  ;;  %v1156_v51 = vpop.f32.mrf.mxu1 }
 0x3f4   :  { %v3906_v17 = vadd.f32 %v4478_v5, %v1068_v11  ;;  %v1157_v53 = vadd.f32 %v1156_v51, %v4480_v47 }
 0x3f5   :  { %v2329_v54 = vpop.f32.mrf.mxu0  ;;  %v1158_v8 = vpop.f32.mrf.mxu1 }
 0x3f6   :  { %4481 = vst [vmem:[#allocation5_spill] sm:$0xff] %v3906_v17  ;;  %v1231_v19 = vadd.f32 %v1157_v53, %v3383_v22  ;;  %1072 = vmax.xlane.f32.xlu1 %v3906_v17  ;;  %v1159_v29 = vadd.f32 %v1158_v8, %v3385_v25  ;;  %v4078_v17 = vld [vmem:[%s4322_s4 + $0x70] sm:$0xff] }
 0x3f7   :  { %4484 = vst [vmem:[#allocation8_spill] sm:$0xff] %v4078_v17 }
 0x3f8   :  { %v1855_v23 = vmul.f32 -1.442695, %v1231_v19  ;;  %v1238_v7 = vadd.f32 %v1159_v29, %v3390_v59  ;;  %v3923_v19 = vld [vmem:[%s4322_s4 + $0x178] sm:$0xff]  ;;  %v3946_v29 = vld [vmem:[%s4324_s7 + $0x70] sm:$0xff] }
 0x3fa   :  { %2572 = vpow2.f32 %v1855_v23  ;;  %v1856_v0 = vmul.f32 -1.442695, %v1238_v7  ;;  %v3938_v23 = vld [vmem:[%s4322_s4 + $0x160] sm:$0xff]  ;;  %v3952_v7 = vld [vmem:[%s4322_s4 + $0x148] sm:$0xff] }
 0x3fc   :  { %2574 = vpow2.f32 %v1856_v0  ;;  %v3960_v0 = vld [vmem:[%s4324_s7 + $0x68] sm:$0xff] }
 0x407   :  { %v2573_v13 = vpop.eup %2572 }
 0x408   :  { %v1235_v63 = vadd.f32 1.0, %v2573_v13  ;;  %v3966_v13 = vld [vmem:[%s4322_s4 + $0x130] sm:$0xff] }
 0x409   :  { %v2575_v20 = vpop.eup %2574 }
 0x40a   :  { %2576 = vrcp.f32 %v1235_v63  ;;  %v1242_v1 = vadd.f32 1.0, %v2575_v20  ;;  %v3974_v63 = vld [vmem:[%s4324_s7 + $0x60] sm:$0xff]  ;;  %v3980_v20 = vld [vmem:[%s4322_s4 + $0x118] sm:$0xff] }
 0x40c   :  { %2578 = vrcp.f32 %v1242_v1  ;;  %v3994_v1 = vld [vmem:[%s4322_s4 + $0x100] sm:$0xff] }
 0x413   :  { %v1227_v56 = vpop.f32.mrf.mxu0 }
 0x414   :  { %v1228_v60 = vadd.f32 %v1227_v56, %v3393_v3  ;;  %v3988_v56 = vld [vmem:[%s4324_s7 + $0x58] sm:$0xff] }
 0x415   :  { %v2364_v14 = vpop.f32.mrf.mxu0 }
 0x416   :  { %v4002_v14 = vld [vmem:[%s4324_s7 + $0x50] sm:$0xff] }
 0x417   :  { %v2577_v16 = vpop.eup %2576 }
 0x418   :  { %v1245_v10 = vmul.f32 %v2577_v16, %v1228_v60  ;;  %v4008_v60 = vld [vmem:[%s4322_s4 + $0xe8] sm:$0xff] }
 0x419   :  { %v2579_v48 = vpop.eup %2578  ;;  %v4016_v16 = vld [vmem:[%s4324_s7 + $0x48] sm:$0xff] }
 0x41a   :  { %v1246_v4 = vadd.f32 %v1245_v10, %v3396_v62  ;;  %v1248_v11 = vsub.f32 1.0, %v2579_v48  ;;  %v1250_v54 = vmul.f32 %v2579_v48, %v3639_v50  ;;  %v3932_v50 = vld [vmem:[%s4324_s7 + $0x78] sm:$0xff]  ;;  %v4022_v10 = vld [vmem:[%s4322_s4 + $0xd0] sm:$0xff] }
 0x41b   :  { %v4036_v48 = vld [vmem:[%s4322_s4 + $0xb8] sm:$0xff] }
 0x41c   :  { %2580 = vtanh.f32 %v1246_v4  ;;  %v4030_v4 = vld [vmem:[%s4324_s7 + $0x40] sm:$0xff] }
 0x429   :  { %v2581_v51 = vpop.eup %2580 }
 0x42a   :  { %v1249_v53 = vmul.f32 %v2581_v51, %v1248_v11  ;;  %v4044_v11 = vld [vmem:[%s4324_s7 + $0x38] sm:$0xff]  ;;  %v4050_v51 = vld [vmem:[%s4322_s4 + $0xa0] sm:$0xff] }
 0x42c   :  { %v3916_v8 = vadd.f32 %v1250_v54, %v1249_v53  ;;  %v4058_v53 = vld [vmem:[%s4324_s7 + $0x30] sm:$0xff]  ;;  %v4064_v54 = vld [vmem:[%s4322_s4 + $0x88] sm:$0xff] }
 0x42d   :  { %4482 = vst [vmem:[#allocation6_spill] sm:$0xff] %v4064_v54 }
 0x42e   :  { %2398 = vmatmul.mubr.f32.vlgmr.msra.gmra.mxu1 %v3916_v8  ;;  %1405 = vmatmul.mubr.f32.vlgmr.msra.gmra.mxu0 %v3916_v8 }
 0x42f   :  { %2401 = vmatpush3.msra.mxu1 %v3923_v19  ;;  %2432 = vmatprep.mubr.msk.f32.mxu1 %vm2692_vm0, %v4427_v57 }
 0x430   :  { %2402 = vmatprep.subr.mxu1 %v4427_v57  ;;  %2436 = vmatpush3.msra.mxu0 %v3932_v50 }
 0x431   :  { %2403 = vmatpush3.msra.mxu1 %v3938_v23  ;;  %2437 = vmatprep.subr.mxu0 %v4427_v57 }
 0x432   :  { %2404 = vmatprep.subr.mxu1 %v4427_v57  ;;  %2438 = vmatpush3.msra.mxu0 %v3946_v29 }
 0x433   :  { %2405 = vmatpush3.msra.mxu1 %v3952_v7  ;;  %2439 = vmatprep.subr.mxu0 %v4427_v57 }
 0x434   :  { %2406 = vmatprep.subr.mxu1 %v4427_v57  ;;  %2440 = vmatpush3.msra.mxu0 %v3960_v0 }
 0x435   :  { %2407 = vmatpush3.msra.mxu1 %v3966_v13  ;;  %2441 = vmatprep.subr.mxu0 %v4427_v57 }
 0x436   :  { %2408 = vmatprep.subr.mxu1 %v4427_v57  ;;  %2442 = vmatpush3.msra.mxu0 %v3974_v63 }
 0x437   :  { %2409 = vmatpush3.msra.mxu1 %v3980_v20  ;;  %2443 = vmatprep.subr.mxu0 %v4427_v57 }
 0x438   :  { %2410 = vmatprep.subr.mxu1 %v4427_v57  ;;  %2444 = vmatpush3.msra.mxu0 %v3988_v56 }
 0x439   :  { %2411 = vmatpush3.msra.mxu1 %v3994_v1  ;;  %2445 = vmatprep.subr.mxu0 %v4427_v57 }
 0x43a   :  { %2412 = vmatprep.subr.mxu1 %v4427_v57  ;;  %2446 = vmatpush3.msra.mxu0 %v4002_v14 }
 0x43b   :  { %2413 = vmatpush3.msra.mxu1 %v4008_v60  ;;  %2447 = vmatprep.subr.mxu0 %v4427_v57 }
 0x43c   :  { %2414 = vmatprep.subr.mxu1 %v4427_v57  ;;  %2448 = vmatpush3.msra.mxu0 %v4016_v16 }
 0x43d   :  { %2415 = vmatpush3.msra.mxu1 %v4022_v10  ;;  %2449 = vmatprep.subr.mxu0 %v4427_v57 }
 0x43e   :  { %2416 = vmatprep.subr.mxu1 %v4427_v57  ;;  %2450 = vmatpush3.msra.mxu0 %v4030_v4 }
 0x43f   :  { %2417 = vmatpush3.msra.mxu1 %v4036_v48  ;;  %2451 = vmatprep.subr.mxu0 %v4427_v57 }
 0x440   :  { %2418 = vmatprep.subr.mxu1 %v4427_v57  ;;  %2452 = vmatpush3.msra.mxu0 %v4044_v11 }
 0x441   :  { %2419 = vmatpush3.msra.mxu1 %v4050_v51  ;;  %2453 = vmatprep.subr.mxu0 %v4427_v57 }
 0x442   :  { %2420 = vmatprep.subr.mxu1 %v4427_v57  ;;  %2454 = vmatpush3.msra.mxu0 %v4058_v53 }
 0x443   :  { %2421 = vmatpush3.msra.mxu1 %v4064_v54  ;;  %2455 = vmatprep.subr.mxu0 %v4427_v57  ;;  %v4086_v54 = vld [vmem:[%s4324_s7 + $0x20] sm:$0xff] }
 0x444   :  { %2422 = vmatprep.subr.mxu1 %v4427_v57  ;;  %2456 = vmatpush3.msra.mxu0 %v4072_v46  ;;  %4485 = vst [vmem:[#allocation9_spill] sm:$0xff] %v4086_v54  ;;  %v4092_v46 = vld [vmem:[%s4322_s4 + $0x58] sm:$0xff] }
 0x445   :  { %2423 = vmatpush3.msra.mxu1 %v4078_v17  ;;  %2457 = vmatprep.subr.mxu0 %v4427_v57  ;;  %4486 = vst [vmem:[#allocation10_spill] sm:$0xff] %v4092_v46  ;;  %v4100_v17 = vld [vmem:[%s4324_s7 + $0x18] sm:$0xff] }
 0x446   :  { %2424 = vmatprep.subr.mxu1 %v4427_v57  ;;  %2458 = vmatpush3.msra.mxu0 %v4086_v54  ;;  %4487 = vst [vmem:[#allocation11_spill] sm:$0xff] %v4100_v17  ;;  %v4106_v54 = vld [vmem:[%s4322_s4 + $0x40] sm:$0xff] }
 0x447   :  { %2425 = vmatpush3.msra.mxu1 %v4092_v46  ;;  %2459 = vmatprep.subr.mxu0 %v4427_v57  ;;  %4488 = vst [vmem:[#allocation12_spill] sm:$0xff] %v4106_v54  ;;  %v4114_v46 = vld [vmem:[%s4324_s7 + $0x10] sm:$0xff] }
 0x448   :  { %2426 = vmatprep.subr.mxu1 %v4427_v57  ;;  %2460 = vmatpush3.msra.mxu0 %v4100_v17  ;;  %4489 = vst [vmem:[#allocation13_spill] sm:$0xff] %v4114_v46  ;;  %v4120_v17 = vld [vmem:[%s4322_s4 + $0x28] sm:$0xff] }
 0x449   :  { %2427 = vmatpush3.msra.mxu1 %v4106_v54  ;;  %2461 = vmatprep.subr.mxu0 %v4427_v57  ;;  %4490 = vst [vmem:[#allocation14_spill] sm:$0xff] %v4120_v17  ;;  %v4128_v54 = vld [vmem:[%s4324_s7 + $0x8] sm:$0xff] }
 0x44a   :  { %2428 = vmatprep.subr.mxu1 %v4427_v57  ;;  %2462 = vmatpush3.msra.mxu0 %v4114_v46  ;;  %v4134_v46 = vld [vmem:[%s4322_s4 + $0x10] sm:$0xff] }
 0x44b   :  { %2429 = vmatpush3.msra.mxu1 %v4120_v17  ;;  %2463 = vmatprep.subr.mxu0 %v4427_v57  ;;  %v4144_v17 = vld [vmem:[%s4324_s7] sm:$0xff] }
 0x44c   :  { %2430 = vmatprep.subr.mxu1 %v4427_v57  ;;  %2464 = vmatpush3.msra.mxu0 %v4128_v54 }
 0x44d   :  { %2431 = vmatpush3.msra.mxu1 %v4134_v46  ;;  %2465 = vmatprep.subr.mxu0 %v4427_v57 }
 0x44e   :  { %2433 = vmatmul.mubr.f32.vlgmr.msra.gmra.mxu1 %v3916_v8  ;;  %1590 = vmatprep.subr.mxu1 %v3710_v2 }
 0x44f   :  { %1591 = vmatpush1.msra.mxu1 %v3716_v6  ;;  %2466 = vmatpush3.msra.mxu0 %v4144_v17 }
 0x450   :  { %1592 = vmatprep.subr.mxu1 %v3723_v9  ;;  %2467 = vmatprep.mubr.msk.f32.mxu0 %vm2692_vm0, %v4427_v57 }
 0x451   :  { %1593 = vmatpush1.msra.mxu1 %v3731_v12  ;;  %1654 = vmatprep.mubr.f32.mxu1 %v4427_v57 }
 0x452   :  { %1594 = vmatprep.subr.mxu1 %v3738_v15  ;;  %2470 = vmatprep.subr.mxu0 %v4427_v57 }
 0x453   :  { %1595 = vmatpush1.msra.mxu1 %v3745_v18 }
 0x454   :  { %1596 = vmatprep.subr.mxu1 %v3751_v21 }
 0x455   :  { %1597 = vmatpush1.msra.mxu1 %v3757_v24 }
 0x456   :  { %1598 = vmatprep.subr.mxu1 %v3763_v26 }
 0x457   :  { %1599 = vmatpush1.msra.mxu1 %v3769_v27 }
 0x458   :  { %1600 = vmatprep.subr.mxu1 %v3775_v28 }
 0x459   :  { %1601 = vmatpush1.msra.mxu1 %v3781_v30 }
 0x45a   :  { %1602 = vmatprep.subr.mxu1 %v3787_v31 }
 0x45b   :  { %1603 = vmatpush1.msra.mxu1 %v3793_v32 }
 0x45c   :  { %1604 = vmatprep.subr.mxu1 %v3799_v33 }
 0x45d   :  { %1605 = vmatpush1.msra.mxu1 %v3805_v34 }
 0x45e   :  { %1606 = vmatprep.subr.mxu1 %v3811_v35 }
 0x45f   :  { %1607 = vmatpush1.msra.mxu1 %v3817_v36 }
 0x460   :  { %1608 = vmatprep.subr.mxu1 %v3823_v37 }
 0x461   :  { %1609 = vmatpush1.msra.mxu1 %v3829_v38 }
 0x462   :  { %1610 = vmatprep.subr.mxu1 %v3835_v39 }
 0x463   :  { %1611 = vmatpush1.msra.mxu1 %v3841_v40 }
 0x464   :  { %1612 = vmatprep.subr.mxu1 %v3847_v41 }
 0x465   :  { %1613 = vmatpush1.msra.mxu1 %v3853_v42 }
 0x466   :  { %1614 = vmatprep.subr.mxu1 %v3859_v43 }
 0x467   :  { %1615 = vmatpush1.msra.mxu1 %v3865_v44 }
 0x468   :  { %1616 = vmatprep.subr.mxu1 %v3871_v45  ;;  %v4491_v45 = vld [vmem:[#allocation6_spill] sm:$0xff] }
 0x469   :  { %1617 = vmatpush1.msra.mxu1 %v3877_v49  ;;  %v4492_v49 = vld [vmem:[#allocation7_spill] sm:$0xff] }
 0x46a   :  { %1618 = vmatprep.subr.mxu1 %v3883_v52  ;;  %v4493_v52 = vld [vmem:[#allocation8_spill] sm:$0xff] }
 0x46b   :  { %1619 = vmatpush1.msra.mxu1 %v3889_v55  ;;  %v4494_v55 = vld [vmem:[#allocation9_spill] sm:$0xff] }
 0x46c   :  { %1620 = vmatprep.subr.mxu1 %v3895_v58  ;;  %v4495_v58 = vld [vmem:[#allocation10_spill] sm:$0xff] }
 0x46d   :  { %1621 = vmatpush1.msra.mxu1 %v3901_v61  ;;  %v4496_v61 = vld [vmem:[#allocation11_spill] sm:$0xff] }
 0x46e   :  { %2505 = vmatprep.subr.mxu1 %v4427_v57 }
 0x4ee   :  { %v1318_v2 = vpop.f32.mrf.mxu1  ;;  %v1406_v6 = vpop.f32.mrf.mxu0 }
 0x4ef   :  { %v4183_v9 = vadd.f32 %v4478_v5, %v1318_v2  ;;  %v1407_v12 = vadd.f32 %v1406_v6, %v4480_v47 }
 0x4f0   :  { %v2399_v15 = vpop.f32.mrf.mxu1  ;;  %v1408_v18 = vpop.f32.mrf.mxu0 }
 0x4f1   :  { %v1481_v21 = vadd.f32 %v1407_v12, %v3383_v22  ;;  %1322 = vmax.xlane.f32.xlu1 %v4183_v9  ;;  %v1409_v26 = vadd.f32 %v1408_v18, %v3385_v25 }
 0x4f3   :  { %v1858_v24 = vmul.f32 -1.442695, %v1481_v21  ;;  %v1488_v27 = vadd.f32 %v1409_v26, %v3390_v59 }
 0x4f5   :  { %2582 = vpow2.f32 %v1858_v24  ;;  %v1859_v28 = vmul.f32 -1.442695, %v1488_v27 }
 0x4f7   :  { %2584 = vpow2.f32 %v1859_v28 }
 0x502   :  { %v2583_v30 = vpop.eup %2582 }
 0x503   :  { %v1485_v31 = vadd.f32 1.0, %v2583_v30 }
 0x504   :  { %v2585_v5 = vpop.eup %2584 }
 0x505   :  { %2586 = vrcp.f32 %v1485_v31  ;;  %v1492_v33 = vadd.f32 1.0, %v2585_v5 }
 0x507   :  { %2588 = vrcp.f32 %v1492_v33 }
 0x50e   :  { %v1477_v32 = vpop.f32.mrf.mxu1 }
 0x50f   :  { %v1478_v35 = vadd.f32 %v1477_v32, %v3393_v3 }
 0x510   :  { %v2434_v34 = vpop.f32.mrf.mxu1 }
 0x512   :  { %v2587_v36 = vpop.eup %2586 }
 0x513   :  { %v1495_v37 = vmul.f32 %v2587_v36, %v1478_v35 }
 0x514   :  { %v2589_v39 = vpop.eup %2588 }
 0x515   :  { %v1496_v38 = vadd.f32 %v1495_v37, %v3396_v62  ;;  %v1498_v40 = vsub.f32 1.0, %v2589_v39  ;;  %v1500_v43 = vmul.f32 %v2589_v39, %v3916_v8  ;;  %v4497_v8 = vld [vmem:[#allocation12_spill] sm:$0xff] }
 0x517   :  { %2590 = vtanh.f32 %v1496_v38 }
 0x524   :  { %v2591_v41 = vpop.eup %2590 }
 0x525   :  { %v1499_v42 = vmul.f32 %v2591_v41, %v1498_v40  ;;  %v584_v41 = vld [vmem:[%s4328_s0] sm:$0xff] }
 0x527   :  { %v4193_v44 = vadd.f32 %v1500_v43, %v1499_v42 }
 0x529   :  { %2468 = vmatmul.mubr.f32.vlgmr.msra.gmra.mxu0 %v4193_v44  ;;  %1655 = vmatmul.mubr.f32.vlgmr.msra.gmra.mxu1 %v4193_v44 }
 0x52a   :  { %2471 = vmatpush3.msra.mxu0 %v3923_v19  ;;  %2502 = vmatprep.mubr.msk.f32.mxu0 %vm2692_vm0, %v4427_v57  ;;  %v4498_v19 = vld [vmem:[#allocation13_spill] sm:$0xff] }
 0x52b   :  { %2472 = vmatprep.subr.mxu0 %v4427_v57  ;;  %2506 = vmatpush3.msra.mxu1 %v3932_v50  ;;  %v4499_v50 = vld [vmem:[#allocation14_spill] sm:$0xff] }
 0x52c   :  { %2473 = vmatpush3.msra.mxu0 %v3938_v23  ;;  %2507 = vmatprep.subr.mxu1 %v4427_v57  ;;  %v574_v23 = vpop.xlane.xlu0 %573 }
 0x52d   :  { %2474 = vmatprep.subr.mxu0 %v4427_v57  ;;  %2508 = vmatpush3.msra.mxu1 %v3946_v29  ;;  %v4500_v29 = vld [vmem:[#allocation3_spill] sm:$0xff] }
 0x52e   :  { %2475 = vmatpush3.msra.mxu0 %v3952_v7  ;;  %2509 = vmatprep.subr.mxu1 %v4427_v57  ;;  %v575_v7 = vsub.f32 %v4500_v29, %v574_v23 }
 0x52f   :  { %2476 = vmatprep.subr.mxu0 %v4427_v57  ;;  %2510 = vmatpush3.msra.mxu1 %v3960_v0  ;;  %v4265_v0 = vpop.xlane.xlu1 %1072 }
 0x530   :  { %2477 = vmatpush3.msra.mxu0 %v3966_v13  ;;  %2511 = vmatprep.subr.mxu1 %v4427_v57  ;;  %v576_v13 = vmul.f32 1.442695, %v575_v7  ;;  %v4285_v5 = vpop.xlane.xlu0 %822 }
 0x531   :  { %2478 = vmatprep.subr.mxu0 %v4427_v57  ;;  %2512 = vmatpush3.msra.mxu1 %v3974_v63  ;;  %v4501_v63 = vld [vmem:[#allocation5_spill] sm:$0xff] }
 0x532   :  { %2479 = vmatpush3.msra.mxu0 %v3980_v20  ;;  %2513 = vmatprep.subr.mxu1 %v4427_v57  ;;  %v1074_v20 = vsub.f32 %v4501_v63, %v4265_v0  ;;  %2592 = vpow2.f32 %v576_v13 }
 0x533   :  { %2480 = vmatprep.subr.mxu0 %v4427_v57  ;;  %2514 = vmatpush3.msra.mxu1 %v3988_v56 }
 0x534   :  { %2481 = vmatpush3.msra.mxu0 %v3994_v1  ;;  %2515 = vmatprep.subr.mxu1 %v4427_v57 }
 0x535   :  { %2482 = vmatprep.subr.mxu0 %v4427_v57  ;;  %2516 = vmatpush3.msra.mxu1 %v4002_v14 }
 0x536   :  { %2483 = vmatpush3.msra.mxu0 %v4008_v60  ;;  %2517 = vmatprep.subr.mxu1 %v4427_v57 }
 0x537   :  { %2484 = vmatprep.subr.mxu0 %v4427_v57  ;;  %2518 = vmatpush3.msra.mxu1 %v4016_v16 }
 0x538   :  { %2485 = vmatpush3.msra.mxu0 %v4022_v10  ;;  %2519 = vmatprep.subr.mxu1 %v4427_v57 }
 0x539   :  { %2486 = vmatprep.subr.mxu0 %v4427_v57  ;;  %2520 = vmatpush3.msra.mxu1 %v4030_v4 }
 0x53a   :  { %2487 = vmatpush3.msra.mxu0 %v4036_v48  ;;  %2521 = vmatprep.subr.mxu1 %v4427_v57 }
 0x53b   :  { %2488 = vmatprep.subr.mxu0 %v4427_v57  ;;  %2522 = vmatpush3.msra.mxu1 %v4044_v11 }
 0x53c   :  { %2489 = vmatpush3.msra.mxu0 %v4050_v51  ;;  %2523 = vmatprep.subr.mxu1 %v4427_v57 }
 0x53d   :  { %2490 = vmatprep.subr.mxu0 %v4427_v57  ;;  %2524 = vmatpush3.msra.mxu1 %v4058_v53 }
 0x53e   :  { %2491 = vmatpush3.msra.mxu0 %v4491_v45  ;;  %2525 = vmatprep.subr.mxu1 %v4427_v57  ;;  %v1854_v45 = vld [vmem:[%s4328_s0 + $0x10] sm:$0xff] }
 0x53f   :  { %2492 = vmatprep.subr.mxu0 %v4427_v57  ;;  %2526 = vmatpush3.msra.mxu1 %v4492_v49  ;;  %v2593_v11 = vpop.eup %2592 }
 0x540   :  { %2493 = vmatpush3.msra.mxu0 %v4493_v52  ;;  %2527 = vmatprep.subr.mxu1 %v4427_v57 }
 0x541   :  { %2494 = vmatprep.subr.mxu0 %v4427_v57  ;;  %2528 = vmatpush3.msra.mxu1 %v4494_v55  ;;  %v4502_v55 = vld [vmem:[#allocation4_spill] sm:$0xff] }
 0x542   :  { %2495 = vmatpush3.msra.mxu0 %v4495_v58  ;;  %2529 = vmatprep.subr.mxu1 %v4427_v57  ;;  %v824_v58 = vsub.f32 %v4502_v55, %v4285_v5 }
 0x543   :  { %2496 = vmatprep.subr.mxu0 %v4427_v57  ;;  %2530 = vmatpush3.msra.mxu1 %v4496_v61 }
 0x544   :  { %2497 = vmatpush3.msra.mxu0 %v4497_v8  ;;  %2531 = vmatprep.subr.mxu1 %v4427_v57  ;;  %v825_v8 = vmul.f32 1.442695, %v824_v58 }
 0x545   :  { %2498 = vmatprep.subr.mxu0 %v4427_v57  ;;  %2532 = vmatpush3.msra.mxu1 %v4498_v19 }
 0x546   :  { %2499 = vmatpush3.msra.mxu0 %v4499_v50  ;;  %2533 = vmatprep.subr.mxu1 %v4427_v57 }
 0x547   :  { %2500 = vmatprep.subr.mxu0 %v4427_v57  ;;  %2534 = vmatpush3.msra.mxu1 %v4128_v54 }
 0x548   :  { %2501 = vmatpush3.msra.mxu0 %v4134_v46  ;;  %2535 = vmatprep.subr.mxu1 %v4427_v57  ;;  %v1075_v46 = vmul.f32 1.442695, %v1074_v20 }
 0x549   :  { %2503 = vmatmul.mubr.f32.vlgmr.msra.gmra.mxu0 %v4193_v44  ;;  %2536 = vmatpush3.msra.mxu1 %v4144_v17  ;;  %v4272_v17 = vld [vmem:[%s4327_s8] ss:$0 sm:$0xff] }
 0x54a   :  { %2537 = vmatprep.mubr.msk.f32.mxu1 %vm2692_vm0, %v4427_v57  ;;  %2594 = vpow2.f32 %v1075_v46 }
 0x557   :  { %v2595_v53 = vpop.eup %2594 }
 0x57a   :  { %v1323_v61 = vpop.xlane.xlu1 %1322 }
 0x57b   :  { %v1324_v19 = vsub.f32 %v4183_v9, %v1323_v61 }
 0x57d   :  { %v1325_v50 = vmul.f32 1.442695, %v1324_v19 }
 0x5e9   :  { %v1568_v56 = vpop.f32.mrf.mxu0  ;;  %v1656_v1 = vpop.f32.mrf.mxu1 }
 0x5ea   :  { %v4275_v57 = vadd.f32 %v4272_v17, %v1568_v56  ;;  %v1657_v14 = vadd.f32 %v1656_v1, %v4480_v47  ;;  %v1860_v1 = vld [vmem:[%s4328_s0 + $0x20] sm:$0xff] }
 0x5eb   :  { %v2469_v60 = vpop.f32.mrf.mxu0  ;;  %v1658_v16 = vpop.f32.mrf.mxu1 }
 0x5ec   :  { %v1731_v10 = vadd.f32 %v1657_v14, %v3383_v22  ;;  %1572 = vmax.xlane.f32.xlu0 %v4275_v57  ;;  %v1659_v48 = vadd.f32 %v1658_v16, %v3385_v25 }
 0x5ee   :  { %v1861_v4 = vmul.f32 -1.442695, %v1731_v10  ;;  %v1738_v51 = vadd.f32 %v1659_v48, %v3390_v59 }
 0x5f0   :  { %2596 = vpow2.f32 %v1861_v4  ;;  %578 = vadd.xlane.f32.xlu0 %v2593_v11  ;;  %v1862_v54 = vmul.f32 -1.442695, %v1738_v51 }
 0x5f2   :  { %2598 = vpow2.f32 %v1862_v54 }
 0x5f4   :  { %1077 = vadd.xlane.f32.xlu0 %v2595_v53 }
 0x5fd   :  { %v2597_v2 = vpop.eup %2596 }
 0x5fe   :  { %v1735_v47 = vadd.f32 1.0, %v2597_v2 }
 0x5ff   :  { %v2599_v6 = vpop.eup %2598 }
 0x600   :  { %2600 = vrcp.f32 %v1735_v47  ;;  %v1742_v22 = vadd.f32 1.0, %v2599_v6 }
 0x602   :  { %2602 = vrcp.f32 %v1742_v22 }
 0x609   :  { %v1727_v12 = vpop.f32.mrf.mxu0 }
 0x60a   :  { %v1728_v18 = vadd.f32 %v1727_v12, %v3393_v3 }
 0x60b   :  { %v2504_v15 = vpop.f32.mrf.mxu0 }
 0x60c   :  { %v1857_v15 = vld [vmem:[%s4328_s0 + $0x18] sm:$0xff] }
 0x60d   :  { %v2601_v21 = vpop.eup %2600 }
 0x60e   :  { %v1745_v25 = vmul.f32 %v2601_v21, %v1728_v18 }
 0x60f   :  { %v2603_v59 = vpop.eup %2602 }
 0x610   :  { %v1746_v24 = vadd.f32 %v1745_v25, %v3396_v62  ;;  %v1748_v26 = vsub.f32 1.0, %v2603_v59  ;;  %v1750_v30 = vmul.f32 %v2603_v59, %v4193_v44 }
 0x612   :  { %2604 = vtanh.f32 %v1746_v24 }
 0x61f   :  { %v2605_v27 = vpop.eup %2604 }
 0x620   :  { %v1749_v28 = vmul.f32 %v2605_v27, %v1748_v26  ;;  %v1863_v27 = vld [vmem:[%s4328_s0 + $0x28] sm:$0xff] }
 0x622   :  { %v1751_v31 = vadd.f32 %v1750_v30, %v1749_v28 }
 0x624   :  { %2538 = vmatmul.mubr.f32.vlgmr.msra.gmra.mxu1 %v1751_v31 }
 0x675   :  { %v1573_v32 = vpop.xlane.xlu0 %1572 }
 0x676   :  { %v1574_v33 = vsub.f32 %v4275_v57, %v1573_v32 }
 0x678   :  { %v1575_v3 = vmul.f32 1.442695, %v1574_v33 }
 0x679   :  { %v579_v34 = vpop.xlane.xlu0 %578 }
 0x67a   :  { %2606 = vpow2.f32 %v1575_v3 }
 0x67b   :  { %2608 = vlog2.f32 %v579_v34 }
 0x67d   :  { %v1078_v35 = vpop.xlane.xlu0 %1077 }
 0x67e   :  { %2610 = vlog2.f32 %v1078_v35 }
 0x67f   :  { %2612 = vpow2.f32 %v825_v8 }
 0x680   :  { %2614 = vpow2.f32 %v1325_v50 }
 0x687   :  { %v2607_v62 = vpop.eup %2606 }
 0x688   :  { %v2609_v36 = vpop.eup %2608  ;;  %1577 = vadd.xlane.f32.xlu0 %v2607_v62 }
 0x689   :  { %v581_v37 = vmul.f32 0.6931472, %v2609_v36 }
 0x68b   :  { %v2611_v38 = vpop.eup %2610  ;;  %v582_v39 = vadd.f32 %v581_v37, %v574_v23 }
 0x68c   :  { %v1080_v40 = vmul.f32 0.6931472, %v2611_v38 }
 0x68d   :  { %v583_v42 = vsub.f32 %v4500_v29, %v582_v39 }
 0x68e   :  { %v1081_v43 = vadd.f32 %v1080_v40, %v4265_v0  ;;  %v2613_v0 = vpop.eup %2612 }
 0x68f   :  { %v585_v44 = vmul.f32 %v584_v41, %v583_v42  ;;  %v2615_v13 = vpop.eup %2614 }
 0x690   :  { %v1082_v49 = vsub.f32 %v4501_v63, %v1081_v43 }
 0x691   :  { %586 = vadd.xlane.f32.xlu0 %v585_v44 }
 0x692   :  { %v1085_v52 = vmul.f32 %v1854_v45, %v1082_v49 }
 0x695   :  { %1086 = vadd.xlane.f32.xlu0 %v1085_v52 }
 0x6e4   :  { %v1818_v23 = vpop.f32.mrf.mxu1 }
 0x6e5   :  { %v1819_v29 = vadd.f32 %v4272_v17, %v1818_v23 }
 0x6e6   :  { %v2539_v7 = vpop.f32.mrf.mxu1 }
 0x6e7   :  { %1822 = vmax.xlane.f32.xlu1 %v1819_v29 }
 0x6eb   :  { %827 = vadd.xlane.f32.xlu1 %v2613_v0 }
 0x6ef   :  { %1327 = vadd.xlane.f32.xlu1 %v2615_v13 }
 0x711   :  { %v1578_v63 = vpop.xlane.xlu0 %1577 }
 0x712   :  { %2616 = vlog2.f32 %v1578_v63 }
 0x71a   :  { %v587_v31 = vpop.xlane.xlu0 %586 }
 0x71b   :  { %v588_v33 = vsub.f32 0.0, %v587_v31 }
 0x71f   :  { %v2617_v20 = vpop.eup %2616 }
 0x720   :  { %v1580_v46 = vmul.f32 0.6931472, %v2617_v20 }
 0x722   :  { %v1581_v56 = vadd.f32 %v1580_v46, %v1573_v32 }
 0x724   :  { %v1582_v14 = vsub.f32 %v4275_v57, %v1581_v56  ;;  %v1851_v57 = vld [vmem:[%s4328_s0 + $0x8] sm:$0xff] }
 0x726   :  { %v1585_v60 = vmul.f32 %v1860_v1, %v1582_v14 }
 0x728   :  { %1586 = vadd.xlane.f32.xlu0 %v1585_v60 }
 0x770   :  { %v1823_v17 = vpop.xlane.xlu1 %1822 }
 0x771   :  { %v1824_v16 = vsub.f32 %v1819_v29, %v1823_v17 }
 0x773   :  { %v1825_v10 = vmul.f32 1.442695, %v1824_v16 }
 0x774   :  { %v828_v4 = vpop.xlane.xlu1 %827 }
 0x775   :  { %2618 = vpow2.f32 %v1825_v10 }
 0x776   :  { %2620 = vlog2.f32 %v828_v4 }
 0x778   :  { %v1328_v48 = vpop.xlane.xlu1 %1327 }
 0x779   :  { %2622 = vlog2.f32 %v1328_v48 }
 0x782   :  { %v2619_v11 = vpop.eup %2618 }
 0x783   :  { %v2621_v51 = vpop.eup %2620  ;;  %1827 = vadd.xlane.f32.xlu1 %v2619_v11 }
 0x784   :  { %v830_v53 = vmul.f32 0.6931472, %v2621_v51 }
 0x786   :  { %v2623_v54 = vpop.eup %2622  ;;  %v831_v2 = vadd.f32 %v830_v53, %v4285_v5 }
 0x787   :  { %v1330_v47 = vmul.f32 0.6931472, %v2623_v54 }
 0x788   :  { %v832_v6 = vsub.f32 %v4502_v55, %v831_v2 }
 0x789   :  { %v1331_v12 = vadd.f32 %v1330_v47, %v1323_v61 }
 0x78a   :  { %v835_v22 = vmul.f32 %v1851_v57, %v832_v6 }
 0x78b   :  { %v1332_v18 = vsub.f32 %v4183_v9, %v1331_v12  ;;  %v1087_v9 = vpop.xlane.xlu0 %1086 }
 0x78c   :  { %836 = vadd.xlane.f32.xlu1 %v835_v22  ;;  %v1088_v35 = vsub.f32 0.0, %v1087_v9 }
 0x78d   :  { %v1335_v21 = vmul.f32 %v1857_v15, %v1332_v18 }
 0x790   :  { %1336 = vadd.xlane.f32.xlu1 %v1335_v21 }
 0x7b1   :  { %v1587_v37 = vpop.xlane.xlu0 %1586 }
 0x7b2   :  { %v1588_v39 = vsub.f32 0.0, %v1587_v37 }
 0x80c   :  { %v1828_v25 = vpop.xlane.xlu1 %1827 }
 0x80d   :  { %2624 = vlog2.f32 %v1828_v25 }
 0x815   :  { %v837_v5 = vpop.xlane.xlu1 %836 }
 0x816   :  { %v838_v32 = vsub.f32 0.0, %v837_v5 }
 0x818   :  { %v839_v3 = vadd.f32 %v838_v32, %v588_v33 }
 0x819   :  { %v1337_v34 = vpop.xlane.xlu1 %1336 }
 0x81a   :  { %v2625_v24 = vpop.eup %2624  ;;  %v1089_v62 = vadd.f32 %v1088_v35, %v839_v3  ;;  %v1338_v36 = vsub.f32 0.0, %v1337_v34 }
 0x81b   :  { %v1830_v59 = vmul.f32 0.6931472, %v2625_v24 }
 0x81c   :  { %v1339_v38 = vadd.f32 %v1338_v36, %v1089_v62 }
 0x81d   :  { %v1831_v26 = vadd.f32 %v1830_v59, %v1823_v17 }
 0x81e   :  { %v1589_v41 = vadd.f32 %v1588_v39, %v1339_v38 }
 0x81f   :  { %v1832_v28 = vsub.f32 %v1819_v29, %v1831_v26 }
 0x821   :  { %v1835_v30 = vmul.f32 %v1863_v27, %v1832_v28 }
 0x823   :  { %1836 = vadd.xlane.f32.xlu1 %v1835_v30 }
 0x8ac   :  { %v1837_v40 = vpop.xlane.xlu1 %1836 }
 0x8ad   :  { %v1838_v42 = vsub.f32 0.0, %v1837_v40 }
 0x8af   :  { %v1839_v43 = vadd.f32 %v1838_v42, %v1589_v41 }
 0x8b1   :  { %1841 = vst.msk [vmem:[%s4329_s9] sm:$0xff] %vm1840_vm1, %v1839_v43 }

// kernel: seq2seq_forward.2
= control target key start
LH: loop header
LB: loop body
LE: loop exit
PB: predicated region body
PF: predicated region fallthrough
CT: control target
= control target key end

     0   :  { %v10378_v3 = vmov 0.0   ;;  %v10376_v5 = vmov 0   ;;  %vm414_vm1 = vcmask 261120   ;;  %s10361_s3 = inlined_call_operand.vmem [shape: f32[128,512], index: 3, kind: input, shape index: {}]   ;;  %s10362_s2 = inlined_call_operand.vmem [shape: f32[32,512], index: 2, kind: input, shape index: {}]   ;;  %s10363_s0 = inlined_call_operand.vmem [shape: s32[8,1], index: 0, kind: input, shape index: {}]   ;;  %s10364_s1 = inlined_call_operand.vmem [shape: f32[8,8,32], index: 1, kind: input, shape index: {}]   ;;  %s10365_s4 = inlined_call_operand.vmem [shape: f32[1,512], index: 4, kind: input, shape index: {}]   ;;  %s10366_s12 = inlined_call_operand.vmem [shape: f32[8,8,256], index: 12, kind: output, shape index: {0}]   ;;  %s10367_s6 = inlined_call_operand.vmem [shape: f32[128,512], index: 6, kind: input, shape index: {}]   ;;  %s10368_s5 = inlined_call_operand.vmem [shape: f32[32,512], index: 5, kind: input, shape index: {}]   ;;  %s10369_s7 = inlined_call_operand.vmem [shape: f32[1,512], index: 7, kind: input, shape index: {}]   ;;  %s10370_s8 = inlined_call_operand.vmem [shape: f32[256,128], index: 8, kind: input, shape index: {}]   ;;  %s10371_s10 = inlined_call_operand.vmem [shape: f32[256,128], index: 10, kind: input, shape index: {}]   ;;  %s10372_s9 = inlined_call_operand.vmem [shape: f32[1,128], index: 9, kind: input, shape index: {}]   ;;  %s10373_s13 = inlined_call_operand.vmem [shape: f32[8,128], index: 13, kind: output, shape index: {1}]   ;;  %s10374_s11 = inlined_call_operand.vmem [shape: f32[1,128], index: 11, kind: input, shape index: {}]   ;;  %s10375_s14 = inlined_call_operand.vmem [shape: f32[8,128], index: 14, kind: output, shape index: {2}]  }
   0x1   :  { %v6628_v0 = vld [vmem:[%s10361_s3 + $0x1e8] sm:$0xff]  ;;  %v6633_v1 = vld [vmem:[%s10361_s3 + $0x1e0] sm:$0xff]  ;;  %336 = vmatprep.mubr.f32.mxu0 %v10378_v3  ;;  %407 = vmatprep.mubr.f32.mxu1 %v10378_v3  ;;  %v6665_v8 = vld [vmem:[%s10361_s3 + $0x1f8] sm:$0xff] }
   0x2   :  { %v6638_v2 = vld [vmem:[%s10361_s3 + $0x1c8] sm:$0xff]  ;;  %272 = vmatprep.subr.mxu0 %v6628_v0  ;;  %v6646_v4 = vld [vmem:[%s10361_s3 + $0x1c0] sm:$0xff]  ;;  %6129 = vset.pattern.permute.xlu0 %v10376_v5  ;;  %v6677_v10 = vld [vmem:[%s10361_s3 + $0x1f0] sm:$0xff] }
   0x3   :  { %273 = vmatpush1.msra.mxu0 %v6633_v1  ;;  %v6653_v6 = vld [vmem:[%s10361_s3 + $0x1a8] sm:$0xff]  ;;  %6130 = vset.pattern.permute.xlu1 %v10376_v5  ;;  %v6660_v7 = vld [vmem:[%s10361_s3 + $0x1a0] sm:$0xff]  ;;  %v6682_v11 = vld [vmem:[%s10361_s3 + $0x1d8] sm:$0xff] }
   0x4   :  { %274 = vmatprep.subr.mxu0 %v6638_v2  ;;  %v6671_v9 = vld [vmem:[%s10361_s3 + $0x188] sm:$0xff]  ;;  %343 = vmatprep.subr.mxu1 %v6665_v8  ;;  %v6688_v12 = vld [vmem:[%s10361_s3 + $0x180] sm:$0xff]  ;;  %v6694_v13 = vld [vmem:[%s10361_s3 + $0x1d0] sm:$0xff] }
   0x5   :  { %275 = vmatpush1.msra.mxu0 %v6646_v4  ;;  %344 = vmatpush1.msra.mxu1 %v6677_v10  ;;  %v6700_v14 = vld [vmem:[%s10361_s3 + $0x168] sm:$0xff]  ;;  %v6706_v15 = vld [vmem:[%s10361_s3 + $0x1b8] sm:$0xff]  ;;  %v6711_v16 = vld [vmem:[%s10361_s3 + $0x1b0] sm:$0xff] }
   0x6   :  { %276 = vmatprep.subr.mxu0 %v6653_v6  ;;  %345 = vmatprep.subr.mxu1 %v6682_v11  ;;  %v6717_v17 = vld [vmem:[%s10361_s3 + $0x160] sm:$0xff]  ;;  %v6723_v18 = vld [vmem:[%s10361_s3 + $0x198] sm:$0xff]  ;;  %v6729_v19 = vld [vmem:[%s10361_s3 + $0x148] sm:$0xff] }
   0x7   :  { %277 = vmatpush1.msra.mxu0 %v6660_v7  ;;  %346 = vmatpush1.msra.mxu1 %v6694_v13  ;;  %v6735_v20 = vld [vmem:[%s10361_s3 + $0x190] sm:$0xff]  ;;  %v6741_v21 = vld [vmem:[%s10361_s3 + $0x140] sm:$0xff]  ;;  %v6747_v22 = vld [vmem:[%s10361_s3 + $0x178] sm:$0xff] }
   0x8   :  { %278 = vmatprep.subr.mxu0 %v6671_v9  ;;  %347 = vmatprep.subr.mxu1 %v6706_v15  ;;  %10766 = vst [vmem:[#allocation2_spill] sm:$0xff] %v6741_v21  ;;  %v6753_v23 = vld [vmem:[%s10361_s3 + $0x128] sm:$0xff]  ;;  %v6759_v24 = vld [vmem:[%s10361_s3 + $0x170] sm:$0xff]  ;;  %v6765_v25 = vld [vmem:[%s10361_s3 + $0x120] sm:$0xff] }
   0x9   :  { %279 = vmatpush1.msra.mxu0 %v6688_v12  ;;  %348 = vmatpush1.msra.mxu1 %v6711_v16  ;;  %10767 = vst [vmem:[#allocation3_spill] sm:$0xff] %v6753_v23  ;;  %10768 = vst [vmem:[#allocation4_spill] sm:$0xff] %v6765_v25  ;;  %v6771_v26 = vld [vmem:[%s10361_s3 + $0x158] sm:$0xff]  ;;  %v6777_v27 = vld [vmem:[%s10361_s3 + $0x108] sm:$0xff] }
   0xa   :  { %280 = vmatprep.subr.mxu0 %v6700_v14  ;;  %349 = vmatprep.subr.mxu1 %v6723_v18  ;;  %10769 = vst [vmem:[#allocation5_spill] sm:$0xff] %v6777_v27  ;;  %v6783_v28 = vld [vmem:[%s10361_s3 + $0x150] sm:$0xff]  ;;  %v6789_v29 = vld [vmem:[%s10361_s3 + $0x100] sm:$0xff]  ;;  %v6795_v30 = vld [vmem:[%s10361_s3 + $0x138] sm:$0xff] }
   0xb   :  { %281 = vmatpush1.msra.mxu0 %v6717_v17  ;;  %350 = vmatpush1.msra.mxu1 %v6735_v20  ;;  %10770 = vst [vmem:[#allocation6_spill] sm:$0xff] %v6783_v28  ;;  %10771 = vst [vmem:[#allocation7_spill] sm:$0xff] %v6789_v29  ;;  %v6801_v31 = vld [vmem:[%s10361_s3 + $0xe8] sm:$0xff]  ;;  %v6807_v32 = vld [vmem:[%s10361_s3 + $0x130] sm:$0xff] }
   0xc   :  { %282 = vmatprep.subr.mxu0 %v6729_v19  ;;  %351 = vmatprep.subr.mxu1 %v6747_v22  ;;  %10772 = vst [vmem:[#allocation8_spill] sm:$0xff] %v6795_v30  ;;  %10773 = vst [vmem:[#allocation9_spill] sm:$0xff] %v6801_v31  ;;  %v6813_v33 = vld [vmem:[%s10361_s3 + $0xe0] sm:$0xff]  ;;  %v6819_v34 = vld [vmem:[%s10361_s3 + $0x118] sm:$0xff] }
   0xd   :  { %283 = vmatpush1.msra.mxu0 %v6741_v21  ;;  %352 = vmatpush1.msra.mxu1 %v6759_v24  ;;  %10774 = vst [vmem:[#allocation10_spill] sm:$0xff] %v6807_v32  ;;  %10775 = vst [vmem:[#allocation11_spill] sm:$0xff] %v6813_v33  ;;  %v6825_v35 = vld [vmem:[%s10361_s3 + $0xc8] sm:$0xff]  ;;  %v6831_v36 = vld [vmem:[%s10361_s3 + $0x110] sm:$0xff] }
   0xe   :  { %284 = vmatprep.subr.mxu0 %v6753_v23  ;;  %353 = vmatprep.subr.mxu1 %v6771_v26  ;;  %10776 = vst [vmem:[#allocation12_spill] sm:$0xff] %v6819_v34  ;;  %10777 = vst [vmem:[#allocation13_spill] sm:$0xff] %v6825_v35  ;;  %v6837_v37 = vld [vmem:[%s10361_s3 + $0xc0] sm:$0xff]  ;;  %v6843_v38 = vld [vmem:[%s10361_s3 + $0xf8] sm:$0xff] }
   0xf   :  { %285 = vmatpush1.msra.mxu0 %v6765_v25  ;;  %354 = vmatpush1.msra.mxu1 %v6783_v28  ;;  %10778 = vst [vmem:[#allocation14_spill] sm:$0xff] %v6831_v36  ;;  %10779 = vst [vmem:[#allocation15_spill] sm:$0xff] %v6837_v37  ;;  %v6849_v39 = vld [vmem:[%s10361_s3 + $0xa8] sm:$0xff]  ;;  %v6855_v40 = vld [vmem:[%s10361_s3 + $0xf0] sm:$0xff] }
  0x10   :  { %286 = vmatprep.subr.mxu0 %v6777_v27  ;;  %355 = vmatprep.subr.mxu1 %v6795_v30  ;;  %10780 = vst [vmem:[#allocation16_spill] sm:$0xff] %v6843_v38  ;;  %10781 = vst [vmem:[#allocation17_spill] sm:$0xff] %v6849_v39  ;;  %v6861_v41 = vld [vmem:[%s10361_s3 + $0xa0] sm:$0xff]  ;;  %v6867_v42 = vld [vmem:[%s10361_s3 + $0xd8] sm:$0xff] }
  0x11   :  { %287 = vmatpush1.msra.mxu0 %v6789_v29  ;;  %356 = vmatpush1.msra.mxu1 %v6807_v32  ;;  %10782 = vst [vmem:[#allocation18_spill] sm:$0xff] %v6855_v40  ;;  %10783 = vst [vmem:[#allocation19_spill] sm:$0xff] %v6861_v41  ;;  %v6873_v43 = vld [vmem:[%s10361_s3 + $0x88] sm:$0xff]  ;;  %v6879_v44 = vld [vmem:[%s10361_s3 + $0xd0] sm:$0xff] }
  0x12   :  { %288 = vmatprep.subr.mxu0 %v6801_v31  ;;  %357 = vmatprep.subr.mxu1 %v6819_v34  ;;  %10784 = vst [vmem:[#allocation20_spill] sm:$0xff] %v6867_v42  ;;  %10785 = vst [vmem:[#allocation21_spill] sm:$0xff] %v6873_v43  ;;  %v6885_v45 = vld [vmem:[%s10361_s3 + $0x80] sm:$0xff]  ;;  %v6891_v46 = vld [vmem:[%s10361_s3 + $0xb8] sm:$0xff] }
  0x13   :  { %289 = vmatpush1.msra.mxu0 %v6813_v33  ;;  %358 = vmatpush1.msra.mxu1 %v6831_v36  ;;  %10786 = vst [vmem:[#allocation22_spill] sm:$0xff] %v6879_v44  ;;  %10787 = vst [vmem:[#allocation23_spill] sm:$0xff] %v6885_v45  ;;  %v6897_v47 = vld [vmem:[%s10361_s3 + $0x68] sm:$0xff]  ;;  %v6903_v48 = vld [vmem:[%s10361_s3 + $0xb0] sm:$0xff] }
  0x14   :  { %290 = vmatprep.subr.mxu0 %v6825_v35  ;;  %359 = vmatprep.subr.mxu1 %v6843_v38  ;;  %10788 = vst [vmem:[#allocation24_spill] sm:$0xff] %v6891_v46  ;;  %10789 = vst [vmem:[#allocation25_spill] sm:$0xff] %v6897_v47  ;;  %v6909_v49 = vld [vmem:[%s10361_s3 + $0x60] sm:$0xff]  ;;  %v6915_v50 = vld [vmem:[%s10361_s3 + $0x98] sm:$0xff] }
  0x15   :  { %291 = vmatpush1.msra.mxu0 %v6837_v37  ;;  %360 = vmatpush1.msra.mxu1 %v6855_v40  ;;  %10790 = vst [vmem:[#allocation26_spill] sm:$0xff] %v6903_v48  ;;  %10791 = vst [vmem:[#allocation27_spill] sm:$0xff] %v6909_v49  ;;  %v6921_v51 = vld [vmem:[%s10361_s3 + $0x48] sm:$0xff]  ;;  %v6927_v52 = vld [vmem:[%s10361_s3 + $0x90] sm:$0xff] }
  0x16   :  { %292 = vmatprep.subr.mxu0 %v6849_v39  ;;  %361 = vmatprep.subr.mxu1 %v6867_v42  ;;  %10792 = vst [vmem:[#allocation28_spill] sm:$0xff] %v6915_v50  ;;  %10793 = vst [vmem:[#allocation29_spill] sm:$0xff] %v6921_v51  ;;  %v6933_v53 = vld [vmem:[%s10361_s3 + $0x40] sm:$0xff]  ;;  %v6939_v54 = vld [vmem:[%s10361_s3 + $0x78] sm:$0xff] }
  0x17   :  { %293 = vmatpush1.msra.mxu0 %v6861_v41  ;;  %362 = vmatpush1.msra.mxu1 %v6879_v44  ;;  %10794 = vst [vmem:[#allocation30_spill] sm:$0xff] %v6927_v52  ;;  %10795 = vst [vmem:[#allocation31_spill] sm:$0xff] %v6933_v53  ;;  %v6945_v55 = vld [vmem:[%s10361_s3 + $0x28] sm:$0xff]  ;;  %v6951_v56 = vld [vmem:[%s10361_s3 + $0x70] sm:$0xff] }
  0x18   :  { %294 = vmatprep.subr.mxu0 %v6873_v43  ;;  %363 = vmatprep.subr.mxu1 %v6891_v46  ;;  %10796 = vst [vmem:[#allocation32_spill] sm:$0xff] %v6939_v54  ;;  %10797 = vst [vmem:[#allocation33_spill] sm:$0xff] %v6945_v55  ;;  %v6957_v57 = vld [vmem:[%s10361_s3 + $0x20] sm:$0xff]  ;;  %v6963_v58 = vld [vmem:[%s10361_s3 + $0x58] sm:$0xff] }
  0x19   :  { %295 = vmatpush1.msra.mxu0 %v6885_v45  ;;  %364 = vmatpush1.msra.mxu1 %v6903_v48  ;;  %10798 = vst [vmem:[#allocation34_spill] sm:$0xff] %v6951_v56  ;;  %10799 = vst [vmem:[#allocation35_spill] sm:$0xff] %v6957_v57  ;;  %v6969_v59 = vld [vmem:[%s10361_s3 + $0x8] sm:$0xff]  ;;  %v6975_v60 = vld [vmem:[%s10361_s3 + $0x50] sm:$0xff] }
  0x1a   :  { %296 = vmatprep.subr.mxu0 %v6897_v47  ;;  %365 = vmatprep.subr.mxu1 %v6915_v50  ;;  %10800 = vst [vmem:[#allocation36_spill] sm:$0xff] %v6963_v58  ;;  %10801 = vst [vmem:[#allocation37_spill] sm:$0xff] %v6969_v59  ;;  %v6981_v61 = vld [vmem:[%s10361_s3] sm:$0xff]  ;;  %v6987_v62 = vld [vmem:[%s10361_s3 + $0x38] sm:$0xff] }
  0x1b   :  { %297 = vmatpush1.msra.mxu0 %v6909_v49  ;;  %366 = vmatpush1.msra.mxu1 %v6927_v52  ;;  %10802 = vst [vmem:[#allocation38_spill] sm:$0xff] %v6975_v60  ;;  %10803 = vst [vmem:[#allocation39_spill] sm:$0xff] %v6981_v61  ;;  %v6993_v63 = vld [vmem:[%s10362_s2 + $0x68] sm:$0xff]  ;;  %v7000_v5 = vld [vmem:[%s10362_s2 + $0x60] sm:$0xff] }
  0x1c   :  { %298 = vmatprep.subr.mxu0 %v6921_v51  ;;  %367 = vmatprep.subr.mxu1 %v6939_v54  ;;  %10804 = vst [vmem:[#allocation40_spill] sm:$0xff] %v6987_v62  ;;  %10805 = vst [vmem:[#allocation41_spill] sm:$0xff] %v6993_v63  ;;  %v7006_v3 = vld [vmem:[%s10361_s3 + $0x30] sm:$0xff] }
  0x1d   :  { %299 = vmatpush1.msra.mxu0 %v6933_v53  ;;  %368 = vmatpush1.msra.mxu1 %v6951_v56  ;;  %10806 = vst [vmem:[#allocation42_spill] sm:$0xff] %v7000_v5  ;;  %10807 = vst [vmem:[#allocation43_spill] sm:$0xff] %v7006_v3  ;;  %v7060_v53 = vld [vmem:[%s10362_s2 + $0x8] sm:$0xff] }
  0x1e   :  { %300 = vmatprep.subr.mxu0 %v6945_v55  ;;  %369 = vmatprep.subr.mxu1 %v6963_v58  ;;  %v10810_v55 = vmov 0.0   ;;  %10817 = vst [vmem:[#allocation52_spill] sm:$0xff] %v7060_v53 }
  0x1f   :  { %301 = vmatpush1.msra.mxu0 %v6957_v57  ;;  %370 = vmatpush1.msra.mxu1 %v6975_v60  ;;  %v7012_v57 = vld [vmem:[%s10362_s2 + $0x48] sm:$0xff]  ;;  %v7037_v60 = vld [vmem:[%s10361_s3 + $0x10] sm:$0xff] }
  0x20   :  { %302 = vmatprep.subr.mxu0 %v6969_v59  ;;  %10808 = vst [vmem:[#allocation44_spill] sm:$0xff] %v7012_v57  ;;  %371 = vmatprep.subr.mxu1 %v6987_v62  ;;  %v7018_v59 = vld [vmem:[%s10361_s3 + $0x18] sm:$0xff]  ;;  %v7031_v62 = vld [vmem:[%s10362_s2 + $0x28] sm:$0xff]  ;;  %10813 = vst [vmem:[#allocation48_spill] sm:$0xff] %v7037_v60 }
  0x21   :  { %303 = vmatpush1.msra.mxu0 %v6981_v61  ;;  %10809 = vst [vmem:[#allocation45_spill] sm:$0xff] %v7018_v59  ;;  %v7025_v61 = vld [vmem:[%s10362_s2 + $0x40] sm:$0xff]  ;;  %10812 = vst [vmem:[#allocation47_spill] sm:$0xff] %v7031_v62  ;;  %372 = vmatpush1.msra.mxu1 %v7006_v3  ;;  %v7054_v3 = vld [vmem:[%s10362_s2 + $0x78] sm:$0xff] }
  0x22   :  { %337 = vmatmul.mubr.f32.vlgmr.msra.gmra.mxu0 %v10810_v55  ;;  %442 = vmatprep.subr.mxu0 %v6993_v63  ;;  %10811 = vst [vmem:[#allocation46_spill] sm:$0xff] %v7025_v61  ;;  %v7042_v63 = vld [vmem:[%s10363_s0] sm:$0xff]  ;;  %10816 = vst [vmem:[#allocation51_spill] sm:$0xff] %v7054_v3 }
  0x23   :  { %443 = vmatpush1.msra.mxu0 %v7000_v5  ;;  %10814 = vst [vmem:[#allocation49_spill] sm:$0xff] %v7042_v63  ;;  %v7048_v5 = vld [vmem:[%s10362_s2 + $0x20] sm:$0xff]  ;;  %373 = vmatprep.subr.mxu1 %v7018_v59  ;;  %vm609_vm0 = vcmp.gt.s32.totalorder %v7042_v63, 0  ;;  %v10821_v59 = vmov 0   ;;  %vm935_vm2 = vcmp.gt.s32.totalorder %v7042_v63, 1  ;;  %vm1919_vm3 = vcmp.gt.s32.totalorder %v7042_v63, 4 }
  0x24   :  { %444 = vmatprep.subr.mxu0 %v7012_v57  ;;  %10815 = vst [vmem:[#allocation50_spill] sm:$0xff] %v7048_v5  ;;  %482 = vmatprep.mubr.f32.mxu0 %v10810_v55  ;;  %v7067_v57 = vld [vmem:[%s10362_s2] sm:$0xff]  ;;  %v610_v58 = vsel %vm609_vm0, 1, %v10821_v59  ;;  %vm2575_vm4 = vcmp.gt.s32.totalorder %v7042_v63, 6  ;;  %v10826_v63 = vld [vmem:[#allocation40_spill] sm:$0xff] }
  0x25   :  { %445 = vmatpush1.msra.mxu0 %v7025_v61  ;;  %10818 = vst [vmem:[#allocation53_spill] sm:$0xff] %v7067_v57  ;;  %374 = vmatpush1.msra.mxu1 %v7037_v60  ;;  %v7073_v61 = vld [vmem:[%s10362_s2 + $0x70] sm:$0xff]  ;;  %v7084_v60 = vld [vmem:[%s10362_s2 + $0x58] sm:$0xff] }
  0x26   :  { %446 = vmatprep.subr.mxu0 %v7031_v62  ;;  %10819 = vst [vmem:[#allocation54_spill] sm:$0xff] %v7073_v61  ;;  %v271_v62 = vld [vmem:[%s10364_s1] sm:$0xff]  ;;  %513 = vmatprep.subr.mxu1 %v7054_v3  ;;  %10820 = vst [vmem:[#allocation55_spill] sm:$0xff] %v7084_v60  ;;  %v7098_v3 = vld [vmem:[%s10362_s2 + $0x38] sm:$0xff] }
  0x27   :  { %447 = vmatpush1.msra.mxu0 %v7048_v5  ;;  %408 = vmatmul.mubr.f32.vlgmr.msra.gmra.mxu1 %v10810_v55  ;;  %v7091_v5 = vld [vmem:[%s10362_s2 + $0x50] sm:$0xff] }
  0x28   :  { %448 = vmatprep.subr.mxu0 %v7060_v53  ;;  %514 = vmatpush1.msra.mxu1 %v7073_v61  ;;  %v7106_v53 = vld [vmem:[%s10362_s2 + $0x30] sm:$0xff]  ;;  %v936_v61 = vsel %vm935_vm2, 1, %v10821_v59  ;;  %vm6549_vm2 = vmmov 0  }
  0x29   :  { %449 = vmatpush1.msra.mxu0 %v7067_v57  ;;  %515 = vmatprep.subr.mxu1 %v7084_v60  ;;  %v7113_v57 = vld [vmem:[%s10362_s2 + $0x18] sm:$0xff]  ;;  %v7120_v60 = vld [vmem:[%s10362_s2 + $0x10] sm:$0xff] }
  0x2a   :  { %5804 = vmatmul.mubr.msk.f32.vlgmr.msra.gmra.mxu0 %vm414_vm1, %v271_v62  ;;  %516 = vmatpush1.msra.mxu1 %v7091_v5 }
  0x2b   :  { %553 = vmatprep.mubr.f32.mxu1 %v10810_v55  ;;  %517 = vmatprep.subr.mxu1 %v7098_v3 }
  0x2c   :  { %612 = vperm.xlu0 %6129, %v610_v58   ;;  %518 = vmatpush1.msra.mxu1 %v7106_v53  ;;  %v1920_v58 = vsel %vm1919_vm3, 1, %v10821_v59 }
  0x2d   :  { %620 = vmatprep.subr.mxu0 %v6628_v0  ;;  %519 = vmatprep.subr.mxu1 %v7113_v57 }
  0x2e   :  { %621 = vmatpush1.msra.mxu0 %v6633_v1  ;;  %520 = vmatpush1.msra.mxu1 %v7120_v60 }
  0x2f   :  { %622 = vmatprep.subr.mxu0 %v6638_v2  ;;  %5805 = vmatmul.mubr.msk.f32.vlgmr.msra.gmra.mxu1 %vm414_vm1, %v271_v62  ;;  %v10822_v62 = vld [vmem:[#allocation36_spill] sm:$0xff] }
  0x30   :  { %938 = vperm.xlu0 %6129, %v936_v61   ;;  %691 = vmatprep.subr.mxu1 %v6665_v8  ;;  %v2576_v61 = vsel %vm2575_vm4, 1, %v10821_v59  ;;  %v10825_v59 = vld [vmem:[#allocation33_spill] sm:$0xff] }
  0x31   :  { %623 = vmatpush1.msra.mxu0 %v6646_v4  ;;  %692 = vmatpush1.msra.mxu1 %v6677_v10 }
  0x32   :  { %624 = vmatprep.subr.mxu0 %v6653_v6  ;;  %693 = vmatprep.subr.mxu1 %v6682_v11 }
  0x33   :  { %625 = vmatpush1.msra.mxu0 %v6660_v7  ;;  %694 = vmatpush1.msra.mxu1 %v6694_v13 }
  0x34   :  { %1922 = vperm.xlu0 %6129, %v1920_v58   ;;  %695 = vmatprep.subr.mxu1 %v6706_v15  ;;  %v10823_v58 = vld [vmem:[#allocation31_spill] sm:$0xff] }
  0x35   :  { %626 = vmatprep.subr.mxu0 %v6671_v9  ;;  %696 = vmatpush1.msra.mxu1 %v6711_v16 }
  0x36   :  { %627 = vmatpush1.msra.mxu0 %v6688_v12  ;;  %697 = vmatprep.subr.mxu1 %v6723_v18 }
  0x37   :  { %628 = vmatprep.subr.mxu0 %v6700_v14  ;;  %698 = vmatpush1.msra.mxu1 %v6735_v20 }
  0x38   :  { %2578 = vperm.xlu0 %6129, %v2576_v61   ;;  %699 = vmatprep.subr.mxu1 %v6747_v22  ;;  %v10824_v61 = vld [vmem:[#allocation38_spill] sm:$0xff] }
  0x39   :  { %629 = vmatpush1.msra.mxu0 %v6717_v17  ;;  %700 = vmatpush1.msra.mxu1 %v6759_v24 }
  0x3a   :  { %630 = vmatprep.subr.mxu0 %v6729_v19  ;;  %701 = vmatprep.subr.mxu1 %v6771_v26 }
  0x3b   :  { %631 = vmatpush1.msra.mxu0 %v6741_v21  ;;  %702 = vmatpush1.msra.mxu1 %v6783_v28 }
  0x3c   :  { %632 = vmatprep.subr.mxu0 %v6753_v23  ;;  %703 = vmatprep.subr.mxu1 %v6795_v30 }
  0x3d   :  { %633 = vmatpush1.msra.mxu0 %v6765_v25  ;;  %704 = vmatpush1.msra.mxu1 %v6807_v32 }
  0x3e   :  { %634 = vmatprep.subr.mxu0 %v6777_v27  ;;  %705 = vmatprep.subr.mxu1 %v6819_v34 }
  0x3f   :  { %635 = vmatpush1.msra.mxu0 %v6789_v29  ;;  %706 = vmatpush1.msra.mxu1 %v6831_v36 }
  0x40   :  { %636 = vmatprep.subr.mxu0 %v6801_v31  ;;  %707 = vmatprep.subr.mxu1 %v6843_v38 }
  0x41   :  { %637 = vmatpush1.msra.mxu0 %v6813_v33  ;;  %708 = vmatpush1.msra.mxu1 %v6855_v40 }
  0x42   :  { %638 = vmatprep.subr.mxu0 %v6825_v35  ;;  %709 = vmatprep.subr.mxu1 %v6867_v42 }
  0x43   :  { %639 = vmatpush1.msra.mxu0 %v6837_v37  ;;  %710 = vmatpush1.msra.mxu1 %v6879_v44 }
  0x44   :  { %640 = vmatprep.subr.mxu0 %v6849_v39  ;;  %711 = vmatprep.subr.mxu1 %v6891_v46 }
  0x45   :  { %641 = vmatpush1.msra.mxu0 %v6861_v41  ;;  %712 = vmatpush1.msra.mxu1 %v6903_v48 }
  0x46   :  { %642 = vmatprep.subr.mxu0 %v6873_v43  ;;  %713 = vmatprep.subr.mxu1 %v6915_v50 }
  0x47   :  { %643 = vmatpush1.msra.mxu0 %v6885_v45  ;;  %714 = vmatpush1.msra.mxu1 %v6927_v52  ;;  %v10827_v52 = vld [vmem:[#allocation35_spill] sm:$0xff] }
  0x48   :  { %644 = vmatprep.subr.mxu0 %v6897_v47  ;;  %715 = vmatprep.subr.mxu1 %v6939_v54  ;;  %v10828_v47 = vld [vmem:[#allocation43_spill] sm:$0xff]  ;;  %v10829_v54 = vld [vmem:[#allocation37_spill] sm:$0xff] }
  0x49   :  { %645 = vmatpush1.msra.mxu0 %v6909_v49  ;;  %716 = vmatpush1.msra.mxu1 %v6951_v56  ;;  %v10830_v49 = vld [vmem:[#allocation45_spill] sm:$0xff]  ;;  %v10831_v56 = vld [vmem:[#allocation39_spill] sm:$0xff] }
  0x4a   :  { %646 = vmatprep.subr.mxu0 %v6921_v51  ;;  %717 = vmatprep.subr.mxu1 %v10822_v62  ;;  %v10832_v51 = vld [vmem:[#allocation48_spill] sm:$0xff] }
  0x4b   :  { %647 = vmatpush1.msra.mxu0 %v10823_v58  ;;  %718 = vmatpush1.msra.mxu1 %v10824_v61  ;;  %v10833_v61 = vld [vmem:[#allocation41_spill] sm:$0xff] }
  0x4c   :  { %648 = vmatprep.subr.mxu0 %v10825_v59  ;;  %719 = vmatprep.subr.mxu1 %v10826_v63  ;;  %v10834_v59 = vld [vmem:[#allocation51_spill] sm:$0xff]  ;;  %v561_v63 = vlaneseq }
  0x4d   :  { %649 = vmatpush1.msra.mxu0 %v10827_v52  ;;  %720 = vmatpush1.msra.mxu1 %v10828_v47 }
  0x4e   :  { %650 = vmatprep.subr.mxu0 %v10829_v54  ;;  %721 = vmatprep.subr.mxu1 %v10830_v49  ;;  %v7199_v52 = vshrl.u32 %v561_v63, 7 }
  0x4f   :  { %651 = vmatpush1.msra.mxu0 %v10831_v56  ;;  %722 = vmatpush1.msra.mxu1 %v10832_v51  ;;  %v125_v56 = vld [vmem:[%s10365_s4] sm:$0xf] }
  0x50   :  { %684 = vmatprep.mubr.f32.mxu0 %v10810_v55  ;;  %755 = vmatprep.mubr.f32.mxu1 %v10810_v55  ;;  %10835 = vst [vmem:[#allocation56_spill] sm:$0xff] %v7199_v52  ;;  %v10455_v54 = vsub.s32 0, %v7199_v52  ;;  %v10458_v51 = vsub.s32 1, %v7199_v52  ;;  %v10459_v44 = vsub.s32 3, %v7199_v52 }
  0x51   :  { %789 = vmatprep.subr.mxu0 %v10833_v61  ;;  %860 = vmatprep.subr.mxu1 %v10834_v59 }
  0x52   :  { %v7208_v62 = vrot.slane %v125_v56, %v10455_v54  ;;  %v7212_v63 = vrot.slane %v125_v56, %v10458_v51  ;;  %v10464_v51 = vsub.s32 2, %v7199_v52 }
  0x54   :  { %10836 = vst [vmem:[#allocation57_spill] sm:$0xff] %v7208_v62  ;;  %10837 = vst [vmem:[#allocation58_spill] sm:$0xff] %v7212_v63 }
  0xe2   :  { %v338_v47 = vpop.f32.mrf.mxu0 }
  0xe4   :  { %v340_v49 = vpop.f32.mrf.mxu0 }
  0xe7   :  { %v409_v58 = vpop.f32.mrf.mxu1 }
  0xe9   :  { %v411_v50 = vpop.f32.mrf.mxu1 }
  0xea   :  { %v484_v61 = vpop.f32.mrf.mxu0 }
  0xeb   :  { %v485_v59 = vadd.f32 %v484_v61, %v338_v47  ;;  %v7219_v61 = vrot.slane %v125_v56, %v10459_v44 }
  0xec   :  { %v486_v45 = vpop.f32.mrf.mxu0 }
  0xed   :  { %v581_v43 = vadd.f32 %v7208_v62, %v485_v59  ;;  %v487_v48 = vadd.f32 %v486_v45, %v340_v49  ;;  %10838 = vst [vmem:[#allocation59_spill] sm:$0xff] %v7219_v61 }
  0xef   :  { %v5806_v41 = vmul.f32 -1.442695, %v581_v43  ;;  %v582_v46 = vadd.f32 %v7212_v63, %v487_v48  ;;  %v555_v39 = vpop.f32.mrf.mxu1  ;;  %v7225_v43 = vrot.slane %v125_v56, %v10464_v51  ;;  %v10854_v51 = vld [vmem:[#allocation19_spill] sm:$0xff] }
  0xf0   :  { %v556_v45 = vadd.f32 %v555_v39, %v409_v58 }
  0xf1   :  { %6131 = vpow2.f32 %v5806_v41  ;;  %v5807_v54 = vmul.f32 -1.442695, %v582_v46  ;;  %v557_v37 = vpop.f32.mrf.mxu1  ;;  %10839 = vst [vmem:[#allocation60_spill] sm:$0xff] %v7225_v43 }
  0xf2   :  { %v558_v47 = vadd.f32 %v557_v37, %v411_v50  ;;  %v583_v41 = vadd.f32 %v7225_v43, %v556_v45  ;;  %v7231_v45 = vpop.permute.xlu0 %612 }
  0xf3   :  { %6133 = vpow2.f32 %v5807_v54  ;;  %10840 = vst [vmem:[#allocation61_spill] sm:$0xff] %v7231_v45  ;;  %vm614_vm5 = vcmp.eq.s32.totalorder %v7231_v45, 1  ;;  %v7831_v45 = vld [vmem:[%s10361_s3 + $0x40] sm:$0xff] }
  0xf4   :  { %v584_v59 = vadd.f32 %v7219_v61, %v558_v47 }
  0xf6   :  { %v5808_v48 = vmul.f32 -1.442695, %v584_v59 }
  0xf8   :  { %6135 = vpow2.f32 %v5808_v48 }
  0xfe   :  { %v6132_v49 = vpop.eup %6131 }
  0xff   :  { %v588_v46 = vadd.f32 1.0, %v6132_v49 }
 0x100   :  { %v6134_v54 = vpop.eup %6133 }
 0x101   :  { %6137 = vrcp.f32 %v588_v46  ;;  %v594_v37 = vadd.f32 1.0, %v6134_v54  ;;  %v10844_v46 = vld [vmem:[#allocation55_spill] sm:$0xff]  ;;  %v10845_v54 = vld [vmem:[#allocation46_spill] sm:$0xff] }
 0x102   :  { %6139 = vtanh.f32 %v583_v41  ;;  %v10843_v41 = vld [vmem:[#allocation44_spill] sm:$0xff] }
 0x103   :  { %6141 = vrcp.f32 %v594_v37  ;;  %v10846_v37 = vld [vmem:[#allocation47_spill] sm:$0xff] }
 0x105   :  { %v6136_v50 = vpop.eup %6135 }
 0x106   :  { %v601_v39 = vadd.f32 1.0, %v6136_v50  ;;  %v10847_v50 = vld [vmem:[#allocation50_spill] sm:$0xff] }
 0x108   :  { %6143 = vrcp.f32 %v601_v39  ;;  %v5809_v39 = vld [vmem:[%s10364_s1 + $0x8] sm:$0xff] }
 0x10e   :  { %v6138_v44 = vpop.eup %6137 }
 0x10f   :  { %v6140_v63 = vpop.eup %6139 }
 0x110   :  { %v6142_v47 = vpop.eup %6141  ;;  %v605_v52 = vmul.f32 %v6140_v63, %v6138_v44  ;;  %v10842_v63 = vld [vmem:[#allocation54_spill] sm:$0xff] }
 0x111   :  { %v604_v58 = vmul.f32 0.0, %v6142_v47  ;;  %v10848_v47 = vld [vmem:[#allocation52_spill] sm:$0xff] }
 0x113   :  { %v7228_v56 = vadd.f32 %v605_v52, %v604_v58  ;;  %v10841_v52 = vld [vmem:[#allocation42_spill] sm:$0xff]  ;;  %v10849_v58 = vld [vmem:[#allocation53_spill] sm:$0xff] }
 0x115   :  { %6145 = vtanh.f32 %v7228_v56  ;;  %v6144_v59 = vpop.eup %6143 }
 0x122   :  { %v6146_v48 = vpop.eup %6145 }
 0x123   :  { %v608_v49 = vmul.f32 %v6146_v48, %v6144_v59  ;;  %v10850_v59 = vld [vmem:[#allocation15_spill] sm:$0xff]  ;;  %v10851_v48 = vld [vmem:[#allocation22_spill] sm:$0xff] }
 0x125   :  { %5810 = vmatmul.mubr.msk.f32.vlgmr.msra.gmra.mxu0 %vm614_vm5, %v608_v49  ;;  %5811 = vmatmul.mubr.msk.f32.vlgmr.msra.gmra.mxu1 %vm614_vm5, %v608_v49  ;;  %v7240_v44 = vsel %vm614_vm5, %v608_v49, 0.0  ;;  %v10852_v49 = vld [vmem:[#allocation17_spill] sm:$0xff] }
 0x126   :  { %790 = vmatpush1.msra.mxu0 %v10841_v52  ;;  %861 = vmatpush1.msra.mxu1 %v10842_v63  ;;  %616 = vst [vmem:[%s10366_s12] sm:$0xff] %v7240_v44 }
 0x127   :  { %791 = vmatprep.subr.mxu0 %v10843_v41  ;;  %862 = vmatprep.subr.mxu1 %v10844_v46 }
 0x128   :  { %792 = vmatpush1.msra.mxu0 %v10845_v54  ;;  %863 = vmatpush1.msra.mxu1 %v7091_v5 }
 0x129   :  { %793 = vmatprep.subr.mxu0 %v10846_v37  ;;  %864 = vmatprep.subr.mxu1 %v7098_v3 }
 0x12a   :  { %794 = vmatpush1.msra.mxu0 %v10847_v50  ;;  %865 = vmatpush1.msra.mxu1 %v7106_v53 }
 0x12b   :  { %795 = vmatprep.subr.mxu0 %v10848_v47  ;;  %866 = vmatprep.subr.mxu1 %v7113_v57 }
 0x12c   :  { %796 = vmatpush1.msra.mxu0 %v10849_v58  ;;  %829 = vmatprep.mubr.f32.mxu0 %v10810_v55 }
 0x12d   :  { %867 = vmatpush1.msra.mxu1 %v7120_v60  ;;  %900 = vmatprep.mubr.f32.mxu1 %v10810_v55 }
 0x12e   :  { %5812 = vmatmul.mubr.msk.f32.vlgmr.msra.gmra.mxu0 %vm414_vm1, %v5809_v39  ;;  %5813 = vmatmul.mubr.msk.f32.vlgmr.msra.gmra.mxu1 %vm414_vm1, %v5809_v39  ;;  %v10853_v39 = vld [vmem:[#allocation24_spill] sm:$0xff] }
 0x12f   :  { %948 = vmatprep.subr.mxu0 %v6628_v0  ;;  %1019 = vmatprep.subr.mxu1 %v6665_v8 }
 0x130   :  { %949 = vmatpush1.msra.mxu0 %v6633_v1  ;;  %1020 = vmatpush1.msra.mxu1 %v6677_v10 }
 0x131   :  { %950 = vmatprep.subr.mxu0 %v6638_v2  ;;  %1021 = vmatprep.subr.mxu1 %v6682_v11 }
 0x132   :  { %951 = vmatpush1.msra.mxu0 %v6646_v4  ;;  %1022 = vmatpush1.msra.mxu1 %v6694_v13 }
 0x133   :  { %952 = vmatprep.subr.mxu0 %v6653_v6  ;;  %1023 = vmatprep.subr.mxu1 %v6706_v15 }
 0x134   :  { %953 = vmatpush1.msra.mxu0 %v6660_v7  ;;  %1024 = vmatpush1.msra.mxu1 %v6711_v16 }
 0x135   :  { %954 = vmatprep.subr.mxu0 %v6671_v9  ;;  %1025 = vmatprep.subr.mxu1 %v6723_v18 }
 0x136   :  { %955 = vmatpush1.msra.mxu0 %v6688_v12  ;;  %1026 = vmatpush1.msra.mxu1 %v6735_v20 }
 0x137   :  { %956 = vmatprep.subr.mxu0 %v6700_v14  ;;  %1027 = vmatprep.subr.mxu1 %v6747_v22 }
 0x138   :  { %957 = vmatpush1.msra.mxu0 %v6717_v17  ;;  %1028 = vmatpush1.msra.mxu1 %v6759_v24 }
 0x139   :  { %958 = vmatprep.subr.mxu0 %v6729_v19  ;;  %1029 = vmatprep.subr.mxu1 %v6771_v26 }
 0x13a   :  { %959 = vmatpush1.msra.mxu0 %v6741_v21  ;;  %1030 = vmatpush1.msra.mxu1 %v6783_v28 }
 0x13b   :  { %960 = vmatprep.subr.mxu0 %v6753_v23  ;;  %1031 = vmatprep.subr.mxu1 %v6795_v30 }
 0x13c   :  { %961 = vmatpush1.msra.mxu0 %v6765_v25  ;;  %1032 = vmatpush1.msra.mxu1 %v6807_v32  ;;  %v10880_v32 = vld [vmem:[#allocation58_spill] sm:$0xff] }
 0x13d   :  { %962 = vmatprep.subr.mxu0 %v6777_v27  ;;  %1033 = vmatprep.subr.mxu1 %v6819_v34 }
 0x13e   :  { %963 = vmatpush1.msra.mxu0 %v6789_v29  ;;  %1034 = vmatpush1.msra.mxu1 %v6831_v36 }
 0x13f   :  { %964 = vmatprep.subr.mxu0 %v6801_v31  ;;  %1035 = vmatprep.subr.mxu1 %v6843_v38  ;;  %v10855_v31 = vld [vmem:[#allocation26_spill] sm:$0xff]  ;;  %v10856_v38 = vld [vmem:[#allocation21_spill] sm:$0xff] }
 0x140   :  { %965 = vmatpush1.msra.mxu0 %v6813_v33  ;;  %1036 = vmatpush1.msra.mxu1 %v6855_v40  ;;  %v10857_v33 = vld [vmem:[#allocation28_spill] sm:$0xff]  ;;  %v10858_v40 = vld [vmem:[#allocation23_spill] sm:$0xff] }
 0x141   :  { %966 = vmatprep.subr.mxu0 %v6825_v35  ;;  %1037 = vmatprep.subr.mxu1 %v6867_v42  ;;  %v10859_v35 = vld [vmem:[#allocation30_spill] sm:$0xff]  ;;  %v10860_v42 = vld [vmem:[#allocation25_spill] sm:$0xff] }
 0x142   :  { %967 = vmatpush1.msra.mxu0 %v10850_v59  ;;  %1038 = vmatpush1.msra.mxu1 %v10851_v48  ;;  %v10861_v59 = vld [vmem:[#allocation32_spill] sm:$0xff]  ;;  %v10862_v48 = vld [vmem:[#allocation27_spill] sm:$0xff] }
 0x143   :  { %968 = vmatprep.subr.mxu0 %v10852_v49  ;;  %1039 = vmatprep.subr.mxu1 %v10853_v39  ;;  %v10863_v49 = vld [vmem:[#allocation34_spill] sm:$0xff]  ;;  %v10864_v39 = vld [vmem:[#allocation29_spill] sm:$0xff] }
 0x144   :  { %969 = vmatpush1.msra.mxu0 %v10854_v51  ;;  %1040 = vmatpush1.msra.mxu1 %v10855_v31  ;;  %v10865_v51 = vld [vmem:[#allocation36_spill] sm:$0xff]  ;;  %v10866_v31 = vld [vmem:[#allocation31_spill] sm:$0xff] }
 0x145   :  { %970 = vmatprep.subr.mxu0 %v10856_v38  ;;  %1041 = vmatprep.subr.mxu1 %v10857_v33  ;;  %v10867_v38 = vld [vmem:[#allocation38_spill] sm:$0xff]  ;;  %v10868_v33 = vld [vmem:[#allocation33_spill] sm:$0xff] }
 0x146   :  { %971 = vmatpush1.msra.mxu0 %v10858_v40  ;;  %1042 = vmatpush1.msra.mxu1 %v10859_v35  ;;  %v10869_v40 = vld [vmem:[#allocation40_spill] sm:$0xff]  ;;  %v10870_v35 = vld [vmem:[#allocation35_spill] sm:$0xff] }
 0x147   :  { %972 = vmatprep.subr.mxu0 %v10860_v42  ;;  %1043 = vmatprep.subr.mxu1 %v10861_v59  ;;  %v10871_v42 = vld [vmem:[#allocation43_spill] sm:$0xff]  ;;  %v10872_v59 = vld [vmem:[#allocation37_spill] sm:$0xff] }
 0x148   :  { %973 = vmatpush1.msra.mxu0 %v10862_v48  ;;  %1044 = vmatpush1.msra.mxu1 %v10863_v49  ;;  %v10873_v48 = vld [vmem:[#allocation45_spill] sm:$0xff]  ;;  %v10874_v49 = vld [vmem:[#allocation39_spill] sm:$0xff] }
 0x149   :  { %974 = vmatprep.subr.mxu0 %v10864_v39  ;;  %1045 = vmatprep.subr.mxu1 %v10865_v51  ;;  %v10875_v39 = vld [vmem:[#allocation48_spill] sm:$0xff] }
 0x14a   :  { %975 = vmatpush1.msra.mxu0 %v10866_v31  ;;  %1046 = vmatpush1.msra.mxu1 %v10867_v38  ;;  %v10876_v38 = vld [vmem:[#allocation41_spill] sm:$0xff] }
 0x14b   :  { %976 = vmatprep.subr.mxu0 %v10868_v33  ;;  %1047 = vmatprep.subr.mxu1 %v10869_v40  ;;  %v10877_v33 = vld [vmem:[#allocation51_spill] sm:$0xff]  ;;  %v10878_v40 = vld [vmem:[#allocation49_spill] sm:$0xff] }
 0x14c   :  { %977 = vmatpush1.msra.mxu0 %v10870_v35  ;;  %1048 = vmatpush1.msra.mxu1 %v10871_v42  ;;  %vm1263_vm6 = vcmp.gt.s32.totalorder %v10878_v40, 2  ;;  %vm1591_vm7 = vcmp.gt.s32.totalorder %v10878_v40, 3  ;;  %v10879_v42 = vmov 0   ;;  %vm2247_vm8 = vcmp.gt.s32.totalorder %v10878_v40, 5 }
 0x14d   :  { %978 = vmatprep.subr.mxu0 %v10872_v59  ;;  %1049 = vmatprep.subr.mxu1 %v10873_v48  ;;  %v1264_v59 = vsel %vm1263_vm6, 1, %v10879_v42  ;;  %v1592_v48 = vsel %vm1591_vm7, 1, %v10879_v42  ;;  %vm2903_vm9 = vcmp.gt.s32.totalorder %v10878_v40, 7 }
 0x14e   :  { %979 = vmatpush1.msra.mxu0 %v10874_v49  ;;  %1050 = vmatpush1.msra.mxu1 %v10875_v39  ;;  %v2248_v39 = vsel %vm2247_vm8, 1, %v10879_v42 }
 0x14f   :  { %1012 = vmatprep.mubr.f32.mxu0 %v10810_v55  ;;  %1083 = vmatprep.mubr.f32.mxu1 %v10810_v55 }
 0x150   :  { %1117 = vmatprep.subr.mxu0 %v10876_v38  ;;  %1188 = vmatprep.subr.mxu1 %v10877_v33  ;;  %v2904_v38 = vsel %vm2903_vm9, 1, %v10879_v42 }
 0x151   :  { %1266 = vperm.xlu1 %6130, %v1264_v59  }
 0x155   :  { %1594 = vperm.xlu1 %6130, %v1592_v48  }
 0x159   :  { %2250 = vperm.xlu1 %6130, %v2248_v39  }
 0x15d   :  { %2906 = vperm.xlu1 %6130, %v2904_v38  }
 0x1e5   :  { %v686_v33 = vpop.f32.mrf.mxu0  ;;  %v757_v49 = vpop.f32.mrf.mxu1 }
 0x1e7   :  { %v688_v35 = vpop.f32.mrf.mxu0  ;;  %v759_v51 = vpop.f32.mrf.mxu1 }
 0x1ee   :  { %v831_v31 = vpop.f32.mrf.mxu0  ;;  %v902_v34 = vpop.f32.mrf.mxu1 }
 0x1ef   :  { %v832_v36 = vadd.f32 %v831_v31, %v686_v33  ;;  %v903_v30 = vadd.f32 %v902_v34, %v757_v49 }
 0x1f0   :  { %v833_v59 = vpop.f32.mrf.mxu0  ;;  %v904_v39 = vpop.f32.mrf.mxu1 }
 0x1f1   :  { %v907_v29 = vadd.f32 %v832_v36, %v7208_v62  ;;  %v834_v27 = vadd.f32 %v833_v59, %v688_v35  ;;  %v905_v42 = vadd.f32 %v904_v39, %v759_v51  ;;  %v909_v31 = vadd.f32 %v903_v30, %v7225_v43 }
 0x1f2   :  { %v617_v51 = vsel %vm614_vm5, %v7228_v56, 0.0 }
 0x1f3   :  { %v5814_v48 = vmul.f32 -1.442695, %v907_v29  ;;  %v908_v25 = vadd.f32 %v834_v27, %v10880_v32  ;;  %v910_v38 = vadd.f32 %v905_v42, %v7219_v61  ;;  %v10904_v42 = vld [vmem:[#allocation21_spill] sm:$0xff] }
 0x1f5   :  { %6147 = vpow2.f32 %v5814_v48  ;;  %v5815_v40 = vmul.f32 -1.442695, %v908_v25  ;;  %v5816_v23 = vmul.f32 -1.442695, %v910_v38  ;;  %v7350_v48 = vpop.permute.xlu0 %938  ;;  %v10905_v38 = vld [vmem:[#allocation28_spill] sm:$0xff] }
 0x1f6   :  { %10881 = vst [vmem:[#allocation42_spill] sm:$0xff] %v7350_v48  ;;  %vm940_vm10 = vcmp.eq.s32.totalorder %v7350_v48, 1  ;;  %10958 = vst [vmem:[#allocation28_spill] sm:$0xff] %v7831_v45  ;;  %v7837_v48 = vld [vmem:[%s10361_s3 + $0x50] sm:$0xff] }
 0x1f7   :  { %6149 = vpow2.f32 %v5815_v40 }
 0x1f8   :  { %6151 = vpow2.f32 %v5816_v23 }
 0x202   :  { %v6148_v28 = vpop.eup %6147 }
 0x203   :  { %v914_v33 = vadd.f32 1.0, %v6148_v28 }
 0x204   :  { %v6150_v21 = vpop.eup %6149 }
 0x205   :  { %6153 = vrcp.f32 %v914_v33  ;;  %v920_v35 = vadd.f32 1.0, %v6150_v21  ;;  %v6152_v27 = vpop.eup %6151  ;;  %v10907_v33 = vld [vmem:[#allocation30_spill] sm:$0xff] }
 0x206   :  { %6155 = vtanh.f32 %v909_v31  ;;  %v927_v34 = vadd.f32 1.0, %v6152_v27  ;;  %v10906_v31 = vld [vmem:[#allocation23_spill] sm:$0xff]  ;;  %v10909_v27 = vld [vmem:[#allocation32_spill] sm:$0xff] }
 0x207   :  { %6157 = vrcp.f32 %v920_v35  ;;  %v10908_v35 = vld [vmem:[#allocation25_spill] sm:$0xff]  ;;  %10959 = vst [vmem:[#allocation23_spill] sm:$0xff] %v7837_v48 }
 0x208   :  { %6159 = vrcp.f32 %v927_v34  ;;  %v10914_v34 = vld [vmem:[#allocation31_spill] sm:$0xff] }
 0x212   :  { %v6154_v29 = vpop.eup %6153 }
 0x213   :  { %v6156_v25 = vpop.eup %6155 }
 0x214   :  { %v6158_v36 = vpop.eup %6157  ;;  %v931_v49 = vmul.f32 %v6156_v25, %v6154_v29  ;;  %v10910_v29 = vld [vmem:[#allocation27_spill] sm:$0xff]  ;;  %v10911_v25 = vld [vmem:[#allocation34_spill] sm:$0xff] }
 0x215   :  { %v930_v59 = vmul.f32 %v6158_v36, %v617_v51  ;;  %v6160_v23 = vpop.eup %6159  ;;  %v10912_v36 = vld [vmem:[#allocation29_spill] sm:$0xff] }
 0x217   :  { %v932_v28 = vadd.f32 %v931_v49, %v930_v59  ;;  %v10915_v49 = vld [vmem:[#allocation38_spill] sm:$0xff]  ;;  %v10916_v59 = vld [vmem:[#allocation33_spill] sm:$0xff] }
 0x219   :  { %6161 = vtanh.f32 %v932_v28  ;;  %v7355_v21 = vsel %vm940_vm10, %v932_v28, %v617_v51  ;;  %v10913_v51 = vld [vmem:[#allocation36_spill] sm:$0xff] }
 0x21a   :  { %v10917_v28 = vld [vmem:[#allocation40_spill] sm:$0xff] }
 0x226   :  { %v6162_v30 = vpop.eup %6161 }
 0x227   :  { %v934_v40 = vmul.f32 %v6162_v30, %v6160_v23  ;;  %v10918_v23 = vld [vmem:[#allocation35_spill] sm:$0xff] }
 0x228   :  { %v10919_v30 = vld [vmem:[#allocation43_spill] sm:$0xff] }
 0x229   :  { %v941_v56 = vsel %vm940_vm10, %v934_v40, 0.0  ;;  %v7362_v39 = vsel %vm940_vm10, %v934_v40, %v7240_v44  ;;  %v5818_v44 = vld [vmem:[%s10364_s1 + $0x10] sm:$0xff]  ;;  %v10920_v40 = vld [vmem:[#allocation37_spill] sm:$0xff] }
 0x22a   :  { %5817 = vst [vmem:[%s10366_s12 + $0x10] sm:$0xff] %v941_v56  ;;  %1013 = vmatmul.mubr.f32.vlgmr.msra.gmra.mxu0 %v7362_v39  ;;  %1084 = vmatmul.mubr.f32.vlgmr.msra.gmra.mxu1 %v7362_v39  ;;  %v10921_v56 = vld [vmem:[#allocation45_spill] sm:$0xff] }
 0x22b   :  { %1118 = vmatpush1.msra.mxu0 %v10841_v52  ;;  %1189 = vmatpush1.msra.mxu1 %v10842_v63 }
 0x22c   :  { %1119 = vmatprep.subr.mxu0 %v10843_v41  ;;  %1190 = vmatprep.subr.mxu1 %v10844_v46 }
 0x22d   :  { %1120 = vmatpush1.msra.mxu0 %v10845_v54  ;;  %1191 = vmatpush1.msra.mxu1 %v7091_v5 }
 0x22e   :  { %1121 = vmatprep.subr.mxu0 %v10846_v37  ;;  %1192 = vmatprep.subr.mxu1 %v7098_v3 }
 0x22f   :  { %1122 = vmatpush1.msra.mxu0 %v10847_v50  ;;  %1193 = vmatpush1.msra.mxu1 %v7106_v53 }
 0x230   :  { %1123 = vmatprep.subr.mxu0 %v10848_v47  ;;  %1194 = vmatprep.subr.mxu1 %v7113_v57 }
 0x231   :  { %1124 = vmatpush1.msra.mxu0 %v10849_v58  ;;  %1157 = vmatprep.mubr.f32.mxu0 %v10810_v55 }
 0x232   :  { %1195 = vmatpush1.msra.mxu1 %v7120_v60  ;;  %1228 = vmatprep.mubr.f32.mxu1 %v10810_v55 }
 0x233   :  { %5819 = vmatmul.mubr.msk.f32.vlgmr.msra.gmra.mxu0 %vm414_vm1, %v5818_v44  ;;  %5820 = vmatmul.mubr.msk.f32.vlgmr.msra.gmra.mxu1 %vm414_vm1, %v5818_v44  ;;  %v10922_v44 = vld [vmem:[#allocation39_spill] sm:$0xff] }
 0x234   :  { %1276 = vmatprep.subr.mxu0 %v6628_v0  ;;  %1347 = vmatprep.subr.mxu1 %v6665_v8  ;;  %v10882_v0 = vld [vmem:[#allocation2_spill] sm:$0xff]  ;;  %v10888_v8 = vld [vmem:[#allocation5_spill] sm:$0xff] }
 0x235   :  { %1277 = vmatpush1.msra.mxu0 %v6633_v1  ;;  %1348 = vmatpush1.msra.mxu1 %v6677_v10  ;;  %v10883_v1 = vld [vmem:[#allocation6_spill] sm:$0xff]  ;;  %v10890_v10 = vld [vmem:[#allocation7_spill] sm:$0xff] }
 0x236   :  { %1278 = vmatprep.subr.mxu0 %v6638_v2  ;;  %1349 = vmatprep.subr.mxu1 %v6682_v11  ;;  %v10884_v2 = vld [vmem:[#allocation3_spill] sm:$0xff]  ;;  %v10891_v11 = vld [vmem:[#allocation14_spill] sm:$0xff] }
 0x237   :  { %1279 = vmatpush1.msra.mxu0 %v6646_v4  ;;  %1350 = vmatpush1.msra.mxu1 %v6694_v13  ;;  %v10885_v4 = vld [vmem:[#allocation8_spill] sm:$0xff] }
 0x238   :  { %1280 = vmatprep.subr.mxu0 %v6653_v6  ;;  %1351 = vmatprep.subr.mxu1 %v6706_v15  ;;  %v10886_v6 = vld [vmem:[#allocation4_spill] sm:$0xff]  ;;  %v10895_v15 = vld [vmem:[#allocation18_spill] sm:$0xff] }
 0x239   :  { %1281 = vmatpush1.msra.mxu0 %v6660_v7  ;;  %1352 = vmatpush1.msra.mxu1 %v6711_v16  ;;  %v10887_v7 = vld [vmem:[#allocation10_spill] sm:$0xff]  ;;  %v10893_v13 = vld [vmem:[#allocation16_spill] sm:$0xff]  ;;  %v10896_v16 = vld [vmem:[#allocation13_spill] sm:$0xff] }
 0x23a   :  { %1282 = vmatprep.subr.mxu0 %v6671_v9  ;;  %1353 = vmatprep.subr.mxu1 %v6723_v18  ;;  %v10889_v9 = vld [vmem:[#allocation12_spill] sm:$0xff]  ;;  %v10898_v18 = vld [vmem:[#allocation15_spill] sm:$0xff] }
 0x23b   :  { %1283 = vmatpush1.msra.mxu0 %v6688_v12  ;;  %1354 = vmatpush1.msra.mxu1 %v6735_v20  ;;  %v10892_v12 = vld [vmem:[#allocation9_spill] sm:$0xff] }
 0x23c   :  { %1284 = vmatprep.subr.mxu0 %v6700_v14  ;;  %1355 = vmatprep.subr.mxu1 %v6747_v22  ;;  %v10894_v14 = vld [vmem:[#allocation11_spill] sm:$0xff]  ;;  %v10900_v20 = vld [vmem:[#allocation17_spill] sm:$0xff]  ;;  %v10901_v22 = vld [vmem:[#allocation24_spill] sm:$0xff] }
 0x23d   :  { %1285 = vmatpush1.msra.mxu0 %v6717_v17  ;;  %1356 = vmatpush1.msra.mxu1 %v6759_v24  ;;  %v10897_v17 = vld [vmem:[#allocation20_spill] sm:$0xff]  ;;  %v10902_v24 = vld [vmem:[#allocation19_spill] sm:$0xff] }
 0x23e   :  { %1286 = vmatprep.subr.mxu0 %v6729_v19  ;;  %1357 = vmatprep.subr.mxu1 %v6771_v26  ;;  %v10899_v19 = vld [vmem:[#allocation22_spill] sm:$0xff] }
 0x23f   :  { %1287 = vmatpush1.msra.mxu0 %v10882_v0  ;;  %1358 = vmatpush1.msra.mxu1 %v10883_v1  ;;  %v10903_v26 = vld [vmem:[#allocation26_spill] sm:$0xff]  ;;  %v10923_v0 = vld [vmem:[#allocation48_spill] sm:$0xff]  ;;  %v10924_v1 = vld [vmem:[#allocation41_spill] sm:$0xff] }
 0x240   :  { %1288 = vmatprep.subr.mxu0 %v10884_v2  ;;  %1359 = vmatprep.subr.mxu1 %v10885_v4  ;;  %v10925_v2 = vld [vmem:[#allocation51_spill] sm:$0xff] }
 0x241   :  { %1289 = vmatpush1.msra.mxu0 %v10886_v6  ;;  %1360 = vmatpush1.msra.mxu1 %v10887_v7 }
 0x242   :  { %1290 = vmatprep.subr.mxu0 %v10888_v8  ;;  %1361 = vmatprep.subr.mxu1 %v10889_v9 }
 0x243   :  { %1291 = vmatpush1.msra.mxu0 %v10890_v10  ;;  %1362 = vmatpush1.msra.mxu1 %v10891_v11 }
 0x244   :  { %1292 = vmatprep.subr.mxu0 %v10892_v12  ;;  %1363 = vmatprep.subr.mxu1 %v10893_v13 }
 0x245   :  { %1293 = vmatpush1.msra.mxu0 %v10894_v14  ;;  %1364 = vmatpush1.msra.mxu1 %v10895_v15 }
 0x246   :  { %1294 = vmatprep.subr.mxu0 %v10896_v16  ;;  %1365 = vmatprep.subr.mxu1 %v10897_v17 }
 0x247   :  { %1295 = vmatpush1.msra.mxu0 %v10898_v18  ;;  %1366 = vmatpush1.msra.mxu1 %v10899_v19 }
 0x248   :  { %1296 = vmatprep.subr.mxu0 %v10900_v20  ;;  %1367 = vmatprep.subr.mxu1 %v10901_v22 }
 0x249   :  { %1297 = vmatpush1.msra.mxu0 %v10902_v24  ;;  %1368 = vmatpush1.msra.mxu1 %v10903_v26 }
 0x24a   :  { %1298 = vmatprep.subr.mxu0 %v10904_v42  ;;  %1369 = vmatprep.subr.mxu1 %v10905_v38 }
 0x24b   :  { %1299 = vmatpush1.msra.mxu0 %v10906_v31  ;;  %1370 = vmatpush1.msra.mxu1 %v10907_v33 }
 0x24c   :  { %1300 = vmatprep.subr.mxu0 %v10908_v35  ;;  %1371 = vmatprep.subr.mxu1 %v10909_v27 }
 0x24d   :  { %1301 = vmatpush1.msra.mxu0 %v10910_v29  ;;  %1372 = vmatpush1.msra.mxu1 %v10911_v25  ;;  %v7462_v25 = vpop.permute.xlu1 %1266 }
 0x24e   :  { %1302 = vmatprep.subr.mxu0 %v10912_v36  ;;  %1373 = vmatprep.subr.mxu1 %v10913_v51  ;;  %10926 = vst [vmem:[#allocation54_spill] sm:$0xff] %v7462_v25  ;;  %vm1268_vm11 = vcmp.eq.s32.totalorder %v7462_v25, 1  ;;  %v7843_v25 = vld [vmem:[%s10361_s3 + $0x28] sm:$0xff] }
 0x24f   :  { %1303 = vmatpush1.msra.mxu0 %v10914_v34  ;;  %1374 = vmatpush1.msra.mxu1 %v10915_v49  ;;  %10960 = vst [vmem:[#allocation30_spill] sm:$0xff] %v7843_v25 }
 0x250   :  { %1304 = vmatprep.subr.mxu0 %v10916_v59  ;;  %1375 = vmatprep.subr.mxu1 %v10917_v28 }
 0x251   :  { %1305 = vmatpush1.msra.mxu0 %v10918_v23  ;;  %1376 = vmatpush1.msra.mxu1 %v10919_v30 }
 0x252   :  { %1306 = vmatprep.subr.mxu0 %v10920_v40  ;;  %1377 = vmatprep.subr.mxu1 %v10921_v56 }
 0x253   :  { %1307 = vmatpush1.msra.mxu0 %v10922_v44  ;;  %1378 = vmatpush1.msra.mxu1 %v10923_v0  ;;  %v7597_v0 = vld [vmem:[%s10361_s3 + $0x190] sm:$0xff] }
 0x254   :  { %1340 = vmatprep.mubr.f32.mxu0 %v10810_v55  ;;  %1411 = vmatprep.mubr.f32.mxu1 %v10810_v55 }
 0x255   :  { %1445 = vmatprep.subr.mxu0 %v10924_v1  ;;  %1516 = vmatprep.subr.mxu1 %v10925_v2  ;;  %v7603_v1 = vld [vmem:[%s10361_s3 + $0x168] sm:$0xff]  ;;  %v7609_v2 = vld [vmem:[%s10361_s3 + $0x178] sm:$0xff] }
 0x2ea   :  { %v1014_v4 = vpop.f32.mrf.mxu0  ;;  %v1085_v6 = vpop.f32.mrf.mxu1 }
 0x2ec   :  { %v1016_v7 = vpop.f32.mrf.mxu0  ;;  %v1087_v9 = vpop.f32.mrf.mxu1 }
 0x2f3   :  { %v1159_v8 = vpop.f32.mrf.mxu0  ;;  %v1230_v13 = vpop.f32.mrf.mxu1 }
 0x2f4   :  { %v1160_v10 = vadd.f32 %v1159_v8, %v1014_v4  ;;  %v1231_v22 = vadd.f32 %v1230_v13, %v1085_v6  ;;  %v7615_v4 = vld [vmem:[%s10361_s3 + $0x160] sm:$0xff]  ;;  %v7621_v6 = vld [vmem:[%s10361_s3 + $0x170] sm:$0xff]  ;;  %v7633_v8 = vld [vmem:[%s10361_s3 + $0x158] sm:$0xff] }
 0x2f5   :  { %v1161_v11 = vpop.f32.mrf.mxu0  ;;  %v1232_v18 = vpop.f32.mrf.mxu1  ;;  %v7663_v13 = vld [vmem:[%s10361_s3 + $0x120] sm:$0xff] }
 0x2f6   :  { %v1235_v12 = vadd.f32 %v1160_v10, %v7208_v62  ;;  %v1162_v14 = vadd.f32 %v1161_v11, %v1016_v7  ;;  %v1233_v19 = vadd.f32 %v1232_v18, %v1087_v9  ;;  %v1237_v42 = vadd.f32 %v1231_v22, %v7225_v43  ;;  %v7627_v7 = vld [vmem:[%s10361_s3 + $0x148] sm:$0xff]  ;;  %v7639_v9 = vld [vmem:[%s10361_s3 + $0x140] sm:$0xff]  ;;  %v7645_v10 = vld [vmem:[%s10361_s3 + $0x150] sm:$0xff]  ;;  %10930 = vst [vmem:[#allocation47_spill] sm:$0xff] %v7663_v13 }
 0x2f7   :  { %10927 = vst [vmem:[#allocation44_spill] sm:$0xff] %v7645_v10  ;;  %v7651_v11 = vld [vmem:[%s10361_s3 + $0x128] sm:$0xff]  ;;  %v7693_v18 = vld [vmem:[%s10361_s3 + $0x110] sm:$0xff]  ;;  %v7711_v22 = vld [vmem:[%s10361_s3 + $0xe0] sm:$0xff] }
 0x2f8   :  { %v5821_v15 = vmul.f32 -1.442695, %v1235_v12  ;;  %v1236_v16 = vadd.f32 %v1162_v14, %v10880_v32  ;;  %v1238_v20 = vadd.f32 %v1233_v19, %v7219_v61  ;;  %10928 = vst [vmem:[#allocation55_spill] sm:$0xff] %v7651_v11  ;;  %v7657_v12 = vld [vmem:[%s10361_s3 + $0x138] sm:$0xff]  ;;  %v7669_v14 = vld [vmem:[%s10361_s3 + $0x130] sm:$0xff]  ;;  %10935 = vst [vmem:[#allocation2_spill] sm:$0xff] %v7693_v18 }
 0x2f9   :  { %10929 = vst [vmem:[#allocation46_spill] sm:$0xff] %v7657_v12  ;;  %10931 = vst [vmem:[#allocation50_spill] sm:$0xff] %v7669_v14  ;;  %v7699_v19 = vld [vmem:[%s10361_s3 + $0xe8] sm:$0xff] }
 0x2fa   :  { %6163 = vpow2.f32 %v5821_v15  ;;  %v5822_v17 = vmul.f32 -1.442695, %v1236_v16  ;;  %v5823_v24 = vmul.f32 -1.442695, %v1238_v20  ;;  %v7675_v15 = vld [vmem:[%s10361_s3 + $0x108] sm:$0xff]  ;;  %v7681_v16 = vld [vmem:[%s10361_s3 + $0x118] sm:$0xff] }
 0x2fb   :  { %10932 = vst [vmem:[#allocation52_spill] sm:$0xff] %v7675_v15  ;;  %10933 = vst [vmem:[#allocation53_spill] sm:$0xff] %v7681_v16  ;;  %v7705_v20 = vld [vmem:[%s10361_s3 + $0xf8] sm:$0xff] }
 0x2fc   :  { %6165 = vpow2.f32 %v5822_v17  ;;  %v7687_v17 = vld [vmem:[%s10361_s3 + $0x100] sm:$0xff]  ;;  %10936 = vst [vmem:[#allocation6_spill] sm:$0xff] %v7699_v19  ;;  %10937 = vst [vmem:[#allocation3_spill] sm:$0xff] %v7705_v20 }
 0x2fd   :  { %6167 = vpow2.f32 %v5823_v24  ;;  %10934 = vst [vmem:[#allocation49_spill] sm:$0xff] %v7687_v17  ;;  %10938 = vst [vmem:[#allocation8_spill] sm:$0xff] %v7711_v22  ;;  %v7717_v24 = vld [vmem:[%s10361_s3 + $0xf0] sm:$0xff] }
 0x2fe   :  { %10939 = vst [vmem:[#allocation4_spill] sm:$0xff] %v7717_v24 }
 0x307   :  { %v6164_v26 = vpop.eup %6163 }
 0x308   :  { %v1242_v38 = vadd.f32 1.0, %v6164_v26  ;;  %v7723_v26 = vld [vmem:[%s10361_s3 + $0xc8] sm:$0xff] }
 0x309   :  { %v6166_v31 = vpop.eup %6165  ;;  %10940 = vst [vmem:[#allocation10_spill] sm:$0xff] %v7723_v26 }
 0x30a   :  { %6169 = vrcp.f32 %v1242_v38  ;;  %v1248_v33 = vadd.f32 1.0, %v6166_v31  ;;  %v6168_v35 = vpop.eup %6167  ;;  %v7735_v38 = vld [vmem:[%s10361_s3 + $0xc0] sm:$0xff]  ;;  %v7741_v31 = vld [vmem:[%s10361_s3 + $0xd0] sm:$0xff] }
 0x30b   :  { %6171 = vtanh.f32 %v1237_v42  ;;  %v1255_v51 = vadd.f32 1.0, %v6168_v35  ;;  %v7729_v42 = vld [vmem:[%s10361_s3 + $0xd8] sm:$0xff]  ;;  %10942 = vst [vmem:[#allocation12_spill] sm:$0xff] %v7735_v38  ;;  %10943 = vst [vmem:[#allocation7_spill] sm:$0xff] %v7741_v31 }
 0x30c   :  { %6173 = vrcp.f32 %v1248_v33  ;;  %10941 = vst [vmem:[#allocation5_spill] sm:$0xff] %v7729_v42  ;;  %v7747_v33 = vld [vmem:[%s10361_s3 + $0xa8] sm:$0xff]  ;;  %v7753_v35 = vld [vmem:[%s10361_s3 + $0xb8] sm:$0xff] }
 0x30d   :  { %6175 = vrcp.f32 %v1255_v51  ;;  %10944 = vst [vmem:[#allocation14_spill] sm:$0xff] %v7747_v33  ;;  %10945 = vst [vmem:[#allocation9_spill] sm:$0xff] %v7753_v35  ;;  %v7777_v51 = vld [vmem:[%s10361_s3 + $0x98] sm:$0xff] }
 0x30e   :  { %10949 = vst [vmem:[#allocation13_spill] sm:$0xff] %v7777_v51 }
 0x317   :  { %v6170_v27 = vpop.eup %6169 }
 0x318   :  { %v6172_v29 = vpop.eup %6171 }
 0x319   :  { %v6174_v36 = vpop.eup %6173  ;;  %v1259_v49 = vmul.f32 %v6172_v29, %v6170_v27  ;;  %v7759_v27 = vld [vmem:[%s10361_s3 + $0xa0] sm:$0xff]  ;;  %v7765_v29 = vld [vmem:[%s10361_s3 + $0xb0] sm:$0xff] }
 0x31a   :  { %v1258_v34 = vmul.f32 %v6174_v36, %v7355_v21  ;;  %v6176_v23 = vpop.eup %6175  ;;  %10946 = vst [vmem:[#allocation16_spill] sm:$0xff] %v7759_v27  ;;  %10947 = vst [vmem:[#allocation11_spill] sm:$0xff] %v7765_v29  ;;  %v7771_v36 = vld [vmem:[%s10361_s3 + $0x88] sm:$0xff] }
 0x31b   :  { %10948 = vst [vmem:[#allocation18_spill] sm:$0xff] %v7771_v36 }
 0x31c   :  { %v1260_v59 = vadd.f32 %v1259_v49, %v1258_v34  ;;  %v7783_v34 = vld [vmem:[%s10361_s3 + $0x80] sm:$0xff]  ;;  %v7789_v49 = vld [vmem:[%s10361_s3 + $0x90] sm:$0xff] }
 0x31d   :  { %10950 = vst [vmem:[#allocation20_spill] sm:$0xff] %v7783_v34  ;;  %10951 = vst [vmem:[#allocation15_spill] sm:$0xff] %v7789_v49 }
 0x31e   :  { %6177 = vtanh.f32 %v1260_v59  ;;  %v7469_v28 = vsel %vm1268_vm11, %v1260_v59, %v7355_v21  ;;  %v7585_v21 = vld [vmem:[%s10361_s3 + $0x198] sm:$0xff]  ;;  %v7795_v59 = vld [vmem:[%s10361_s3 + $0x68] sm:$0xff] }
 0x31f   :  { %10952 = vst [vmem:[#allocation22_spill] sm:$0xff] %v7795_v59 }
 0x32b   :  { %v6178_v30 = vpop.eup %6177 }
 0x32c   :  { %v1262_v40 = vmul.f32 %v6178_v30, %v6176_v23  ;;  %v7801_v23 = vld [vmem:[%s10361_s3 + $0x78] sm:$0xff]  ;;  %v7807_v30 = vld [vmem:[%s10361_s3 + $0x60] sm:$0xff] }
 0x32d   :  { %10953 = vst [vmem:[#allocation17_spill] sm:$0xff] %v7801_v23  ;;  %10954 = vst [vmem:[#allocation24_spill] sm:$0xff] %v7807_v30 }
 0x32e   :  { %v1269_v56 = vsel %vm1268_vm11, %v1262_v40, 0.0  ;;  %v7476_v44 = vsel %vm1268_vm11, %v1262_v40, %v7362_v39  ;;  %v7591_v39 = vld [vmem:[%s10361_s3 + $0x180] sm:$0xff]  ;;  %v7813_v40 = vld [vmem:[%s10361_s3 + $0x70] sm:$0xff] }
 0x32f   :  { %5824 = vst [vmem:[%s10366_s12 + $0x20] sm:$0xff] %v1269_v56  ;;  %1341 = vmatmul.mubr.f32.vlgmr.msra.gmra.mxu0 %v7476_v44  ;;  %1412 = vmatmul.mubr.f32.vlgmr.msra.gmra.mxu1 %v7476_v44  ;;  %10955 = vst [vmem:[#allocation19_spill] sm:$0xff] %v7813_v40  ;;  %v7819_v56 = vld [vmem:[%s10361_s3 + $0x48] sm:$0xff] }
 0x330   :  { %1446 = vmatpush1.msra.mxu0 %v10841_v52  ;;  %1517 = vmatpush1.msra.mxu1 %v10842_v63  ;;  %v5825_v52 = vld [vmem:[%s10364_s1 + $0x18] sm:$0xff]  ;;  %10956 = vst [vmem:[#allocation26_spill] sm:$0xff] %v7819_v56 }
 0x331   :  { %1447 = vmatprep.subr.mxu0 %v10843_v41  ;;  %1518 = vmatprep.subr.mxu1 %v10844_v46  ;;  %v7537_v63 = vld [vmem:[%s10361_s3 + $0x1d8] sm:$0xff]  ;;  %v7543_v41 = vld [vmem:[%s10361_s3 + $0x1c0] sm:$0xff]  ;;  %v7549_v46 = vld [vmem:[%s10361_s3 + $0x1d0] sm:$0xff] }
 0x332   :  { %1448 = vmatpush1.msra.mxu0 %v10845_v54  ;;  %1519 = vmatpush1.msra.mxu1 %v7091_v5  ;;  %v7513_v5 = vld [vmem:[%s10361_s3 + $0x1f8] sm:$0xff]  ;;  %v7555_v54 = vld [vmem:[%s10361_s3 + $0x1a8] sm:$0xff] }
 0x333   :  { %1449 = vmatprep.subr.mxu0 %v10846_v37  ;;  %1520 = vmatprep.subr.mxu1 %v7098_v3  ;;  %v7507_v3 = vld [vmem:[%s10361_s3 + $0x1e8] sm:$0xff]  ;;  %v7561_v37 = vld [vmem:[%s10361_s3 + $0x1b8] sm:$0xff] }
 0x334   :  { %1450 = vmatpush1.msra.mxu0 %v10847_v50  ;;  %1521 = vmatpush1.msra.mxu1 %v7106_v53  ;;  %v7519_v53 = vld [vmem:[%s10361_s3 + $0x1e0] sm:$0xff] }
 0x335   :  { %1451 = vmatprep.subr.mxu0 %v10848_v47  ;;  %1522 = vmatprep.subr.mxu1 %v7113_v57  ;;  %v7525_v57 = vld [vmem:[%s10361_s3 + $0x1f0] sm:$0xff]  ;;  %v7567_v50 = vld [vmem:[%s10361_s3 + $0x1a0] sm:$0xff] }
 0x336   :  { %1452 = vmatpush1.msra.mxu0 %v10849_v58  ;;  %1485 = vmatprep.mubr.f32.mxu0 %v10810_v55  ;;  %v7573_v47 = vld [vmem:[%s10361_s3 + $0x1b0] sm:$0xff]  ;;  %v7579_v58 = vld [vmem:[%s10361_s3 + $0x188] sm:$0xff] }
 0x337   :  { %1523 = vmatpush1.msra.mxu1 %v7120_v60  ;;  %1556 = vmatprep.mubr.f32.mxu1 %v10810_v55  ;;  %v7531_v60 = vld [vmem:[%s10361_s3 + $0x1c8] sm:$0xff] }
 0x338   :  { %5826 = vmatmul.mubr.msk.f32.vlgmr.msra.gmra.mxu0 %vm414_vm1, %v5825_v52  ;;  %5827 = vmatmul.mubr.msk.f32.vlgmr.msra.gmra.mxu1 %vm414_vm1, %v5825_v52  ;;  %v7825_v52 = vld [vmem:[%s10361_s3 + $0x58] sm:$0xff] }
 0x339   :  { %1604 = vmatprep.subr.mxu0 %v7507_v3  ;;  %1675 = vmatprep.subr.mxu1 %v7513_v5  ;;  %10957 = vst [vmem:[#allocation21_spill] sm:$0xff] %v7825_v52 }
 0x33a   :  { %1605 = vmatpush1.msra.mxu0 %v7519_v53  ;;  %1676 = vmatpush1.msra.mxu1 %v7525_v57 }
 0x33b   :  { %1606 = vmatprep.subr.mxu0 %v7531_v60  ;;  %1677 = vmatprep.subr.mxu1 %v7537_v63 }
 0x33c   :  { %1607 = vmatpush1.msra.mxu0 %v7543_v41  ;;  %1678 = vmatpush1.msra.mxu1 %v7549_v46 }
 0x33d   :  { %1608 = vmatprep.subr.mxu0 %v7555_v54  ;;  %1679 = vmatprep.subr.mxu1 %v7561_v37 }
 0x33e   :  { %1609 = vmatpush1.msra.mxu0 %v7567_v50  ;;  %1680 = vmatpush1.msra.mxu1 %v7573_v47 }
 0x33f   :  { %1610 = vmatprep.subr.mxu0 %v7579_v58  ;;  %1681 = vmatprep.subr.mxu1 %v7585_v21 }
 0x340   :  { %1611 = vmatpush1.msra.mxu0 %v7591_v39  ;;  %1682 = vmatpush1.msra.mxu1 %v7597_v0 }
 0x341   :  { %1612 = vmatprep.subr.mxu0 %v7603_v1  ;;  %1683 = vmatprep.subr.mxu1 %v7609_v2 }
 0x342   :  { %1613 = vmatpush1.msra.mxu0 %v7615_v4  ;;  %1684 = vmatpush1.msra.mxu1 %v7621_v6 }
 0x343   :  { %1614 = vmatprep.subr.mxu0 %v7627_v7  ;;  %1685 = vmatprep.subr.mxu1 %v7633_v8 }
 0x344   :  { %1615 = vmatpush1.msra.mxu0 %v7639_v9  ;;  %1686 = vmatpush1.msra.mxu1 %v7645_v10 }
 0x345   :  { %1616 = vmatprep.subr.mxu0 %v7651_v11  ;;  %1687 = vmatprep.subr.mxu1 %v7657_v12 }
 0x346   :  { %1617 = vmatpush1.msra.mxu0 %v7663_v13  ;;  %1688 = vmatpush1.msra.mxu1 %v7669_v14 }
 0x347   :  { %1618 = vmatprep.subr.mxu0 %v7675_v15  ;;  %1689 = vmatprep.subr.mxu1 %v7681_v16 }
 0x348   :  { %1619 = vmatpush1.msra.mxu0 %v7687_v17  ;;  %1690 = vmatpush1.msra.mxu1 %v7693_v18 }
 0x349   :  { %1620 = vmatprep.subr.mxu0 %v7699_v19  ;;  %1691 = vmatprep.subr.mxu1 %v7705_v20 }
 0x34a   :  { %1621 = vmatpush1.msra.mxu0 %v7711_v22  ;;  %1692 = vmatpush1.msra.mxu1 %v7717_v24 }
 0x34b   :  { %1622 = vmatprep.subr.mxu0 %v7723_v26  ;;  %1693 = vmatprep.subr.mxu1 %v7729_v42 }
 0x34c   :  { %1623 = vmatpush1.msra.mxu0 %v7735_v38  ;;  %1694 = vmatpush1.msra.mxu1 %v7741_v31 }
 0x34d   :  { %1624 = vmatprep.subr.mxu0 %v7747_v33  ;;  %1695 = vmatprep.subr.mxu1 %v7753_v35 }
 0x34e   :  { %1625 = vmatpush1.msra.mxu0 %v7759_v27  ;;  %1696 = vmatpush1.msra.mxu1 %v7765_v29 }
 0x34f   :  { %1626 = vmatprep.subr.mxu0 %v7771_v36  ;;  %1697 = vmatprep.subr.mxu1 %v7777_v51 }
 0x350   :  { %1627 = vmatpush1.msra.mxu0 %v7783_v34  ;;  %1698 = vmatpush1.msra.mxu1 %v7789_v49 }
 0x351   :  { %1628 = vmatprep.subr.mxu0 %v7795_v59  ;;  %1699 = vmatprep.subr.mxu1 %v7801_v23 }
 0x352   :  { %1629 = vmatpush1.msra.mxu0 %v7807_v30  ;;  %1700 = vmatpush1.msra.mxu1 %v7813_v40 }
 0x353   :  { %1630 = vmatprep.subr.mxu0 %v7819_v56  ;;  %1701 = vmatprep.subr.mxu1 %v7825_v52  ;;  %v7849_v52 = vld [vmem:[%s10361_s3 + $0x38] sm:$0xff] }
 0x354   :  { %1631 = vmatpush1.msra.mxu0 %v7831_v45  ;;  %1702 = vmatpush1.msra.mxu1 %v7837_v48  ;;  %10961 = vst [vmem:[#allocation25_spill] sm:$0xff] %v7849_v52  ;;  %v7855_v45 = vld [vmem:[%s10361_s3 + $0x20] sm:$0xff]  ;;  %v7861_v48 = vld [vmem:[%s10361_s3 + $0x30] sm:$0xff] }
 0x355   :  { %1632 = vmatprep.subr.mxu0 %v7843_v25  ;;  %1703 = vmatprep.subr.mxu1 %v7849_v52  ;;  %10962 = vst [vmem:[#allocation32_spill] sm:$0xff] %v7855_v45  ;;  %10963 = vst [vmem:[#allocation27_spill] sm:$0xff] %v7861_v48  ;;  %v7867_v25 = vld [vmem:[%s10361_s3 + $0x8] sm:$0xff]  ;;  %v7873_v52 = vld [vmem:[%s10361_s3 + $0x18] sm:$0xff] }
 0x356   :  { %1633 = vmatpush1.msra.mxu0 %v7855_v45  ;;  %1704 = vmatpush1.msra.mxu1 %v7861_v48  ;;  %10964 = vst [vmem:[#allocation34_spill] sm:$0xff] %v7867_v25  ;;  %10965 = vst [vmem:[#allocation29_spill] sm:$0xff] %v7873_v52  ;;  %v7879_v45 = vld [vmem:[%s10361_s3] sm:$0xff]  ;;  %v7885_v48 = vld [vmem:[%s10361_s3 + $0x10] sm:$0xff] }
 0x357   :  { %1634 = vmatprep.subr.mxu0 %v7867_v25  ;;  %1705 = vmatprep.subr.mxu1 %v7873_v52  ;;  %10966 = vst [vmem:[#allocation36_spill] sm:$0xff] %v7879_v45  ;;  %10967 = vst [vmem:[#allocation31_spill] sm:$0xff] %v7885_v48  ;;  %v7893_v52 = vld [vmem:[%s10362_s2 + $0x68] sm:$0xff] }
 0x358   :  { %1635 = vmatpush1.msra.mxu0 %v7879_v45  ;;  %1706 = vmatpush1.msra.mxu1 %v7885_v48  ;;  %10968 = vst [vmem:[#allocation38_spill] sm:$0xff] %v7893_v52  ;;  %v7899_v45 = vld [vmem:[%s10362_s2 + $0x78] sm:$0xff] }
 0x359   :  { %1668 = vmatprep.mubr.f32.mxu0 %v10810_v55  ;;  %1739 = vmatprep.mubr.f32.mxu1 %v10810_v55  ;;  %10969 = vst [vmem:[#allocation33_spill] sm:$0xff] %v7899_v45 }
 0x35a   :  { %1773 = vmatprep.subr.mxu0 %v7893_v52  ;;  %1844 = vmatprep.subr.mxu1 %v7899_v45 }
 0x3ef   :  { %v1342_v25 = vpop.f32.mrf.mxu0  ;;  %v1413_v48 = vpop.f32.mrf.mxu1 }
 0x3f1   :  { %v1344_v56 = vpop.f32.mrf.mxu0  ;;  %v1415_v30 = vpop.f32.mrf.mxu1 }
 0x3f8   :  { %v1487_v40 = vpop.f32.mrf.mxu0  ;;  %v1558_v34 = vpop.f32.mrf.mxu1 }
 0x3f9   :  { %v1488_v23 = vadd.f32 %v1487_v40, %v1342_v25  ;;  %v1559_v33 = vadd.f32 %v1558_v34, %v1413_v48  ;;  %v7907_v48 = vpop.permute.xlu1 %1594 }
 0x3fa   :  { %v1489_v59 = vpop.f32.mrf.mxu0  ;;  %v1560_v27 = vpop.f32.mrf.mxu1  ;;  %10970 = vst [vmem:[#allocation40_spill] sm:$0xff] %v7907_v48  ;;  %vm1596_vm12 = vcmp.eq.s32.totalorder %v7907_v48, 1  ;;  %v10976_v48 = vld [vmem:[#allocation16_spill] sm:$0xff] }
 0x3fb   :  { %v1563_v49 = vadd.f32 %v1488_v23, %v7208_v62  ;;  %v1490_v51 = vadd.f32 %v1489_v59, %v1344_v56  ;;  %v1561_v35 = vadd.f32 %v1560_v27, %v1415_v30  ;;  %v1565_v25 = vadd.f32 %v1559_v33, %v7225_v43  ;;  %v7942_v56 = vld [vmem:[%s10362_s2 + $0x48] sm:$0xff] }
 0x3fd   :  { %v5828_v36 = vmul.f32 -1.442695, %v1563_v49  ;;  %v1564_v52 = vadd.f32 %v1490_v51, %v10880_v32  ;;  %v1566_v45 = vadd.f32 %v1561_v35, %v7219_v61 }
 0x3ff   :  { %6179 = vpow2.f32 %v5828_v36  ;;  %v5829_v29 = vmul.f32 -1.442695, %v1564_v52  ;;  %v5830_v31 = vmul.f32 -1.442695, %v1566_v45  ;;  %v7948_v52 = vld [vmem:[%s10362_s2 + $0x58] sm:$0xff] }
 0x401   :  { %6181 = vpow2.f32 %v5829_v29 }
 0x402   :  { %6183 = vpow2.f32 %v5830_v31 }
 0x40c   :  { %v6180_v38 = vpop.eup %6179 }
 0x40d   :  { %v1570_v40 = vadd.f32 1.0, %v6180_v38 }
 0x40e   :  { %v6182_v42 = vpop.eup %6181 }
 0x40f   :  { %6185 = vrcp.f32 %v1570_v40  ;;  %v1576_v59 = vadd.f32 1.0, %v6182_v42  ;;  %v6184_v51 = vpop.eup %6183  ;;  %v7960_v40 = vld [vmem:[%s10362_s2 + $0x50] sm:$0xff] }
 0x410   :  { %6187 = vtanh.f32 %v1565_v25  ;;  %v1583_v29 = vadd.f32 1.0, %v6184_v51  ;;  %v7954_v25 = vld [vmem:[%s10362_s2 + $0x40] sm:$0xff]  ;;  %v7972_v51 = vld [vmem:[%s10362_s2 + $0x38] sm:$0xff] }
 0x411   :  { %6189 = vrcp.f32 %v1576_v59  ;;  %v7966_v59 = vld [vmem:[%s10362_s2 + $0x28] sm:$0xff] }
 0x412   :  { %6191 = vrcp.f32 %v1583_v29  ;;  %v7996_v29 = vld [vmem:[%s10362_s2 + $0x18] sm:$0xff] }
 0x41c   :  { %v6186_v36 = vpop.eup %6185 }
 0x41d   :  { %v6188_v49 = vpop.eup %6187 }
 0x41e   :  { %v6190_v23 = vpop.eup %6189  ;;  %v1587_v27 = vmul.f32 %v6188_v49, %v6186_v36  ;;  %v7978_v36 = vld [vmem:[%s10362_s2 + $0x20] sm:$0xff]  ;;  %v7984_v49 = vld [vmem:[%s10362_s2 + $0x30] sm:$0xff] }
 0x41f   :  { %v1586_v35 = vmul.f32 %v6190_v23, %v7469_v28  ;;  %v6192_v38 = vpop.eup %6191  ;;  %v7990_v23 = vld [vmem:[%s10362_s2 + $0x8] sm:$0xff] }
 0x421   :  { %v1588_v45 = vadd.f32 %v1587_v27, %v1586_v35  ;;  %v5832_v27 = vld [vmem:[%s10364_s1 + $0x20] sm:$0xff] }
 0x422   :  { %v8005_v35 = vld [vmem:[%s10362_s2] sm:$0xff] }
 0x423   :  { %6193 = vtanh.f32 %v1588_v45  ;;  %v7913_v42 = vsel %vm1596_vm12, %v1588_v45, %v7469_v28  ;;  %v7930_v28 = vld [vmem:[%s10362_s2 + $0x60] sm:$0xff]  ;;  %v8012_v45 = vld [vmem:[%s10362_s2 + $0x10] sm:$0xff] }
 0x430   :  { %v6194_v31 = vpop.eup %6193 }
 0x431   :  { %v1590_v33 = vmul.f32 %v6194_v31, %v6192_v38  ;;  %v10971_v38 = vld [vmem:[#allocation5_spill] sm:$0xff]  ;;  %v10972_v31 = vld [vmem:[#allocation12_spill] sm:$0xff] }
 0x433   :  { %v1597_v34 = vsel %vm1596_vm12, %v1590_v33, 0.0  ;;  %v7920_v30 = vsel %vm1596_vm12, %v1590_v33, %v7476_v44  ;;  %v7936_v44 = vld [vmem:[%s10362_s2 + $0x70] sm:$0xff]  ;;  %v10973_v33 = vld [vmem:[#allocation7_spill] sm:$0xff] }
 0x434   :  { %5831 = vst [vmem:[%s10366_s12 + $0x30] sm:$0xff] %v1597_v34  ;;  %1669 = vmatmul.mubr.f32.vlgmr.msra.gmra.mxu0 %v7920_v30  ;;  %1740 = vmatmul.mubr.f32.vlgmr.msra.gmra.mxu1 %v7920_v30  ;;  %v10974_v34 = vld [vmem:[#allocation14_spill] sm:$0xff] }
 0x435   :  { %1774 = vmatpush1.msra.mxu0 %v7930_v28  ;;  %1845 = vmatpush1.msra.mxu1 %v7936_v44 }
 0x436   :  { %1775 = vmatprep.subr.mxu0 %v7942_v56  ;;  %1846 = vmatprep.subr.mxu1 %v7948_v52 }
 0x437   :  { %1776 = vmatpush1.msra.mxu0 %v7954_v25  ;;  %1847 = vmatpush1.msra.mxu1 %v7960_v40 }
 0x438   :  { %1777 = vmatprep.subr.mxu0 %v7966_v59  ;;  %1848 = vmatprep.subr.mxu1 %v7972_v51 }
 0x439   :  { %1778 = vmatpush1.msra.mxu0 %v7978_v36  ;;  %1849 = vmatpush1.msra.mxu1 %v7984_v49 }
 0x43a   :  { %1779 = vmatprep.subr.mxu0 %v7990_v23  ;;  %1850 = vmatprep.subr.mxu1 %v7996_v29 }
 0x43b   :  { %1780 = vmatpush1.msra.mxu0 %v8005_v35  ;;  %1813 = vmatprep.mubr.f32.mxu0 %v10810_v55 }
 0x43c   :  { %1851 = vmatpush1.msra.mxu1 %v8012_v45  ;;  %1884 = vmatprep.mubr.f32.mxu1 %v10810_v55 }
 0x43d   :  { %5833 = vmatmul.mubr.msk.f32.vlgmr.msra.gmra.mxu0 %vm414_vm1, %v5832_v27  ;;  %5834 = vmatmul.mubr.msk.f32.vlgmr.msra.gmra.mxu1 %vm414_vm1, %v5832_v27  ;;  %v10975_v27 = vld [vmem:[#allocation9_spill] sm:$0xff] }
 0x43e   :  { %1932 = vmatprep.subr.mxu0 %v7507_v3  ;;  %2003 = vmatprep.subr.mxu1 %v7513_v5 }
 0x43f   :  { %1933 = vmatpush1.msra.mxu0 %v7519_v53  ;;  %2004 = vmatpush1.msra.mxu1 %v7525_v57 }
 0x440   :  { %1934 = vmatprep.subr.mxu0 %v7531_v60  ;;  %2005 = vmatprep.subr.mxu1 %v7537_v63 }
 0x441   :  { %1935 = vmatpush1.msra.mxu0 %v7543_v41  ;;  %2006 = vmatpush1.msra.mxu1 %v7549_v46 }
 0x442   :  { %1936 = vmatprep.subr.mxu0 %v7555_v54  ;;  %2007 = vmatprep.subr.mxu1 %v7561_v37 }
 0x443   :  { %1937 = vmatpush1.msra.mxu0 %v7567_v50  ;;  %2008 = vmatpush1.msra.mxu1 %v7573_v47 }
 0x444   :  { %1938 = vmatprep.subr.mxu0 %v7579_v58  ;;  %2009 = vmatprep.subr.mxu1 %v7585_v21 }
 0x445   :  { %1939 = vmatpush1.msra.mxu0 %v7591_v39  ;;  %2010 = vmatpush1.msra.mxu1 %v7597_v0 }
 0x446   :  { %1940 = vmatprep.subr.mxu0 %v7603_v1  ;;  %2011 = vmatprep.subr.mxu1 %v7609_v2 }
 0x447   :  { %1941 = vmatpush1.msra.mxu0 %v7615_v4  ;;  %2012 = vmatpush1.msra.mxu1 %v7621_v6 }
 0x448   :  { %1942 = vmatprep.subr.mxu0 %v7627_v7  ;;  %2013 = vmatprep.subr.mxu1 %v7633_v8 }
 0x449   :  { %1943 = vmatpush1.msra.mxu0 %v7639_v9  ;;  %2014 = vmatpush1.msra.mxu1 %v7645_v10 }
 0x44a   :  { %1944 = vmatprep.subr.mxu0 %v7651_v11  ;;  %2015 = vmatprep.subr.mxu1 %v7657_v12 }
 0x44b   :  { %1945 = vmatpush1.msra.mxu0 %v7663_v13  ;;  %2016 = vmatpush1.msra.mxu1 %v7669_v14 }
 0x44c   :  { %1946 = vmatprep.subr.mxu0 %v7675_v15  ;;  %2017 = vmatprep.subr.mxu1 %v7681_v16 }
 0x44d   :  { %1947 = vmatpush1.msra.mxu0 %v7687_v17  ;;  %2018 = vmatpush1.msra.mxu1 %v7693_v18 }
 0x44e   :  { %1948 = vmatprep.subr.mxu0 %v7699_v19  ;;  %2019 = vmatprep.subr.mxu1 %v7705_v20  ;;  %v10977_v19 = vld [vmem:[#allocation11_spill] sm:$0xff]  ;;  %v10978_v20 = vld [vmem:[#allocation18_spill] sm:$0xff] }
 0x44f   :  { %1949 = vmatpush1.msra.mxu0 %v7711_v22  ;;  %2020 = vmatpush1.msra.mxu1 %v7717_v24  ;;  %v10979_v22 = vld [vmem:[#allocation13_spill] sm:$0xff]  ;;  %v10980_v24 = vld [vmem:[#allocation20_spill] sm:$0xff] }
 0x450   :  { %1950 = vmatprep.subr.mxu0 %v7723_v26  ;;  %2021 = vmatprep.subr.mxu1 %v10971_v38  ;;  %v10981_v26 = vld [vmem:[#allocation15_spill] sm:$0xff]  ;;  %v10982_v38 = vld [vmem:[#allocation22_spill] sm:$0xff] }
 0x451   :  { %1951 = vmatpush1.msra.mxu0 %v10972_v31  ;;  %2022 = vmatpush1.msra.mxu1 %v10973_v33  ;;  %v10983_v31 = vld [vmem:[#allocation17_spill] sm:$0xff]  ;;  %v10984_v33 = vld [vmem:[#allocation24_spill] sm:$0xff] }
 0x452   :  { %1952 = vmatprep.subr.mxu0 %v10974_v34  ;;  %2023 = vmatprep.subr.mxu1 %v10975_v27  ;;  %v10985_v34 = vld [vmem:[#allocation19_spill] sm:$0xff]  ;;  %v10986_v27 = vld [vmem:[#allocation26_spill] sm:$0xff] }
 0x453   :  { %1953 = vmatpush1.msra.mxu0 %v10976_v48  ;;  %2024 = vmatpush1.msra.mxu1 %v10977_v19  ;;  %v10987_v48 = vld [vmem:[#allocation21_spill] sm:$0xff]  ;;  %v10988_v19 = vld [vmem:[#allocation28_spill] sm:$0xff] }
 0x454   :  { %1954 = vmatprep.subr.mxu0 %v10978_v20  ;;  %2025 = vmatprep.subr.mxu1 %v10979_v22  ;;  %v10989_v20 = vld [vmem:[#allocation23_spill] sm:$0xff]  ;;  %v10990_v22 = vld [vmem:[#allocation30_spill] sm:$0xff] }
 0x455   :  { %1955 = vmatpush1.msra.mxu0 %v10980_v24  ;;  %2026 = vmatpush1.msra.mxu1 %v10981_v26  ;;  %v10991_v24 = vld [vmem:[#allocation25_spill] sm:$0xff]  ;;  %v10992_v26 = vld [vmem:[#allocation32_spill] sm:$0xff] }
 0x456   :  { %1956 = vmatprep.subr.mxu0 %v10982_v38  ;;  %2027 = vmatprep.subr.mxu1 %v10983_v31  ;;  %v10993_v38 = vld [vmem:[#allocation27_spill] sm:$0xff]  ;;  %v10994_v31 = vld [vmem:[#allocation34_spill] sm:$0xff] }
 0x457   :  { %1957 = vmatpush1.msra.mxu0 %v10984_v33  ;;  %2028 = vmatpush1.msra.mxu1 %v10985_v34  ;;  %v10995_v33 = vld [vmem:[#allocation29_spill] sm:$0xff]  ;;  %v10996_v34 = vld [vmem:[#allocation36_spill] sm:$0xff] }
 0x458   :  { %1958 = vmatprep.subr.mxu0 %v10986_v27  ;;  %2029 = vmatprep.subr.mxu1 %v10987_v48  ;;  %v10997_v27 = vld [vmem:[#allocation31_spill] sm:$0xff] }
 0x459   :  { %1959 = vmatpush1.msra.mxu0 %v10988_v19  ;;  %2030 = vmatpush1.msra.mxu1 %v10989_v20  ;;  %v10998_v20 = vld [vmem:[#allocation38_spill] sm:$0xff] }
 0x45a   :  { %1960 = vmatprep.subr.mxu0 %v10990_v22  ;;  %2031 = vmatprep.subr.mxu1 %v10991_v24  ;;  %v10999_v22 = vld [vmem:[#allocation33_spill] sm:$0xff] }
 0x45b   :  { %1961 = vmatpush1.msra.mxu0 %v10992_v26  ;;  %2032 = vmatpush1.msra.mxu1 %v10993_v38 }
 0x45c   :  { %1962 = vmatprep.subr.mxu0 %v10994_v31  ;;  %2033 = vmatprep.subr.mxu1 %v10995_v33 }
 0x45d   :  { %1963 = vmatpush1.msra.mxu0 %v10996_v34  ;;  %2034 = vmatpush1.msra.mxu1 %v10997_v27 }
 0x45e   :  { %1996 = vmatprep.mubr.f32.mxu0 %v10810_v55  ;;  %2067 = vmatprep.mubr.f32.mxu1 %v10810_v55 }
 0x45f   :  { %2101 = vmatprep.subr.mxu0 %v10998_v20  ;;  %2172 = vmatprep.subr.mxu1 %v10999_v22 }
 0x4f4   :  { %v1670_v24 = vpop.f32.mrf.mxu0  ;;  %v1741_v26 = vpop.f32.mrf.mxu1 }
 0x4f6   :  { %v1672_v19 = vpop.f32.mrf.mxu0  ;;  %v1743_v48 = vpop.f32.mrf.mxu1 }
 0x4fd   :  { %v1815_v38 = vpop.f32.mrf.mxu0  ;;  %v1886_v34 = vpop.f32.mrf.mxu1 }
 0x4fe   :  { %v1816_v31 = vadd.f32 %v1815_v38, %v1670_v24  ;;  %v1887_v13 = vadd.f32 %v1886_v34, %v1741_v26  ;;  %v8091_v26 = vpop.permute.xlu0 %1922  ;;  %v11002_v34 = vld [vmem:[#allocation55_spill] sm:$0xff] }
 0x4ff   :  { %v1817_v18 = vpop.f32.mrf.mxu0  ;;  %v1888_v14 = vpop.f32.mrf.mxu1  ;;  %11000 = vst [vmem:[#allocation35_spill] sm:$0xff] %v8091_v26  ;;  %vm1924_vm13 = vcmp.eq.s32.totalorder %v8091_v26, 1  ;;  %v11020_v26 = vld [vmem:[#allocation16_spill] sm:$0xff] }
 0x500   :  { %v1891_v33 = vadd.f32 %v1816_v31, %v7208_v62  ;;  %v1818_v17 = vadd.f32 %v1817_v18, %v1672_v19  ;;  %v1889_v20 = vadd.f32 %v1888_v14, %v1743_v48  ;;  %v1893_v24 = vadd.f32 %v1887_v13, %v7225_v43 }
 0x502   :  { %v5835_v27 = vmul.f32 -1.442695, %v1891_v33  ;;  %v1892_v16 = vadd.f32 %v1818_v17, %v10880_v32  ;;  %v1894_v22 = vadd.f32 %v1889_v20, %v7219_v61 }
 0x504   :  { %6195 = vpow2.f32 %v5835_v27  ;;  %v5836_v15 = vmul.f32 -1.442695, %v1892_v16  ;;  %v5837_v12 = vmul.f32 -1.442695, %v1894_v22  ;;  %v11003_v27 = vld [vmem:[#allocation46_spill] sm:$0xff] }
 0x506   :  { %6197 = vpow2.f32 %v5836_v15 }
 0x507   :  { %6199 = vpow2.f32 %v5837_v12 }
 0x511   :  { %v6196_v11 = vpop.eup %6195 }
 0x512   :  { %v1898_v38 = vadd.f32 1.0, %v6196_v11 }
 0x513   :  { %v6198_v10 = vpop.eup %6197 }
 0x514   :  { %6201 = vrcp.f32 %v1898_v38  ;;  %v1904_v18 = vadd.f32 1.0, %v6198_v10  ;;  %v6200_v17 = vpop.eup %6199  ;;  %v11005_v38 = vld [vmem:[#allocation50_spill] sm:$0xff] }
 0x515   :  { %6203 = vtanh.f32 %v1893_v24  ;;  %v1911_v15 = vadd.f32 1.0, %v6200_v17  ;;  %v11004_v24 = vld [vmem:[#allocation47_spill] sm:$0xff]  ;;  %v11007_v17 = vld [vmem:[#allocation53_spill] sm:$0xff] }
 0x516   :  { %6205 = vrcp.f32 %v1904_v18  ;;  %v11006_v18 = vld [vmem:[#allocation52_spill] sm:$0xff] }
 0x517   :  { %6207 = vrcp.f32 %v1911_v15  ;;  %v11011_v15 = vld [vmem:[#allocation3_spill] sm:$0xff] }
 0x521   :  { %v6202_v19 = vpop.eup %6201 }
 0x522   :  { %v6204_v16 = vpop.eup %6203 }
 0x523   :  { %v6206_v31 = vpop.eup %6205  ;;  %v1915_v14 = vmul.f32 %v6204_v16, %v6202_v19  ;;  %v11008_v19 = vld [vmem:[#allocation49_spill] sm:$0xff]  ;;  %v11009_v16 = vld [vmem:[#allocation2_spill] sm:$0xff] }
 0x524   :  { %v1914_v20 = vmul.f32 %v6206_v31, %v7913_v42  ;;  %v6208_v11 = vpop.eup %6207  ;;  %v11010_v31 = vld [vmem:[#allocation6_spill] sm:$0xff] }
 0x526   :  { %v1916_v22 = vadd.f32 %v1915_v14, %v1914_v20  ;;  %v11012_v14 = vld [vmem:[#allocation8_spill] sm:$0xff] }
 0x527   :  { %v11013_v20 = vld [vmem:[#allocation4_spill] sm:$0xff] }
 0x528   :  { %6209 = vtanh.f32 %v1916_v22  ;;  %v8097_v10 = vsel %vm1924_vm13, %v1916_v22, %v7913_v42  ;;  %v5839_v42 = vld [vmem:[%s10364_s1 + $0x28] sm:$0xff]  ;;  %v11014_v22 = vld [vmem:[#allocation10_spill] sm:$0xff] }
 0x535   :  { %v6210_v12 = vpop.eup %6209 }
 0x536   :  { %v1918_v13 = vmul.f32 %v6210_v12, %v6208_v11  ;;  %v11015_v11 = vld [vmem:[#allocation5_spill] sm:$0xff]  ;;  %v11016_v12 = vld [vmem:[#allocation12_spill] sm:$0xff] }
 0x538   :  { %v1925_v48 = vsel %vm1924_vm13, %v1918_v13, 0.0  ;;  %v8104_v33 = vsel %vm1924_vm13, %v1918_v13, %v7920_v30  ;;  %v11001_v30 = vld [vmem:[#allocation44_spill] sm:$0xff]  ;;  %v11017_v13 = vld [vmem:[#allocation7_spill] sm:$0xff] }
 0x539   :  { %5838 = vst [vmem:[%s10366_s12 + $0x40] sm:$0xff] %v1925_v48  ;;  %1997 = vmatmul.mubr.f32.vlgmr.msra.gmra.mxu0 %v8104_v33  ;;  %2068 = vmatmul.mubr.f32.vlgmr.msra.gmra.mxu1 %v8104_v33  ;;  %v11018_v48 = vld [vmem:[#allocation14_spill] sm:$0xff] }
 0x53a   :  { %2102 = vmatpush1.msra.mxu0 %v7930_v28  ;;  %2173 = vmatpush1.msra.mxu1 %v7936_v44 }
 0x53b   :  { %2103 = vmatprep.subr.mxu0 %v7942_v56  ;;  %2174 = vmatprep.subr.mxu1 %v7948_v52 }
 0x53c   :  { %2104 = vmatpush1.msra.mxu0 %v7954_v25  ;;  %2175 = vmatpush1.msra.mxu1 %v7960_v40 }
 0x53d   :  { %2105 = vmatprep.subr.mxu0 %v7966_v59  ;;  %2176 = vmatprep.subr.mxu1 %v7972_v51 }
 0x53e   :  { %2106 = vmatpush1.msra.mxu0 %v7978_v36  ;;  %2177 = vmatpush1.msra.mxu1 %v7984_v49 }
 0x53f   :  { %2107 = vmatprep.subr.mxu0 %v7990_v23  ;;  %2178 = vmatprep.subr.mxu1 %v7996_v29 }
 0x540   :  { %2108 = vmatpush1.msra.mxu0 %v8005_v35  ;;  %2141 = vmatprep.mubr.f32.mxu0 %v10810_v55 }
 0x541   :  { %2179 = vmatpush1.msra.mxu1 %v8012_v45  ;;  %2212 = vmatprep.mubr.f32.mxu1 %v10810_v55 }
 0x542   :  { %5840 = vmatmul.mubr.msk.f32.vlgmr.msra.gmra.mxu0 %vm414_vm1, %v5839_v42  ;;  %5841 = vmatmul.mubr.msk.f32.vlgmr.msra.gmra.mxu1 %vm414_vm1, %v5839_v42  ;;  %v11019_v42 = vld [vmem:[#allocation9_spill] sm:$0xff] }
 0x543   :  { %2260 = vmatprep.subr.mxu0 %v7507_v3  ;;  %2331 = vmatprep.subr.mxu1 %v7513_v5 }
 0x544   :  { %2261 = vmatpush1.msra.mxu0 %v7519_v53  ;;  %2332 = vmatpush1.msra.mxu1 %v7525_v57 }
 0x545   :  { %2262 = vmatprep.subr.mxu0 %v7531_v60  ;;  %2333 = vmatprep.subr.mxu1 %v7537_v63 }
 0x546   :  { %2263 = vmatpush1.msra.mxu0 %v7543_v41  ;;  %2334 = vmatpush1.msra.mxu1 %v7549_v46 }
 0x547   :  { %2264 = vmatprep.subr.mxu0 %v7555_v54  ;;  %2335 = vmatprep.subr.mxu1 %v7561_v37 }
 0x548   :  { %2265 = vmatpush1.msra.mxu0 %v7567_v50  ;;  %2336 = vmatpush1.msra.mxu1 %v7573_v47 }
 0x549   :  { %2266 = vmatprep.subr.mxu0 %v7579_v58  ;;  %2337 = vmatprep.subr.mxu1 %v7585_v21 }
 0x54a   :  { %2267 = vmatpush1.msra.mxu0 %v7591_v39  ;;  %2338 = vmatpush1.msra.mxu1 %v7597_v0 }
 0x54b   :  { %2268 = vmatprep.subr.mxu0 %v7603_v1  ;;  %2339 = vmatprep.subr.mxu1 %v7609_v2 }
 0x54c   :  { %2269 = vmatpush1.msra.mxu0 %v7615_v4  ;;  %2340 = vmatpush1.msra.mxu1 %v7621_v6 }
 0x54d   :  { %2270 = vmatprep.subr.mxu0 %v7627_v7  ;;  %2341 = vmatprep.subr.mxu1 %v7633_v8 }
 0x54e   :  { %2271 = vmatpush1.msra.mxu0 %v7639_v9  ;;  %2342 = vmatpush1.msra.mxu1 %v11001_v30 }
 0x54f   :  { %2272 = vmatprep.subr.mxu0 %v11002_v34  ;;  %2343 = vmatprep.subr.mxu1 %v11003_v27 }
 0x550   :  { %2273 = vmatpush1.msra.mxu0 %v11004_v24  ;;  %2344 = vmatpush1.msra.mxu1 %v11005_v38 }
 0x551   :  { %2274 = vmatprep.subr.mxu0 %v11006_v18  ;;  %2345 = vmatprep.subr.mxu1 %v11007_v17 }
 0x552   :  { %2275 = vmatpush1.msra.mxu0 %v11008_v19  ;;  %2346 = vmatpush1.msra.mxu1 %v11009_v16 }
 0x553   :  { %2276 = vmatprep.subr.mxu0 %v11010_v31  ;;  %2347 = vmatprep.subr.mxu1 %v11011_v15  ;;  %v11021_v31 = vld [vmem:[#allocation11_spill] sm:$0xff]  ;;  %v11022_v15 = vld [vmem:[#allocation18_spill] sm:$0xff] }
 0x554   :  { %2277 = vmatpush1.msra.mxu0 %v11012_v14  ;;  %2348 = vmatpush1.msra.mxu1 %v11013_v20  ;;  %v11023_v14 = vld [vmem:[#allocation13_spill] sm:$0xff]  ;;  %v11024_v20 = vld [vmem:[#allocation20_spill] sm:$0xff] }
 0x555   :  { %2278 = vmatprep.subr.mxu0 %v11014_v22  ;;  %2349 = vmatprep.subr.mxu1 %v11015_v11  ;;  %v11025_v22 = vld [vmem:[#allocation15_spill] sm:$0xff]  ;;  %v11026_v11 = vld [vmem:[#allocation22_spill] sm:$0xff] }
 0x556   :  { %2279 = vmatpush1.msra.mxu0 %v11016_v12  ;;  %2350 = vmatpush1.msra.mxu1 %v11017_v13  ;;  %v11027_v12 = vld [vmem:[#allocation17_spill] sm:$0xff]  ;;  %v11028_v13 = vld [vmem:[#allocation24_spill] sm:$0xff] }
 0x557   :  { %2280 = vmatprep.subr.mxu0 %v11018_v48  ;;  %2351 = vmatprep.subr.mxu1 %v11019_v42  ;;  %v11029_v48 = vld [vmem:[#allocation19_spill] sm:$0xff]  ;;  %v11030_v42 = vld [vmem:[#allocation26_spill] sm:$0xff] }
 0x558   :  { %2281 = vmatpush1.msra.mxu0 %v11020_v26  ;;  %2352 = vmatpush1.msra.mxu1 %v11021_v31  ;;  %v11031_v26 = vld [vmem:[#allocation21_spill] sm:$0xff]  ;;  %v11032_v31 = vld [vmem:[#allocation28_spill] sm:$0xff] }
 0x559   :  { %2282 = vmatprep.subr.mxu0 %v11022_v15  ;;  %2353 = vmatprep.subr.mxu1 %v11023_v14  ;;  %v11033_v15 = vld [vmem:[#allocation23_spill] sm:$0xff]  ;;  %v11034_v14 = vld [vmem:[#allocation30_spill] sm:$0xff] }
 0x55a   :  { %2283 = vmatpush1.msra.mxu0 %v11024_v20  ;;  %2354 = vmatpush1.msra.mxu1 %v11025_v22  ;;  %v11035_v20 = vld [vmem:[#allocation25_spill] sm:$0xff]  ;;  %v11036_v22 = vld [vmem:[#allocation32_spill] sm:$0xff] }
 0x55b   :  { %2284 = vmatprep.subr.mxu0 %v11026_v11  ;;  %2355 = vmatprep.subr.mxu1 %v11027_v12  ;;  %v11037_v11 = vld [vmem:[#allocation27_spill] sm:$0xff]  ;;  %v11038_v12 = vld [vmem:[#allocation34_spill] sm:$0xff] }
 0x55c   :  { %2285 = vmatpush1.msra.mxu0 %v11028_v13  ;;  %2356 = vmatpush1.msra.mxu1 %v11029_v48  ;;  %v11039_v13 = vld [vmem:[#allocation29_spill] sm:$0xff]  ;;  %v11040_v48 = vld [vmem:[#allocation36_spill] sm:$0xff] }
 0x55d   :  { %2286 = vmatprep.subr.mxu0 %v11030_v42  ;;  %2357 = vmatprep.subr.mxu1 %v11031_v26  ;;  %v11041_v42 = vld [vmem:[#allocation31_spill] sm:$0xff] }
 0x55e   :  { %2287 = vmatpush1.msra.mxu0 %v11032_v31  ;;  %2358 = vmatpush1.msra.mxu1 %v11033_v15  ;;  %v11042_v15 = vld [vmem:[#allocation38_spill] sm:$0xff] }
 0x55f   :  { %2288 = vmatprep.subr.mxu0 %v11034_v14  ;;  %2359 = vmatprep.subr.mxu1 %v11035_v20  ;;  %v11043_v14 = vld [vmem:[#allocation33_spill] sm:$0xff] }
 0x560   :  { %2289 = vmatpush1.msra.mxu0 %v11036_v22  ;;  %2360 = vmatpush1.msra.mxu1 %v11037_v11 }
 0x561   :  { %2290 = vmatprep.subr.mxu0 %v11038_v12  ;;  %2361 = vmatprep.subr.mxu1 %v11039_v13 }
 0x562   :  { %2291 = vmatpush1.msra.mxu0 %v11040_v48  ;;  %2362 = vmatpush1.msra.mxu1 %v11041_v42 }
 0x563   :  { %2324 = vmatprep.mubr.f32.mxu0 %v10810_v55  ;;  %2395 = vmatprep.mubr.f32.mxu1 %v10810_v55 }
 0x564   :  { %2429 = vmatprep.subr.mxu0 %v11042_v15  ;;  %2500 = vmatprep.subr.mxu1 %v11043_v14 }
 0x5f9   :  { %v1998_v20 = vpop.f32.mrf.mxu0  ;;  %v2069_v22 = vpop.f32.mrf.mxu1 }
 0x5fb   :  { %v2000_v31 = vpop.f32.mrf.mxu0  ;;  %v2071_v26 = vpop.f32.mrf.mxu1 }
 0x602   :  { %v2143_v11 = vpop.f32.mrf.mxu0  ;;  %v2214_v48 = vpop.f32.mrf.mxu1 }
 0x603   :  { %v2144_v12 = vadd.f32 %v2143_v11, %v1998_v20  ;;  %v2215_v24 = vadd.f32 %v2214_v48, %v2069_v22  ;;  %v11070_v48 = vld [vmem:[#allocation15_spill] sm:$0xff] }
 0x604   :  { %v2145_v16 = vpop.f32.mrf.mxu0  ;;  %v2216_v38 = vpop.f32.mrf.mxu1 }
 0x605   :  { %v2219_v13 = vadd.f32 %v2144_v12, %v7208_v62  ;;  %v2146_v19 = vadd.f32 %v2145_v16, %v2000_v31  ;;  %v2217_v15 = vadd.f32 %v2216_v38, %v2071_v26  ;;  %v2221_v20 = vadd.f32 %v2215_v24, %v7225_v43 }
 0x607   :  { %v5842_v42 = vmul.f32 -1.442695, %v2219_v13  ;;  %v2220_v17 = vadd.f32 %v2146_v19, %v10880_v32  ;;  %v2222_v14 = vadd.f32 %v2217_v15, %v7219_v61  ;;  %v8205_v15 = vpop.permute.xlu1 %2250 }
 0x608   :  { %11044 = vst [vmem:[#allocation43_spill] sm:$0xff] %v8205_v15  ;;  %vm2252_vm14 = vcmp.eq.s32.totalorder %v8205_v15, 1  ;;  %v8685_v15 = vld [vmem:[%s10367_s6 + $0x40] sm:$0xff] }
 0x609   :  { %6211 = vpow2.f32 %v5842_v42  ;;  %v5843_v18 = vmul.f32 -1.442695, %v2220_v17  ;;  %v5844_v27 = vmul.f32 -1.442695, %v2222_v14  ;;  %v11071_v42 = vld [vmem:[#allocation22_spill] sm:$0xff] }
 0x60b   :  { %6213 = vpow2.f32 %v5843_v18 }
 0x60c   :  { %6215 = vpow2.f32 %v5844_v27 }
 0x616   :  { %v6212_v34 = vpop.eup %6211 }
 0x617   :  { %v2226_v11 = vadd.f32 1.0, %v6212_v34 }
 0x618   :  { %v6214_v30 = vpop.eup %6213 }
 0x619   :  { %6217 = vrcp.f32 %v2226_v11  ;;  %v2232_v16 = vadd.f32 1.0, %v6214_v30  ;;  %v6216_v19 = vpop.eup %6215  ;;  %v11073_v11 = vld [vmem:[#allocation24_spill] sm:$0xff] }
 0x61a   :  { %6219 = vtanh.f32 %v2221_v20  ;;  %v2239_v18 = vadd.f32 1.0, %v6216_v19  ;;  %v11072_v20 = vld [vmem:[#allocation17_spill] sm:$0xff]  ;;  %v11075_v19 = vld [vmem:[#allocation26_spill] sm:$0xff] }
 0x61b   :  { %6221 = vrcp.f32 %v2232_v16  ;;  %v11074_v16 = vld [vmem:[#allocation19_spill] sm:$0xff] }
 0x61c   :  { %6223 = vrcp.f32 %v2239_v18  ;;  %v11079_v18 = vld [vmem:[#allocation30_spill] sm:$0xff]  ;;  %11122 = vst [vmem:[#allocation19_spill] sm:$0xff] %v8685_v15 }
 0x626   :  { %v6218_v31 = vpop.eup %6217 }
 0x627   :  { %v6220_v17 = vpop.eup %6219 }
 0x628   :  { %v6222_v12 = vpop.eup %6221  ;;  %v2243_v26 = vmul.f32 %v6220_v17, %v6218_v31  ;;  %v11076_v31 = vld [vmem:[#allocation21_spill] sm:$0xff]  ;;  %v11077_v17 = vld [vmem:[#allocation28_spill] sm:$0xff] }
 0x629   :  { %v2242_v38 = vmul.f32 %v6222_v12, %v8097_v10  ;;  %v6224_v34 = vpop.eup %6223  ;;  %v11078_v12 = vld [vmem:[#allocation23_spill] sm:$0xff] }
 0x62b   :  { %v2244_v14 = vadd.f32 %v2243_v26, %v2242_v38  ;;  %v11080_v26 = vld [vmem:[#allocation25_spill] sm:$0xff]  ;;  %v11081_v38 = vld [vmem:[#allocation32_spill] sm:$0xff] }
 0x62d   :  { %6225 = vtanh.f32 %v2244_v14  ;;  %v8211_v30 = vsel %vm2252_vm14, %v2244_v14, %v8097_v10  ;;  %v8240_v10 = vld [vmem:[%s10364_s1 + $0x30] sm:$0xff]  ;;  %v11082_v14 = vld [vmem:[#allocation27_spill] sm:$0xff] }
 0x62e   :  { %11045 = vst [vmem:[#allocation37_spill] sm:$0xff] %v8240_v10 }
 0x63a   :  { %v6226_v27 = vpop.eup %6225 }
 0x63b   :  { %v2246_v24 = vmul.f32 %v6226_v27, %v6224_v34  ;;  %v11083_v34 = vld [vmem:[#allocation34_spill] sm:$0xff]  ;;  %v11084_v27 = vld [vmem:[#allocation29_spill] sm:$0xff] }
 0x63d   :  { %v2253_v22 = vsel %vm2252_vm14, %v2246_v24, 0.0  ;;  %v8218_v13 = vsel %vm2252_vm14, %v2246_v24, %v8104_v33  ;;  %v11069_v33 = vld [vmem:[#allocation20_spill] sm:$0xff] }
 0x63e   :  { %5845 = vst [vmem:[%s10366_s12 + $0x50] sm:$0xff] %v2253_v22  ;;  %2325 = vmatmul.mubr.f32.vlgmr.msra.gmra.mxu0 %v8218_v13  ;;  %2396 = vmatmul.mubr.f32.vlgmr.msra.gmra.mxu1 %v8218_v13  ;;  %v11085_v24 = vld [vmem:[#allocation36_spill] sm:$0xff]  ;;  %v11086_v22 = vld [vmem:[#allocation31_spill] sm:$0xff] }
 0x63f   :  { %2430 = vmatpush1.msra.mxu0 %v7930_v28  ;;  %2501 = vmatpush1.msra.mxu1 %v7936_v44 }
 0x640   :  { %2431 = vmatprep.subr.mxu0 %v7942_v56  ;;  %2502 = vmatprep.subr.mxu1 %v7948_v52 }
 0x641   :  { %2432 = vmatpush1.msra.mxu0 %v7954_v25  ;;  %2503 = vmatpush1.msra.mxu1 %v7960_v40 }
 0x642   :  { %2433 = vmatprep.subr.mxu0 %v7966_v59  ;;  %2504 = vmatprep.subr.mxu1 %v7972_v51 }
 0x643   :  { %2434 = vmatpush1.msra.mxu0 %v7978_v36  ;;  %2505 = vmatpush1.msra.mxu1 %v7984_v49 }
 0x644   :  { %2435 = vmatprep.subr.mxu0 %v7990_v23  ;;  %2506 = vmatprep.subr.mxu1 %v7996_v29 }
 0x645   :  { %2436 = vmatpush1.msra.mxu0 %v8005_v35  ;;  %2469 = vmatprep.mubr.f32.mxu0 %v10810_v55 }
 0x646   :  { %2507 = vmatpush1.msra.mxu1 %v8012_v45  ;;  %2540 = vmatprep.mubr.f32.mxu1 %v10810_v55 }
 0x647   :  { %5847 = vmatmul.mubr.msk.f32.vlgmr.msra.gmra.mxu0 %vm414_vm1, %v8240_v10  ;;  %5848 = vmatmul.mubr.msk.f32.vlgmr.msra.gmra.mxu1 %vm414_vm1, %v8240_v10  ;;  %v8697_v10 = vld [vmem:[%s10367_s6 + $0x28] sm:$0xff] }
 0x648   :  { %2588 = vmatprep.subr.mxu0 %v7507_v3  ;;  %2659 = vmatprep.subr.mxu1 %v7513_v5  ;;  %v11046_v3 = vld [vmem:[#allocation44_spill] sm:$0xff]  ;;  %v11047_v5 = vld [vmem:[#allocation55_spill] sm:$0xff]  ;;  %11124 = vst [vmem:[#allocation21_spill] sm:$0xff] %v8697_v10 }
 0x649   :  { %2589 = vmatpush1.msra.mxu0 %v7519_v53  ;;  %2660 = vmatpush1.msra.mxu1 %v7525_v57  ;;  %v11048_v53 = vld [vmem:[#allocation46_spill] sm:$0xff]  ;;  %v11049_v57 = vld [vmem:[#allocation47_spill] sm:$0xff] }
 0x64a   :  { %2590 = vmatprep.subr.mxu0 %v7531_v60  ;;  %2661 = vmatprep.subr.mxu1 %v7537_v63  ;;  %v11050_v60 = vld [vmem:[#allocation50_spill] sm:$0xff]  ;;  %v11051_v63 = vld [vmem:[#allocation52_spill] sm:$0xff] }
 0x64b   :  { %2591 = vmatpush1.msra.mxu0 %v7543_v41  ;;  %2662 = vmatpush1.msra.mxu1 %v7549_v46  ;;  %v11052_v41 = vld [vmem:[#allocation53_spill] sm:$0xff] }
 0x64c   :  { %2592 = vmatprep.subr.mxu0 %v7555_v54  ;;  %2663 = vmatprep.subr.mxu1 %v7561_v37  ;;  %v11053_v46 = vld [vmem:[#allocation49_spill] sm:$0xff]  ;;  %v11054_v54 = vld [vmem:[#allocation2_spill] sm:$0xff] }
 0x64d   :  { %2593 = vmatpush1.msra.mxu0 %v7567_v50  ;;  %2664 = vmatpush1.msra.mxu1 %v7573_v47  ;;  %v11055_v37 = vld [vmem:[#allocation6_spill] sm:$0xff]  ;;  %v11056_v50 = vld [vmem:[#allocation3_spill] sm:$0xff]  ;;  %v11057_v47 = vld [vmem:[#allocation8_spill] sm:$0xff] }
 0x64e   :  { %2594 = vmatprep.subr.mxu0 %v7579_v58  ;;  %2665 = vmatprep.subr.mxu1 %v7585_v21  ;;  %v11058_v58 = vld [vmem:[#allocation4_spill] sm:$0xff]  ;;  %v11059_v21 = vld [vmem:[#allocation10_spill] sm:$0xff] }
 0x64f   :  { %2595 = vmatpush1.msra.mxu0 %v7591_v39  ;;  %2666 = vmatpush1.msra.mxu1 %v7597_v0  ;;  %v11060_v39 = vld [vmem:[#allocation5_spill] sm:$0xff]  ;;  %v11061_v0 = vld [vmem:[#allocation12_spill] sm:$0xff] }
 0x650   :  { %2596 = vmatprep.subr.mxu0 %v7603_v1  ;;  %2667 = vmatprep.subr.mxu1 %v7609_v2  ;;  %v11062_v1 = vld [vmem:[#allocation7_spill] sm:$0xff]  ;;  %v11063_v2 = vld [vmem:[#allocation14_spill] sm:$0xff] }
 0x651   :  { %2597 = vmatpush1.msra.mxu0 %v7615_v4  ;;  %2668 = vmatpush1.msra.mxu1 %v7621_v6  ;;  %v11064_v4 = vld [vmem:[#allocation9_spill] sm:$0xff]  ;;  %v11065_v6 = vld [vmem:[#allocation16_spill] sm:$0xff] }
 0x652   :  { %2598 = vmatprep.subr.mxu0 %v7627_v7  ;;  %2669 = vmatprep.subr.mxu1 %v7633_v8  ;;  %v11066_v7 = vld [vmem:[#allocation11_spill] sm:$0xff]  ;;  %v11067_v8 = vld [vmem:[#allocation18_spill] sm:$0xff] }
 0x653   :  { %2599 = vmatpush1.msra.mxu0 %v7639_v9  ;;  %2670 = vmatpush1.msra.mxu1 %v11046_v3  ;;  %v11068_v9 = vld [vmem:[#allocation13_spill] sm:$0xff]  ;;  %v11087_v3 = vld [vmem:[#allocation38_spill] sm:$0xff] }
 0x654   :  { %2600 = vmatprep.subr.mxu0 %v11047_v5  ;;  %2671 = vmatprep.subr.mxu1 %v11048_v53  ;;  %v11088_v5 = vld [vmem:[#allocation33_spill] sm:$0xff] }
 0x655   :  { %2601 = vmatpush1.msra.mxu0 %v11049_v57  ;;  %2672 = vmatpush1.msra.mxu1 %v11050_v60 }
 0x656   :  { %2602 = vmatprep.subr.mxu0 %v11051_v63  ;;  %2673 = vmatprep.subr.mxu1 %v11052_v41 }
 0x657   :  { %2603 = vmatpush1.msra.mxu0 %v11053_v46  ;;  %2674 = vmatpush1.msra.mxu1 %v11054_v54 }
 0x658   :  { %2604 = vmatprep.subr.mxu0 %v11055_v37  ;;  %2675 = vmatprep.subr.mxu1 %v11056_v50 }
 0x659   :  { %2605 = vmatpush1.msra.mxu0 %v11057_v47  ;;  %2676 = vmatpush1.msra.mxu1 %v11058_v58 }
 0x65a   :  { %2606 = vmatprep.subr.mxu0 %v11059_v21  ;;  %2677 = vmatprep.subr.mxu1 %v11060_v39 }
 0x65b   :  { %2607 = vmatpush1.msra.mxu0 %v11061_v0  ;;  %2678 = vmatpush1.msra.mxu1 %v11062_v1 }
 0x65c   :  { %2608 = vmatprep.subr.mxu0 %v11063_v2  ;;  %2679 = vmatprep.subr.mxu1 %v11064_v4 }
 0x65d   :  { %2609 = vmatpush1.msra.mxu0 %v11065_v6  ;;  %2680 = vmatpush1.msra.mxu1 %v11066_v7 }
 0x65e   :  { %2610 = vmatprep.subr.mxu0 %v11067_v8  ;;  %2681 = vmatprep.subr.mxu1 %v11068_v9 }
 0x65f   :  { %2611 = vmatpush1.msra.mxu0 %v11069_v33  ;;  %2682 = vmatpush1.msra.mxu1 %v11070_v48 }
 0x660   :  { %2612 = vmatprep.subr.mxu0 %v11071_v42  ;;  %2683 = vmatprep.subr.mxu1 %v11072_v20 }
 0x661   :  { %2613 = vmatpush1.msra.mxu0 %v11073_v11  ;;  %2684 = vmatpush1.msra.mxu1 %v11074_v16 }
 0x662   :  { %2614 = vmatprep.subr.mxu0 %v11075_v19  ;;  %2685 = vmatprep.subr.mxu1 %v11076_v31  ;;  %v8322_v31 = vpop.permute.xlu0 %2578 }
 0x663   :  { %2615 = vmatpush1.msra.mxu0 %v11077_v17  ;;  %2686 = vmatpush1.msra.mxu1 %v11078_v12  ;;  %11089 = vst [vmem:[#allocation45_spill] sm:$0xff] %v8322_v31  ;;  %vm2580_vm15 = vcmp.eq.s32.totalorder %v8322_v31, 1  ;;  %v8691_v31 = vld [vmem:[%s10367_s6 + $0x58] sm:$0xff] }
 0x664   :  { %2616 = vmatprep.subr.mxu0 %v11079_v18  ;;  %2687 = vmatprep.subr.mxu1 %v11080_v26  ;;  %11123 = vst [vmem:[#allocation26_spill] sm:$0xff] %v8691_v31 }
 0x665   :  { %2617 = vmatpush1.msra.mxu0 %v11081_v38  ;;  %2688 = vmatpush1.msra.mxu1 %v11082_v14 }
 0x666   :  { %2618 = vmatprep.subr.mxu0 %v11083_v34  ;;  %2689 = vmatprep.subr.mxu1 %v11084_v27 }
 0x667   :  { %2619 = vmatpush1.msra.mxu0 %v11085_v24  ;;  %2690 = vmatpush1.msra.mxu1 %v11086_v22  ;;  %v8456_v22 = vld [vmem:[%s10367_s6 + $0x190] sm:$0xff] }
 0x668   :  { %2652 = vmatprep.mubr.f32.mxu0 %v10810_v55  ;;  %2723 = vmatprep.mubr.f32.mxu1 %v10810_v55 }
 0x669   :  { %2757 = vmatprep.subr.mxu0 %v11087_v3  ;;  %2828 = vmatprep.subr.mxu1 %v11088_v5  ;;  %v8462_v3 = vld [vmem:[%s10367_s6 + $0x168] sm:$0xff]  ;;  %v8468_v5 = vld [vmem:[%s10367_s6 + $0x178] sm:$0xff] }
 0x6fe   :  { %v2326_v53 = vpop.f32.mrf.mxu0  ;;  %v2397_v57 = vpop.f32.mrf.mxu1 }
 0x700   :  { %v2328_v60 = vpop.f32.mrf.mxu0  ;;  %v2399_v41 = vpop.f32.mrf.mxu1 }
 0x707   :  { %v2471_v63 = vpop.f32.mrf.mxu0  ;;  %v2542_v50 = vpop.f32.mrf.mxu1 }
 0x708   :  { %v2472_v46 = vadd.f32 %v2471_v63, %v2326_v53  ;;  %v2543_v4 = vadd.f32 %v2542_v50, %v2397_v57  ;;  %v8474_v53 = vld [vmem:[%s10367_s6 + $0x160] sm:$0xff]  ;;  %v8480_v57 = vld [vmem:[%s10367_s6 + $0x170] sm:$0xff]  ;;  %v8492_v63 = vld [vmem:[%s10367_s6 + $0x158] sm:$0xff] }
 0x709   :  { %v2473_v54 = vpop.f32.mrf.mxu0  ;;  %v2544_v0 = vpop.f32.mrf.mxu1  ;;  %v8522_v50 = vld [vmem:[%s10367_s6 + $0x120] sm:$0xff] }
 0x70a   :  { %v2547_v37 = vadd.f32 %v2472_v46, %v7208_v62  ;;  %v2474_v47 = vadd.f32 %v2473_v54, %v2328_v60  ;;  %v2545_v1 = vadd.f32 %v2544_v0, %v2399_v41  ;;  %v2549_v8 = vadd.f32 %v2543_v4, %v7225_v43  ;;  %v8486_v60 = vld [vmem:[%s10367_s6 + $0x148] sm:$0xff]  ;;  %v8498_v41 = vld [vmem:[%s10367_s6 + $0x140] sm:$0xff]  ;;  %v8504_v46 = vld [vmem:[%s10367_s6 + $0x150] sm:$0xff]  ;;  %11095 = vst [vmem:[#allocation55_spill] sm:$0xff] %v8522_v50 }
 0x70b   :  { %11092 = vst [vmem:[#allocation41_spill] sm:$0xff] %v8504_v46  ;;  %v8510_v54 = vld [vmem:[%s10367_s6 + $0x128] sm:$0xff]  ;;  %v8552_v0 = vld [vmem:[%s10367_s6 + $0x110] sm:$0xff]  ;;  %v8570_v4 = vld [vmem:[%s10367_s6 + $0xe0] sm:$0xff] }
 0x70c   :  { %v5849_v58 = vmul.f32 -1.442695, %v2547_v37  ;;  %v2548_v21 = vadd.f32 %v2474_v47, %v10880_v32  ;;  %v2550_v2 = vadd.f32 %v2545_v1, %v7219_v61  ;;  %11093 = vst [vmem:[#allocation51_spill] sm:$0xff] %v8510_v54  ;;  %v8516_v37 = vld [vmem:[%s10367_s6 + $0x138] sm:$0xff]  ;;  %v8528_v47 = vld [vmem:[%s10367_s6 + $0x130] sm:$0xff]  ;;  %11100 = vst [vmem:[#allocation53_spill] sm:$0xff] %v8552_v0 }
 0x70d   :  { %11094 = vst [vmem:[#allocation44_spill] sm:$0xff] %v8516_v37  ;;  %11096 = vst [vmem:[#allocation46_spill] sm:$0xff] %v8528_v47  ;;  %v8558_v1 = vld [vmem:[%s10367_s6 + $0xe8] sm:$0xff]  ;;  %v8715_v43 = vld [vmem:[%s10367_s6 + $0x38] sm:$0xff] }
 0x70e   :  { %6227 = vpow2.f32 %v5849_v58  ;;  %v5850_v39 = vmul.f32 -1.442695, %v2548_v21  ;;  %v5851_v6 = vmul.f32 -1.442695, %v2550_v2  ;;  %v8534_v58 = vld [vmem:[%s10367_s6 + $0x108] sm:$0xff]  ;;  %v8540_v21 = vld [vmem:[%s10367_s6 + $0x118] sm:$0xff] }
 0x70f   :  { %11097 = vst [vmem:[#allocation47_spill] sm:$0xff] %v8534_v58  ;;  %11098 = vst [vmem:[#allocation50_spill] sm:$0xff] %v8540_v21  ;;  %v8564_v2 = vld [vmem:[%s10367_s6 + $0xf8] sm:$0xff]  ;;  %v8721_v61 = vld [vmem:[%s10367_s6 + $0x8] sm:$0xff] }
 0x710   :  { %6229 = vpow2.f32 %v5850_v39  ;;  %v8546_v39 = vld [vmem:[%s10367_s6 + $0x100] sm:$0xff]  ;;  %11101 = vst [vmem:[#allocation49_spill] sm:$0xff] %v8558_v1  ;;  %11102 = vst [vmem:[#allocation2_spill] sm:$0xff] %v8564_v2  ;;  %v8727_v32 = vld [vmem:[%s10367_s6 + $0x30] sm:$0xff] }
 0x711   :  { %6231 = vpow2.f32 %v5851_v6  ;;  %11099 = vst [vmem:[#allocation52_spill] sm:$0xff] %v8546_v39  ;;  %11103 = vst [vmem:[#allocation6_spill] sm:$0xff] %v8570_v4  ;;  %v8576_v6 = vld [vmem:[%s10367_s6 + $0xf0] sm:$0xff]  ;;  %v8733_v62 = vld [vmem:[%s10367_s6] sm:$0xff] }
 0x712   :  { %11104 = vst [vmem:[#allocation3_spill] sm:$0xff] %v8576_v6  ;;  %11127 = vst [vmem:[#allocation30_spill] sm:$0xff] %v8715_v43 }
 0x713   :  { %11128 = vst [vmem:[#allocation25_spill] sm:$0xff] %v8721_v61  ;;  %11129 = vst [vmem:[#allocation32_spill] sm:$0xff] %v8727_v32 }
 0x714   :  { %11130 = vst [vmem:[#allocation27_spill] sm:$0xff] %v8733_v62 }
 0x71b   :  { %v6228_v7 = vpop.eup %6227 }
 0x71c   :  { %v2554_v9 = vadd.f32 1.0, %v6228_v7  ;;  %v8582_v7 = vld [vmem:[%s10367_s6 + $0xc8] sm:$0xff] }
 0x71d   :  { %v6230_v33 = vpop.eup %6229  ;;  %11105 = vst [vmem:[#allocation8_spill] sm:$0xff] %v8582_v7 }
 0x71e   :  { %6233 = vrcp.f32 %v2554_v9  ;;  %v2560_v48 = vadd.f32 1.0, %v6230_v33  ;;  %v6232_v42 = vpop.eup %6231  ;;  %v8594_v9 = vld [vmem:[%s10367_s6 + $0xc0] sm:$0xff]  ;;  %v8600_v33 = vld [vmem:[%s10367_s6 + $0xd0] sm:$0xff] }
 0x71f   :  { %6235 = vtanh.f32 %v2549_v8  ;;  %v2567_v19 = vadd.f32 1.0, %v6232_v42  ;;  %v8588_v8 = vld [vmem:[%s10367_s6 + $0xd8] sm:$0xff]  ;;  %11107 = vst [vmem:[#allocation10_spill] sm:$0xff] %v8594_v9  ;;  %11108 = vst [vmem:[#allocation5_spill] sm:$0xff] %v8600_v33 }
 0x720   :  { %6237 = vrcp.f32 %v2560_v48  ;;  %11106 = vst [vmem:[#allocation4_spill] sm:$0xff] %v8588_v8  ;;  %v8606_v48 = vld [vmem:[%s10367_s6 + $0xa8] sm:$0xff]  ;;  %v8612_v42 = vld [vmem:[%s10367_s6 + $0xb8] sm:$0xff] }
 0x721   :  { %6239 = vrcp.f32 %v2567_v19  ;;  %11109 = vst [vmem:[#allocation12_spill] sm:$0xff] %v8606_v48  ;;  %11110 = vst [vmem:[#allocation7_spill] sm:$0xff] %v8612_v42  ;;  %v8637_v19 = vld [vmem:[%s10367_s6 + $0x80] sm:$0xff] }
 0x722   :  { %11114 = vst [vmem:[#allocation11_spill] sm:$0xff] %v8637_v19 }
 0x72b   :  { %v6234_v20 = vpop.eup %6233 }
 0x72c   :  { %v6236_v11 = vpop.eup %6235 }
 0x72d   :  { %v6238_v16 = vpop.eup %6237  ;;  %v2571_v17 = vmul.f32 %v6236_v11, %v6234_v20  ;;  %v8618_v20 = vld [vmem:[%s10367_s6 + $0xa0] sm:$0xff]  ;;  %v8624_v11 = vld [vmem:[%s10367_s6 + $0xb0] sm:$0xff] }
 0x72e   :  { %v2570_v12 = vmul.f32 %v6238_v16, %v8211_v30  ;;  %v6240_v38 = vpop.eup %6239  ;;  %11111 = vst [vmem:[#allocation14_spill] sm:$0xff] %v8618_v20  ;;  %11112 = vst [vmem:[#allocation9_spill] sm:$0xff] %v8624_v11  ;;  %v8630_v16 = vld [vmem:[%s10367_s6 + $0x88] sm:$0xff] }
 0x72f   :  { %11113 = vst [vmem:[#allocation16_spill] sm:$0xff] %v8630_v16 }
 0x730   :  { %v2572_v18 = vadd.f32 %v2571_v17, %v2570_v12  ;;  %v8643_v17 = vld [vmem:[%s10367_s6 + $0x98] sm:$0xff]  ;;  %v8649_v12 = vld [vmem:[%s10367_s6 + $0x68] sm:$0xff] }
 0x731   :  { %11115 = vst [vmem:[#allocation18_spill] sm:$0xff] %v8643_v17  ;;  %11116 = vst [vmem:[#allocation13_spill] sm:$0xff] %v8649_v12 }
 0x732   :  { %6241 = vtanh.f32 %v2572_v18  ;;  %v8329_v26 = vsel %vm2580_vm15, %v2572_v18, %v8211_v30  ;;  %v8444_v30 = vld [vmem:[%s10367_s6 + $0x198] sm:$0xff]  ;;  %v8655_v18 = vld [vmem:[%s10367_s6 + $0x90] sm:$0xff] }
 0x733   :  { %11090 = vst [vmem:[#allocation39_spill] sm:$0xff] %v8329_v26  ;;  %11117 = vst [vmem:[#allocation20_spill] sm:$0xff] %v8655_v18  ;;  %v8709_v26 = vld [vmem:[%s10367_s6 + $0x20] sm:$0xff] }
 0x734   :  { %11126 = vst [vmem:[#allocation23_spill] sm:$0xff] %v8709_v26 }
 0x73f   :  { %v6242_v14 = vpop.eup %6241 }
 0x740   :  { %v2574_v34 = vmul.f32 %v6242_v14, %v6240_v38  ;;  %v8661_v38 = vld [vmem:[%s10367_s6 + $0x60] sm:$0xff]  ;;  %v8667_v14 = vld [vmem:[%s10367_s6 + $0x78] sm:$0xff] }
 0x741   :  { %11118 = vst [vmem:[#allocation15_spill] sm:$0xff] %v8661_v38  ;;  %11119 = vst [vmem:[#allocation22_spill] sm:$0xff] %v8667_v14 }
 0x742   :  { %v2581_v27 = vsel %vm2580_vm15, %v2574_v34, 0.0  ;;  %v8336_v24 = vsel %vm2580_vm15, %v2574_v34, %v8218_v13  ;;  %v8450_v13 = vld [vmem:[%s10367_s6 + $0x180] sm:$0xff]  ;;  %v8673_v34 = vld [vmem:[%s10367_s6 + $0x48] sm:$0xff] }
 0x743   :  { %11091 = vst [vmem:[#allocation48_spill] sm:$0xff] %v8336_v24  ;;  %5852 = vst [vmem:[%s10366_s12 + $0x60] sm:$0xff] %v2581_v27  ;;  %2653 = vmatmul.mubr.f32.vlgmr.msra.gmra.mxu0 %v8336_v24  ;;  %2724 = vmatmul.mubr.f32.vlgmr.msra.gmra.mxu1 %v8336_v24  ;;  %v8679_v27 = vld [vmem:[%s10367_s6 + $0x70] sm:$0xff] }
 0x744   :  { %2758 = vmatpush1.msra.mxu0 %v7930_v28  ;;  %2829 = vmatpush1.msra.mxu1 %v7936_v44  ;;  %v8358_v28 = vld [vmem:[%s10364_s1 + $0x38] sm:$0xff]  ;;  %v8365_v44 = vld [vmem:[%s10367_s6 + $0x1e8] sm:$0xff]  ;;  %11120 = vst [vmem:[#allocation17_spill] sm:$0xff] %v8673_v34  ;;  %11121 = vst [vmem:[#allocation24_spill] sm:$0xff] %v8679_v27 }
 0x745   :  { %2759 = vmatprep.subr.mxu0 %v7942_v56  ;;  %2830 = vmatprep.subr.mxu1 %v7948_v52  ;;  %v8370_v56 = vld [vmem:[%s10367_s6 + $0x1f8] sm:$0xff]  ;;  %v8377_v52 = vld [vmem:[%s10367_s6 + $0x1e0] sm:$0xff]  ;;  %v8703_v24 = vld [vmem:[%s10367_s6 + $0x50] sm:$0xff] }
 0x746   :  { %2760 = vmatpush1.msra.mxu0 %v7954_v25  ;;  %2831 = vmatpush1.msra.mxu1 %v7960_v40  ;;  %v8382_v25 = vld [vmem:[%s10367_s6 + $0x1f0] sm:$0xff]  ;;  %v8391_v40 = vld [vmem:[%s10367_s6 + $0x1c8] sm:$0xff]  ;;  %11125 = vst [vmem:[#allocation28_spill] sm:$0xff] %v8703_v24 }
 0x747   :  { %2761 = vmatprep.subr.mxu0 %v7966_v59  ;;  %2832 = vmatprep.subr.mxu1 %v7972_v51  ;;  %v8396_v59 = vld [vmem:[%s10367_s6 + $0x1d8] sm:$0xff]  ;;  %v8402_v51 = vld [vmem:[%s10367_s6 + $0x1c0] sm:$0xff] }
 0x748   :  { %2762 = vmatpush1.msra.mxu0 %v7978_v36  ;;  %2833 = vmatpush1.msra.mxu1 %v7984_v49  ;;  %v8408_v36 = vld [vmem:[%s10367_s6 + $0x1d0] sm:$0xff]  ;;  %v8414_v49 = vld [vmem:[%s10367_s6 + $0x1a8] sm:$0xff] }
 0x749   :  { %2763 = vmatprep.subr.mxu0 %v7990_v23  ;;  %2834 = vmatprep.subr.mxu1 %v7996_v29  ;;  %v8420_v23 = vld [vmem:[%s10367_s6 + $0x1b8] sm:$0xff]  ;;  %v8426_v29 = vld [vmem:[%s10367_s6 + $0x1a0] sm:$0xff] }
 0x74a   :  { %2764 = vmatpush1.msra.mxu0 %v8005_v35  ;;  %2797 = vmatprep.mubr.f32.mxu0 %v10810_v55  ;;  %v8432_v35 = vld [vmem:[%s10367_s6 + $0x1b0] sm:$0xff] }
 0x74b   :  { %2835 = vmatpush1.msra.mxu1 %v8012_v45  ;;  %2868 = vmatprep.mubr.f32.mxu1 %v10810_v55  ;;  %v8438_v45 = vld [vmem:[%s10367_s6 + $0x188] sm:$0xff] }
 0x74c   :  { %5854 = vmatmul.mubr.msk.f32.vlgmr.msra.gmra.mxu0 %vm414_vm1, %v8358_v28  ;;  %5855 = vmatmul.mubr.msk.f32.vlgmr.msra.gmra.mxu1 %vm414_vm1, %v8358_v28 }
 0x74d   :  { %2915 = vmatprep.subr.mxu0 %v8365_v44  ;;  %2986 = vmatprep.subr.mxu1 %v8370_v56 }
 0x74e   :  { %2916 = vmatpush1.msra.mxu0 %v8377_v52  ;;  %2987 = vmatpush1.msra.mxu1 %v8382_v25 }
 0x74f   :  { %2917 = vmatprep.subr.mxu0 %v8391_v40  ;;  %2988 = vmatprep.subr.mxu1 %v8396_v59 }
 0x750   :  { %2918 = vmatpush1.msra.mxu0 %v8402_v51  ;;  %2989 = vmatpush1.msra.mxu1 %v8408_v36 }
 0x751   :  { %2919 = vmatprep.subr.mxu0 %v8414_v49  ;;  %2990 = vmatprep.subr.mxu1 %v8420_v23 }
 0x752   :  { %2920 = vmatpush1.msra.mxu0 %v8426_v29  ;;  %2991 = vmatpush1.msra.mxu1 %v8432_v35 }
 0x753   :  { %2921 = vmatprep.subr.mxu0 %v8438_v45  ;;  %2992 = vmatprep.subr.mxu1 %v8444_v30 }
 0x754   :  { %2922 = vmatpush1.msra.mxu0 %v8450_v13  ;;  %2993 = vmatpush1.msra.mxu1 %v8456_v22 }
 0x755   :  { %2923 = vmatprep.subr.mxu0 %v8462_v3  ;;  %2994 = vmatprep.subr.mxu1 %v8468_v5 }
 0x756   :  { %2924 = vmatpush1.msra.mxu0 %v8474_v53  ;;  %2995 = vmatpush1.msra.mxu1 %v8480_v57 }
 0x757   :  { %2925 = vmatprep.subr.mxu0 %v8486_v60  ;;  %2996 = vmatprep.subr.mxu1 %v8492_v63 }
 0x758   :  { %2926 = vmatpush1.msra.mxu0 %v8498_v41  ;;  %2997 = vmatpush1.msra.mxu1 %v8504_v46 }
 0x759   :  { %2927 = vmatprep.subr.mxu0 %v8510_v54  ;;  %2998 = vmatprep.subr.mxu1 %v8516_v37 }
 0x75a   :  { %2928 = vmatpush1.msra.mxu0 %v8522_v50  ;;  %2999 = vmatpush1.msra.mxu1 %v8528_v47 }
 0x75b   :  { %2929 = vmatprep.subr.mxu0 %v8534_v58  ;;  %3000 = vmatprep.subr.mxu1 %v8540_v21 }
 0x75c   :  { %2930 = vmatpush1.msra.mxu0 %v8546_v39  ;;  %3001 = vmatpush1.msra.mxu1 %v8552_v0 }
 0x75d   :  { %2931 = vmatprep.subr.mxu0 %v8558_v1  ;;  %3002 = vmatprep.subr.mxu1 %v8564_v2 }
 0x75e   :  { %2932 = vmatpush1.msra.mxu0 %v8570_v4  ;;  %3003 = vmatpush1.msra.mxu1 %v8576_v6 }
 0x75f   :  { %2933 = vmatprep.subr.mxu0 %v8582_v7  ;;  %3004 = vmatprep.subr.mxu1 %v8588_v8 }
 0x760   :  { %2934 = vmatpush1.msra.mxu0 %v8594_v9  ;;  %3005 = vmatpush1.msra.mxu1 %v8600_v33 }
 0x761   :  { %2935 = vmatprep.subr.mxu0 %v8606_v48  ;;  %3006 = vmatprep.subr.mxu1 %v8612_v42 }
 0x762   :  { %2936 = vmatpush1.msra.mxu0 %v8618_v20  ;;  %3007 = vmatpush1.msra.mxu1 %v8624_v11 }
 0x763   :  { %2937 = vmatprep.subr.mxu0 %v8630_v16  ;;  %2979 = vmatprep.mubr.f32.mxu0 %v10810_v55 }
 0x764   :  { %2938 = vmatpush1.msra.mxu0 %v8637_v19  ;;  %3008 = vmatprep.subr.mxu1 %v8643_v17 }
 0x765   :  { %2939 = vmatprep.subr.mxu0 %v8649_v12  ;;  %3009 = vmatpush1.msra.mxu1 %v8655_v18 }
 0x766   :  { %2940 = vmatpush1.msra.mxu0 %v8661_v38  ;;  %3010 = vmatprep.subr.mxu1 %v8667_v14 }
 0x767   :  { %2941 = vmatprep.subr.mxu0 %v8673_v34  ;;  %3011 = vmatpush1.msra.mxu1 %v8679_v27 }
 0x768   :  { %2942 = vmatpush1.msra.mxu0 %v8685_v15  ;;  %3012 = vmatprep.subr.mxu1 %v8691_v31  ;;  %v8739_v15 = vld [vmem:[%s10367_s6 + $0x18] sm:$0xff]  ;;  %v8745_v31 = vld [vmem:[%s10368_s5 + $0x68] sm:$0xff] }
 0x769   :  { %2943 = vmatprep.subr.mxu0 %v8697_v10  ;;  %3013 = vmatpush1.msra.mxu1 %v8703_v24  ;;  %11131 = vst [vmem:[#allocation34_spill] sm:$0xff] %v8739_v15  ;;  %11132 = vst [vmem:[#allocation29_spill] sm:$0xff] %v8745_v31  ;;  %v8752_v24 = vld [vmem:[%s10368_s5 + $0x60] sm:$0xff] }
 0x76a   :  { %2944 = vmatpush1.msra.mxu0 %v8709_v26  ;;  %3014 = vmatprep.subr.mxu1 %v8715_v43  ;;  %11133 = vst [vmem:[#allocation36_spill] sm:$0xff] %v8752_v24  ;;  %v8759_v26 = vld [vmem:[%s10368_s5 + $0x48] sm:$0xff] }
 0x76b   :  { %2945 = vmatprep.subr.mxu0 %v8721_v61  ;;  %3015 = vmatpush1.msra.mxu1 %v8727_v32  ;;  %11134 = vst [vmem:[#allocation31_spill] sm:$0xff] %v8759_v26  ;;  %v8765_v61 = vld [vmem:[%s10367_s6 + $0x10] sm:$0xff]  ;;  %v8784_v32 = vld [vmem:[%s10368_s5 + $0x78] sm:$0xff] }
 0x76c   :  { %2946 = vmatpush1.msra.mxu0 %v8733_v62  ;;  %3016 = vmatprep.subr.mxu1 %v8739_v15  ;;  %11135 = vst [vmem:[#allocation38_spill] sm:$0xff] %v8765_v61  ;;  %v8772_v62 = vld [vmem:[%s10368_s5 + $0x40] sm:$0xff]  ;;  %v8778_v15 = vld [vmem:[%s10368_s5 + $0x28] sm:$0xff]  ;;  %11138 = vst [vmem:[#allocation63_spill] sm:$0xff] %v8784_v32 }
 0x76d   :  { %2980 = vmatmul.mubr.f32.vlgmr.msra.gmra.mxu0 %v10810_v55  ;;  %3084 = vmatprep.subr.mxu0 %v8745_v31  ;;  %11136 = vst [vmem:[#allocation33_spill] sm:$0xff] %v8772_v62  ;;  %11137 = vst [vmem:[#allocation62_spill] sm:$0xff] %v8778_v15  ;;  %v8790_v31 = vld [vmem:[%s10368_s5 + $0x20] sm:$0xff] }
 0x76e   :  { %3085 = vmatpush1.msra.mxu0 %v8752_v24  ;;  %3124 = vmatprep.mubr.f32.mxu0 %v10810_v55  ;;  %11139 = vst [vmem:[#allocation64_spill] sm:$0xff] %v8790_v31  ;;  %v8797_v24 = vld [vmem:[%s10368_s5 + $0x8] sm:$0xff] }
 0x76f   :  { %3086 = vmatprep.subr.mxu0 %v8759_v26  ;;  %3017 = vmatpush1.msra.mxu1 %v8765_v61  ;;  %11140 = vst [vmem:[#allocation65_spill] sm:$0xff] %v8797_v24  ;;  %v8803_v26 = vld [vmem:[%s10368_s5 + $0x70] sm:$0xff]  ;;  %v8809_v61 = vld [vmem:[%s10368_s5] sm:$0xff] }
 0x770   :  { %3087 = vmatpush1.msra.mxu0 %v8772_v62  ;;  %3050 = vmatprep.mubr.f32.mxu1 %v10810_v55  ;;  %11141 = vst [vmem:[#allocation66_spill] sm:$0xff] %v8809_v61  ;;  %v8815_v62 = vld [vmem:[%s10368_s5 + $0x58] sm:$0xff] }
 0x771   :  { %3088 = vmatprep.subr.mxu0 %v8778_v15  ;;  %3155 = vmatprep.subr.mxu1 %v8784_v32  ;;  %v8822_v15 = vld [vmem:[%s10368_s5 + $0x50] sm:$0xff]  ;;  %v8829_v32 = vld [vmem:[%s10368_s5 + $0x38] sm:$0xff] }
 0x772   :  { %3089 = vmatpush1.msra.mxu0 %v8790_v31  ;;  %3051 = vmatmul.mubr.f32.vlgmr.msra.gmra.mxu1 %v10810_v55  ;;  %v8836_v31 = vld [vmem:[%s10368_s5 + $0x30] sm:$0xff] }
 0x773   :  { %3090 = vmatprep.subr.mxu0 %v8797_v24  ;;  %3156 = vmatpush1.msra.mxu1 %v8803_v26  ;;  %v8844_v24 = vld [vmem:[%s10368_s5 + $0x18] sm:$0xff] }
 0x774   :  { %3091 = vmatpush1.msra.mxu0 %v8809_v61  ;;  %3157 = vmatprep.subr.mxu1 %v8815_v62  ;;  %v8850_v61 = vld [vmem:[%s10368_s5 + $0x10] sm:$0xff] }
 0x775   :  { %5861 = vmatmul.mubr.msk.f32.vlgmr.msra.gmra.mxu0 %vm414_vm1, %v8358_v28  ;;  %3158 = vmatpush1.msra.mxu1 %v8822_v15 }
 0x776   :  { %3159 = vmatprep.subr.mxu1 %v8829_v32  ;;  %3195 = vmatprep.mubr.f32.mxu1 %v10810_v55 }
 0x777   :  { %3160 = vmatpush1.msra.mxu1 %v8836_v31  ;;  %3255 = vmatprep.subr.mxu0 %v8365_v44 }
 0x778   :  { %3161 = vmatprep.subr.mxu1 %v8844_v24  ;;  %3256 = vmatpush1.msra.mxu0 %v8377_v52 }
 0x779   :  { %3162 = vmatpush1.msra.mxu1 %v8850_v61  ;;  %3257 = vmatprep.subr.mxu0 %v8391_v40 }
 0x77a   :  { %5862 = vmatmul.mubr.msk.f32.vlgmr.msra.gmra.mxu1 %vm414_vm1, %v8358_v28  ;;  %3326 = vmatprep.subr.mxu1 %v8370_v56  ;;  %v11142_v28 = vld [vmem:[#allocation19_spill] sm:$0xff] }
 0x77b   :  { %3327 = vmatpush1.msra.mxu1 %v8382_v25  ;;  %3258 = vmatpush1.msra.mxu0 %v8402_v51 }
 0x77c   :  { %3328 = vmatprep.subr.mxu1 %v8396_v59  ;;  %3259 = vmatprep.subr.mxu0 %v8414_v49 }
 0x77d   :  { %3329 = vmatpush1.msra.mxu1 %v8408_v36  ;;  %3260 = vmatpush1.msra.mxu0 %v8426_v29 }
 0x77e   :  { %3330 = vmatprep.subr.mxu1 %v8420_v23  ;;  %3261 = vmatprep.subr.mxu0 %v8438_v45 }
 0x77f   :  { %3331 = vmatpush1.msra.mxu1 %v8432_v35  ;;  %3262 = vmatpush1.msra.mxu0 %v8450_v13 }
 0x780   :  { %3332 = vmatprep.subr.mxu1 %v8444_v30  ;;  %3263 = vmatprep.subr.mxu0 %v8462_v3 }
 0x781   :  { %3333 = vmatpush1.msra.mxu1 %v8456_v22  ;;  %3264 = vmatpush1.msra.mxu0 %v8474_v53 }
 0x782   :  { %3334 = vmatprep.subr.mxu1 %v8468_v5  ;;  %3265 = vmatprep.subr.mxu0 %v8486_v60 }
 0x783   :  { %3335 = vmatpush1.msra.mxu1 %v8480_v57  ;;  %3266 = vmatpush1.msra.mxu0 %v8498_v41 }
 0x784   :  { %3336 = vmatprep.subr.mxu1 %v8492_v63  ;;  %3267 = vmatprep.subr.mxu0 %v8510_v54 }
 0x785   :  { %3337 = vmatpush1.msra.mxu1 %v8504_v46  ;;  %3268 = vmatpush1.msra.mxu0 %v8522_v50 }
 0x786   :  { %3338 = vmatprep.subr.mxu1 %v8516_v37  ;;  %3269 = vmatprep.subr.mxu0 %v8534_v58 }
 0x787   :  { %3339 = vmatpush1.msra.mxu1 %v8528_v47  ;;  %3270 = vmatpush1.msra.mxu0 %v8546_v39 }
 0x788   :  { %3340 = vmatprep.subr.mxu1 %v8540_v21  ;;  %3271 = vmatprep.subr.mxu0 %v8558_v1 }
 0x789   :  { %3341 = vmatpush1.msra.mxu1 %v8552_v0  ;;  %3272 = vmatpush1.msra.mxu0 %v8570_v4 }
 0x78a   :  { %3342 = vmatprep.subr.mxu1 %v8564_v2  ;;  %3273 = vmatprep.subr.mxu0 %v8582_v7  ;;  %v11156_v2 = vld [vmem:[#allocation60_spill] sm:$0xff] }
 0x78b   :  { %3343 = vmatpush1.msra.mxu1 %v8576_v6  ;;  %3274 = vmatpush1.msra.mxu0 %v8594_v9 }
 0x78c   :  { %3344 = vmatprep.subr.mxu1 %v8588_v8  ;;  %3275 = vmatprep.subr.mxu0 %v8606_v48  ;;  %v11154_v48 = vld [vmem:[#allocation58_spill] sm:$0xff] }
 0x78d   :  { %3345 = vmatpush1.msra.mxu1 %v8600_v33  ;;  %3276 = vmatpush1.msra.mxu0 %v8618_v20 }
 0x78e   :  { %3346 = vmatprep.subr.mxu1 %v8612_v42  ;;  %3277 = vmatprep.subr.mxu0 %v8630_v16  ;;  %v11143_v16 = vld [vmem:[#allocation26_spill] sm:$0xff] }
 0x78f   :  { %3347 = vmatpush1.msra.mxu1 %v8624_v11  ;;  %3278 = vmatpush1.msra.mxu0 %v8637_v19  ;;  %v11144_v19 = vld [vmem:[#allocation28_spill] sm:$0xff] }
 0x790   :  { %3348 = vmatprep.subr.mxu1 %v8643_v17  ;;  %3279 = vmatprep.subr.mxu0 %v8649_v12  ;;  %v11145_v17 = vld [vmem:[#allocation23_spill] sm:$0xff]  ;;  %v11146_v12 = vld [vmem:[#allocation25_spill] sm:$0xff] }
 0x791   :  { %3349 = vmatpush1.msra.mxu1 %v8655_v18  ;;  %3280 = vmatpush1.msra.mxu0 %v8661_v38  ;;  %v11147_v38 = vld [vmem:[#allocation32_spill] sm:$0xff] }
 0x792   :  { %3350 = vmatprep.subr.mxu1 %v8667_v14  ;;  %3281 = vmatprep.subr.mxu0 %v8673_v34  ;;  %v11148_v14 = vld [vmem:[#allocation27_spill] sm:$0xff]  ;;  %v11149_v34 = vld [vmem:[#allocation34_spill] sm:$0xff] }
 0x793   :  { %3351 = vmatpush1.msra.mxu1 %v8679_v27  ;;  %3282 = vmatpush1.msra.mxu0 %v11142_v28  ;;  %v11150_v28 = vld [vmem:[#allocation38_spill] sm:$0xff] }
 0x794   :  { %3352 = vmatprep.subr.mxu1 %v11143_v16  ;;  %3283 = vmatprep.subr.mxu0 %v8697_v10  ;;  %v11151_v10 = vld [vmem:[#allocation29_spill] sm:$0xff] }
 0x795   :  { %3353 = vmatpush1.msra.mxu1 %v11144_v19  ;;  %3284 = vmatpush1.msra.mxu0 %v11145_v17  ;;  %v11152_v19 = vld [vmem:[#allocation63_spill] sm:$0xff] }
 0x796   :  { %3354 = vmatprep.subr.mxu1 %v8715_v43  ;;  %3285 = vmatprep.subr.mxu0 %v11146_v12 }
 0x797   :  { %3355 = vmatpush1.msra.mxu1 %v11147_v38  ;;  %3286 = vmatpush1.msra.mxu0 %v11148_v14  ;;  %v11153_v14 = vld [vmem:[#allocation57_spill] sm:$0xff] }
 0x798   :  { %3356 = vmatprep.subr.mxu1 %v11149_v34  ;;  %3319 = vmatprep.mubr.f32.mxu0 %v10810_v55 }
 0x799   :  { %3357 = vmatpush1.msra.mxu1 %v11150_v28  ;;  %3390 = vmatprep.mubr.f32.mxu1 %v10810_v55 }
 0x79a   :  { %3424 = vmatprep.subr.mxu0 %v11151_v10  ;;  %3495 = vmatprep.subr.mxu1 %v11152_v19  ;;  %v11155_v19 = vld [vmem:[#allocation59_spill] sm:$0xff] }
 0x803   :  { %v2654_v17 = vpop.f32.mrf.mxu0  ;;  %v2725_v43 = vpop.f32.mrf.mxu1 }
 0x805   :  { %v2656_v16 = vpop.f32.mrf.mxu0  ;;  %v2727_v27 = vpop.f32.mrf.mxu1 }
 0x80c   :  { %v2799_v12 = vpop.f32.mrf.mxu0  ;;  %v2870_v34 = vpop.f32.mrf.mxu1 }
 0x80d   :  { %v2800_v38 = vadd.f32 %v2799_v12, %v2654_v17  ;;  %v2871_v7 = vadd.f32 %v2870_v34, %v2725_v43 }
 0x80e   :  { %v2801_v18 = vpop.f32.mrf.mxu0  ;;  %v2872_v9 = vpop.f32.mrf.mxu1 }
 0x80f   :  { %v2875_v11 = vadd.f32 %v2800_v38, %v11153_v14  ;;  %v2802_v20 = vadd.f32 %v2801_v18, %v2656_v16  ;;  %v2873_v10 = vadd.f32 %v2872_v9, %v2727_v27  ;;  %v2877_v17 = vadd.f32 %v2871_v7, %v11156_v2 }
 0x811   :  { %v5856_v42 = vmul.f32 -1.442695, %v2875_v11  ;;  %v2876_v28 = vadd.f32 %v2802_v20, %v11154_v48  ;;  %v2878_v8 = vadd.f32 %v2873_v10, %v11155_v19  ;;  %v206_v10 = vld [vmem:[%s10369_s7] sm:$0xf]  ;;  %v11158_v19 = vld [vmem:[#allocation56_spill] sm:$0xff] }
 0x812   :  { %v11160_v27 = vsub.s32 1, %v11158_v19 }
 0x813   :  { %6243 = vpow2.f32 %v5856_v42  ;;  %v5857_v33 = vmul.f32 -1.442695, %v2876_v28  ;;  %v5858_v6 = vmul.f32 -1.442695, %v2878_v8 }
 0x814   :  { %v8940_v28 = vrot.slane %v206_v10, %v11160_v27 }
 0x815   :  { %6245 = vpow2.f32 %v5857_v33  ;;  %v2907_v33 = vpop.permute.xlu1 %2906 }
 0x816   :  { %6247 = vpow2.f32 %v5858_v6  ;;  %vm2908_vm0 = vcmp.eq.s32.totalorder %v2907_v33, 1  ;;  %v11169_v33 = vld [vmem:[#allocation62_spill] sm:$0xff] }
 0x820   :  { %v6244_v4 = vpop.eup %6243 }
 0x821   :  { %v2882_v12 = vadd.f32 1.0, %v6244_v4  ;;  %v11157_v4 = vld [vmem:[#allocation39_spill] sm:$0xff] }
 0x822   :  { %v6246_v1 = vpop.eup %6245 }
 0x823   :  { %6249 = vrcp.f32 %v2882_v12  ;;  %v2888_v16 = vadd.f32 1.0, %v6246_v1  ;;  %v6248_v48 = vpop.eup %6247  ;;  %v11159_v1 = vsub.s32 0, %v11158_v19 }
 0x824   :  { %6251 = vtanh.f32 %v2877_v17  ;;  %v2895_v8 = vadd.f32 1.0, %v6248_v48 }
 0x825   :  { %6253 = vrcp.f32 %v2888_v16  ;;  %v8936_v18 = vrot.slane %v206_v10, %v11159_v1  ;;  %v11162_v1 = vsub.s32 3, %v11158_v19 }
 0x826   :  { %6255 = vrcp.f32 %v2895_v8 }
 0x82d   :  { %v2981_v42 = vpop.f32.mrf.mxu0 }
 0x82f   :  { %v2983_v6 = vpop.f32.mrf.mxu0 }
 0x830   :  { %v6250_v20 = vpop.eup %6249 }
 0x831   :  { %v6252_v11 = vpop.eup %6251 }
 0x832   :  { %v6254_v43 = vpop.eup %6253  ;;  %v3052_v9 = vpop.f32.mrf.mxu1  ;;  %v2899_v2 = vmul.f32 %v6252_v11, %v6250_v20 }
 0x833   :  { %v2898_v7 = vmul.f32 %v6254_v43, %v11157_v4  ;;  %v6256_v27 = vpop.eup %6255 }
 0x834   :  { %v3054_v17 = vpop.f32.mrf.mxu1 }
 0x835   :  { %v2900_v38 = vadd.f32 %v2899_v2, %v2898_v7  ;;  %v3126_v14 = vpop.f32.mrf.mxu0 }
 0x836   :  { %v3127_v34 = vadd.f32 %v3126_v14, %v2981_v42  ;;  %v8950_v14 = vrot.slane %v206_v10, %v11162_v1 }
 0x837   :  { %v3128_v12 = vpop.f32.mrf.mxu0  ;;  %6257 = vtanh.f32 %v2900_v38  ;;  %v8944_v16 = vsel %vm2908_vm0, %v2900_v38, %v11157_v4 }
 0x838   :  { %11161 = vst [vmem:[#allocation57_spill] sm:$0xff] %v8944_v16  ;;  %v3223_v48 = vadd.f32 %v8936_v18, %v3127_v34  ;;  %v3129_v20 = vadd.f32 %v3128_v12, %v2983_v6  ;;  %v11163_v6 = vsub.s32 2, %v11158_v19 }
 0x83a   :  { %v5863_v11 = vmul.f32 -1.442695, %v3223_v48  ;;  %v3224_v43 = vadd.f32 %v8940_v28, %v3129_v20  ;;  %v3197_v2 = vpop.f32.mrf.mxu1  ;;  %v8955_v34 = vrot.slane %v206_v10, %v11163_v6 }
 0x83b   :  { %v3198_v16 = vadd.f32 %v3197_v2, %v3052_v9 }
 0x83c   :  { %6259 = vpow2.f32 %v5863_v11  ;;  %v5864_v42 = vmul.f32 -1.442695, %v3224_v43  ;;  %v3199_v8 = vpop.f32.mrf.mxu1  ;;  %v11164_v11 = vld [vmem:[#allocation48_spill] sm:$0xff] }
 0x83d   :  { %v3200_v7 = vadd.f32 %v3199_v8, %v3054_v17 }
 0x83e   :  { %6261 = vpow2.f32 %v5864_v42  ;;  %v3225_v42 = vadd.f32 %v8955_v34, %v3198_v16 }
 0x83f   :  { %v3226_v4 = vadd.f32 %v8950_v14, %v3200_v7 }
 0x841   :  { %v5865_v48 = vmul.f32 -1.442695, %v3226_v4 }
 0x843   :  { %6263 = vpow2.f32 %v5865_v48 }
 0x844   :  { %v6258_v38 = vpop.eup %6257 }
 0x845   :  { %v2902_v12 = vmul.f32 %v6258_v38, %v6256_v27 }
 0x847   :  { %v2909_v20 = vsel %vm2908_vm0, %v2902_v12, 0.0  ;;  %v8960_v17 = vsel %vm2908_vm0, %v2902_v12, %v11164_v11 }
 0x848   :  { %11165 = vst [vmem:[#allocation58_spill] sm:$0xff] %v8960_v17  ;;  %5859 = vst [vmem:[%s10366_s12 + $0x70] sm:$0xff] %v2909_v20  ;;  %v11184_v17 = vld [vmem:[#allocation14_spill] sm:$0xff] }
 0x849   :  { %v6260_v43 = vpop.eup %6259 }
 0x84a   :  { %v3230_v9 = vadd.f32 1.0, %v6260_v43  ;;  %v11166_v43 = vld [vmem:[#allocation36_spill] sm:$0xff] }
 0x84b   :  { %v6262_v2 = vpop.eup %6261 }
 0x84c   :  { %6265 = vrcp.f32 %v3230_v9  ;;  %v3236_v10 = vadd.f32 1.0, %v6262_v2  ;;  %v11168_v9 = vld [vmem:[#allocation33_spill] sm:$0xff]  ;;  %v11170_v2 = vld [vmem:[#allocation64_spill] sm:$0xff] }
 0x84d   :  { %6267 = vtanh.f32 %v3225_v42  ;;  %v11167_v42 = vld [vmem:[#allocation31_spill] sm:$0xff] }
 0x84e   :  { %6269 = vrcp.f32 %v3236_v10  ;;  %v11171_v10 = vld [vmem:[#allocation65_spill] sm:$0xff] }
 0x850   :  { %v6264_v19 = vpop.eup %6263 }
 0x851   :  { %v3243_v27 = vadd.f32 1.0, %v6264_v19  ;;  %v11172_v19 = vld [vmem:[#allocation66_spill] sm:$0xff] }
 0x853   :  { %6271 = vrcp.f32 %v3243_v27  ;;  %v11176_v27 = vld [vmem:[#allocation6_spill] sm:$0xff] }
 0x859   :  { %v6266_v8 = vpop.eup %6265 }
 0x85a   :  { %v6268_v7 = vpop.eup %6267 }
 0x85b   :  { %v6270_v1 = vpop.eup %6269  ;;  %v3247_v38 = vmul.f32 %v6268_v7, %v6266_v8  ;;  %v11173_v8 = vld [vmem:[#allocation37_spill] sm:$0xff] }
 0x85c   :  { %v3246_v4 = vmul.f32 0.0, %v6270_v1  ;;  %v11174_v7 = vld [vmem:[#allocation49_spill] sm:$0xff]  ;;  %v11175_v1 = vld [vmem:[#allocation2_spill] sm:$0xff] }
 0x85e   :  { %v3248_v6 = vadd.f32 %v3247_v38, %v3246_v4  ;;  %v11177_v4 = vld [vmem:[#allocation3_spill] sm:$0xff]  ;;  %v11178_v38 = vld [vmem:[#allocation8_spill] sm:$0xff] }
 0x860   :  { %6273 = vtanh.f32 %v3248_v6  ;;  %v8967_v12 = vsel %vm2908_vm0, %v3248_v6, 0.0  ;;  %v6272_v16 = vpop.eup %6271  ;;  %v11179_v6 = vld [vmem:[#allocation4_spill] sm:$0xff] }
 0x86d   :  { %v6274_v20 = vpop.eup %6273 }
 0x86e   :  { %v3250_v48 = vmul.f32 %v6274_v20, %v6272_v16  ;;  %v11180_v16 = vld [vmem:[#allocation10_spill] sm:$0xff]  ;;  %v11181_v20 = vld [vmem:[#allocation5_spill] sm:$0xff] }
 0x870   :  { %5868 = vmatmul.mubr.msk.f32.vlgmr.msra.gmra.mxu0 %vm2908_vm0, %v3250_v48  ;;  %5869 = vmatmul.mubr.msk.f32.vlgmr.msra.gmra.mxu1 %vm2908_vm0, %v3250_v48  ;;  %v8972_v11 = vsel %vm2908_vm0, %v3250_v48, 0.0  ;;  %v11182_v48 = vld [vmem:[#allocation12_spill] sm:$0xff] }
 0x871   :  { %3425 = vmatpush1.msra.mxu0 %v11166_v43  ;;  %3496 = vmatpush1.msra.mxu1 %v8803_v26  ;;  %5866 = vst [vmem:[%s10366_s12 + $0x78] sm:$0xff] %v8972_v11 }
 0x872   :  { %3426 = vmatprep.subr.mxu0 %v11167_v42  ;;  %3497 = vmatprep.subr.mxu1 %v8815_v62 }
 0x873   :  { %3427 = vmatpush1.msra.mxu0 %v11168_v9  ;;  %3498 = vmatpush1.msra.mxu1 %v8822_v15 }
 0x874   :  { %3428 = vmatprep.subr.mxu0 %v11169_v33  ;;  %3499 = vmatprep.subr.mxu1 %v8829_v32 }
 0x875   :  { %3429 = vmatpush1.msra.mxu0 %v11170_v2  ;;  %3500 = vmatpush1.msra.mxu1 %v8836_v31 }
 0x876   :  { %3430 = vmatprep.subr.mxu0 %v11171_v10  ;;  %3501 = vmatprep.subr.mxu1 %v8844_v24 }
 0x877   :  { %3431 = vmatpush1.msra.mxu0 %v11172_v19  ;;  %3464 = vmatprep.mubr.f32.mxu0 %v10810_v55 }
 0x878   :  { %3502 = vmatpush1.msra.mxu1 %v8850_v61  ;;  %3535 = vmatprep.mubr.f32.mxu1 %v10810_v55 }
 0x879   :  { %5870 = vmatmul.mubr.msk.f32.vlgmr.msra.gmra.mxu0 %vm414_vm1, %v11173_v8  ;;  %5871 = vmatmul.mubr.msk.f32.vlgmr.msra.gmra.mxu1 %vm414_vm1, %v11173_v8  ;;  %v11183_v8 = vld [vmem:[#allocation7_spill] sm:$0xff] }
 0x87a   :  { %3575 = vmatprep.subr.mxu0 %v8365_v44  ;;  %3646 = vmatprep.subr.mxu1 %v8370_v56 }
 0x87b   :  { %3576 = vmatpush1.msra.mxu0 %v8377_v52  ;;  %3647 = vmatpush1.msra.mxu1 %v8382_v25 }
 0x87c   :  { %3577 = vmatprep.subr.mxu0 %v8391_v40  ;;  %3648 = vmatprep.subr.mxu1 %v8396_v59 }
 0x87d   :  { %3578 = vmatpush1.msra.mxu0 %v8402_v51  ;;  %3649 = vmatpush1.msra.mxu1 %v8408_v36 }
 0x87e   :  { %3579 = vmatprep.subr.mxu0 %v8414_v49  ;;  %3650 = vmatprep.subr.mxu1 %v8420_v23 }
 0x87f   :  { %3580 = vmatpush1.msra.mxu0 %v8426_v29  ;;  %3651 = vmatpush1.msra.mxu1 %v8432_v35 }
 0x880   :  { %3581 = vmatprep.subr.mxu0 %v8438_v45  ;;  %3652 = vmatprep.subr.mxu1 %v8444_v30 }
 0x881   :  { %3582 = vmatpush1.msra.mxu0 %v8450_v13  ;;  %3653 = vmatpush1.msra.mxu1 %v8456_v22 }
 0x882   :  { %3583 = vmatprep.subr.mxu0 %v8462_v3  ;;  %3654 = vmatprep.subr.mxu1 %v8468_v5 }
 0x883   :  { %3584 = vmatpush1.msra.mxu0 %v8474_v53  ;;  %3655 = vmatpush1.msra.mxu1 %v8480_v57 }
 0x884   :  { %3585 = vmatprep.subr.mxu0 %v8486_v60  ;;  %3656 = vmatprep.subr.mxu1 %v8492_v63 }
 0x885   :  { %3586 = vmatpush1.msra.mxu0 %v8498_v41  ;;  %3657 = vmatpush1.msra.mxu1 %v8504_v46 }
 0x886   :  { %3587 = vmatprep.subr.mxu0 %v8510_v54  ;;  %3658 = vmatprep.subr.mxu1 %v8516_v37 }
 0x887   :  { %3588 = vmatpush1.msra.mxu0 %v8522_v50  ;;  %3659 = vmatpush1.msra.mxu1 %v8528_v47 }
 0x888   :  { %3589 = vmatprep.subr.mxu0 %v8534_v58  ;;  %3660 = vmatprep.subr.mxu1 %v8540_v21 }
 0x889   :  { %3590 = vmatpush1.msra.mxu0 %v8546_v39  ;;  %3661 = vmatpush1.msra.mxu1 %v8552_v0 }
 0x88a   :  { %3591 = vmatprep.subr.mxu0 %v11174_v7  ;;  %3662 = vmatprep.subr.mxu1 %v11175_v1  ;;  %v11185_v7 = vld [vmem:[#allocation9_spill] sm:$0xff]  ;;  %v11186_v1 = vld [vmem:[#allocation16_spill] sm:$0xff] }
 0x88b   :  { %3592 = vmatpush1.msra.mxu0 %v11176_v27  ;;  %3663 = vmatpush1.msra.mxu1 %v11177_v4  ;;  %v11187_v27 = vld [vmem:[#allocation18_spill] sm:$0xff]  ;;  %v11188_v4 = vld [vmem:[#allocation11_spill] sm:$0xff] }
 0x88c   :  { %3593 = vmatprep.subr.mxu0 %v11178_v38  ;;  %3664 = vmatprep.subr.mxu1 %v11179_v6  ;;  %v11189_v38 = vld [vmem:[#allocation20_spill] sm:$0xff]  ;;  %v11190_v6 = vld [vmem:[#allocation13_spill] sm:$0xff] }
 0x88d   :  { %3594 = vmatpush1.msra.mxu0 %v11180_v16  ;;  %3665 = vmatpush1.msra.mxu1 %v11181_v20  ;;  %v11191_v16 = vld [vmem:[#allocation22_spill] sm:$0xff]  ;;  %v11192_v20 = vld [vmem:[#allocation15_spill] sm:$0xff] }
 0x88e   :  { %3595 = vmatprep.subr.mxu0 %v11182_v48  ;;  %3666 = vmatprep.subr.mxu1 %v11183_v8  ;;  %v11193_v48 = vld [vmem:[#allocation24_spill] sm:$0xff]  ;;  %v11194_v8 = vld [vmem:[#allocation17_spill] sm:$0xff] }
 0x88f   :  { %3596 = vmatpush1.msra.mxu0 %v11184_v17  ;;  %3667 = vmatpush1.msra.mxu1 %v11185_v7  ;;  %v11195_v17 = vld [vmem:[#allocation26_spill] sm:$0xff]  ;;  %v11196_v7 = vld [vmem:[#allocation19_spill] sm:$0xff] }
 0x890   :  { %3597 = vmatprep.subr.mxu0 %v11186_v1  ;;  %3668 = vmatprep.subr.mxu1 %v11187_v27  ;;  %v11197_v1 = vld [vmem:[#allocation28_spill] sm:$0xff]  ;;  %v11198_v27 = vld [vmem:[#allocation21_spill] sm:$0xff] }
 0x891   :  { %3598 = vmatpush1.msra.mxu0 %v11188_v4  ;;  %3669 = vmatpush1.msra.mxu1 %v11189_v38  ;;  %v11199_v4 = vld [vmem:[#allocation30_spill] sm:$0xff]  ;;  %v11200_v38 = vld [vmem:[#allocation23_spill] sm:$0xff] }
 0x892   :  { %3599 = vmatprep.subr.mxu0 %v11190_v6  ;;  %3670 = vmatprep.subr.mxu1 %v11191_v16  ;;  %v11201_v6 = vld [vmem:[#allocation32_spill] sm:$0xff]  ;;  %v11202_v16 = vld [vmem:[#allocation25_spill] sm:$0xff] }
 0x893   :  { %3600 = vmatpush1.msra.mxu0 %v11192_v20  ;;  %3671 = vmatpush1.msra.mxu1 %v11193_v48  ;;  %v11203_v20 = vld [vmem:[#allocation34_spill] sm:$0xff]  ;;  %v11204_v48 = vld [vmem:[#allocation27_spill] sm:$0xff] }
 0x894   :  { %3601 = vmatprep.subr.mxu0 %v11194_v8  ;;  %3672 = vmatprep.subr.mxu1 %v11195_v17  ;;  %v11205_v8 = vld [vmem:[#allocation38_spill] sm:$0xff] }
 0x895   :  { %3602 = vmatpush1.msra.mxu0 %v11196_v7  ;;  %3673 = vmatpush1.msra.mxu1 %v11197_v1  ;;  %v11206_v1 = vld [vmem:[#allocation29_spill] sm:$0xff] }
 0x896   :  { %3603 = vmatprep.subr.mxu0 %v11198_v27  ;;  %3674 = vmatprep.subr.mxu1 %v11199_v4  ;;  %v11207_v27 = vld [vmem:[#allocation63_spill] sm:$0xff] }
 0x897   :  { %3604 = vmatpush1.msra.mxu0 %v11200_v38  ;;  %3675 = vmatpush1.msra.mxu1 %v11201_v6 }
 0x898   :  { %3605 = vmatprep.subr.mxu0 %v11202_v16  ;;  %3676 = vmatprep.subr.mxu1 %v11203_v20 }
 0x899   :  { %3606 = vmatpush1.msra.mxu0 %v11204_v48  ;;  %3677 = vmatpush1.msra.mxu1 %v11205_v8 }
 0x89a   :  { %3639 = vmatprep.mubr.f32.mxu0 %v10810_v55  ;;  %3710 = vmatprep.mubr.f32.mxu1 %v10810_v55 }
 0x89b   :  { %3744 = vmatprep.subr.mxu0 %v11206_v1  ;;  %3815 = vmatprep.subr.mxu1 %v11207_v27 }
 0x930   :  { %v3321_v4 = vpop.f32.mrf.mxu0  ;;  %v3392_v38 = vpop.f32.mrf.mxu1 }
 0x932   :  { %v3323_v7 = vpop.f32.mrf.mxu0  ;;  %v3394_v17 = vpop.f32.mrf.mxu1 }
 0x939   :  { %v3466_v6 = vpop.f32.mrf.mxu0  ;;  %v3537_v48 = vpop.f32.mrf.mxu1 }
 0x93a   :  { %v3467_v16 = vadd.f32 %v3466_v6, %v3321_v4  ;;  %v3538_v50 = vadd.f32 %v3537_v48, %v3392_v38  ;;  %v11233_v48 = vld [vmem:[#allocation20_spill] sm:$0xff] }
 0x93b   :  { %v3468_v0 = vpop.f32.mrf.mxu0  ;;  %v3539_v47 = vpop.f32.mrf.mxu1 }
 0x93c   :  { %v3542_v20 = vadd.f32 %v3467_v16, %v8936_v18  ;;  %v3469_v39 = vadd.f32 %v3468_v0, %v3323_v7  ;;  %v3540_v1 = vadd.f32 %v3539_v47, %v3394_v17  ;;  %v3544_v4 = vadd.f32 %v3538_v50, %v8955_v34  ;;  %v11246_v50 = vld [vmem:[#allocation25_spill] sm:$0xff] }
 0x93e   :  { %v5872_v8 = vmul.f32 -1.442695, %v3542_v20  ;;  %v3543_v21 = vadd.f32 %v3469_v39, %v8940_v28  ;;  %v3545_v27 = vadd.f32 %v3540_v1, %v8950_v14 }
 0x940   :  { %6275 = vpow2.f32 %v5872_v8  ;;  %v5873_v58 = vmul.f32 -1.442695, %v3543_v21  ;;  %v5874_v37 = vmul.f32 -1.442695, %v3545_v27  ;;  %v11234_v8 = vld [vmem:[#allocation13_spill] sm:$0xff] }
 0x942   :  { %6277 = vpow2.f32 %v5873_v58 }
 0x943   :  { %6279 = vpow2.f32 %v5874_v37 }
 0x94d   :  { %v6276_v54 = vpop.eup %6275 }
 0x94e   :  { %v3549_v6 = vadd.f32 1.0, %v6276_v54 }
 0x94f   :  { %v6278_v46 = vpop.eup %6277 }
 0x950   :  { %6281 = vrcp.f32 %v3549_v6  ;;  %v3555_v0 = vadd.f32 1.0, %v6278_v46  ;;  %v6280_v39 = vpop.eup %6279  ;;  %v11236_v6 = vld [vmem:[#allocation15_spill] sm:$0xff] }
 0x951   :  { %6283 = vtanh.f32 %v3544_v4  ;;  %v3562_v58 = vadd.f32 1.0, %v6280_v39  ;;  %v11235_v4 = vld [vmem:[#allocation22_spill] sm:$0xff]  ;;  %v11238_v39 = vld [vmem:[#allocation17_spill] sm:$0xff] }
 0x952   :  { %6285 = vrcp.f32 %v3555_v0  ;;  %v11237_v0 = vld [vmem:[#allocation24_spill] sm:$0xff] }
 0x953   :  { %6287 = vrcp.f32 %v3562_v58  ;;  %v11242_v58 = vld [vmem:[#allocation21_spill] sm:$0xff] }
 0x95d   :  { %v6282_v7 = vpop.eup %6281 }
 0x95e   :  { %v6284_v21 = vpop.eup %6283 }
 0x95f   :  { %v6286_v16 = vpop.eup %6285  ;;  %v3566_v47 = vmul.f32 %v6284_v21, %v6282_v7  ;;  %v11239_v7 = vld [vmem:[#allocation26_spill] sm:$0xff]  ;;  %v11240_v21 = vld [vmem:[#allocation19_spill] sm:$0xff] }
 0x960   :  { %v3565_v17 = vmul.f32 %v6286_v16, %v8967_v12  ;;  %v6288_v37 = vpop.eup %6287  ;;  %v11241_v16 = vld [vmem:[#allocation28_spill] sm:$0xff] }
 0x962   :  { %v3567_v1 = vadd.f32 %v3566_v47, %v3565_v17  ;;  %v11243_v47 = vld [vmem:[#allocation30_spill] sm:$0xff]  ;;  %v11244_v17 = vld [vmem:[#allocation23_spill] sm:$0xff] }
 0x964   :  { %6289 = vtanh.f32 %v3567_v1  ;;  %v9074_v54 = vsel %vm2580_vm15, %v3567_v1, %v8967_v12  ;;  %v5876_v12 = vld [vmem:[%s10364_s1 + $0x28] sm:$0xff]  ;;  %v11245_v1 = vld [vmem:[#allocation32_spill] sm:$0xff] }
 0x971   :  { %v6290_v46 = vpop.eup %6289 }
 0x972   :  { %v3569_v27 = vmul.f32 %v6290_v46, %v6288_v37  ;;  %v11247_v37 = vld [vmem:[#allocation34_spill] sm:$0xff]  ;;  %v11248_v46 = vld [vmem:[#allocation27_spill] sm:$0xff] }
 0x974   :  { %v3570_v38 = vsel %vm2580_vm15, %v3569_v27, 0.0  ;;  %v9081_v20 = vsel %vm2580_vm15, %v3569_v27, %v8972_v11  ;;  %v11232_v11 = vld [vmem:[#allocation11_spill] sm:$0xff]  ;;  %v11249_v27 = vld [vmem:[#allocation38_spill] sm:$0xff] }
 0x975   :  { %5875 = vst [vmem:[%s10366_s12 + $0x68] sm:$0xff] %v3570_v38  ;;  %3640 = vmatmul.mubr.f32.vlgmr.msra.gmra.mxu0 %v9081_v20  ;;  %3711 = vmatmul.mubr.f32.vlgmr.msra.gmra.mxu1 %v9081_v20  ;;  %v11250_v38 = vld [vmem:[#allocation29_spill] sm:$0xff] }
 0x976   :  { %3745 = vmatpush1.msra.mxu0 %v11166_v43  ;;  %3816 = vmatpush1.msra.mxu1 %v8803_v26 }
 0x977   :  { %3746 = vmatprep.subr.mxu0 %v11167_v42  ;;  %3817 = vmatprep.subr.mxu1 %v8815_v62 }
 0x978   :  { %3747 = vmatpush1.msra.mxu0 %v11168_v9  ;;  %3818 = vmatpush1.msra.mxu1 %v8822_v15 }
 0x979   :  { %3748 = vmatprep.subr.mxu0 %v11169_v33  ;;  %3819 = vmatprep.subr.mxu1 %v8829_v32 }
 0x97a   :  { %3749 = vmatpush1.msra.mxu0 %v11170_v2  ;;  %3820 = vmatpush1.msra.mxu1 %v8836_v31 }
 0x97b   :  { %3750 = vmatprep.subr.mxu0 %v11171_v10  ;;  %3821 = vmatprep.subr.mxu1 %v8844_v24 }
 0x97c   :  { %3751 = vmatpush1.msra.mxu0 %v11172_v19  ;;  %3784 = vmatprep.mubr.f32.mxu0 %v10810_v55 }
 0x97d   :  { %3822 = vmatpush1.msra.mxu1 %v8850_v61  ;;  %3855 = vmatprep.mubr.f32.mxu1 %v10810_v55 }
 0x97e   :  { %5877 = vmatmul.mubr.msk.f32.vlgmr.msra.gmra.mxu0 %vm414_vm1, %v5876_v12  ;;  %5878 = vmatmul.mubr.msk.f32.vlgmr.msra.gmra.mxu1 %vm414_vm1, %v5876_v12  ;;  %v11251_v12 = vld [vmem:[#allocation63_spill] sm:$0xff] }
 0x97f   :  { %3895 = vmatprep.subr.mxu0 %v8365_v44  ;;  %3966 = vmatprep.subr.mxu1 %v8370_v56  ;;  %v11209_v44 = vld [vmem:[#allocation41_spill] sm:$0xff]  ;;  %v11210_v56 = vld [vmem:[#allocation51_spill] sm:$0xff] }
 0x980   :  { %3896 = vmatpush1.msra.mxu0 %v8377_v52  ;;  %3967 = vmatpush1.msra.mxu1 %v8382_v25  ;;  %v11211_v52 = vld [vmem:[#allocation44_spill] sm:$0xff]  ;;  %v11212_v25 = vld [vmem:[#allocation55_spill] sm:$0xff] }
 0x981   :  { %3897 = vmatprep.subr.mxu0 %v8391_v40  ;;  %3968 = vmatprep.subr.mxu1 %v8396_v59  ;;  %v11213_v40 = vld [vmem:[#allocation46_spill] sm:$0xff]  ;;  %v11214_v59 = vld [vmem:[#allocation47_spill] sm:$0xff] }
 0x982   :  { %3898 = vmatpush1.msra.mxu0 %v8402_v51  ;;  %3969 = vmatpush1.msra.mxu1 %v8408_v36  ;;  %v11215_v51 = vld [vmem:[#allocation50_spill] sm:$0xff]  ;;  %v11216_v36 = vld [vmem:[#allocation52_spill] sm:$0xff] }
 0x983   :  { %3899 = vmatprep.subr.mxu0 %v8414_v49  ;;  %3970 = vmatprep.subr.mxu1 %v8420_v23  ;;  %v11217_v49 = vld [vmem:[#allocation53_spill] sm:$0xff] }
 0x984   :  { %3900 = vmatpush1.msra.mxu0 %v8426_v29  ;;  %3971 = vmatpush1.msra.mxu1 %v8432_v35  ;;  %v11218_v23 = vld [vmem:[#allocation49_spill] sm:$0xff]  ;;  %v11219_v29 = vld [vmem:[#allocation2_spill] sm:$0xff] }
 0x985   :  { %3901 = vmatprep.subr.mxu0 %v8438_v45  ;;  %3972 = vmatprep.subr.mxu1 %v8444_v30  ;;  %v11220_v35 = vld [vmem:[#allocation6_spill] sm:$0xff]  ;;  %v11221_v45 = vld [vmem:[#allocation3_spill] sm:$0xff]  ;;  %v11222_v30 = vld [vmem:[#allocation8_spill] sm:$0xff] }
 0x986   :  { %3902 = vmatpush1.msra.mxu0 %v8450_v13  ;;  %3973 = vmatpush1.msra.mxu1 %v8456_v22  ;;  %v11223_v13 = vld [vmem:[#allocation4_spill] sm:$0xff]  ;;  %v11224_v22 = vld [vmem:[#allocation10_spill] sm:$0xff] }
 0x987   :  { %3903 = vmatprep.subr.mxu0 %v8462_v3  ;;  %3974 = vmatprep.subr.mxu1 %v8468_v5  ;;  %v11225_v3 = vld [vmem:[#allocation5_spill] sm:$0xff]  ;;  %v11226_v5 = vld [vmem:[#allocation12_spill] sm:$0xff] }
 0x988   :  { %3904 = vmatpush1.msra.mxu0 %v8474_v53  ;;  %3975 = vmatpush1.msra.mxu1 %v8480_v57  ;;  %v11227_v53 = vld [vmem:[#allocation7_spill] sm:$0xff]  ;;  %v11228_v57 = vld [vmem:[#allocation14_spill] sm:$0xff] }
 0x989   :  { %3905 = vmatprep.subr.mxu0 %v8486_v60  ;;  %3976 = vmatprep.subr.mxu1 %v8492_v63  ;;  %v11229_v60 = vld [vmem:[#allocation9_spill] sm:$0xff]  ;;  %v11230_v63 = vld [vmem:[#allocation16_spill] sm:$0xff] }
 0x98a   :  { %3906 = vmatpush1.msra.mxu0 %v8498_v41  ;;  %3977 = vmatpush1.msra.mxu1 %v11209_v44  ;;  %v11231_v41 = vld [vmem:[#allocation18_spill] sm:$0xff] }
 0x98b   :  { %3907 = vmatprep.subr.mxu0 %v11210_v56  ;;  %3978 = vmatprep.subr.mxu1 %v11211_v52 }
 0x98c   :  { %3908 = vmatpush1.msra.mxu0 %v11212_v25  ;;  %3979 = vmatpush1.msra.mxu1 %v11213_v40 }
 0x98d   :  { %3909 = vmatprep.subr.mxu0 %v11214_v59  ;;  %3980 = vmatprep.subr.mxu1 %v11215_v51 }
 0x98e   :  { %3910 = vmatpush1.msra.mxu0 %v11216_v36  ;;  %3981 = vmatpush1.msra.mxu1 %v11217_v49 }
 0x98f   :  { %3911 = vmatprep.subr.mxu0 %v11218_v23  ;;  %3982 = vmatprep.subr.mxu1 %v11219_v29 }
 0x990   :  { %3912 = vmatpush1.msra.mxu0 %v11220_v35  ;;  %3983 = vmatpush1.msra.mxu1 %v11221_v45 }
 0x991   :  { %3913 = vmatprep.subr.mxu0 %v11222_v30  ;;  %3984 = vmatprep.subr.mxu1 %v11223_v13 }
 0x992   :  { %3914 = vmatpush1.msra.mxu0 %v11224_v22  ;;  %3985 = vmatpush1.msra.mxu1 %v11225_v3 }
 0x993   :  { %3915 = vmatprep.subr.mxu0 %v11226_v5  ;;  %3986 = vmatprep.subr.mxu1 %v11227_v53 }
 0x994   :  { %3916 = vmatpush1.msra.mxu0 %v11228_v57  ;;  %3987 = vmatpush1.msra.mxu1 %v11229_v60 }
 0x995   :  { %3917 = vmatprep.subr.mxu0 %v11230_v63  ;;  %3988 = vmatprep.subr.mxu1 %v11231_v41 }
 0x996   :  { %3918 = vmatpush1.msra.mxu0 %v11232_v11  ;;  %3989 = vmatpush1.msra.mxu1 %v11233_v48 }
 0x997   :  { %3919 = vmatprep.subr.mxu0 %v11234_v8  ;;  %3990 = vmatprep.subr.mxu1 %v11235_v4 }
 0x998   :  { %3920 = vmatpush1.msra.mxu0 %v11236_v6  ;;  %3991 = vmatpush1.msra.mxu1 %v11237_v0 }
 0x999   :  { %3921 = vmatprep.subr.mxu0 %v11238_v39  ;;  %3992 = vmatprep.subr.mxu1 %v11239_v7 }
 0x99a   :  { %3922 = vmatpush1.msra.mxu0 %v11240_v21  ;;  %3993 = vmatpush1.msra.mxu1 %v11241_v16  ;;  %v9529_v21 = vld [vmem:[%s10367_s6 + $0x70] sm:$0xff] }
 0x99b   :  { %3923 = vmatprep.subr.mxu0 %v11242_v58  ;;  %3994 = vmatprep.subr.mxu1 %v11243_v47  ;;  %11281 = vst [vmem:[#allocation4_spill] sm:$0xff] %v9529_v21 }
 0x99c   :  { %3924 = vmatpush1.msra.mxu0 %v11244_v17  ;;  %3995 = vmatpush1.msra.mxu1 %v11245_v1 }
 0x99d   :  { %3925 = vmatprep.subr.mxu0 %v11246_v50  ;;  %3996 = vmatprep.subr.mxu1 %v11247_v37  ;;  %v9313_v37 = vld [vmem:[%s10367_s6 + $0x190] sm:$0xff] }
 0x99e   :  { %3926 = vmatpush1.msra.mxu0 %v11248_v46  ;;  %3997 = vmatpush1.msra.mxu1 %v11249_v27  ;;  %v9319_v46 = vld [vmem:[%s10367_s6 + $0x168] sm:$0xff]  ;;  %v9325_v27 = vld [vmem:[%s10367_s6 + $0x178] sm:$0xff] }
 0x99f   :  { %3959 = vmatprep.mubr.f32.mxu0 %v10810_v55  ;;  %4030 = vmatprep.mubr.f32.mxu1 %v10810_v55 }
 0x9a0   :  { %4064 = vmatprep.subr.mxu0 %v11250_v38  ;;  %4135 = vmatprep.subr.mxu1 %v11251_v12  ;;  %v9331_v38 = vld [vmem:[%s10367_s6 + $0x160] sm:$0xff]  ;;  %v9337_v12 = vld [vmem:[%s10367_s6 + $0x170] sm:$0xff] }
 0xa35   :  { %v3641_v44 = vpop.f32.mrf.mxu0  ;;  %v3712_v56 = vpop.f32.mrf.mxu1 }
 0xa37   :  { %v3643_v52 = vpop.f32.mrf.mxu0  ;;  %v3714_v40 = vpop.f32.mrf.mxu1 }
 0xa3e   :  { %v3786_v25 = vpop.f32.mrf.mxu0  ;;  %v3857_v49 = vpop.f32.mrf.mxu1 }
 0xa3f   :  { %v3787_v59 = vadd.f32 %v3786_v25, %v3641_v44  ;;  %v3858_v3 = vadd.f32 %v3857_v49, %v3712_v56  ;;  %v9343_v44 = vld [vmem:[%s10367_s6 + $0x148] sm:$0xff]  ;;  %v9349_v56 = vld [vmem:[%s10367_s6 + $0x158] sm:$0xff]  ;;  %v9361_v25 = vld [vmem:[%s10367_s6 + $0x150] sm:$0xff] }
 0xa40   :  { %v3788_v51 = vpop.f32.mrf.mxu0  ;;  %v3859_v30 = vpop.f32.mrf.mxu1  ;;  %11253 = vst [vmem:[#allocation59_spill] sm:$0xff] %v9361_v25  ;;  %v9391_v49 = vld [vmem:[%s10367_s6 + $0x108] sm:$0xff] }
 0xa41   :  { %v3862_v36 = vadd.f32 %v3787_v59, %v8936_v18  ;;  %v3789_v23 = vadd.f32 %v3788_v51, %v3643_v52  ;;  %v3860_v13 = vadd.f32 %v3859_v30, %v3714_v40  ;;  %v3864_v57 = vadd.f32 %v3858_v3, %v8955_v34  ;;  %v9355_v52 = vld [vmem:[%s10367_s6 + $0x140] sm:$0xff]  ;;  %v9367_v40 = vld [vmem:[%s10367_s6 + $0x128] sm:$0xff]  ;;  %v9373_v59 = vld [vmem:[%s10367_s6 + $0x138] sm:$0xff]  ;;  %11258 = vst [vmem:[#allocation36_spill] sm:$0xff] %v9391_v49 }
 0xa42   :  { %11254 = vst [vmem:[#allocation60_spill] sm:$0xff] %v9367_v40  ;;  %11255 = vst [vmem:[#allocation39_spill] sm:$0xff] %v9373_v59  ;;  %v9379_v51 = vld [vmem:[%s10367_s6 + $0x120] sm:$0xff]  ;;  %v9421_v30 = vld [vmem:[%s10367_s6 + $0xf8] sm:$0xff] }
 0xa43   :  { %v5879_v29 = vmul.f32 -1.442695, %v3862_v36  ;;  %v3863_v35 = vadd.f32 %v3789_v23, %v8940_v28  ;;  %v3865_v22 = vadd.f32 %v3860_v13, %v8950_v14  ;;  %11256 = vst [vmem:[#allocation56_spill] sm:$0xff] %v9379_v51  ;;  %v9385_v36 = vld [vmem:[%s10367_s6 + $0x130] sm:$0xff]  ;;  %v9397_v23 = vld [vmem:[%s10367_s6 + $0x118] sm:$0xff]  ;;  %11263 = vst [vmem:[#allocation65_spill] sm:$0xff] %v9421_v30 }
 0xa44   :  { %11257 = vst [vmem:[#allocation48_spill] sm:$0xff] %v9385_v36  ;;  %11259 = vst [vmem:[#allocation31_spill] sm:$0xff] %v9397_v23  ;;  %v9427_v13 = vld [vmem:[%s10367_s6 + $0xe0] sm:$0xff]  ;;  %v9439_v3 = vld [vmem:[%s10367_s6 + $0xc8] sm:$0xff] }
 0xa45   :  { %6291 = vpow2.f32 %v5879_v29  ;;  %v5880_v45 = vmul.f32 -1.442695, %v3863_v35  ;;  %v5881_v5 = vmul.f32 -1.442695, %v3865_v22  ;;  %v9403_v29 = vld [vmem:[%s10367_s6 + $0x100] sm:$0xff]  ;;  %v9409_v35 = vld [vmem:[%s10367_s6 + $0x110] sm:$0xff] }
 0xa46   :  { %11260 = vst [vmem:[#allocation33_spill] sm:$0xff] %v9403_v29  ;;  %11261 = vst [vmem:[#allocation62_spill] sm:$0xff] %v9409_v35  ;;  %v9433_v22 = vld [vmem:[%s10367_s6 + $0xf0] sm:$0xff] }
 0xa47   :  { %6293 = vpow2.f32 %v5880_v45  ;;  %v9415_v45 = vld [vmem:[%s10367_s6 + $0xe8] sm:$0xff]  ;;  %11264 = vst [vmem:[#allocation66_spill] sm:$0xff] %v9427_v13  ;;  %11265 = vst [vmem:[#allocation37_spill] sm:$0xff] %v9433_v22 }
 0xa48   :  { %6295 = vpow2.f32 %v5881_v5  ;;  %11262 = vst [vmem:[#allocation64_spill] sm:$0xff] %v9415_v45  ;;  %11266 = vst [vmem:[#allocation45_spill] sm:$0xff] %v9439_v3  ;;  %v9445_v5 = vld [vmem:[%s10367_s6 + $0xd8] sm:$0xff] }
 0xa49   :  { %11267 = vst [vmem:[#allocation41_spill] sm:$0xff] %v9445_v5 }
 0xa52   :  { %v6292_v53 = vpop.eup %6291 }
 0xa53   :  { %v3869_v60 = vadd.f32 1.0, %v6292_v53  ;;  %v9451_v53 = vld [vmem:[%s10367_s6 + $0xc0] sm:$0xff] }
 0xa54   :  { %v6294_v63 = vpop.eup %6293  ;;  %11268 = vst [vmem:[#allocation51_spill] sm:$0xff] %v9451_v53 }
 0xa55   :  { %6297 = vrcp.f32 %v3869_v60  ;;  %v3875_v41 = vadd.f32 1.0, %v6294_v63  ;;  %v6296_v11 = vpop.eup %6295  ;;  %v9463_v60 = vld [vmem:[%s10367_s6 + $0xa8] sm:$0xff]  ;;  %v9469_v63 = vld [vmem:[%s10367_s6 + $0xb8] sm:$0xff] }
 0xa56   :  { %6299 = vtanh.f32 %v3864_v57  ;;  %v3882_v6 = vadd.f32 1.0, %v6296_v11  ;;  %v9457_v57 = vld [vmem:[%s10367_s6 + $0xd0] sm:$0xff]  ;;  %11270 = vst [vmem:[#allocation55_spill] sm:$0xff] %v9463_v60  ;;  %11271 = vst [vmem:[#allocation46_spill] sm:$0xff] %v9469_v63 }
 0xa57   :  { %6301 = vrcp.f32 %v3875_v41  ;;  %11269 = vst [vmem:[#allocation44_spill] sm:$0xff] %v9457_v57  ;;  %v9475_v41 = vld [vmem:[%s10367_s6 + $0xa0] sm:$0xff]  ;;  %v9481_v11 = vld [vmem:[%s10367_s6 + $0xb0] sm:$0xff] }
 0xa58   :  { %6303 = vrcp.f32 %v3882_v6  ;;  %11272 = vst [vmem:[#allocation47_spill] sm:$0xff] %v9475_v41  ;;  %11273 = vst [vmem:[#allocation50_spill] sm:$0xff] %v9481_v11  ;;  %v9505_v6 = vld [vmem:[%s10367_s6 + $0x90] sm:$0xff] }
 0xa59   :  { %11277 = vst [vmem:[#allocation2_spill] sm:$0xff] %v9505_v6 }
 0xa62   :  { %v6298_v48 = vpop.eup %6297 }
 0xa63   :  { %v6300_v8 = vpop.eup %6299 }
 0xa64   :  { %v6302_v4 = vpop.eup %6301  ;;  %v3886_v0 = vmul.f32 %v6300_v8, %v6298_v48  ;;  %v9487_v48 = vld [vmem:[%s10367_s6 + $0x88] sm:$0xff]  ;;  %v9493_v8 = vld [vmem:[%s10367_s6 + $0x98] sm:$0xff] }
 0xa65   :  { %v3885_v39 = vmul.f32 %v6302_v4, %v9074_v54  ;;  %v6304_v58 = vpop.eup %6303  ;;  %11274 = vst [vmem:[#allocation52_spill] sm:$0xff] %v9487_v48  ;;  %11275 = vst [vmem:[#allocation53_spill] sm:$0xff] %v9493_v8  ;;  %v9499_v4 = vld [vmem:[%s10367_s6 + $0x80] sm:$0xff] }
 0xa66   :  { %11276 = vst [vmem:[#allocation49_spill] sm:$0xff] %v9499_v4 }
 0xa67   :  { %v3887_v7 = vadd.f32 %v3886_v0, %v3885_v39  ;;  %v9511_v0 = vld [vmem:[%s10367_s6 + $0x68] sm:$0xff]  ;;  %v9517_v39 = vld [vmem:[%s10367_s6 + $0x78] sm:$0xff] }
 0xa68   :  { %11278 = vst [vmem:[#allocation6_spill] sm:$0xff] %v9511_v0  ;;  %11279 = vst [vmem:[#allocation3_spill] sm:$0xff] %v9517_v39 }
 0xa69   :  { %6305 = vtanh.f32 %v3887_v7  ;;  %v9185_v16 = vsel %vm2252_vm14, %v3887_v7, %v9074_v54  ;;  %v9301_v54 = vld [vmem:[%s10367_s6 + $0x198] sm:$0xff]  ;;  %v9523_v7 = vld [vmem:[%s10367_s6 + $0x60] sm:$0xff] }
 0xa6a   :  { %11280 = vst [vmem:[#allocation8_spill] sm:$0xff] %v9523_v7 }
 0xa76   :  { %v6306_v47 = vpop.eup %6305 }
 0xa77   :  { %v3889_v17 = vmul.f32 %v6306_v47, %v6304_v58  ;;  %v9535_v58 = vld [vmem:[%s10367_s6 + $0x48] sm:$0xff]  ;;  %v9541_v47 = vld [vmem:[%s10367_s6 + $0x58] sm:$0xff] }
 0xa78   :  { %11282 = vst [vmem:[#allocation10_spill] sm:$0xff] %v9535_v58  ;;  %11283 = vst [vmem:[#allocation5_spill] sm:$0xff] %v9541_v47 }
 0xa79   :  { %v3890_v1 = vsel %vm2252_vm14, %v3889_v17, 0.0  ;;  %v9192_v50 = vsel %vm2252_vm14, %v3889_v17, %v9081_v20  ;;  %v9307_v20 = vld [vmem:[%s10367_s6 + $0x180] sm:$0xff] }
 0xa7a   :  { %5882 = vst [vmem:[%s10366_s12 + $0x58] sm:$0xff] %v3890_v1  ;;  %3960 = vmatmul.mubr.f32.vlgmr.msra.gmra.mxu0 %v9192_v50  ;;  %4031 = vmatmul.mubr.f32.vlgmr.msra.gmra.mxu1 %v9192_v50  ;;  %v9547_v17 = vld [vmem:[%s10367_s6 + $0x40] sm:$0xff]  ;;  %v9553_v1 = vld [vmem:[%s10367_s6 + $0x50] sm:$0xff] }
 0xa7b   :  { %4065 = vmatpush1.msra.mxu0 %v11166_v43  ;;  %4136 = vmatpush1.msra.mxu1 %v8803_v26  ;;  %v9247_v26 = vld [vmem:[%s10367_s6 + $0x1c8] sm:$0xff]  ;;  %v9259_v43 = vld [vmem:[%s10367_s6 + $0x1c0] sm:$0xff]  ;;  %11284 = vst [vmem:[#allocation12_spill] sm:$0xff] %v9547_v17  ;;  %11285 = vst [vmem:[#allocation7_spill] sm:$0xff] %v9553_v1 }
 0xa7c   :  { %4066 = vmatprep.subr.mxu0 %v11167_v42  ;;  %4137 = vmatprep.subr.mxu1 %v8815_v62  ;;  %v5883_v62 = vld [vmem:[%s10364_s1 + $0x20] sm:$0xff]  ;;  %v9265_v42 = vld [vmem:[%s10367_s6 + $0x1d0] sm:$0xff] }
 0xa7d   :  { %4067 = vmatpush1.msra.mxu0 %v11168_v9  ;;  %4138 = vmatpush1.msra.mxu1 %v8822_v15  ;;  %v9229_v15 = vld [vmem:[%s10367_s6 + $0x1f8] sm:$0xff]  ;;  %v9271_v9 = vld [vmem:[%s10367_s6 + $0x1a8] sm:$0xff] }
 0xa7e   :  { %4068 = vmatprep.subr.mxu0 %v11169_v33  ;;  %4139 = vmatprep.subr.mxu1 %v8829_v32  ;;  %v9223_v32 = vld [vmem:[%s10367_s6 + $0x1e8] sm:$0xff]  ;;  %v9277_v33 = vld [vmem:[%s10367_s6 + $0x1b8] sm:$0xff] }
 0xa7f   :  { %4069 = vmatpush1.msra.mxu0 %v11170_v2  ;;  %4140 = vmatpush1.msra.mxu1 %v8836_v31  ;;  %v9241_v31 = vld [vmem:[%s10367_s6 + $0x1f0] sm:$0xff]  ;;  %v9283_v2 = vld [vmem:[%s10367_s6 + $0x1a0] sm:$0xff] }
 0xa80   :  { %4070 = vmatprep.subr.mxu0 %v11171_v10  ;;  %4141 = vmatprep.subr.mxu1 %v8844_v24  ;;  %v9253_v24 = vld [vmem:[%s10367_s6 + $0x1d8] sm:$0xff]  ;;  %v9289_v10 = vld [vmem:[%s10367_s6 + $0x1b0] sm:$0xff] }
 0xa81   :  { %4071 = vmatpush1.msra.mxu0 %v11172_v19  ;;  %4104 = vmatprep.mubr.f32.mxu0 %v10810_v55  ;;  %v9295_v19 = vld [vmem:[%s10367_s6 + $0x188] sm:$0xff] }
 0xa82   :  { %4142 = vmatpush1.msra.mxu1 %v8850_v61  ;;  %4175 = vmatprep.mubr.f32.mxu1 %v10810_v55  ;;  %v9235_v61 = vld [vmem:[%s10367_s6 + $0x1e0] sm:$0xff] }
 0xa83   :  { %5884 = vmatmul.mubr.msk.f32.vlgmr.msra.gmra.mxu0 %vm414_vm1, %v5883_v62  ;;  %5885 = vmatmul.mubr.msk.f32.vlgmr.msra.gmra.mxu1 %vm414_vm1, %v5883_v62  ;;  %v9559_v62 = vld [vmem:[%s10367_s6 + $0x28] sm:$0xff] }
 0xa84   :  { %4215 = vmatprep.subr.mxu0 %v9223_v32  ;;  %4286 = vmatprep.subr.mxu1 %v9229_v15  ;;  %11286 = vst [vmem:[#allocation14_spill] sm:$0xff] %v9559_v62 }
 0xa85   :  { %4216 = vmatpush1.msra.mxu0 %v9235_v61  ;;  %4287 = vmatpush1.msra.mxu1 %v9241_v31 }
 0xa86   :  { %4217 = vmatprep.subr.mxu0 %v9247_v26  ;;  %4288 = vmatprep.subr.mxu1 %v9253_v24 }
 0xa87   :  { %4218 = vmatpush1.msra.mxu0 %v9259_v43  ;;  %4289 = vmatpush1.msra.mxu1 %v9265_v42 }
 0xa88   :  { %4219 = vmatprep.subr.mxu0 %v9271_v9  ;;  %4290 = vmatprep.subr.mxu1 %v9277_v33 }
 0xa89   :  { %4220 = vmatpush1.msra.mxu0 %v9283_v2  ;;  %4291 = vmatpush1.msra.mxu1 %v9289_v10 }
 0xa8a   :  { %4221 = vmatprep.subr.mxu0 %v9295_v19  ;;  %4292 = vmatprep.subr.mxu1 %v9301_v54 }
 0xa8b   :  { %4222 = vmatpush1.msra.mxu0 %v9307_v20  ;;  %4293 = vmatpush1.msra.mxu1 %v9313_v37 }
 0xa8c   :  { %4223 = vmatprep.subr.mxu0 %v9319_v46  ;;  %4294 = vmatprep.subr.mxu1 %v9325_v27 }
 0xa8d   :  { %4224 = vmatpush1.msra.mxu0 %v9331_v38  ;;  %4295 = vmatpush1.msra.mxu1 %v9337_v12 }
 0xa8e   :  { %4225 = vmatprep.subr.mxu0 %v9343_v44  ;;  %4296 = vmatprep.subr.mxu1 %v9349_v56 }
 0xa8f   :  { %4226 = vmatpush1.msra.mxu0 %v9355_v52  ;;  %4297 = vmatpush1.msra.mxu1 %v9361_v25 }
 0xa90   :  { %4227 = vmatprep.subr.mxu0 %v9367_v40  ;;  %4298 = vmatprep.subr.mxu1 %v9373_v59 }
 0xa91   :  { %4228 = vmatpush1.msra.mxu0 %v9379_v51  ;;  %4299 = vmatpush1.msra.mxu1 %v9385_v36 }
 0xa92   :  { %4229 = vmatprep.subr.mxu0 %v9391_v49  ;;  %4300 = vmatprep.subr.mxu1 %v9397_v23 }
 0xa93   :  { %4230 = vmatpush1.msra.mxu0 %v9403_v29  ;;  %4301 = vmatpush1.msra.mxu1 %v9409_v35 }
 0xa94   :  { %4231 = vmatprep.subr.mxu0 %v9415_v45  ;;  %4302 = vmatprep.subr.mxu1 %v9421_v30 }
 0xa95   :  { %4232 = vmatpush1.msra.mxu0 %v9427_v13  ;;  %4303 = vmatpush1.msra.mxu1 %v9433_v22 }
 0xa96   :  { %4233 = vmatprep.subr.mxu0 %v9439_v3  ;;  %4304 = vmatprep.subr.mxu1 %v9445_v5 }
 0xa97   :  { %4234 = vmatpush1.msra.mxu0 %v9451_v53  ;;  %4305 = vmatpush1.msra.mxu1 %v9457_v57 }
 0xa98   :  { %4235 = vmatprep.subr.mxu0 %v9463_v60  ;;  %4306 = vmatprep.subr.mxu1 %v9469_v63 }
 0xa99   :  { %4236 = vmatpush1.msra.mxu0 %v9475_v41  ;;  %4307 = vmatpush1.msra.mxu1 %v9481_v11 }
 0xa9a   :  { %4237 = vmatprep.subr.mxu0 %v9487_v48  ;;  %4308 = vmatprep.subr.mxu1 %v9493_v8 }
 0xa9b   :  { %4238 = vmatpush1.msra.mxu0 %v9499_v4  ;;  %4309 = vmatpush1.msra.mxu1 %v9505_v6 }
 0xa9c   :  { %4239 = vmatprep.subr.mxu0 %v9511_v0  ;;  %4310 = vmatprep.subr.mxu1 %v9517_v39 }
 0xa9d   :  { %4240 = vmatpush1.msra.mxu0 %v9523_v7  ;;  %4311 = vmatpush1.msra.mxu1 %v9529_v21 }
 0xa9e   :  { %4241 = vmatprep.subr.mxu0 %v9535_v58  ;;  %4312 = vmatprep.subr.mxu1 %v9541_v47  ;;  %v9565_v47 = vld [vmem:[%s10367_s6 + $0x38] sm:$0xff] }
 0xa9f   :  { %4242 = vmatpush1.msra.mxu0 %v9547_v17  ;;  %4313 = vmatpush1.msra.mxu1 %v9553_v1  ;;  %11287 = vst [vmem:[#allocation9_spill] sm:$0xff] %v9565_v47  ;;  %v9571_v17 = vld [vmem:[%s10367_s6 + $0x20] sm:$0xff]  ;;  %v9577_v1 = vld [vmem:[%s10367_s6 + $0x30] sm:$0xff] }
 0xaa0   :  { %4243 = vmatprep.subr.mxu0 %v9559_v62  ;;  %4314 = vmatprep.subr.mxu1 %v9565_v47  ;;  %11288 = vst [vmem:[#allocation16_spill] sm:$0xff] %v9571_v17  ;;  %11289 = vst [vmem:[#allocation18_spill] sm:$0xff] %v9577_v1  ;;  %v9583_v62 = vld [vmem:[%s10367_s6 + $0x8] sm:$0xff]  ;;  %v9589_v47 = vld [vmem:[%s10367_s6 + $0x18] sm:$0xff] }
 0xaa1   :  { %4244 = vmatpush1.msra.mxu0 %v9571_v17  ;;  %4315 = vmatpush1.msra.mxu1 %v9577_v1  ;;  %11290 = vst [vmem:[#allocation11_spill] sm:$0xff] %v9583_v62  ;;  %11291 = vst [vmem:[#allocation20_spill] sm:$0xff] %v9589_v47  ;;  %v9595_v17 = vld [vmem:[%s10367_s6] sm:$0xff]  ;;  %v9601_v1 = vld [vmem:[%s10367_s6 + $0x10] sm:$0xff] }
 0xaa2   :  { %4245 = vmatprep.subr.mxu0 %v9583_v62  ;;  %4316 = vmatprep.subr.mxu1 %v9589_v47  ;;  %11292 = vst [vmem:[#allocation13_spill] sm:$0xff] %v9595_v17  ;;  %11293 = vst [vmem:[#allocation22_spill] sm:$0xff] %v9601_v1  ;;  %v9609_v47 = vld [vmem:[%s10368_s5 + $0x68] sm:$0xff] }
 0xaa3   :  { %4246 = vmatpush1.msra.mxu0 %v9595_v17  ;;  %4317 = vmatpush1.msra.mxu1 %v9601_v1  ;;  %11294 = vst [vmem:[#allocation15_spill] sm:$0xff] %v9609_v47  ;;  %v9615_v17 = vld [vmem:[%s10368_s5 + $0x78] sm:$0xff] }
 0xaa4   :  { %4279 = vmatprep.mubr.f32.mxu0 %v10810_v55  ;;  %4350 = vmatprep.mubr.f32.mxu1 %v10810_v55  ;;  %11295 = vst [vmem:[#allocation24_spill] sm:$0xff] %v9615_v17 }
 0xaa5   :  { %4384 = vmatprep.subr.mxu0 %v9609_v47  ;;  %4455 = vmatprep.subr.mxu1 %v9615_v17 }
 0xb3a   :  { %v3961_v62 = vpop.f32.mrf.mxu0  ;;  %v4032_v1 = vpop.f32.mrf.mxu1 }
 0xb3c   :  { %v3963_v58 = vpop.f32.mrf.mxu0  ;;  %v4034_v7 = vpop.f32.mrf.mxu1 }
 0xb43   :  { %v4106_v21 = vpop.f32.mrf.mxu0  ;;  %v4177_v4 = vpop.f32.mrf.mxu1 }
 0xb44   :  { %v4107_v39 = vadd.f32 %v4106_v21, %v3961_v62  ;;  %v4178_v60 = vadd.f32 %v4177_v4, %v4032_v1  ;;  %v9661_v1 = vld [vmem:[%s10368_s5 + $0x58] sm:$0xff] }
 0xb45   :  { %v4108_v0 = vpop.f32.mrf.mxu0  ;;  %v4179_v41 = vpop.f32.mrf.mxu1 }
 0xb46   :  { %v4182_v6 = vadd.f32 %v4107_v39, %v8936_v18  ;;  %v4109_v8 = vadd.f32 %v4108_v0, %v3963_v58  ;;  %v4180_v63 = vadd.f32 %v4179_v41, %v4034_v7  ;;  %v4184_v21 = vadd.f32 %v4178_v60, %v8955_v34  ;;  %v11297_v60 = vld [vmem:[#allocation41_spill] sm:$0xff] }
 0xb48   :  { %v5886_v48 = vmul.f32 -1.442695, %v4182_v6  ;;  %v4183_v47 = vadd.f32 %v4109_v8, %v8940_v28  ;;  %v4185_v17 = vadd.f32 %v4180_v63, %v8950_v14 }
 0xb4a   :  { %6307 = vpow2.f32 %v5886_v48  ;;  %v5887_v11 = vmul.f32 -1.442695, %v4183_v47  ;;  %v5888_v57 = vmul.f32 -1.442695, %v4185_v17  ;;  %v9655_v17 = vld [vmem:[%s10368_s5 + $0x48] sm:$0xff] }
 0xb4c   :  { %6309 = vpow2.f32 %v5887_v11 }
 0xb4d   :  { %6311 = vpow2.f32 %v5888_v57 }
 0xb57   :  { %v6308_v53 = vpop.eup %6307 }
 0xb58   :  { %v4189_v62 = vadd.f32 1.0, %v6308_v53 }
 0xb59   :  { %v6310_v5 = vpop.eup %6309 }
 0xb5a   :  { %6313 = vrcp.f32 %v4189_v62  ;;  %v4195_v0 = vadd.f32 1.0, %v6310_v5  ;;  %v6312_v8 = vpop.eup %6311  ;;  %v9673_v62 = vld [vmem:[%s10368_s5 + $0x50] sm:$0xff] }
 0xb5b   :  { %6315 = vtanh.f32 %v4184_v21  ;;  %v4202_v11 = vadd.f32 1.0, %v6312_v8  ;;  %v9667_v21 = vld [vmem:[%s10368_s5 + $0x40] sm:$0xff]  ;;  %v9685_v8 = vld [vmem:[%s10368_s5 + $0x38] sm:$0xff] }
 0xb5c   :  { %6317 = vrcp.f32 %v4195_v0  ;;  %v9679_v0 = vld [vmem:[%s10368_s5 + $0x28] sm:$0xff] }
 0xb5d   :  { %6319 = vrcp.f32 %v4202_v11  ;;  %v9709_v11 = vld [vmem:[%s10368_s5 + $0x18] sm:$0xff] }
 0xb67   :  { %v6314_v48 = vpop.eup %6313 }
 0xb68   :  { %v6316_v6 = vpop.eup %6315 }
 0xb69   :  { %v6318_v39 = vpop.eup %6317  ;;  %v4206_v41 = vmul.f32 %v6316_v6, %v6314_v48  ;;  %v9691_v48 = vld [vmem:[%s10368_s5 + $0x20] sm:$0xff]  ;;  %v9697_v6 = vld [vmem:[%s10368_s5 + $0x30] sm:$0xff] }
 0xb6a   :  { %v4205_v63 = vmul.f32 %v6318_v39, %v9185_v16  ;;  %v6320_v57 = vpop.eup %6319  ;;  %v9703_v39 = vld [vmem:[%s10368_s5 + $0x8] sm:$0xff] }
 0xb6c   :  { %v4207_v4 = vadd.f32 %v4206_v41, %v4205_v63  ;;  %v5890_v41 = vld [vmem:[%s10364_s1 + $0x18] sm:$0xff]  ;;  %v9718_v63 = vld [vmem:[%s10368_s5] sm:$0xff] }
 0xb6e   :  { %6321 = vtanh.f32 %v4207_v4  ;;  %v9626_v53 = vsel %vm1924_vm13, %v4207_v4, %v9185_v16  ;;  %v9643_v16 = vld [vmem:[%s10368_s5 + $0x60] sm:$0xff]  ;;  %v9725_v4 = vld [vmem:[%s10368_s5 + $0x10] sm:$0xff] }
 0xb7b   :  { %v6322_v5 = vpop.eup %6321 }
 0xb7c   :  { %v4209_v7 = vmul.f32 %v6322_v5, %v6320_v57  ;;  %v11298_v57 = vld [vmem:[#allocation51_spill] sm:$0xff]  ;;  %v11299_v5 = vld [vmem:[#allocation44_spill] sm:$0xff] }
 0xb7e   :  { %v4210_v58 = vsel %vm1924_vm13, %v4209_v7, 0.0  ;;  %v9633_v47 = vsel %vm1924_vm13, %v4209_v7, %v9192_v50  ;;  %v9649_v50 = vld [vmem:[%s10368_s5 + $0x70] sm:$0xff]  ;;  %v11300_v7 = vld [vmem:[#allocation55_spill] sm:$0xff] }
 0xb7f   :  { %5889 = vst [vmem:[%s10366_s12 + $0x48] sm:$0xff] %v4210_v58  ;;  %4280 = vmatmul.mubr.f32.vlgmr.msra.gmra.mxu0 %v9633_v47  ;;  %4351 = vmatmul.mubr.f32.vlgmr.msra.gmra.mxu1 %v9633_v47  ;;  %v11301_v58 = vld [vmem:[#allocation46_spill] sm:$0xff] }
 0xb80   :  { %4385 = vmatpush1.msra.mxu0 %v9643_v16  ;;  %4456 = vmatpush1.msra.mxu1 %v9649_v50 }
 0xb81   :  { %4386 = vmatprep.subr.mxu0 %v9655_v17  ;;  %4457 = vmatprep.subr.mxu1 %v9661_v1 }
 0xb82   :  { %4387 = vmatpush1.msra.mxu0 %v9667_v21  ;;  %4458 = vmatpush1.msra.mxu1 %v9673_v62 }
 0xb83   :  { %4388 = vmatprep.subr.mxu0 %v9679_v0  ;;  %4459 = vmatprep.subr.mxu1 %v9685_v8 }
 0xb84   :  { %4389 = vmatpush1.msra.mxu0 %v9691_v48  ;;  %4460 = vmatpush1.msra.mxu1 %v9697_v6 }
 0xb85   :  { %4390 = vmatprep.subr.mxu0 %v9703_v39  ;;  %4461 = vmatprep.subr.mxu1 %v9709_v11 }
 0xb86   :  { %4391 = vmatpush1.msra.mxu0 %v9718_v63  ;;  %4424 = vmatprep.mubr.f32.mxu0 %v10810_v55 }
 0xb87   :  { %4462 = vmatpush1.msra.mxu1 %v9725_v4  ;;  %4495 = vmatprep.mubr.f32.mxu1 %v10810_v55 }
 0xb88   :  { %5891 = vmatmul.mubr.msk.f32.vlgmr.msra.gmra.mxu0 %vm414_vm1, %v5890_v41  ;;  %5892 = vmatmul.mubr.msk.f32.vlgmr.msra.gmra.mxu1 %vm414_vm1, %v5890_v41  ;;  %v11302_v41 = vld [vmem:[#allocation47_spill] sm:$0xff] }
 0xb89   :  { %4535 = vmatprep.subr.mxu0 %v9223_v32  ;;  %4606 = vmatprep.subr.mxu1 %v9229_v15 }
 0xb8a   :  { %4536 = vmatpush1.msra.mxu0 %v9235_v61  ;;  %4607 = vmatpush1.msra.mxu1 %v9241_v31 }
 0xb8b   :  { %4537 = vmatprep.subr.mxu0 %v9247_v26  ;;  %4608 = vmatprep.subr.mxu1 %v9253_v24 }
 0xb8c   :  { %4538 = vmatpush1.msra.mxu0 %v9259_v43  ;;  %4609 = vmatpush1.msra.mxu1 %v9265_v42 }
 0xb8d   :  { %4539 = vmatprep.subr.mxu0 %v9271_v9  ;;  %4610 = vmatprep.subr.mxu1 %v9277_v33 }
 0xb8e   :  { %4540 = vmatpush1.msra.mxu0 %v9283_v2  ;;  %4611 = vmatpush1.msra.mxu1 %v9289_v10 }
 0xb8f   :  { %4541 = vmatprep.subr.mxu0 %v9295_v19  ;;  %4612 = vmatprep.subr.mxu1 %v9301_v54 }
 0xb90   :  { %4542 = vmatpush1.msra.mxu0 %v9307_v20  ;;  %4613 = vmatpush1.msra.mxu1 %v9313_v37 }
 0xb91   :  { %4543 = vmatprep.subr.mxu0 %v9319_v46  ;;  %4614 = vmatprep.subr.mxu1 %v9325_v27 }
 0xb92   :  { %4544 = vmatpush1.msra.mxu0 %v9331_v38  ;;  %4615 = vmatpush1.msra.mxu1 %v9337_v12 }
 0xb93   :  { %4545 = vmatprep.subr.mxu0 %v9343_v44  ;;  %4616 = vmatprep.subr.mxu1 %v9349_v56 }
 0xb94   :  { %4546 = vmatpush1.msra.mxu0 %v9355_v52  ;;  %4617 = vmatpush1.msra.mxu1 %v9361_v25 }
 0xb95   :  { %4547 = vmatprep.subr.mxu0 %v9367_v40  ;;  %4618 = vmatprep.subr.mxu1 %v9373_v59 }
 0xb96   :  { %4548 = vmatpush1.msra.mxu0 %v9379_v51  ;;  %4619 = vmatpush1.msra.mxu1 %v9385_v36 }
 0xb97   :  { %4549 = vmatprep.subr.mxu0 %v9391_v49  ;;  %4620 = vmatprep.subr.mxu1 %v9397_v23 }
 0xb98   :  { %4550 = vmatpush1.msra.mxu0 %v9403_v29  ;;  %4621 = vmatpush1.msra.mxu1 %v9409_v35 }
 0xb99   :  { %4551 = vmatprep.subr.mxu0 %v9415_v45  ;;  %4622 = vmatprep.subr.mxu1 %v9421_v30  ;;  %v11303_v45 = vld [vmem:[#allocation50_spill] sm:$0xff]  ;;  %v11304_v30 = vld [vmem:[#allocation52_spill] sm:$0xff] }
 0xb9a   :  { %4552 = vmatpush1.msra.mxu0 %v9427_v13  ;;  %4623 = vmatpush1.msra.mxu1 %v9433_v22  ;;  %v11305_v13 = vld [vmem:[#allocation53_spill] sm:$0xff] }
 0xb9b   :  { %4553 = vmatprep.subr.mxu0 %v9439_v3  ;;  %4624 = vmatprep.subr.mxu1 %v11297_v60  ;;  %v11306_v22 = vld [vmem:[#allocation49_spill] sm:$0xff]  ;;  %v11307_v3 = vld [vmem:[#allocation2_spill] sm:$0xff] }
 0xb9c   :  { %4554 = vmatpush1.msra.mxu0 %v11298_v57  ;;  %4625 = vmatpush1.msra.mxu1 %v11299_v5  ;;  %v11308_v60 = vld [vmem:[#allocation6_spill] sm:$0xff]  ;;  %v11309_v57 = vld [vmem:[#allocation3_spill] sm:$0xff]  ;;  %v11310_v5 = vld [vmem:[#allocation8_spill] sm:$0xff] }
 0xb9d   :  { %4555 = vmatprep.subr.mxu0 %v11300_v7  ;;  %4626 = vmatprep.subr.mxu1 %v11301_v58  ;;  %v11311_v7 = vld [vmem:[#allocation4_spill] sm:$0xff]  ;;  %v11312_v58 = vld [vmem:[#allocation10_spill] sm:$0xff] }
 0xb9e   :  { %4556 = vmatpush1.msra.mxu0 %v11302_v41  ;;  %4627 = vmatpush1.msra.mxu1 %v11303_v45  ;;  %v11313_v41 = vld [vmem:[#allocation5_spill] sm:$0xff]  ;;  %v11314_v45 = vld [vmem:[#allocation12_spill] sm:$0xff] }
 0xb9f   :  { %4557 = vmatprep.subr.mxu0 %v11304_v30  ;;  %4628 = vmatprep.subr.mxu1 %v11305_v13  ;;  %v11315_v30 = vld [vmem:[#allocation7_spill] sm:$0xff]  ;;  %v11316_v13 = vld [vmem:[#allocation14_spill] sm:$0xff] }
 0xba0   :  { %4558 = vmatpush1.msra.mxu0 %v11306_v22  ;;  %4629 = vmatpush1.msra.mxu1 %v11307_v3  ;;  %v11317_v22 = vld [vmem:[#allocation9_spill] sm:$0xff]  ;;  %v11318_v3 = vld [vmem:[#allocation16_spill] sm:$0xff] }
 0xba1   :  { %4559 = vmatprep.subr.mxu0 %v11308_v60  ;;  %4630 = vmatprep.subr.mxu1 %v11309_v57  ;;  %v11319_v60 = vld [vmem:[#allocation18_spill] sm:$0xff]  ;;  %v11320_v57 = vld [vmem:[#allocation11_spill] sm:$0xff] }
 0xba2   :  { %4560 = vmatpush1.msra.mxu0 %v11310_v5  ;;  %4631 = vmatpush1.msra.mxu1 %v11311_v7  ;;  %v11321_v5 = vld [vmem:[#allocation20_spill] sm:$0xff]  ;;  %v11322_v7 = vld [vmem:[#allocation13_spill] sm:$0xff] }
 0xba3   :  { %4561 = vmatprep.subr.mxu0 %v11312_v58  ;;  %4632 = vmatprep.subr.mxu1 %v11313_v41  ;;  %v11323_v58 = vld [vmem:[#allocation22_spill] sm:$0xff] }
 0xba4   :  { %4562 = vmatpush1.msra.mxu0 %v11314_v45  ;;  %4633 = vmatpush1.msra.mxu1 %v11315_v30  ;;  %v11324_v30 = vld [vmem:[#allocation15_spill] sm:$0xff] }
 0xba5   :  { %4563 = vmatprep.subr.mxu0 %v11316_v13  ;;  %4634 = vmatprep.subr.mxu1 %v11317_v22  ;;  %v11325_v13 = vld [vmem:[#allocation24_spill] sm:$0xff] }
 0xba6   :  { %4564 = vmatpush1.msra.mxu0 %v11318_v3  ;;  %4635 = vmatpush1.msra.mxu1 %v11319_v60 }
 0xba7   :  { %4565 = vmatprep.subr.mxu0 %v11320_v57  ;;  %4636 = vmatprep.subr.mxu1 %v11321_v5 }
 0xba8   :  { %4566 = vmatpush1.msra.mxu0 %v11322_v7  ;;  %4637 = vmatpush1.msra.mxu1 %v11323_v58 }
 0xba9   :  { %4599 = vmatprep.mubr.f32.mxu0 %v10810_v55  ;;  %4670 = vmatprep.mubr.f32.mxu1 %v10810_v55 }
 0xbaa   :  { %4704 = vmatprep.subr.mxu0 %v11324_v30  ;;  %4775 = vmatprep.subr.mxu1 %v11325_v13 }
 0xc3f   :  { %v4281_v22 = vpop.f32.mrf.mxu0  ;;  %v4352_v3 = vpop.f32.mrf.mxu1 }
 0xc41   :  { %v4283_v45 = vpop.f32.mrf.mxu0  ;;  %v4354_v41 = vpop.f32.mrf.mxu1 }
 0xc48   :  { %v4426_v60 = vpop.f32.mrf.mxu0  ;;  %v4497_v7 = vpop.f32.mrf.mxu1 }
 0xc49   :  { %v4427_v57 = vadd.f32 %v4426_v60, %v4281_v22  ;;  %v4498_v51 = vadd.f32 %v4497_v7, %v4352_v3 }
 0xc4a   :  { %v4428_v35 = vpop.f32.mrf.mxu0  ;;  %v4499_v36 = vpop.f32.mrf.mxu1 }
 0xc4b   :  { %v4502_v5 = vadd.f32 %v4427_v57, %v8936_v18  ;;  %v4429_v29 = vadd.f32 %v4428_v35, %v4283_v45  ;;  %v4500_v30 = vadd.f32 %v4499_v36, %v4354_v41  ;;  %v4504_v22 = vadd.f32 %v4498_v51, %v8955_v34  ;;  %v11329_v41 = vld [vmem:[#allocation39_spill] sm:$0xff]  ;;  %v11341_v51 = vld [vmem:[#allocation41_spill] sm:$0xff] }
 0xc4d   :  { %v5893_v58 = vmul.f32 -1.442695, %v4502_v5  ;;  %v4503_v23 = vadd.f32 %v4429_v29, %v8940_v28  ;;  %v4505_v13 = vadd.f32 %v4500_v30, %v8950_v14 }
 0xc4f   :  { %6323 = vpow2.f32 %v5893_v58  ;;  %v5894_v49 = vmul.f32 -1.442695, %v4503_v23  ;;  %v5895_v59 = vmul.f32 -1.442695, %v4505_v13  ;;  %v11328_v58 = vld [vmem:[#allocation60_spill] sm:$0xff] }
 0xc51   :  { %6325 = vpow2.f32 %v5894_v49 }
 0xc52   :  { %6327 = vpow2.f32 %v5895_v59 }
 0xc5c   :  { %v6324_v40 = vpop.eup %6323 }
 0xc5d   :  { %v4509_v60 = vadd.f32 1.0, %v6324_v40 }
 0xc5e   :  { %v6326_v25 = vpop.eup %6325 }
 0xc5f   :  { %6329 = vrcp.f32 %v4509_v60  ;;  %v4515_v35 = vadd.f32 1.0, %v6326_v25  ;;  %v6328_v29 = vpop.eup %6327  ;;  %v11331_v60 = vld [vmem:[#allocation48_spill] sm:$0xff] }
 0xc60   :  { %6331 = vtanh.f32 %v4504_v22  ;;  %v4522_v49 = vadd.f32 1.0, %v6328_v29  ;;  %v11330_v22 = vld [vmem:[#allocation56_spill] sm:$0xff]  ;;  %v11333_v29 = vld [vmem:[#allocation31_spill] sm:$0xff] }
 0xc61   :  { %6333 = vrcp.f32 %v4515_v35  ;;  %v11332_v35 = vld [vmem:[#allocation36_spill] sm:$0xff] }
 0xc62   :  { %6335 = vrcp.f32 %v4522_v49  ;;  %v11337_v49 = vld [vmem:[#allocation65_spill] sm:$0xff] }
 0xc6c   :  { %v6330_v45 = vpop.eup %6329 }
 0xc6d   :  { %v6332_v23 = vpop.eup %6331 }
 0xc6e   :  { %v6334_v57 = vpop.eup %6333  ;;  %v4526_v36 = vmul.f32 %v6332_v23, %v6330_v45  ;;  %v11334_v45 = vld [vmem:[#allocation33_spill] sm:$0xff]  ;;  %v11335_v23 = vld [vmem:[#allocation62_spill] sm:$0xff] }
 0xc6f   :  { %v4525_v30 = vmul.f32 %v6334_v57, %v9626_v53  ;;  %v6336_v59 = vpop.eup %6335  ;;  %v11336_v57 = vld [vmem:[#allocation64_spill] sm:$0xff] }
 0xc71   :  { %v4527_v3 = vadd.f32 %v4526_v36, %v4525_v30  ;;  %v11338_v36 = vld [vmem:[#allocation66_spill] sm:$0xff]  ;;  %v11339_v30 = vld [vmem:[#allocation37_spill] sm:$0xff] }
 0xc73   :  { %6337 = vtanh.f32 %v4527_v3  ;;  %v9807_v40 = vsel %vm1596_vm12, %v4527_v3, %v9626_v53  ;;  %v5897_v53 = vld [vmem:[%s10364_s1 + $0x10] sm:$0xff]  ;;  %v11340_v3 = vld [vmem:[#allocation45_spill] sm:$0xff] }
 0xc80   :  { %v6338_v25 = vpop.eup %6337 }
 0xc81   :  { %v4529_v13 = vmul.f32 %v6338_v25, %v6336_v59  ;;  %v11342_v59 = vld [vmem:[#allocation51_spill] sm:$0xff]  ;;  %v11343_v25 = vld [vmem:[#allocation44_spill] sm:$0xff] }
 0xc83   :  { %v4530_v5 = vsel %vm1596_vm12, %v4529_v13, 0.0  ;;  %v9814_v7 = vsel %vm1596_vm12, %v4529_v13, %v9633_v47  ;;  %v11327_v47 = vld [vmem:[#allocation59_spill] sm:$0xff] }
 0xc84   :  { %5896 = vst [vmem:[%s10366_s12 + $0x38] sm:$0xff] %v4530_v5  ;;  %4600 = vmatmul.mubr.f32.vlgmr.msra.gmra.mxu0 %v9814_v7  ;;  %4671 = vmatmul.mubr.f32.vlgmr.msra.gmra.mxu1 %v9814_v7  ;;  %v11344_v13 = vld [vmem:[#allocation55_spill] sm:$0xff]  ;;  %v11345_v5 = vld [vmem:[#allocation46_spill] sm:$0xff] }
 0xc85   :  { %4705 = vmatpush1.msra.mxu0 %v9643_v16  ;;  %4776 = vmatpush1.msra.mxu1 %v9649_v50 }
 0xc86   :  { %4706 = vmatprep.subr.mxu0 %v9655_v17  ;;  %4777 = vmatprep.subr.mxu1 %v9661_v1 }
 0xc87   :  { %4707 = vmatpush1.msra.mxu0 %v9667_v21  ;;  %4778 = vmatpush1.msra.mxu1 %v9673_v62 }
 0xc88   :  { %4708 = vmatprep.subr.mxu0 %v9679_v0  ;;  %4779 = vmatprep.subr.mxu1 %v9685_v8 }
 0xc89   :  { %4709 = vmatpush1.msra.mxu0 %v9691_v48  ;;  %4780 = vmatpush1.msra.mxu1 %v9697_v6 }
 0xc8a   :  { %4710 = vmatprep.subr.mxu0 %v9703_v39  ;;  %4781 = vmatprep.subr.mxu1 %v9709_v11 }
 0xc8b   :  { %4711 = vmatpush1.msra.mxu0 %v9718_v63  ;;  %4744 = vmatprep.mubr.f32.mxu0 %v10810_v55 }
 0xc8c   :  { %4782 = vmatpush1.msra.mxu1 %v9725_v4  ;;  %4815 = vmatprep.mubr.f32.mxu1 %v10810_v55 }
 0xc8d   :  { %5898 = vmatmul.mubr.msk.f32.vlgmr.msra.gmra.mxu0 %vm414_vm1, %v5897_v53  ;;  %5899 = vmatmul.mubr.msk.f32.vlgmr.msra.gmra.mxu1 %vm414_vm1, %v5897_v53  ;;  %v11346_v53 = vld [vmem:[#allocation47_spill] sm:$0xff] }
 0xc8e   :  { %4855 = vmatprep.subr.mxu0 %v9223_v32  ;;  %4926 = vmatprep.subr.mxu1 %v9229_v15 }
 0xc8f   :  { %4856 = vmatpush1.msra.mxu0 %v9235_v61  ;;  %4927 = vmatpush1.msra.mxu1 %v9241_v31 }
 0xc90   :  { %4857 = vmatprep.subr.mxu0 %v9247_v26  ;;  %4928 = vmatprep.subr.mxu1 %v9253_v24 }
 0xc91   :  { %4858 = vmatpush1.msra.mxu0 %v9259_v43  ;;  %4929 = vmatpush1.msra.mxu1 %v9265_v42 }
 0xc92   :  { %4859 = vmatprep.subr.mxu0 %v9271_v9  ;;  %4930 = vmatprep.subr.mxu1 %v9277_v33 }
 0xc93   :  { %4860 = vmatpush1.msra.mxu0 %v9283_v2  ;;  %4931 = vmatpush1.msra.mxu1 %v9289_v10 }
 0xc94   :  { %4861 = vmatprep.subr.mxu0 %v9295_v19  ;;  %4932 = vmatprep.subr.mxu1 %v9301_v54 }
 0xc95   :  { %4862 = vmatpush1.msra.mxu0 %v9307_v20  ;;  %4933 = vmatpush1.msra.mxu1 %v9313_v37 }
 0xc96   :  { %4863 = vmatprep.subr.mxu0 %v9319_v46  ;;  %4934 = vmatprep.subr.mxu1 %v9325_v27 }
 0xc97   :  { %4864 = vmatpush1.msra.mxu0 %v9331_v38  ;;  %4935 = vmatpush1.msra.mxu1 %v9337_v12 }
 0xc98   :  { %4865 = vmatprep.subr.mxu0 %v9343_v44  ;;  %4936 = vmatprep.subr.mxu1 %v9349_v56 }
 0xc99   :  { %4866 = vmatpush1.msra.mxu0 %v9355_v52  ;;  %4937 = vmatpush1.msra.mxu1 %v11327_v47 }
 0xc9a   :  { %4867 = vmatprep.subr.mxu0 %v11328_v58  ;;  %4938 = vmatprep.subr.mxu1 %v11329_v41 }
 0xc9b   :  { %4868 = vmatpush1.msra.mxu0 %v11330_v22  ;;  %4939 = vmatpush1.msra.mxu1 %v11331_v60 }
 0xc9c   :  { %4869 = vmatprep.subr.mxu0 %v11332_v35  ;;  %4940 = vmatprep.subr.mxu1 %v11333_v29 }
 0xc9d   :  { %4870 = vmatpush1.msra.mxu0 %v11334_v45  ;;  %4941 = vmatpush1.msra.mxu1 %v11335_v23 }
 0xc9e   :  { %4871 = vmatprep.subr.mxu0 %v11336_v57  ;;  %4942 = vmatprep.subr.mxu1 %v11337_v49  ;;  %v11347_v57 = vld [vmem:[#allocation50_spill] sm:$0xff]  ;;  %v11348_v49 = vld [vmem:[#allocation52_spill] sm:$0xff] }
 0xc9f   :  { %4872 = vmatpush1.msra.mxu0 %v11338_v36  ;;  %4943 = vmatpush1.msra.mxu1 %v11339_v30  ;;  %v11349_v36 = vld [vmem:[#allocation53_spill] sm:$0xff] }
 0xca0   :  { %4873 = vmatprep.subr.mxu0 %v11340_v3  ;;  %4944 = vmatprep.subr.mxu1 %v11341_v51  ;;  %v11350_v30 = vld [vmem:[#allocation49_spill] sm:$0xff]  ;;  %v11351_v3 = vld [vmem:[#allocation2_spill] sm:$0xff] }
 0xca1   :  { %4874 = vmatpush1.msra.mxu0 %v11342_v59  ;;  %4945 = vmatpush1.msra.mxu1 %v11343_v25  ;;  %v11352_v51 = vld [vmem:[#allocation6_spill] sm:$0xff]  ;;  %v11353_v59 = vld [vmem:[#allocation3_spill] sm:$0xff]  ;;  %v11354_v25 = vld [vmem:[#allocation8_spill] sm:$0xff] }
 0xca2   :  { %4875 = vmatprep.subr.mxu0 %v11344_v13  ;;  %4946 = vmatprep.subr.mxu1 %v11345_v5  ;;  %v11355_v13 = vld [vmem:[#allocation4_spill] sm:$0xff]  ;;  %v11356_v5 = vld [vmem:[#allocation10_spill] sm:$0xff] }
 0xca3   :  { %4876 = vmatpush1.msra.mxu0 %v11346_v53  ;;  %4947 = vmatpush1.msra.mxu1 %v11347_v57  ;;  %v11357_v53 = vld [vmem:[#allocation5_spill] sm:$0xff]  ;;  %v11358_v57 = vld [vmem:[#allocation12_spill] sm:$0xff] }
 0xca4   :  { %4877 = vmatprep.subr.mxu0 %v11348_v49  ;;  %4948 = vmatprep.subr.mxu1 %v11349_v36  ;;  %v11359_v49 = vld [vmem:[#allocation7_spill] sm:$0xff]  ;;  %v11360_v36 = vld [vmem:[#allocation14_spill] sm:$0xff] }
 0xca5   :  { %4878 = vmatpush1.msra.mxu0 %v11350_v30  ;;  %4949 = vmatpush1.msra.mxu1 %v11351_v3  ;;  %v11361_v30 = vld [vmem:[#allocation9_spill] sm:$0xff]  ;;  %v11362_v3 = vld [vmem:[#allocation16_spill] sm:$0xff] }
 0xca6   :  { %4879 = vmatprep.subr.mxu0 %v11352_v51  ;;  %4950 = vmatprep.subr.mxu1 %v11353_v59  ;;  %v11363_v51 = vld [vmem:[#allocation18_spill] sm:$0xff]  ;;  %v11364_v59 = vld [vmem:[#allocation11_spill] sm:$0xff] }
 0xca7   :  { %4880 = vmatpush1.msra.mxu0 %v11354_v25  ;;  %4951 = vmatpush1.msra.mxu1 %v11355_v13  ;;  %v11365_v25 = vld [vmem:[#allocation20_spill] sm:$0xff]  ;;  %v11366_v13 = vld [vmem:[#allocation13_spill] sm:$0xff] }
 0xca8   :  { %4881 = vmatprep.subr.mxu0 %v11356_v5  ;;  %4952 = vmatprep.subr.mxu1 %v11357_v53  ;;  %v11367_v5 = vld [vmem:[#allocation22_spill] sm:$0xff] }
 0xca9   :  { %4882 = vmatpush1.msra.mxu0 %v11358_v57  ;;  %4953 = vmatpush1.msra.mxu1 %v11359_v49  ;;  %v11368_v49 = vld [vmem:[#allocation15_spill] sm:$0xff] }
 0xcaa   :  { %4883 = vmatprep.subr.mxu0 %v11360_v36  ;;  %4954 = vmatprep.subr.mxu1 %v11361_v30  ;;  %v11369_v36 = vld [vmem:[#allocation24_spill] sm:$0xff] }
 0xcab   :  { %4884 = vmatpush1.msra.mxu0 %v11362_v3  ;;  %4955 = vmatpush1.msra.mxu1 %v11363_v51 }
 0xcac   :  { %4885 = vmatprep.subr.mxu0 %v11364_v59  ;;  %4956 = vmatprep.subr.mxu1 %v11365_v25 }
 0xcad   :  { %4886 = vmatpush1.msra.mxu0 %v11366_v13  ;;  %4957 = vmatpush1.msra.mxu1 %v11367_v5 }
 0xcae   :  { %4919 = vmatprep.mubr.f32.mxu0 %v10810_v55  ;;  %4990 = vmatprep.mubr.f32.mxu1 %v10810_v55 }
 0xcaf   :  { %5024 = vmatprep.subr.mxu0 %v11368_v49  ;;  %5095 = vmatprep.subr.mxu1 %v11369_v36 }
 0xd44   :  { %v4601_v30 = vpop.f32.mrf.mxu0  ;;  %v4672_v3 = vpop.f32.mrf.mxu1 }
 0xd46   :  { %v4603_v57 = vpop.f32.mrf.mxu0  ;;  %v4674_v53 = vpop.f32.mrf.mxu1 }
 0xd4d   :  { %v4746_v51 = vpop.f32.mrf.mxu0  ;;  %v4817_v13 = vpop.f32.mrf.mxu1 }
 0xd4e   :  { %v4747_v59 = vadd.f32 %v4746_v51, %v4601_v30  ;;  %v4818_v22 = vadd.f32 %v4817_v13, %v4672_v3 }
 0xd4f   :  { %v4748_v23 = vpop.f32.mrf.mxu0  ;;  %v4819_v60 = vpop.f32.mrf.mxu1 }
 0xd50   :  { %v4822_v25 = vadd.f32 %v4747_v59, %v8936_v18  ;;  %v4749_v45 = vadd.f32 %v4748_v23, %v4603_v57  ;;  %v4820_v49 = vadd.f32 %v4819_v60, %v4674_v53  ;;  %v4824_v30 = vadd.f32 %v4818_v22, %v8955_v34  ;;  %v11396_v53 = vld [vmem:[#allocation6_spill] sm:$0xff]  ;;  %v11408_v22 = vld [vmem:[#allocation11_spill] sm:$0xff] }
 0xd52   :  { %v5900_v5 = vmul.f32 -1.442695, %v4822_v25  ;;  %v4823_v29 = vadd.f32 %v4749_v45, %v8940_v28  ;;  %v4825_v36 = vadd.f32 %v4820_v49, %v8950_v14 }
 0xd54   :  { %6339 = vpow2.f32 %v5900_v5  ;;  %v5901_v35 = vmul.f32 -1.442695, %v4823_v29  ;;  %v5902_v41 = vmul.f32 -1.442695, %v4825_v36  ;;  %v11395_v5 = vld [vmem:[#allocation2_spill] sm:$0xff] }
 0xd56   :  { %6341 = vpow2.f32 %v5901_v35 }
 0xd57   :  { %6343 = vpow2.f32 %v5902_v41 }
 0xd61   :  { %v6340_v58 = vpop.eup %6339 }
 0xd62   :  { %v4829_v51 = vadd.f32 1.0, %v6340_v58 }
 0xd63   :  { %v6342_v47 = vpop.eup %6341 }
 0xd64   :  { %6345 = vrcp.f32 %v4829_v51  ;;  %v4835_v23 = vadd.f32 1.0, %v6342_v47  ;;  %v6344_v45 = vpop.eup %6343  ;;  %v11398_v51 = vld [vmem:[#allocation8_spill] sm:$0xff] }
 0xd65   :  { %6347 = vtanh.f32 %v4824_v30  ;;  %v4842_v35 = vadd.f32 1.0, %v6344_v45  ;;  %v11397_v30 = vld [vmem:[#allocation3_spill] sm:$0xff]  ;;  %v11400_v45 = vld [vmem:[#allocation10_spill] sm:$0xff] }
 0xd66   :  { %6349 = vrcp.f32 %v4835_v23  ;;  %v11399_v23 = vld [vmem:[#allocation4_spill] sm:$0xff] }
 0xd67   :  { %6351 = vrcp.f32 %v4842_v35  ;;  %v11404_v35 = vld [vmem:[#allocation14_spill] sm:$0xff] }
 0xd71   :  { %v6346_v57 = vpop.eup %6345 }
 0xd72   :  { %v6348_v29 = vpop.eup %6347 }
 0xd73   :  { %v6350_v59 = vpop.eup %6349  ;;  %v4846_v60 = vmul.f32 %v6348_v29, %v6346_v57  ;;  %v11401_v57 = vld [vmem:[#allocation5_spill] sm:$0xff]  ;;  %v11402_v29 = vld [vmem:[#allocation12_spill] sm:$0xff] }
 0xd74   :  { %v4845_v49 = vmul.f32 %v6350_v59, %v9807_v40  ;;  %v6352_v41 = vpop.eup %6351  ;;  %v11403_v59 = vld [vmem:[#allocation7_spill] sm:$0xff] }
 0xd76   :  { %v4847_v3 = vadd.f32 %v4846_v60, %v4845_v49  ;;  %v11405_v60 = vld [vmem:[#allocation9_spill] sm:$0xff]  ;;  %v11406_v49 = vld [vmem:[#allocation16_spill] sm:$0xff] }
 0xd78   :  { %6353 = vtanh.f32 %v4847_v3  ;;  %v9918_v58 = vsel %vm1268_vm11, %v4847_v3, %v9807_v40  ;;  %v5904_v40 = vld [vmem:[%s10364_s1 + $0x8] sm:$0xff]  ;;  %v11407_v3 = vld [vmem:[#allocation18_spill] sm:$0xff] }
 0xd85   :  { %v6354_v47 = vpop.eup %6353 }
 0xd86   :  { %v4849_v36 = vmul.f32 %v6354_v47, %v6352_v41  ;;  %v11409_v41 = vld [vmem:[#allocation20_spill] sm:$0xff]  ;;  %v11410_v47 = vld [vmem:[#allocation13_spill] sm:$0xff] }
 0xd88   :  { %v4850_v25 = vsel %vm1268_vm11, %v4849_v36, 0.0  ;;  %v9925_v13 = vsel %vm1268_vm11, %v4849_v36, %v9814_v7  ;;  %v11394_v7 = vld [vmem:[#allocation49_spill] sm:$0xff]  ;;  %v11411_v36 = vld [vmem:[#allocation22_spill] sm:$0xff] }
 0xd89   :  { %5903 = vst [vmem:[%s10366_s12 + $0x28] sm:$0xff] %v4850_v25  ;;  %4920 = vmatmul.mubr.f32.vlgmr.msra.gmra.mxu0 %v9925_v13  ;;  %4991 = vmatmul.mubr.f32.vlgmr.msra.gmra.mxu1 %v9925_v13  ;;  %v11412_v25 = vld [vmem:[#allocation15_spill] sm:$0xff] }
 0xd8a   :  { %5025 = vmatpush1.msra.mxu0 %v9643_v16  ;;  %5096 = vmatpush1.msra.mxu1 %v9649_v50 }
 0xd8b   :  { %5026 = vmatprep.subr.mxu0 %v9655_v17  ;;  %5097 = vmatprep.subr.mxu1 %v9661_v1 }
 0xd8c   :  { %5027 = vmatpush1.msra.mxu0 %v9667_v21  ;;  %5098 = vmatpush1.msra.mxu1 %v9673_v62 }
 0xd8d   :  { %5028 = vmatprep.subr.mxu0 %v9679_v0  ;;  %5099 = vmatprep.subr.mxu1 %v9685_v8 }
 0xd8e   :  { %5029 = vmatpush1.msra.mxu0 %v9691_v48  ;;  %5100 = vmatpush1.msra.mxu1 %v9697_v6 }
 0xd8f   :  { %5030 = vmatprep.subr.mxu0 %v9703_v39  ;;  %5101 = vmatprep.subr.mxu1 %v9709_v11 }
 0xd90   :  { %5031 = vmatpush1.msra.mxu0 %v9718_v63  ;;  %5064 = vmatprep.mubr.f32.mxu0 %v10810_v55 }
 0xd91   :  { %5102 = vmatpush1.msra.mxu1 %v9725_v4  ;;  %5135 = vmatprep.mubr.f32.mxu1 %v10810_v55 }
 0xd92   :  { %5905 = vmatmul.mubr.msk.f32.vlgmr.msra.gmra.mxu0 %vm414_vm1, %v5904_v40  ;;  %5906 = vmatmul.mubr.msk.f32.vlgmr.msra.gmra.mxu1 %vm414_vm1, %v5904_v40  ;;  %v11413_v40 = vld [vmem:[#allocation24_spill] sm:$0xff] }
 0xd93   :  { %5175 = vmatprep.subr.mxu0 %v9223_v32  ;;  %5246 = vmatprep.subr.mxu1 %v9229_v15  ;;  %v11371_v32 = vld [vmem:[#allocation59_spill] sm:$0xff]  ;;  %v11372_v15 = vld [vmem:[#allocation60_spill] sm:$0xff] }
 0xd94   :  { %5176 = vmatpush1.msra.mxu0 %v9235_v61  ;;  %5247 = vmatpush1.msra.mxu1 %v9241_v31  ;;  %v11373_v61 = vld [vmem:[#allocation39_spill] sm:$0xff]  ;;  %v11374_v31 = vld [vmem:[#allocation56_spill] sm:$0xff] }
 0xd95   :  { %5177 = vmatprep.subr.mxu0 %v9247_v26  ;;  %5248 = vmatprep.subr.mxu1 %v9253_v24  ;;  %v11375_v26 = vld [vmem:[#allocation48_spill] sm:$0xff] }
 0xd96   :  { %5178 = vmatpush1.msra.mxu0 %v9259_v43  ;;  %5249 = vmatpush1.msra.mxu1 %v9265_v42  ;;  %v11376_v24 = vld [vmem:[#allocation36_spill] sm:$0xff]  ;;  %v11377_v43 = vld [vmem:[#allocation31_spill] sm:$0xff]  ;;  %v11378_v42 = vld [vmem:[#allocation33_spill] sm:$0xff] }
 0xd97   :  { %5179 = vmatprep.subr.mxu0 %v9271_v9  ;;  %5250 = vmatprep.subr.mxu1 %v9277_v33  ;;  %v11379_v9 = vld [vmem:[#allocation62_spill] sm:$0xff]  ;;  %v11380_v33 = vld [vmem:[#allocation64_spill] sm:$0xff] }
 0xd98   :  { %5180 = vmatpush1.msra.mxu0 %v9283_v2  ;;  %5251 = vmatpush1.msra.mxu1 %v9289_v10  ;;  %v11381_v2 = vld [vmem:[#allocation65_spill] sm:$0xff]  ;;  %v11382_v10 = vld [vmem:[#allocation66_spill] sm:$0xff] }
 0xd99   :  { %5181 = vmatprep.subr.mxu0 %v9295_v19  ;;  %5252 = vmatprep.subr.mxu1 %v9301_v54  ;;  %v11383_v19 = vld [vmem:[#allocation37_spill] sm:$0xff] }
 0xd9a   :  { %5182 = vmatpush1.msra.mxu0 %v9307_v20  ;;  %5253 = vmatpush1.msra.mxu1 %v9313_v37  ;;  %v11384_v54 = vld [vmem:[#allocation45_spill] sm:$0xff]  ;;  %v11386_v37 = vld [vmem:[#allocation51_spill] sm:$0xff] }
 0xd9b   :  { %5183 = vmatprep.subr.mxu0 %v9319_v46  ;;  %5254 = vmatprep.subr.mxu1 %v9325_v27  ;;  %v11385_v20 = vld [vmem:[#allocation41_spill] sm:$0xff]  ;;  %v11387_v46 = vld [vmem:[#allocation44_spill] sm:$0xff]  ;;  %v11388_v27 = vld [vmem:[#allocation55_spill] sm:$0xff] }
 0xd9c   :  { %5184 = vmatpush1.msra.mxu0 %v9331_v38  ;;  %5255 = vmatpush1.msra.mxu1 %v9337_v12  ;;  %v11389_v38 = vld [vmem:[#allocation46_spill] sm:$0xff]  ;;  %v11390_v12 = vld [vmem:[#allocation47_spill] sm:$0xff] }
 0xd9d   :  { %5185 = vmatprep.subr.mxu0 %v9343_v44  ;;  %5256 = vmatprep.subr.mxu1 %v9349_v56  ;;  %v11391_v44 = vld [vmem:[#allocation50_spill] sm:$0xff]  ;;  %v11392_v56 = vld [vmem:[#allocation52_spill] sm:$0xff] }
 0xd9e   :  { %5186 = vmatpush1.msra.mxu0 %v9355_v52  ;;  %5257 = vmatpush1.msra.mxu1 %v11371_v32  ;;  %v11393_v52 = vld [vmem:[#allocation53_spill] sm:$0xff] }
 0xd9f   :  { %5187 = vmatprep.subr.mxu0 %v11372_v15  ;;  %5258 = vmatprep.subr.mxu1 %v11373_v61 }
 0xda0   :  { %5188 = vmatpush1.msra.mxu0 %v11374_v31  ;;  %5259 = vmatpush1.msra.mxu1 %v11375_v26 }
 0xda1   :  { %5189 = vmatprep.subr.mxu0 %v11376_v24  ;;  %5260 = vmatprep.subr.mxu1 %v11377_v43 }
 0xda2   :  { %5190 = vmatpush1.msra.mxu0 %v11378_v42  ;;  %5261 = vmatpush1.msra.mxu1 %v11379_v9 }
 0xda3   :  { %5191 = vmatprep.subr.mxu0 %v11380_v33  ;;  %5262 = vmatprep.subr.mxu1 %v11381_v2 }
 0xda4   :  { %5192 = vmatpush1.msra.mxu0 %v11382_v10  ;;  %5263 = vmatpush1.msra.mxu1 %v11383_v19 }
 0xda5   :  { %5193 = vmatprep.subr.mxu0 %v11384_v54  ;;  %5264 = vmatprep.subr.mxu1 %v11385_v20 }
 0xda6   :  { %5194 = vmatpush1.msra.mxu0 %v11386_v37  ;;  %5265 = vmatpush1.msra.mxu1 %v11387_v46 }
 0xda7   :  { %5195 = vmatprep.subr.mxu0 %v11388_v27  ;;  %5266 = vmatprep.subr.mxu1 %v11389_v38 }
 0xda8   :  { %5196 = vmatpush1.msra.mxu0 %v11390_v12  ;;  %5267 = vmatpush1.msra.mxu1 %v11391_v44 }
 0xda9   :  { %5197 = vmatprep.subr.mxu0 %v11392_v56  ;;  %5268 = vmatprep.subr.mxu1 %v11393_v52 }
 0xdaa   :  { %5198 = vmatpush1.msra.mxu0 %v11394_v7  ;;  %5269 = vmatpush1.msra.mxu1 %v11395_v5 }
 0xdab   :  { %5199 = vmatprep.subr.mxu0 %v11396_v53  ;;  %5270 = vmatprep.subr.mxu1 %v11397_v30 }
 0xdac   :  { %5200 = vmatpush1.msra.mxu0 %v11398_v51  ;;  %5271 = vmatpush1.msra.mxu1 %v11399_v23 }
 0xdad   :  { %5201 = vmatprep.subr.mxu0 %v11400_v45  ;;  %5272 = vmatprep.subr.mxu1 %v11401_v57 }
 0xdae   :  { %5202 = vmatpush1.msra.mxu0 %v11402_v29  ;;  %5273 = vmatpush1.msra.mxu1 %v11403_v59 }
 0xdaf   :  { %5203 = vmatprep.subr.mxu0 %v11404_v35  ;;  %5274 = vmatprep.subr.mxu1 %v11405_v60 }
 0xdb0   :  { %5204 = vmatpush1.msra.mxu0 %v11406_v49  ;;  %5275 = vmatpush1.msra.mxu1 %v11407_v3 }
 0xdb1   :  { %5205 = vmatprep.subr.mxu0 %v11408_v22  ;;  %5276 = vmatprep.subr.mxu1 %v11409_v41  ;;  %v207_v41 = vld [vmem:[%s10370_s8] sm:$0xff] }
 0xdb2   :  { %5206 = vmatpush1.msra.mxu0 %v11410_v47  ;;  %5277 = vmatpush1.msra.mxu1 %v11411_v36  ;;  %v254_v47 = vld [vmem:[%s10371_s10 + $0x78] sm:$0xff]  ;;  %v11415_v36 = vld [vmem:[#allocation58_spill] sm:$0xff] }
 0xdb3   :  { %5239 = vmatprep.mubr.f32.mxu0 %v10810_v55  ;;  %5310 = vmatprep.mubr.f32.mxu1 %v10810_v55 }
 0xdb4   :  { %5344 = vmatprep.subr.mxu0 %v11412_v25  ;;  %5415 = vmatprep.subr.mxu1 %v11413_v40  ;;  %v253_v25 = vld [vmem:[%s10371_s10 + $0x70] sm:$0xff]  ;;  %v252_v40 = vld [vmem:[%s10371_s10 + $0x68] sm:$0xff] }
 0xe49   :  { %v4921_v32 = vpop.f32.mrf.mxu0  ;;  %v4992_v15 = vpop.f32.mrf.mxu1 }
 0xe4b   :  { %v4923_v61 = vpop.f32.mrf.mxu0  ;;  %v4994_v26 = vpop.f32.mrf.mxu1 }
 0xe52   :  { %v5066_v31 = vpop.f32.mrf.mxu0  ;;  %v5137_v9 = vpop.f32.mrf.mxu1 }
 0xe53   :  { %v5067_v24 = vadd.f32 %v5066_v31, %v4921_v32  ;;  %v5138_v46 = vadd.f32 %v5137_v9, %v4992_v15  ;;  %v251_v32 = vld [vmem:[%s10371_s10 + $0x60] sm:$0xff]  ;;  %v250_v15 = vld [vmem:[%s10371_s10 + $0x58] sm:$0xff]  ;;  %v248_v31 = vld [vmem:[%s10371_s10 + $0x48] sm:$0xff] }
 0xe54   :  { %v5068_v43 = vpop.f32.mrf.mxu0  ;;  %v5139_v54 = vpop.f32.mrf.mxu1  ;;  %v243_v9 = vld [vmem:[%s10371_s10 + $0x20] sm:$0xff] }
 0xe55   :  { %v5142_v42 = vadd.f32 %v5067_v24, %v8936_v18  ;;  %v5069_v33 = vadd.f32 %v5068_v43, %v4923_v61  ;;  %v5140_v20 = vadd.f32 %v5139_v54, %v4994_v26  ;;  %v5144_v12 = vadd.f32 %v5138_v46, %v8955_v34  ;;  %v249_v61 = vld [vmem:[%s10371_s10 + $0x50] sm:$0xff]  ;;  %v247_v26 = vld [vmem:[%s10371_s10 + $0x40] sm:$0xff]  ;;  %v246_v24 = vld [vmem:[%s10371_s10 + $0x38] sm:$0xff] }
 0xe56   :  { %v245_v43 = vld [vmem:[%s10371_s10 + $0x30] sm:$0xff]  ;;  %v11416_v54 = vld [vmem:[#allocation57_spill] sm:$0xff]  ;;  %v236_v46 = vld [vmem:[%s10370_s8 + $0xe8] sm:$0xff] }
 0xe57   :  { %v5907_v2 = vmul.f32 -1.442695, %v5142_v42  ;;  %v5143_v10 = vadd.f32 %v5069_v33, %v8940_v28  ;;  %v5145_v37 = vadd.f32 %v5140_v20, %v8950_v14  ;;  %v244_v42 = vld [vmem:[%s10371_s10 + $0x28] sm:$0xff]  ;;  %v242_v33 = vld [vmem:[%s10371_s10 + $0x18] sm:$0xff] }
 0xe58   :  { %v238_v20 = vld [vmem:[%s10370_s8 + $0xf8] sm:$0xff] }
 0xe59   :  { %6355 = vpow2.f32 %v5907_v2  ;;  %v5908_v19 = vmul.f32 -1.442695, %v5143_v10  ;;  %v5909_v27 = vmul.f32 -1.442695, %v5145_v37  ;;  %v241_v2 = vld [vmem:[%s10371_s10 + $0x10] sm:$0xff]  ;;  %v240_v10 = vld [vmem:[%s10371_s10 + $0x8] sm:$0xff] }
 0xe5a   :  { %v237_v37 = vld [vmem:[%s10370_s8 + $0xf0] sm:$0xff] }
 0xe5b   :  { %6357 = vpow2.f32 %v5908_v19  ;;  %v239_v19 = vld [vmem:[%s10371_s10] sm:$0xff] }
 0xe5c   :  { %6359 = vpow2.f32 %v5909_v27  ;;  %v235_v27 = vld [vmem:[%s10370_s8 + $0xe0] sm:$0xff] }
 0xe66   :  { %v6356_v38 = vpop.eup %6355 }
 0xe67   :  { %v5149_v44 = vadd.f32 1.0, %v6356_v38  ;;  %v234_v38 = vld [vmem:[%s10370_s8 + $0xd8] sm:$0xff] }
 0xe68   :  { %v6358_v56 = vpop.eup %6357 }
 0xe69   :  { %6361 = vrcp.f32 %v5149_v44  ;;  %v5155_v52 = vadd.f32 1.0, %v6358_v56  ;;  %v6360_v7 = vpop.eup %6359  ;;  %v232_v44 = vld [vmem:[%s10370_s8 + $0xc8] sm:$0xff]  ;;  %v231_v56 = vld [vmem:[%s10370_s8 + $0xc0] sm:$0xff] }
 0xe6a   :  { %6363 = vtanh.f32 %v5144_v12  ;;  %v5162_v51 = vadd.f32 1.0, %v6360_v7  ;;  %v233_v12 = vld [vmem:[%s10370_s8 + $0xd0] sm:$0xff] }
 0xe6b   :  { %6365 = vrcp.f32 %v5155_v52  ;;  %v230_v52 = vld [vmem:[%s10370_s8 + $0xb8] sm:$0xff]  ;;  %v229_v7 = vld [vmem:[%s10370_s8 + $0xb0] sm:$0xff] }
 0xe6c   :  { %6367 = vrcp.f32 %v5162_v51  ;;  %v225_v51 = vld [vmem:[%s10370_s8 + $0x90] sm:$0xff] }
 0xe76   :  { %v6362_v5 = vpop.eup %6361 }
 0xe77   :  { %v6364_v53 = vpop.eup %6363 }
 0xe78   :  { %v6366_v30 = vpop.eup %6365  ;;  %v5166_v23 = vmul.f32 %v6364_v53, %v6362_v5  ;;  %v228_v5 = vld [vmem:[%s10370_s8 + $0xa8] sm:$0xff]  ;;  %v227_v53 = vld [vmem:[%s10370_s8 + $0xa0] sm:$0xff] }
 0xe79   :  { %v5165_v45 = vmul.f32 %v6366_v30, %v9918_v58  ;;  %v6368_v35 = vpop.eup %6367  ;;  %v226_v30 = vld [vmem:[%s10370_s8 + $0x98] sm:$0xff] }
 0xe7b   :  { %v5167_v57 = vadd.f32 %v5166_v23, %v5165_v45  ;;  %v224_v23 = vld [vmem:[%s10370_s8 + $0x88] sm:$0xff]  ;;  %v223_v45 = vld [vmem:[%s10370_s8 + $0x80] sm:$0xff] }
 0xe7d   :  { %6369 = vtanh.f32 %v5167_v57  ;;  %v10029_v59 = vsel %vm940_vm10, %v5167_v57, %v9918_v58  ;;  %v209_v58 = vld [vmem:[%s10370_s8 + $0x10] sm:$0xff] }
 0xe8a   :  { %v6370_v60 = vpop.eup %6369 }
 0xe8b   :  { %v5169_v49 = vmul.f32 %v6370_v60, %v6368_v35 }
 0xe8d   :  { %v5170_v3 = vsel %vm940_vm10, %v5169_v49, 0.0  ;;  %v10036_v22 = vsel %vm940_vm10, %v5169_v49, %v9925_v13  ;;  %v208_v13 = vld [vmem:[%s10370_s8 + $0x8] sm:$0xff] }
 0xe8e   :  { %5910 = vst [vmem:[%s10366_s12 + $0x18] sm:$0xff] %v5170_v3  ;;  %5240 = vmatmul.mubr.f32.vlgmr.msra.gmra.mxu0 %v10036_v22  ;;  %5311 = vmatmul.mubr.f32.vlgmr.msra.gmra.mxu1 %v10036_v22 }
 0xe8f   :  { %5345 = vmatpush1.msra.mxu0 %v9643_v16  ;;  %5416 = vmatpush1.msra.mxu1 %v9649_v50  ;;  %v5174_v16 = vld [vmem:[%s10364_s1] sm:$0xff]  ;;  %v222_v50 = vld [vmem:[%s10370_s8 + $0x78] sm:$0xff] }
 0xe90   :  { %5346 = vmatprep.subr.mxu0 %v9655_v17  ;;  %5417 = vmatprep.subr.mxu1 %v9661_v1  ;;  %v221_v17 = vld [vmem:[%s10370_s8 + $0x70] sm:$0xff]  ;;  %v220_v1 = vld [vmem:[%s10370_s8 + $0x68] sm:$0xff] }
 0xe91   :  { %5347 = vmatpush1.msra.mxu0 %v9667_v21  ;;  %5418 = vmatpush1.msra.mxu1 %v9673_v62  ;;  %v219_v21 = vld [vmem:[%s10370_s8 + $0x60] sm:$0xff]  ;;  %v218_v62 = vld [vmem:[%s10370_s8 + $0x58] sm:$0xff] }
 0xe92   :  { %5348 = vmatprep.subr.mxu0 %v9679_v0  ;;  %5419 = vmatprep.subr.mxu1 %v9685_v8  ;;  %v217_v0 = vld [vmem:[%s10370_s8 + $0x50] sm:$0xff]  ;;  %v216_v8 = vld [vmem:[%s10370_s8 + $0x48] sm:$0xff] }
 0xe93   :  { %5349 = vmatpush1.msra.mxu0 %v9691_v48  ;;  %5420 = vmatpush1.msra.mxu1 %v9697_v6  ;;  %v215_v48 = vld [vmem:[%s10370_s8 + $0x40] sm:$0xff]  ;;  %v214_v6 = vld [vmem:[%s10370_s8 + $0x38] sm:$0xff] }
 0xe94   :  { %5350 = vmatprep.subr.mxu0 %v9703_v39  ;;  %5421 = vmatprep.subr.mxu1 %v9709_v11  ;;  %v213_v39 = vld [vmem:[%s10370_s8 + $0x30] sm:$0xff]  ;;  %v212_v11 = vld [vmem:[%s10370_s8 + $0x28] sm:$0xff] }
 0xe95   :  { %5351 = vmatpush1.msra.mxu0 %v9718_v63  ;;  %5384 = vmatprep.mubr.f32.mxu0 %v10810_v55  ;;  %v211_v63 = vld [vmem:[%s10370_s8 + $0x20] sm:$0xff] }
 0xe96   :  { %5422 = vmatpush1.msra.mxu1 %v9725_v4  ;;  %5455 = vmatprep.mubr.f32.mxu1 %v10810_v55  ;;  %v210_v4 = vld [vmem:[%s10370_s8 + $0x18] sm:$0xff] }
 0xe97   :  { %5911 = vmatmul.mubr.msk.f32.vlgmr.msra.gmra.mxu0 %vm414_vm1, %v5174_v16  ;;  %5912 = vmatmul.mubr.msk.f32.vlgmr.msra.gmra.mxu1 %vm414_vm1, %v5174_v16 }
 0xe98   :  { %6021 = vmatprep.subr.mxu1 %v10810_v55  ;;  %6053 = vmatprep.mubr.msk.f32.mxu1 %vm6549_vm2, %v10810_v55 }
 0xe99   :  { %6022 = vmatpush3.msra.mxu1 %v222_v50  ;;  %5986 = vmatprep.subr.mxu0 %v10810_v55 }
 0xe9a   :  { %6023 = vmatprep.subr.mxu1 %v10810_v55  ;;  %6018 = vmatprep.mubr.msk.f32.mxu0 %vm6549_vm2, %v10810_v55 }
 0xe9b   :  { %6024 = vmatpush3.msra.mxu1 %v221_v17  ;;  %5987 = vmatpush3.msra.mxu0 %v238_v20  ;;  %v265_v20 = vld [vmem:[%s10371_s10 + $0xd0] sm:$0xff] }
 0xe9c   :  { %6025 = vmatprep.subr.mxu1 %v10810_v55  ;;  %5988 = vmatprep.subr.mxu0 %v10810_v55 }
 0xe9d   :  { %6026 = vmatpush3.msra.mxu1 %v220_v1  ;;  %5989 = vmatpush3.msra.mxu0 %v237_v37  ;;  %v264_v37 = vld [vmem:[%s10371_s10 + $0xc8] sm:$0xff] }
 0xe9e   :  { %6027 = vmatprep.subr.mxu1 %v10810_v55  ;;  %5990 = vmatprep.subr.mxu0 %v10810_v55 }
 0xe9f   :  { %6028 = vmatpush3.msra.mxu1 %v219_v21  ;;  %5991 = vmatpush3.msra.mxu0 %v236_v46  ;;  %v263_v46 = vld [vmem:[%s10371_s10 + $0xc0] sm:$0xff] }
 0xea0   :  { %6029 = vmatprep.subr.mxu1 %v10810_v55  ;;  %5992 = vmatprep.subr.mxu0 %v10810_v55 }
 0xea1   :  { %6030 = vmatpush3.msra.mxu1 %v218_v62  ;;  %5993 = vmatpush3.msra.mxu0 %v235_v27  ;;  %v262_v27 = vld [vmem:[%s10371_s10 + $0xb8] sm:$0xff] }
 0xea2   :  { %6031 = vmatprep.subr.mxu1 %v10810_v55  ;;  %5994 = vmatprep.subr.mxu0 %v10810_v55 }
 0xea3   :  { %6032 = vmatpush3.msra.mxu1 %v217_v0  ;;  %5995 = vmatpush3.msra.mxu0 %v234_v38  ;;  %v261_v38 = vld [vmem:[%s10371_s10 + $0xb0] sm:$0xff] }
 0xea4   :  { %6033 = vmatprep.subr.mxu1 %v10810_v55  ;;  %5996 = vmatprep.subr.mxu0 %v10810_v55 }
 0xea5   :  { %6034 = vmatpush3.msra.mxu1 %v216_v8  ;;  %5997 = vmatpush3.msra.mxu0 %v233_v12  ;;  %v260_v12 = vld [vmem:[%s10371_s10 + $0xa8] sm:$0xff] }
 0xea6   :  { %6035 = vmatprep.subr.mxu1 %v10810_v55  ;;  %5998 = vmatprep.subr.mxu0 %v10810_v55 }
 0xea7   :  { %6036 = vmatpush3.msra.mxu1 %v215_v48  ;;  %5999 = vmatpush3.msra.mxu0 %v232_v44  ;;  %v259_v44 = vld [vmem:[%s10371_s10 + $0xa0] sm:$0xff] }
 0xea8   :  { %6037 = vmatprep.subr.mxu1 %v10810_v55  ;;  %6000 = vmatprep.subr.mxu0 %v10810_v55 }
 0xea9   :  { %6038 = vmatpush3.msra.mxu1 %v214_v6  ;;  %6001 = vmatpush3.msra.mxu0 %v231_v56  ;;  %v258_v56 = vld [vmem:[%s10371_s10 + $0x98] sm:$0xff] }
 0xeaa   :  { %6039 = vmatprep.subr.mxu1 %v10810_v55  ;;  %6002 = vmatprep.subr.mxu0 %v10810_v55 }
 0xeab   :  { %6040 = vmatpush3.msra.mxu1 %v213_v39  ;;  %6003 = vmatpush3.msra.mxu0 %v230_v52  ;;  %v257_v52 = vld [vmem:[%s10371_s10 + $0x90] sm:$0xff] }
 0xeac   :  { %6041 = vmatprep.subr.mxu1 %v10810_v55  ;;  %6004 = vmatprep.subr.mxu0 %v10810_v55 }
 0xead   :  { %6042 = vmatpush3.msra.mxu1 %v212_v11  ;;  %6005 = vmatpush3.msra.mxu0 %v229_v7  ;;  %v256_v7 = vld [vmem:[%s10371_s10 + $0x88] sm:$0xff] }
 0xeae   :  { %6043 = vmatprep.subr.mxu1 %v10810_v55  ;;  %6006 = vmatprep.subr.mxu0 %v10810_v55 }
 0xeaf   :  { %6044 = vmatpush3.msra.mxu1 %v211_v63  ;;  %6007 = vmatpush3.msra.mxu0 %v228_v5  ;;  %v255_v5 = vld [vmem:[%s10371_s10 + $0x80] sm:$0xff] }
 0xeb0   :  { %6045 = vmatprep.subr.mxu1 %v10810_v55  ;;  %6008 = vmatprep.subr.mxu0 %v10810_v55 }
 0xeb1   :  { %6046 = vmatpush3.msra.mxu1 %v210_v4  ;;  %6009 = vmatpush3.msra.mxu0 %v227_v53 }
 0xeb2   :  { %6047 = vmatprep.subr.mxu1 %v10810_v55  ;;  %6010 = vmatprep.subr.mxu0 %v10810_v55 }
 0xeb3   :  { %6048 = vmatpush3.msra.mxu1 %v209_v58  ;;  %6011 = vmatpush3.msra.mxu0 %v226_v30 }
 0xeb4   :  { %6049 = vmatprep.subr.mxu1 %v10810_v55  ;;  %6012 = vmatprep.subr.mxu0 %v10810_v55 }
 0xeb5   :  { %6050 = vmatpush3.msra.mxu1 %v208_v13  ;;  %6013 = vmatpush3.msra.mxu0 %v225_v51  ;;  %v5916_v51 = vld [vmem:[%s10372_s9] ss:$0 sm:$0xff] }
 0xeb6   :  { %6051 = vmatprep.subr.mxu1 %v10810_v55  ;;  %6014 = vmatprep.subr.mxu0 %v10810_v55 }
 0xeb7   :  { %6052 = vmatpush3.msra.mxu1 %v207_v41  ;;  %6015 = vmatpush3.msra.mxu0 %v224_v23 }
 0xeb8   :  { %6054 = vmatmul.mubr.f32.vlgmr.msra.gmra.mxu1 %v11415_v36  ;;  %6091 = vmatprep.subr.mxu1 %v10810_v55 }
 0xeb9   :  { %6092 = vmatpush3.msra.mxu1 %v254_v47  ;;  %6123 = vmatprep.mubr.msk.f32.mxu1 %vm6549_vm2, %v10810_v55 }
 0xeba   :  { %6093 = vmatprep.subr.mxu1 %v10810_v55  ;;  %6016 = vmatprep.subr.mxu0 %v10810_v55 }
 0xebb   :  { %6094 = vmatpush3.msra.mxu1 %v253_v25  ;;  %6017 = vmatpush3.msra.mxu0 %v223_v45 }
 0xebc   :  { %6095 = vmatprep.subr.mxu1 %v10810_v55  ;;  %6056 = vmatprep.subr.mxu0 %v10810_v55 }
 0xebd   :  { %6096 = vmatpush3.msra.mxu1 %v252_v40 }
 0xebe   :  { %6097 = vmatprep.subr.mxu1 %v10810_v55 }
 0xebf   :  { %6098 = vmatpush3.msra.mxu1 %v251_v32 }
 0xec0   :  { %6099 = vmatprep.subr.mxu1 %v10810_v55 }
 0xec1   :  { %6100 = vmatpush3.msra.mxu1 %v250_v15 }
 0xec2   :  { %6101 = vmatprep.subr.mxu1 %v10810_v55 }
 0xec3   :  { %6102 = vmatpush3.msra.mxu1 %v249_v61 }
 0xec4   :  { %6103 = vmatprep.subr.mxu1 %v10810_v55 }
 0xec5   :  { %6104 = vmatpush3.msra.mxu1 %v248_v31 }
 0xec6   :  { %6105 = vmatprep.subr.mxu1 %v10810_v55 }
 0xec7   :  { %6106 = vmatpush3.msra.mxu1 %v247_v26 }
 0xec8   :  { %6107 = vmatprep.subr.mxu1 %v10810_v55 }
 0xec9   :  { %6108 = vmatpush3.msra.mxu1 %v246_v24  ;;  %v270_v24 = vld [vmem:[%s10371_s10 + $0xf8] sm:$0xff] }
 0xeca   :  { %6109 = vmatprep.subr.mxu1 %v10810_v55 }
 0xecb   :  { %6110 = vmatpush3.msra.mxu1 %v245_v43 }
 0xecc   :  { %6111 = vmatprep.subr.mxu1 %v10810_v55 }
 0xecd   :  { %6112 = vmatpush3.msra.mxu1 %v244_v42 }
 0xece   :  { %6113 = vmatprep.subr.mxu1 %v10810_v55 }
 0xecf   :  { %6114 = vmatpush3.msra.mxu1 %v243_v9 }
 0xed0   :  { %6115 = vmatprep.subr.mxu1 %v10810_v55 }
 0xed1   :  { %6116 = vmatpush3.msra.mxu1 %v242_v33  ;;  %v269_v33 = vld [vmem:[%s10371_s10 + $0xf0] sm:$0xff] }
 0xed2   :  { %6117 = vmatprep.subr.mxu1 %v10810_v55 }
 0xed3   :  { %6118 = vmatpush3.msra.mxu1 %v241_v2  ;;  %v268_v2 = vld [vmem:[%s10371_s10 + $0xe8] sm:$0xff] }
 0xed4   :  { %6119 = vmatprep.subr.mxu1 %v10810_v55 }
 0xed5   :  { %6120 = vmatpush3.msra.mxu1 %v240_v10 }
 0xed6   :  { %6121 = vmatprep.subr.mxu1 %v10810_v55 }
 0xed7   :  { %6122 = vmatpush3.msra.mxu1 %v239_v19  ;;  %v266_v19 = vld [vmem:[%s10371_s10 + $0xd8] sm:$0xff] }
 0xed8   :  { %6124 = vmatmul.mubr.f32.vlgmr.msra.gmra.mxu1 %v11416_v54 }
 0xf4e   :  { %v5241_v57 = vpop.f32.mrf.mxu0  ;;  %v5312_v29 = vpop.f32.mrf.mxu1 }
 0xf50   :  { %v5243_v35 = vpop.f32.mrf.mxu0  ;;  %v5314_v49 = vpop.f32.mrf.mxu1 }
 0xf57   :  { %v5386_v60 = vpop.f32.mrf.mxu0  ;;  %v5457_v17 = vpop.f32.mrf.mxu1 }
 0xf58   :  { %v5387_v3 = vadd.f32 %v5386_v60, %v5241_v57  ;;  %v5458_v39 = vadd.f32 %v5457_v17, %v5312_v29  ;;  %v5917_v29 = vld [vmem:[%s10374_s11] ss:$0 sm:$0xff] }
 0xf59   :  { %v5388_v16 = vpop.f32.mrf.mxu0  ;;  %v5459_v8 = vpop.f32.mrf.mxu1 }
 0xf5a   :  { %v5462_v50 = vadd.f32 %v5387_v3, %v8936_v18  ;;  %v5389_v1 = vadd.f32 %v5388_v16, %v5243_v35  ;;  %v5460_v48 = vadd.f32 %v5459_v8, %v5314_v49  ;;  %v5464_v4 = vadd.f32 %v5458_v39, %v8955_v34 }
 0xf5c   :  { %v5913_v21 = vmul.f32 -1.442695, %v5462_v50  ;;  %v5463_v62 = vadd.f32 %v5389_v1, %v8940_v28  ;;  %v5465_v6 = vadd.f32 %v5460_v48, %v8950_v14 }
 0xf5e   :  { %6371 = vpow2.f32 %v5913_v21  ;;  %v5914_v0 = vmul.f32 -1.442695, %v5463_v62  ;;  %v5915_v11 = vmul.f32 -1.442695, %v5465_v6 }
 0xf60   :  { %6373 = vpow2.f32 %v5914_v0 }
 0xf61   :  { %6375 = vpow2.f32 %v5915_v11 }
 0xf6b   :  { %v6372_v63 = vpop.eup %6371 }
 0xf6c   :  { %v5469_v58 = vadd.f32 1.0, %v6372_v63 }
 0xf6d   :  { %v6374_v13 = vpop.eup %6373 }
 0xf6e   :  { %6377 = vrcp.f32 %v5469_v58  ;;  %v5475_v18 = vadd.f32 1.0, %v6374_v13  ;;  %v6376_v41 = vpop.eup %6375 }
 0xf6f   :  { %6379 = vtanh.f32 %v5464_v4  ;;  %v5482_v14 = vadd.f32 1.0, %v6376_v41 }
 0xf70   :  { %6381 = vrcp.f32 %v5475_v18 }
 0xf71   :  { %6383 = vrcp.f32 %v5482_v14 }
 0xf78   :  { %v10269_v28 = vpop.f32.mrf.mxu1 }
 0xf7a   :  { %v6055_v47 = vpop.f32.mrf.mxu1 }
 0xf7b   :  { %v6378_v36 = vpop.eup %6377 }
 0xf7c   :  { %v6380_v25 = vpop.eup %6379 }
 0xf7d   :  { %v6382_v40 = vpop.eup %6381  ;;  %v5486_v32 = vmul.f32 %v6380_v25, %v6378_v36 }
 0xf7e   :  { %v5485_v15 = vmul.f32 %v6382_v40, %v10029_v59  ;;  %v6384_v34 = vpop.eup %6383 }
 0xf80   :  { %v5487_v61 = vadd.f32 %v5486_v32, %v5485_v15 }
 0xf82   :  { %6385 = vtanh.f32 %v5487_v61  ;;  %v5493_v53 = vsel %vm614_vm5, %v5487_v61, %v10029_v59 }
 0xf8f   :  { %v6386_v31 = vpop.eup %6385 }
 0xf90   :  { %v5489_v26 = vmul.f32 %v6386_v31, %v6384_v34 }
 0xf92   :  { %v5490_v42 = vsel %vm614_vm5, %v5489_v26, 0.0  ;;  %v5492_v9 = vsel %vm614_vm5, %v5489_v26, %v10036_v22  ;;  %v267_v22 = vld [vmem:[%s10371_s10 + $0xe0] sm:$0xff] }
 0xf93   :  { %5491 = vst [vmem:[%s10366_s12 + $0x8] sm:$0xff] %v5490_v42  ;;  %6019 = vmatmul.mubr.f32.vlgmr.msra.gmra.mxu0 %v5492_v9 }
 0xf94   :  { %6057 = vmatpush3.msra.mxu0 %v270_v24  ;;  %6088 = vmatprep.mubr.msk.f32.mxu0 %vm6549_vm2, %v10810_v55 }
 0xf95   :  { %6058 = vmatprep.subr.mxu0 %v10810_v55 }
 0xf96   :  { %6059 = vmatpush3.msra.mxu0 %v269_v33 }
 0xf97   :  { %6060 = vmatprep.subr.mxu0 %v10810_v55 }
 0xf98   :  { %6061 = vmatpush3.msra.mxu0 %v268_v2  ;;  %v5779_v10 = vpop.f32.mrf.mxu1 }
 0xf99   :  { %6062 = vmatprep.subr.mxu0 %v10810_v55 }
 0xf9a   :  { %6063 = vmatpush3.msra.mxu0 %v267_v22  ;;  %v6125_v54 = vpop.f32.mrf.mxu1 }
 0xf9b   :  { %6064 = vmatprep.subr.mxu0 %v10810_v55 }
 0xf9c   :  { %6065 = vmatpush3.msra.mxu0 %v266_v19 }
 0xf9d   :  { %6066 = vmatprep.subr.mxu0 %v10810_v55 }
 0xf9e   :  { %6067 = vmatpush3.msra.mxu0 %v265_v20 }
 0xf9f   :  { %6068 = vmatprep.subr.mxu0 %v10810_v55 }
 0xfa0   :  { %6069 = vmatpush3.msra.mxu0 %v264_v37 }
 0xfa1   :  { %6070 = vmatprep.subr.mxu0 %v10810_v55 }
 0xfa2   :  { %6071 = vmatpush3.msra.mxu0 %v263_v46 }
 0xfa3   :  { %6072 = vmatprep.subr.mxu0 %v10810_v55 }
 0xfa4   :  { %6073 = vmatpush3.msra.mxu0 %v262_v27 }
 0xfa5   :  { %6074 = vmatprep.subr.mxu0 %v10810_v55 }
 0xfa6   :  { %6075 = vmatpush3.msra.mxu0 %v261_v38 }
 0xfa7   :  { %6076 = vmatprep.subr.mxu0 %v10810_v55 }
 0xfa8   :  { %6077 = vmatpush3.msra.mxu0 %v260_v12 }
 0xfa9   :  { %6078 = vmatprep.subr.mxu0 %v10810_v55 }
 0xfaa   :  { %6079 = vmatpush3.msra.mxu0 %v259_v44 }
 0xfab   :  { %6080 = vmatprep.subr.mxu0 %v10810_v55 }
 0xfac   :  { %6081 = vmatpush3.msra.mxu0 %v258_v56 }
 0xfad   :  { %6082 = vmatprep.subr.mxu0 %v10810_v55 }
 0xfae   :  { %6083 = vmatpush3.msra.mxu0 %v257_v52 }
 0xfaf   :  { %6084 = vmatprep.subr.mxu0 %v10810_v55 }
 0xfb0   :  { %6085 = vmatpush3.msra.mxu0 %v256_v7 }
 0xfb1   :  { %6086 = vmatprep.subr.mxu0 %v10810_v55 }
 0xfb2   :  { %6087 = vmatpush3.msra.mxu0 %v255_v5 }
 0xfb3   :  { %6089 = vmatmul.mubr.f32.vlgmr.msra.gmra.mxu0 %v5493_v53 }
0x1053   :  { %v5560_v30 = vpop.f32.mrf.mxu0 }
0x1054   :  { %v5631_v23 = vadd.f32 %v10269_v28, %v5560_v30 }
0x1055   :  { %v6020_v45 = vpop.f32.mrf.mxu0 }
0x1056   :  { %v5641_v57 = vadd.f32 %v5916_v51, %v5631_v23 }
0x1058   :  { %5642 = vst [vmem:[%s10373_s13] sm:$0xff] %v5641_v57 }
0x1073   :  { %v5709_v55 = vpop.f32.mrf.mxu0 }
0x1074   :  { %v5780_v59 = vadd.f32 %v5779_v10, %v5709_v55 }
0x1075   :  { %v6090_v35 = vpop.f32.mrf.mxu0 }
0x1076   :  { %v5790_v60 = vadd.f32 %v5917_v29, %v5780_v59 }
0x1078   :  { %5791 = vst [vmem:[%s10375_s14] sm:$0xff] %v5790_v60 }

</bundles_post_ra>
